<compile_context>
chip_gen: v7x
topology: tpu7x:2x2x1
jax: 0.10.0
libtpu: 0.0.40
codegen_flags: <defaults>
</compile_context>

<pallas_src>
import functools

import jax
import jax.numpy as jnp
from jax.experimental import pallas as pl
from jax.experimental.pallas import tpu as pltpu


def _conv2d_kernel(x_ref, w_ref, b_ref, o_ref, *, KH, KW, Ho, Wo):
    """Whole-batch valid conv in one invocation.

    x_ref : (N, H, W, Cin)       VMEM  (NHWC)
    w_ref : (KH*KW, Cin, Cout)   VMEM  (tap-major)
    b_ref : (1, Cout)            VMEM
    o_ref : (N, Cout, Ho*Wo)     VMEM  (lane-dense spatial axis)
    """
    N = x_ref.shape[0]
    Cin = x_ref.shape[3]
    Cout = o_ref.shape[1]
    HoWo = Ho * Wo

    x = x_ref[...]                # load the (tiny) input once
    w = w_ref[...]                # (KH*KW, Cin, Cout), loaded once

    # f32 accumulator initialized with the bias (broadcast over all rows).
    acc = jnp.broadcast_to(b_ref[...].astype(jnp.float32), (N * HoWo, Cout))

    # One matmul per 3x3 tap over the whole batch, static straight-line code.
    for kh in range(KH):
        for kw in range(KW):
            patch = x[:, kh:kh + Ho, kw:kw + Wo, :].reshape(N * HoWo, Cin)
            acc = acc + jnp.dot(patch, w[kh * KW + kw],
                                preferred_element_type=jnp.float32)

    # Lane-dense store: per image, (Ho*Wo, Cout) -> (Cout, Ho*Wo).
    for n in range(N):            # N is tiny and static
        o_ref[n, :, :] = acc[n * HoWo:(n + 1) * HoWo, :].T.astype(o_ref.dtype)


@jax.jit
def conv2d_pallas(x_nchw, w_oihw, bias):
    """Valid (padding=0), stride-1 2D convolution with PyTorch NCHW semantics."""
    N, C_in, H, W = x_nchw.shape
    C_out, C_in_w, KH, KW = w_oihw.shape
    assert C_in == C_in_w
    Ho, Wo = H - KH + 1, W - KW + 1

    # Layout glue only (no compute): NCHW -> NHWC, OIHW -> (tap, Cin, Cout).
    x_nhwc = jnp.transpose(x_nchw, (0, 2, 3, 1))                   # (N, H, W, Cin)
    w_taps = jnp.transpose(w_oihw, (2, 3, 1, 0)).reshape(KH * KW, C_in, C_out)
    b2 = bias.reshape(1, C_out)

    out = pl.pallas_call(
        functools.partial(_conv2d_kernel, KH=KH, KW=KW, Ho=Ho, Wo=Wo),
        out_shape=jax.ShapeDtypeStruct((N, C_out, Ho * Wo), x_nchw.dtype),
        grid=(1,),
        in_specs=[
            pl.BlockSpec((N, H, W, C_in), lambda i: (0, 0, 0, 0)),
            pl.BlockSpec((KH * KW, C_in, C_out), lambda i: (0, 0, 0)),
            pl.BlockSpec((1, C_out), lambda i: (0, 0)),
        ],
        out_specs=pl.BlockSpec((N, C_out, Ho * Wo), lambda i: (0, 0, 0)),
        compiler_params=pltpu.CompilerParams(
            dimension_semantics=("arbitrary",)),
    )(x_nhwc, w_taps, b2)

    # (N, Cout, Ho*Wo) -> (N, Cout, Ho, Wo): pure reshape, no transpose.
    return out.reshape(N, C_out, Ho, Wo)


if __name__ == "__main__":
    key = jax.random.PRNGKey(0)
    k_x, k_w, k_b = jax.random.split(key, 3)

    # TT module: Conv2d(3, 6, kernel_size=3, stride=1, padding=0)
    C_IN, C_OUT, K = 3, 6, 3
    N, H, W = 2, 16, 16

    # Deterministic init, mimicking PyTorch's default U(-1/sqrt(fan_in), ...)
    fan_in = C_IN * K * K
    bound = 1.0 / (fan_in ** 0.5)
    weight = jax.random.uniform(k_w, (C_OUT, C_IN, K, K), jnp.float32,
                                minval=-bound, maxval=bound)
    bias = jax.random.uniform(k_b, (C_OUT,), jnp.float32,
                              minval=-bound, maxval=bound)
    x = jax.random.normal(k_x, (N, C_IN, H, W), jnp.float32)

    out = conv2d_pallas(x, weight, bias)
    out = jax.block_until_ready(out)

    # Reference (plain XLA) to validate semantics.
    ref = jax.lax.conv_general_dilated(
        x, weight, window_strides=(1, 1), padding="VALID",
        dimension_numbers=("NCHW", "OIHW", "NCHW"),
    ) + bias.reshape(1, C_OUT, 1, 1)

    assert out.shape == (N, C_OUT, H - K + 1, W - K + 1), out.shape
    assert jnp.allclose(out, ref, atol=1e-4, rtol=1e-4), \
        float(jnp.max(jnp.abs(out - ref)))

    print("KERNEL_OK")
</pallas_src>

<mosaic_0001>
module attributes {stable_mosaic.version = 11 : i64} {
  func.func @_conv2d_kernel(%arg0: i32, %arg1: memref<2x16x16x3xf32, #tpu.memory_space<vmem>>, %arg2: memref<9x3x6xf32, #tpu.memory_space<vmem>>, %arg3: memref<1x6xf32, #tpu.memory_space<vmem>>, %arg4: memref<2x6x196xf32, #tpu.memory_space<vmem>>) attributes {dimension_semantics = [#tpu.dimension_semantics<arbitrary>], iteration_bounds = array<i64: 1>, scalar_prefetch = 0 : i64, scratch_operands = 0 : i64, tpu.core_type = #tpu.core_type<tc>, window_params = [{pipeline_mode = #tpu.pipeline_mode<synchronous>, transform_indices = @transform_0, window_bounds = array<i64: 2, 16, 16, 3>}, {pipeline_mode = #tpu.pipeline_mode<synchronous>, transform_indices = @transform_1, window_bounds = array<i64: 9, 3, 6>}, {pipeline_mode = #tpu.pipeline_mode<synchronous>, transform_indices = @transform_2, window_bounds = array<i64: 1, 6>}, {pipeline_mode = #tpu.pipeline_mode<synchronous>, transform_indices = @transform_3, window_bounds = array<i64: 2, 6, 196>}]} {
    %c0 = arith.constant 0 : index
    %c0_0 = arith.constant 0 : index
    %c0_1 = arith.constant 0 : index
    %c0_2 = arith.constant 0 : index
    %0 = vector.load %arg1[%c0, %c0_0, %c0_1, %c0_2] : memref<2x16x16x3xf32, #tpu.memory_space<vmem>>, vector<2x16x16x3xf32>
    %c0_3 = arith.constant 0 : index
    %c0_4 = arith.constant 0 : index
    %c0_5 = arith.constant 0 : index
    %1 = vector.load %arg2[%c0_3, %c0_4, %c0_5] : memref<9x3x6xf32, #tpu.memory_space<vmem>>, vector<9x3x6xf32>
    %c0_6 = arith.constant 0 : index
    %c0_7 = arith.constant 0 : index
    %2 = vector.load %arg3[%c0_6, %c0_7] : memref<1x6xf32, #tpu.memory_space<vmem>>, vector<1x6xf32>
    %3 = vector.shape_cast %2 : vector<1x6xf32> to vector<1x6xf32>
    %4 = vector.broadcast %3 : vector<1x6xf32> to vector<392x6xf32>
    %5 = vector.extract_strided_slice %0 {offsets = [0, 0, 0, 0], sizes = [2, 14, 14, 3], strides = [1, 1, 1, 1]} : vector<2x16x16x3xf32> to vector<2x14x14x3xf32>
    %6 = vector.shape_cast %5 : vector<2x14x14x3xf32> to vector<392x3xf32>
    %7 = vector.extract_strided_slice %1 {offsets = [0, 0, 0], sizes = [1, 3, 6], strides = [1, 1, 1]} : vector<9x3x6xf32> to vector<1x3x6xf32>
    %8 = vector.shape_cast %7 : vector<1x3x6xf32> to vector<3x6xf32>
    %cst = arith.constant dense<0.000000e+00> : vector<392x6xf32>
    %9 = tpu.matmul %6, %8, %cst {dimension_numbers = #tpu.dot_dimension_numbers<[1], [0], [0], [1], [0, 0, 1, 1], [], []>} : vector<392x3xf32>, vector<3x6xf32>, vector<392x6xf32> -> vector<392x6xf32>
    %10 = arith.addf %4, %9 : vector<392x6xf32>
    %11 = vector.extract_strided_slice %0 {offsets = [0, 0, 1, 0], sizes = [2, 14, 14, 3], strides = [1, 1, 1, 1]} : vector<2x16x16x3xf32> to vector<2x14x14x3xf32>
    %12 = vector.shape_cast %11 : vector<2x14x14x3xf32> to vector<392x3xf32>
    %13 = vector.extract_strided_slice %1 {offsets = [1, 0, 0], sizes = [1, 3, 6], strides = [1, 1, 1]} : vector<9x3x6xf32> to vector<1x3x6xf32>
    %14 = vector.shape_cast %13 : vector<1x3x6xf32> to vector<3x6xf32>
    %cst_8 = arith.constant dense<0.000000e+00> : vector<392x6xf32>
    %15 = tpu.matmul %12, %14, %cst_8 {dimension_numbers = #tpu.dot_dimension_numbers<[1], [0], [0], [1], [0, 0, 1, 1], [], []>} : vector<392x3xf32>, vector<3x6xf32>, vector<392x6xf32> -> vector<392x6xf32>
    %16 = arith.addf %10, %15 : vector<392x6xf32>
    %17 = vector.extract_strided_slice %0 {offsets = [0, 0, 2, 0], sizes = [2, 14, 14, 3], strides = [1, 1, 1, 1]} : vector<2x16x16x3xf32> to vector<2x14x14x3xf32>
    %18 = vector.shape_cast %17 : vector<2x14x14x3xf32> to vector<392x3xf32>
    %19 = vector.extract_strided_slice %1 {offsets = [2, 0, 0], sizes = [1, 3, 6], strides = [1, 1, 1]} : vector<9x3x6xf32> to vector<1x3x6xf32>
    %20 = vector.shape_cast %19 : vector<1x3x6xf32> to vector<3x6xf32>
    %cst_9 = arith.constant dense<0.000000e+00> : vector<392x6xf32>
    %21 = tpu.matmul %18, %20, %cst_9 {dimension_numbers = #tpu.dot_dimension_numbers<[1], [0], [0], [1], [0, 0, 1, 1], [], []>} : vector<392x3xf32>, vector<3x6xf32>, vector<392x6xf32> -> vector<392x6xf32>
    %22 = arith.addf %16, %21 : vector<392x6xf32>
    %23 = vector.extract_strided_slice %0 {offsets = [0, 1, 0, 0], sizes = [2, 14, 14, 3], strides = [1, 1, 1, 1]} : vector<2x16x16x3xf32> to vector<2x14x14x3xf32>
    %24 = vector.shape_cast %23 : vector<2x14x14x3xf32> to vector<392x3xf32>
    %25 = vector.extract_strided_slice %1 {offsets = [3, 0, 0], sizes = [1, 3, 6], strides = [1, 1, 1]} : vector<9x3x6xf32> to vector<1x3x6xf32>
    %26 = vector.shape_cast %25 : vector<1x3x6xf32> to vector<3x6xf32>
    %cst_10 = arith.constant dense<0.000000e+00> : vector<392x6xf32>
    %27 = tpu.matmul %24, %26, %cst_10 {dimension_numbers = #tpu.dot_dimension_numbers<[1], [0], [0], [1], [0, 0, 1, 1], [], []>} : vector<392x3xf32>, vector<3x6xf32>, vector<392x6xf32> -> vector<392x6xf32>
    %28 = arith.addf %22, %27 : vector<392x6xf32>
    %29 = vector.extract_strided_slice %0 {offsets = [0, 1, 1, 0], sizes = [2, 14, 14, 3], strides = [1, 1, 1, 1]} : vector<2x16x16x3xf32> to vector<2x14x14x3xf32>
    %30 = vector.shape_cast %29 : vector<2x14x14x3xf32> to vector<392x3xf32>
    %31 = vector.extract_strided_slice %1 {offsets = [4, 0, 0], sizes = [1, 3, 6], strides = [1, 1, 1]} : vector<9x3x6xf32> to vector<1x3x6xf32>
    %32 = vector.shape_cast %31 : vector<1x3x6xf32> to vector<3x6xf32>
    %cst_11 = arith.constant dense<0.000000e+00> : vector<392x6xf32>
    %33 = tpu.matmul %30, %32, %cst_11 {dimension_numbers = #tpu.dot_dimension_numbers<[1], [0], [0], [1], [0, 0, 1, 1], [], []>} : vector<392x3xf32>, vector<3x6xf32>, vector<392x6xf32> -> vector<392x6xf32>
    %34 = arith.addf %28, %33 : vector<392x6xf32>
    %35 = vector.extract_strided_slice %0 {offsets = [0, 1, 2, 0], sizes = [2, 14, 14, 3], strides = [1, 1, 1, 1]} : vector<2x16x16x3xf32> to vector<2x14x14x3xf32>
    %36 = vector.shape_cast %35 : vector<2x14x14x3xf32> to vector<392x3xf32>
    %37 = vector.extract_strided_slice %1 {offsets = [5, 0, 0], sizes = [1, 3, 6], strides = [1, 1, 1]} : vector<9x3x6xf32> to vector<1x3x6xf32>
    %38 = vector.shape_cast %37 : vector<1x3x6xf32> to vector<3x6xf32>
    %cst_12 = arith.constant dense<0.000000e+00> : vector<392x6xf32>
    %39 = tpu.matmul %36, %38, %cst_12 {dimension_numbers = #tpu.dot_dimension_numbers<[1], [0], [0], [1], [0, 0, 1, 1], [], []>} : vector<392x3xf32>, vector<3x6xf32>, vector<392x6xf32> -> vector<392x6xf32>
    %40 = arith.addf %34, %39 : vector<392x6xf32>
    %41 = vector.extract_strided_slice %0 {offsets = [0, 2, 0, 0], sizes = [2, 14, 14, 3], strides = [1, 1, 1, 1]} : vector<2x16x16x3xf32> to vector<2x14x14x3xf32>
    %42 = vector.shape_cast %41 : vector<2x14x14x3xf32> to vector<392x3xf32>
    %43 = vector.extract_strided_slice %1 {offsets = [6, 0, 0], sizes = [1, 3, 6], strides = [1, 1, 1]} : vector<9x3x6xf32> to vector<1x3x6xf32>
    %44 = vector.shape_cast %43 : vector<1x3x6xf32> to vector<3x6xf32>
    %cst_13 = arith.constant dense<0.000000e+00> : vector<392x6xf32>
    %45 = tpu.matmul %42, %44, %cst_13 {dimension_numbers = #tpu.dot_dimension_numbers<[1], [0], [0], [1], [0, 0, 1, 1], [], []>} : vector<392x3xf32>, vector<3x6xf32>, vector<392x6xf32> -> vector<392x6xf32>
    %46 = arith.addf %40, %45 : vector<392x6xf32>
    %47 = vector.extract_strided_slice %0 {offsets = [0, 2, 1, 0], sizes = [2, 14, 14, 3], strides = [1, 1, 1, 1]} : vector<2x16x16x3xf32> to vector<2x14x14x3xf32>
    %48 = vector.shape_cast %47 : vector<2x14x14x3xf32> to vector<392x3xf32>
    %49 = vector.extract_strided_slice %1 {offsets = [7, 0, 0], sizes = [1, 3, 6], strides = [1, 1, 1]} : vector<9x3x6xf32> to vector<1x3x6xf32>
    %50 = vector.shape_cast %49 : vector<1x3x6xf32> to vector<3x6xf32>
    %cst_14 = arith.constant dense<0.000000e+00> : vector<392x6xf32>
    %51 = tpu.matmul %48, %50, %cst_14 {dimension_numbers = #tpu.dot_dimension_numbers<[1], [0], [0], [1], [0, 0, 1, 1], [], []>} : vector<392x3xf32>, vector<3x6xf32>, vector<392x6xf32> -> vector<392x6xf32>
    %52 = arith.addf %46, %51 : vector<392x6xf32>
    %53 = vector.extract_strided_slice %0 {offsets = [0, 2, 2, 0], sizes = [2, 14, 14, 3], strides = [1, 1, 1, 1]} : vector<2x16x16x3xf32> to vector<2x14x14x3xf32>
    %54 = vector.shape_cast %53 : vector<2x14x14x3xf32> to vector<392x3xf32>
    %55 = vector.extract_strided_slice %1 {offsets = [8, 0, 0], sizes = [1, 3, 6], strides = [1, 1, 1]} : vector<9x3x6xf32> to vector<1x3x6xf32>
    %56 = vector.shape_cast %55 : vector<1x3x6xf32> to vector<3x6xf32>
    %cst_15 = arith.constant dense<0.000000e+00> : vector<392x6xf32>
    %57 = tpu.matmul %54, %56, %cst_15 {dimension_numbers = #tpu.dot_dimension_numbers<[1], [0], [0], [1], [0, 0, 1, 1], [], []>} : vector<392x3xf32>, vector<3x6xf32>, vector<392x6xf32> -> vector<392x6xf32>
    %58 = arith.addf %52, %57 : vector<392x6xf32>
    %59 = vector.extract_strided_slice %58 {offsets = [0, 0], sizes = [196, 6], strides = [1, 1]} : vector<392x6xf32> to vector<196x6xf32>
    %60 = tpu.transpose %59, [1, 0] : vector<196x6xf32> -> vector<6x196xf32>
    %c0_16 = arith.constant 0 : index
    %c0_17 = arith.constant 0 : index
    %c0_18 = arith.constant 0 : index
    %61 = vector.load %arg4[%c0_16, %c0_17, %c0_18] : memref<2x6x196xf32, #tpu.memory_space<vmem>>, vector<1x6x196xf32>
    %62 = vector.shape_cast %61 : vector<1x6x196xf32> to vector<6x196xf32>
    %63 = vector.shape_cast %60 : vector<6x196xf32> to vector<1x6x196xf32>
    tpu.vector_store %arg4[%c0_16, %c0_17, %c0_18], %63 {strides = array<i32>} : memref<2x6x196xf32, #tpu.memory_space<vmem>>, vector<1x6x196xf32>,
    %64 = vector.extract_strided_slice %58 {offsets = [196, 0], sizes = [196, 6], strides = [1, 1]} : vector<392x6xf32> to vector<196x6xf32>
    %65 = tpu.transpose %64, [1, 0] : vector<196x6xf32> -> vector<6x196xf32>
    %c1 = arith.constant 1 : index
    %c0_19 = arith.constant 0 : index
    %c0_20 = arith.constant 0 : index
    %66 = vector.load %arg4[%c1, %c0_19, %c0_20] : memref<2x6x196xf32, #tpu.memory_space<vmem>>, vector<1x6x196xf32>
    %67 = vector.shape_cast %66 : vector<1x6x196xf32> to vector<6x196xf32>
    %68 = vector.shape_cast %65 : vector<6x196xf32> to vector<1x6x196xf32>
    tpu.vector_store %arg4[%c1, %c0_19, %c0_20], %68 {strides = array<i32>} : memref<2x6x196xf32, #tpu.memory_space<vmem>>, vector<1x6x196xf32>,
    return
  }
  func.func @transform_0(%arg0: i32) -> (i32, i32, i32, i32) {
    %c0_i32 = arith.constant 0 : i32
    %c0_i32_0 = arith.constant 0 : i32
    %c0_i32_1 = arith.constant 0 : i32
    %c0_i32_2 = arith.constant 0 : i32
    %c0_i32_3 = arith.constant 0 : i32
    return %c0_i32, %c0_i32_0, %c0_i32_1, %c0_i32_2 : i32, i32, i32, i32
  }
  func.func @transform_1(%arg0: i32) -> (i32, i32, i32) {
    %c0_i32 = arith.constant 0 : i32
    %c0_i32_0 = arith.constant 0 : i32
    %c0_i32_1 = arith.constant 0 : i32
    %c0_i32_2 = arith.constant 0 : i32
    return %c0_i32, %c0_i32_0, %c0_i32_1 : i32, i32, i32
  }
  func.func @transform_2(%arg0: i32) -> (i32, i32) {
    %c0_i32 = arith.constant 0 : i32
    %c0_i32_0 = arith.constant 0 : i32
    %c0_i32_1 = arith.constant 0 : i32
    return %c0_i32, %c0_i32_0 : i32, i32
  }
  func.func @transform_3(%arg0: i32) -> (i32, i32, i32) {
    %c0_i32 = arith.constant 0 : i32
    %c0_i32_0 = arith.constant 0 : i32
    %c0_i32_1 = arith.constant 0 : i32
    %c0_i32_2 = arith.constant 0 : i32
    return %c0_i32, %c0_i32_0, %c0_i32_1 : i32, i32, i32
  }
}

</mosaic_0001>

<bundles_post_ra>
// kernel: conv2d_pallas.1
= control target key start
LH: loop header
LB: loop body
LE: loop exit
PB: predicated region body
PF: predicated region fallthrough
CT: control target
= control target key end

     0   :  { %vm2006_vm0 = vcmask 1042432   ;;  %v20380_v0 = vmov 0.0   ;;  %vm13739_vm1 = vmmov 0   ;;  %v13740_v3 = vmov 1983009808   ;;  %s20376_s1 = inlined_call_operand.vmem [shape: f32[9,3,6], index: 1, kind: input, shape index: {}]   ;;  %s20377_s0 = inlined_call_operand.vmem [shape: f32[2,16,16,3], index: 0, kind: input, shape index: {}]   ;;  %s20378_s2 = inlined_call_operand.vmem [shape: f32[1,6], index: 2, kind: input, shape index: {}]   ;;  %s20379_s3 = inlined_call_operand.vmem [shape: f32[2,6,196], index: 3, kind: output, shape index: {}]  }
   0x1   :  { %11543 = vmatprep.subr.mxu1 %v20380_v0  ;;  %v78_v1 = vld [vmem:[%s20376_s1] sm:$0x7]  ;;  %11545 = vmatprep.mubr.msk.f32.mxu1 %vm13739_vm1, %v20380_v0  ;;  %v152_v4 = vunpack.c.l.s4 %v13740_v3  ;;  %v154_v5 = vlaneseq  ;;  %v82_v6 = vld [vmem:[%s20376_s1 + $0x10] sm:$0x7]  ;;  %v15_v7 = vld [vmem:[%s20377_s0 + $0x8] sm:$0xff]  ;;  %vm2397_vm2 = vcmask 1040384  }
   0x2   :  { %v14_v2 = vld [vmem:[%s20377_s0] sm:$0xff]  ;;  %11544 = vmatpush3.msk.msra.mxu1 %vm2006_vm0, %v78_v1  ;;  %12139 = vmatprep.subr.mxu0 %v20380_v0  ;;  %v16_v8 = vld [vmem:[%s20377_s0 + $0x10] sm:$0xff]  ;;  %vm2398_vm3 = vcmask 1042434   ;;  %v167_v12 = vcombine.high %v15_v7, %v15_v7  ;;  %v17_v15 = vld [vmem:[%s20377_s0 + $0x18] sm:$0xff]  ;;  %vm2400_vm5 = vcmask 1044484   ;;  %vm1907_vm6 = vcmask 23552  }
   0x3   :  { %v150_v9 = vcombine.high %v14_v2, %v14_v2  ;;  %v153_v10 = vunpack.c.0.s8 %v152_v4  ;;  %v155_v11 = vshrl.u32 %v154_v5, 7  ;;  %12140 = vmatpush3.msk.msra.mxu0 %vm2006_vm0, %v82_v6  ;;  %12141 = vmatprep.mubr.msk.f32.mxu0 %vm13739_vm1, %v20380_v0  ;;  %v183_v13 = vcombine.high %v16_v8, %v16_v8  ;;  %vm2399_vm4 = vmor %vm2397_vm2, %vm2398_vm3  ;;  %v13794_v16 = vld [vmem:[%s20377_s0 + $0x20] sm:$0xff]  ;;  %v13833_v28 = vld [vmem:[%s20377_s0 + $0x28] sm:$0xff] }
   0x4   :  { %12288 = vmatprep.subr.mxu0 %v20380_v0  ;;  %11692 = vmatprep.subr.mxu1 %v20380_v0  ;;  %v200_v23 = vcombine.high %v17_v15, %v17_v15  ;;  %vm13814_vm7 = vmor %vm2399_vm4, %vm2400_vm5  ;;  %vm2402_vm8 = vcmask 1046534   ;;  %v216_v29 = vcombine.high %v13794_v16, %v13794_v16  ;;  %v233_v33 = vcombine.high %v13833_v28, %v13833_v28  ;;  %v13866_v39 = vld [vmem:[%s20377_s0 + $0x30] sm:$0xff]  ;;  %v13877_v44 = vld [vmem:[%s20377_s0 + $0x38] sm:$0xff] }
   0x5   :  { %v13786_v14 = vsub.s32 %v153_v10, %v155_v11  ;;  %vm13859_vm9 = vmor %vm13814_vm7, %vm2402_vm8  ;;  %v249_v43 = vcombine.high %v13866_v39, %v13866_v39  ;;  %v79_v56 = vld [vmem:[%s20376_s1 + $0x4] sm:$0x7]  ;;  %vm10432_vm10 = vcmask 1043456   ;;  %vm10405_vm11 = vcmask 553984  }
   0x7   :  { %v13797_v17 = vrot.slane %v14_v2, %v13786_v14  ;;  %v13800_v18 = vrot.slane %v150_v9, %v13786_v14  ;;  %v13803_v19 = vrot.slane %v15_v7, %v13786_v14  ;;  %v13806_v20 = vrot.slane %v167_v12, %v13786_v14 }
   0x8   :  { %v13809_v21 = vrot.slane %v16_v8, %v13786_v14  ;;  %v13812_v22 = vrot.slane %v183_v13, %v13786_v14  ;;  %v13855_v37 = vrot.slane %v17_v15, %v13786_v14  ;;  %v13882_v47 = vrot.slane %v200_v23, %v13786_v14 }
   0x9   :  { %21257 = vst [vmem:[#allocation2_spill] sm:$0xff] %v13800_v18  ;;  %21258 = vst [vmem:[#allocation3_spill] sm:$0xff] %v13803_v19  ;;  %v13820_v25 = vcombine.high %v13797_v17, %v13797_v17  ;;  %v13824_v26 = vcombine.high %v13800_v18, %v13800_v18  ;;  %v13828_v27 = vcombine.high %v13803_v19, %v13803_v19 }
   0xa   :  { %21259 = vst [vmem:[#allocation4_spill] sm:$0xff] %v13806_v20  ;;  %21260 = vst [vmem:[#allocation5_spill] sm:$0xff] %v13809_v21  ;;  %v1092_v30 = vcombine.low %v13806_v20, %v13809_v21  ;;  %v13841_v31 = vcombine.high %v13809_v21, %v13809_v21  ;;  %v10630_v32 = vrot.slane %v13809_v21, 9  ;;  %v13852_v36 = vcombine.high %v13812_v22, %v13812_v22 }
   0xb   :  { %21261 = vst [vmem:[#allocation6_spill] sm:$0xff] %v13812_v22  ;;  %21264 = vst [vmem:[#allocation7_spill] sm:$0xff] %v13820_v25  ;;  %v1074_v34 = vcombine.low %v13797_v17, %v13820_v25  ;;  %v1075_v35 = vcombine.low %v13800_v18, %v13824_v26  ;;  %v1091_v40 = vcombine.low %v13803_v19, %v13828_v27  ;;  %v2431_v52 = vrot.slane %v13812_v22, 7 }
   0xc   :  { %21265 = vst [vmem:[#allocation8_spill] sm:$0xff] %v13824_v26  ;;  %21266 = vst [vmem:[#allocation9_spill] sm:$0xff] %v13828_v27  ;;  %v1106_v41 = vrot.slane %v1092_v30, %v13786_v14  ;;  %v2428_v42 = vrot.slane %v13841_v31, 7  ;;  %v2434_v54 = vrot.slane %v13852_v36, 7  ;;  %v2437_v55 = vrot.slane %v13855_v37, 7 }
   0xd   :  { %21267 = vst [vmem:[#allocation10_spill] sm:$0xff] %v13841_v31  ;;  %21268 = vst [vmem:[#allocation11_spill] sm:$0xff] %v13852_v36  ;;  %v1082_v45 = vrot.slane %v1074_v34, %v13786_v14  ;;  %v1089_v46 = vrot.slane %v1075_v35, %v13786_v14  ;;  %v1099_v49 = vrot.slane %v1091_v40, %v13786_v14  ;;  %v2433_v60 = vrot.slane %v2431_v52, 2 }
   0xe   :  { %21269 = vst [vmem:[#allocation12_spill] sm:$0xff] %v13855_v37  ;;  %21272 = vst [vmem:[#allocation13_spill] sm:$0xff] %v13882_v47  ;;  %v13889_v50 = vsel %vm13859_vm9, %v10630_v32, %v2428_v42  ;;  %v2430_v51 = vrot.slane %v2428_v42, 2  ;;  %v1108_v57 = vcombine.low %v13841_v31, %v13812_v22  ;;  %v1109_v61 = vcombine.low %v13852_v36, %v13855_v37 }
   0xf   :  { %21273 = vst [vmem:[#allocation14_spill] sm:$0xff] %v13889_v50  ;;  %v1090_v53 = vcombine.low %v1082_v45, %v1089_v46  ;;  %v1107_v58 = vcombine.low %v1099_v49, %v1106_v41  ;;  %v2436_v62 = vrot.slane %v2434_v54, 2  ;;  %v13911_v2 = vcombine.high %v13855_v37, %v13855_v37 }
  0x10   :  { %v13901_v59 = vsel %vm13859_vm9, %v2430_v51, %v2431_v52  ;;  %v1116_v1 = vrot.slane %v1108_v57, %v13786_v14  ;;  %v13917_v3 = vsel %vm13859_vm9, %v2433_v60, %v2434_v54  ;;  %v1123_v4 = vrot.slane %v1109_v61, %v13786_v14  ;;  %v83_v52 = vld [vmem:[%s20376_s1 + $0x14] sm:$0x7] }
  0x11   :  { %21274 = vst [vmem:[#allocation15_spill] sm:$0xff] %v13901_v59  ;;  %11546 = vmatmul.mubr.msk.f32.vlgmr.msra.gmra.mrb[0].mxu1 %vm1907_vm6, %v1090_v53  ;;  %v6503_v63 = vcombine.low %v13889_v50, %v13901_v59  ;;  %21275 = vst [vmem:[#allocation16_spill] sm:$0xff] %v13911_v2  ;;  %v13923_v5 = vrot.slane %v13794_v16, %v13786_v14  ;;  %v2439_v6 = vrot.slane %v2437_v55, 2  ;;  %v2440_v10 = vrot.slane %v13911_v2, 7 }
  0x12   :  { %11548 = vmatprep.mubr.msk.f32.mxu1 %vm13739_vm1, %v20380_v0  ;;  %21276 = vst [vmem:[#allocation17_spill] sm:$0xff] %v13917_v3  ;;  %11693 = vmatpush3.msk.msra.mxu1 %vm2006_vm0, %v79_v56  ;;  %v13927_v7 = vsel %vm13859_vm9, %v2436_v62, %v2437_v55  ;;  %v13932_v9 = vcombine.high %v13882_v47, %v13882_v47  ;;  %v2443_v15 = vrot.slane %v13882_v47, 7 }
  0x13   :  { %21277 = vst [vmem:[#allocation18_spill] sm:$0xff] %v13923_v5  ;;  %21278 = vst [vmem:[#allocation19_spill] sm:$0xff] %v13927_v7  ;;  %v6511_v8 = vrot.slane %v6503_v63, %v13786_v14  ;;  %11841 = vmatprep.subr.mxu1 %v20380_v0  ;;  %v6504_v11 = vcombine.low %v13917_v3, %v13927_v7  ;;  %v13938_v12 = vcombine.low %v1116_v1, %v1123_v4 }
  0x14   :  { %21279 = vst [vmem:[#allocation20_spill] sm:$0xff] %v13932_v9  ;;  %v13942_v13 = vcombine.high %v13923_v5, %v13923_v5  ;;  %v13948_v23 = vsel %vm13859_vm9, %v2439_v6, %v2440_v10  ;;  %v2442_v24 = vrot.slane %v2440_v10, 2  ;;  %v2446_v30 = vrot.slane %v13932_v9, 7 }
  0x15   :  { %11549 = vmatmul.mubr.msk.f32.gmra.mrb[2].mxu1 %vm1907_vm6, %v1107_v58  ;;  %21281 = vst [vmem:[#allocation22_spill] sm:$0xff] %v13948_v23  ;;  %v10631_v32 = vrot.slane %v13923_v5, 9  ;;  %v6518_v34 = vrot.slane %v6504_v11, %v13786_v14  ;;  %v2445_v35 = vrot.slane %v2443_v15, 2  ;;  %v1125_v41 = vcombine.low %v13911_v2, %v13882_v47  ;;  %v23_v2 = vld [vmem:[%s20377_s0 + $0x48] sm:$0xff] }
  0x16   :  { %21280 = vst [vmem:[#allocation21_spill] sm:$0xff] %v13942_v13  ;;  %11551 = vmatprep.mubr.msk.f32.mxu1 %vm13739_vm1, %v20380_v0  ;;  %v2450_v40 = vrot.slane %v13942_v13, 7  ;;  %v13960_v42 = vsel %vm13859_vm9, %v2442_v24, %v2443_v15  ;;  %v1126_v45 = vcombine.low %v13923_v5, %v13942_v13  ;;  %v13968_v46 = vrot.slane %v216_v29, %v13786_v14 }
  0x17   :  { %21282 = vst [vmem:[#allocation23_spill] sm:$0xff] %v13960_v42  ;;  %v13972_v49 = vrot.slane %v13833_v28, %v13786_v14  ;;  %v6519_v51 = vcombine.low %v6511_v8, %v6518_v34  ;;  %v13979_v53 = vsel %vm13859_vm9, %v2445_v35, %v2446_v30  ;;  %v6520_v16 = vcombine.low %v13948_v23, %v13960_v42 }
  0x18   :  { %21283 = vst [vmem:[#allocation24_spill] sm:$0xff] %v13968_v46  ;;  %21285 = vst [vmem:[#allocation26_spill] sm:$0xff] %v13979_v53  ;;  %v13983_v54 = vsel %vm13859_vm9, %v10631_v32, %v2450_v40  ;;  %v13992_v55 = vrot.slane %v1125_v41, %v13786_v14  ;;  %v13995_v56 = vrot.slane %v1126_v45, %v13786_v14  ;;  %v2452_v62 = vrot.slane %v2450_v40, 2 }
  0x19   :  { %21284 = vst [vmem:[#allocation25_spill] sm:$0xff] %v13972_v49  ;;  %21286 = vst [vmem:[#allocation27_spill] sm:$0xff] %v13983_v54  ;;  %11552 = vmatmul.mubr.msk.f32.gmra.mrb[4].mxu1 %vm1907_vm6, %v13938_v12  ;;  %v6521_v29 = vcombine.low %v13979_v53, %v13983_v54  ;;  %v13999_v57 = vcombine.high %v13968_v46, %v13968_v46  ;;  %12142 = vmatmul.mubr.msk.f32.vlgmr.msra.gmra.mrb[0].mxu0 %vm1907_vm6, %v6519_v51  ;;  %v2453_v4 = vrot.slane %v13968_v46, 7 }
  0x1a   :  { %21287 = vst [vmem:[#allocation28_spill] sm:$0xff] %v13995_v56  ;;  %v6528_v58 = vrot.slane %v6520_v16, %v13786_v14  ;;  %11554 = vmatprep.mubr.msk.f32.mxu1 %vm13739_vm1, %v20380_v0  ;;  %v14009_v60 = vrot.slane %v233_v33, %v13786_v14  ;;  %v14013_v61 = vcombine.high %v13972_v49, %v13972_v49  ;;  %v2459_v33 = vrot.slane %v13972_v49, 7 }
  0x1b   :  { %21288 = vst [vmem:[#allocation29_spill] sm:$0xff] %v13999_v57  ;;  %12289 = vmatpush3.msk.msra.mxu0 %vm2006_vm0, %v83_v52  ;;  %12144 = vmatprep.mubr.msk.f32.mxu0 %vm13739_vm1, %v20380_v0  ;;  %v6535_v63 = vrot.slane %v6521_v29, %v13786_v14  ;;  %v1141_v1 = vcombine.low %v13992_v55, %v13995_v56  ;;  %v2456_v28 = vrot.slane %v13999_v57, 7  ;;  %v2455_v24 = vrot.slane %v2453_v4, 2 }
  0x1c   :  { %21289 = vst [vmem:[#allocation30_spill] sm:$0xff] %v14009_v60  ;;  %21290 = vst [vmem:[#allocation31_spill] sm:$0xff] %v14013_v61  ;;  %v2462_v6 = vrot.slane %v14013_v61, 7  ;;  %v1142_v8 = vcombine.low %v13968_v46, %v13999_v57  ;;  %v1143_v10 = vcombine.low %v13972_v49, %v14013_v61  ;;  %12437 = vmatprep.subr.mxu0 %v20380_v0  ;;  %v2461_v32 = vrot.slane %v2459_v33, 2 }
  0x1d   :  { %v6536_v11 = vcombine.low %v6528_v58, %v6535_v63  ;;  %11555 = vmatmul.mubr.msk.f32.gmra.mrb[6].mxu1 %vm1907_vm6, %v1141_v1  ;;  %v14033_v15 = vsel %vm13859_vm9, %v2452_v62, %v2453_v4  ;;  %v2458_v30 = vrot.slane %v2456_v28, 2  ;;  %v14045_v40 = vrot.slane %v13866_v39, %v13786_v14 }
  0x1e   :  { %21291 = vst [vmem:[#allocation32_spill] sm:$0xff] %v14033_v15  ;;  %11557 = vmatprep.mubr.msk.f32.mxu1 %vm13739_vm1, %v20380_v0  ;;  %v14038_v34 = vrot.slane %v1142_v8, %v13786_v14  ;;  %v14041_v35 = vrot.slane %v1143_v10, %v13786_v14  ;;  %v14050_v41 = vsel %vm13859_vm9, %v2455_v24, %v2456_v28  ;;  %v2464_v63 = vrot.slane %v2462_v6, 2 }
  0x1f   :  { %21294 = vst [vmem:[#allocation35_spill] sm:$0xff] %v14045_v40  ;;  %12145 = vmatmul.mubr.msk.f32.gmra.mrb[2].mxu0 %vm1907_vm6, %v6536_v11  ;;  %21295 = vst [vmem:[#allocation36_spill] sm:$0xff] %v14050_v41  ;;  %v14054_v45 = vsel %vm13859_vm9, %v2458_v30, %v2459_v33  ;;  %v14060_v51 = vrot.slane %v249_v43, %v13786_v14  ;;  %v14064_v52 = vcombine.high %v14009_v60, %v14009_v60 }
  0x20   :  { %21292 = vst [vmem:[#allocation33_spill] sm:$0xff] %v14038_v34  ;;  %21293 = vst [vmem:[#allocation34_spill] sm:$0xff] %v14041_v35  ;;  %12147 = vmatprep.mubr.msk.f32.mxu0 %vm13739_vm1, %v20380_v0  ;;  %v14070_v16 = vsel %vm13859_vm9, %v2461_v32, %v2462_v6  ;;  %v6537_v29 = vcombine.low %v14033_v15, %v14050_v41  ;;  %v14076_v58 = vcombine.low %v14038_v34, %v14041_v35 }
  0x21   :  { %21296 = vst [vmem:[#allocation37_spill] sm:$0xff] %v14054_v45  ;;  %21297 = vst [vmem:[#allocation38_spill] sm:$0xff] %v14060_v51  ;;  %v6538_v43 = vcombine.low %v14054_v45, %v14070_v16  ;;  %v14084_v62 = vcombine.high %v14045_v40, %v14045_v40  ;;  %v2465_v1 = vrot.slane %v14009_v60, 7  ;;  %v2468_v28 = vrot.slane %v14064_v52, 7 }
  0x22   :  { %21298 = vst [vmem:[#allocation39_spill] sm:$0xff] %v14070_v16  ;;  %v6545_v4 = vrot.slane %v6537_v29, %v13786_v14  ;;  %11558 = vmatmul.mubr.msk.f32.gmra.mrb[8].mxu1 %vm1907_vm6, %v14076_v58  ;;  %v10632_v33 = vrot.slane %v14045_v40, 9  ;;  %v2475_v8 = vrot.slane %v14060_v51, 7  ;;  %v1159_v30 = vcombine.low %v14009_v60, %v14045_v40 }
  0x23   :  { %21299 = vst [vmem:[#allocation40_spill] sm:$0xff] %v14084_v62  ;;  %v6552_v10 = vrot.slane %v6538_v43, %v13786_v14  ;;  %v14096_v11 = vsel %vm13859_vm9, %v2464_v63, %v2465_v1  ;;  %v2467_v6 = vrot.slane %v2465_v1, 2  ;;  %v2472_v24 = vrot.slane %v14084_v62, 7  ;;  %11560 = vmatprep.mubr.msk.f32.mxu1 %vm13739_vm1, %v20380_v0 }
  0x24   :  { %21300 = vst [vmem:[#allocation41_spill] sm:$0xff] %v14096_v11  ;;  %v1160_v32 = vcombine.low %v14084_v62, %v14060_v51  ;;  %v14107_v29 = vcombine.high %v14060_v51, %v14060_v51  ;;  %v14111_v43 = vrot.slane %v13877_v44, %v13786_v14  ;;  %v14124_v62 = vrot.slane %v1159_v30, %v13786_v14 }
  0x25   :  { %v6553_v63 = vcombine.low %v6545_v4, %v6552_v10  ;;  %v14115_v1 = vsel %vm13859_vm9, %v2467_v6, %v2468_v28  ;;  %v14119_v39 = vsel %vm13859_vm9, %v10632_v33, %v2472_v24  ;;  %v2474_v0 = vrot.slane %v2472_v24, 2 }
  0x26   :  { %21301 = vst [vmem:[#allocation42_spill] sm:$0xff] %v14107_v29  ;;  %21302 = vst [vmem:[#allocation43_spill] sm:$0xff] %v14111_v43  ;;  %v6554_v48 = vcombine.low %v14096_v11, %v14115_v1  ;;  %v14127_v31 = vrot.slane %v1160_v32, %v13786_v14  ;;  %v21307_v4 = vcombine.high %v13877_v44, %v13877_v44  ;;  %v2477_v6 = vrot.slane %v2475_v8, 2 }
  0x27   :  { %21303 = vst [vmem:[#allocation44_spill] sm:$0xff] %v14115_v1  ;;  %21304 = vst [vmem:[#allocation45_spill] sm:$0xff] %v14119_v39  ;;  %12148 = vmatmul.mubr.msk.f32.gmra.mrb[4].mxu0 %vm1907_vm6, %v6553_v63  ;;  %v14138_v33 = vsel %vm13859_vm9, %v2474_v0, %v2475_v8  ;;  %v14142_v10 = vcombine.high %v14111_v43, %v14111_v43  ;;  %v2478_v24 = vrot.slane %v14107_v29, 7  ;;  %v21311_v30 = vmov 0.0  }
  0x28   :  { %21305 = vst [vmem:[#allocation46_spill] sm:$0xff] %v14124_v62  ;;  %21306 = vst [vmem:[#allocation47_spill] sm:$0xff] %v14127_v31  ;;  %v14133_v28 = vrot.slane %v21307_v4, %v13786_v14  ;;  %12150 = vmatprep.mubr.msk.f32.mxu0 %vm13739_vm1, %v21311_v30  ;;  %v6555_v44 = vcombine.low %v14119_v39, %v14138_v33  ;;  %v6562_v32 = vrot.slane %v6554_v48, %v13786_v14  ;;  %v22_v4 = vld [vmem:[%s20377_s0 + $0x40] sm:$0xff] }
  0x29   :  { %21309 = vst [vmem:[#allocation49_spill] sm:$0xff] %v14138_v33  ;;  %21310 = vst [vmem:[#allocation50_spill] sm:$0xff] %v14142_v10  ;;  %v1175_v63 = vcombine.low %v14124_v62, %v14127_v31  ;;  %v2481_v0 = vrot.slane %v14111_v43, 7  ;;  %v14158_v8 = vsel %vm13859_vm9, %v2477_v6, %v2478_v24  ;;  %v2480_v51 = vrot.slane %v2478_v24, 2 }
  0x2a   :  { %21308 = vst [vmem:[#allocation48_spill] sm:$0xff] %v14133_v28  ;;  %21312 = vst [vmem:[#allocation51_spill] sm:$0xff] %v14158_v8  ;;  %v2484_v40 = vrot.slane %v14142_v10, 7  ;;  %v2487_v61 = vrot.slane %v14133_v28, 7  ;;  %v6569_v48 = vrot.slane %v6555_v44, %v13786_v14  ;;  %v1176_v49 = vcombine.low %v14107_v29, %v14111_v43 }
  0x2b   :  { %11561 = vmatmul.mubr.msk.f32.gmra.mrb[10].mxu1 %vm1907_vm6, %v1175_v63  ;;  %v2483_v57 = vrot.slane %v2481_v0, 2  ;;  %v1177_v13 = vcombine.low %v14142_v10, %v14133_v28  ;;  %v14170_v6 = vsel %vm13859_vm9, %v2480_v51, %v2481_v0  ;;  %v282_v46 = vcombine.high %v22_v4, %v22_v4 }
  0x2c   :  { %21313 = vst [vmem:[#allocation52_spill] sm:$0xff] %v14170_v6  ;;  %v2486_v24 = vrot.slane %v2484_v40, 2  ;;  %11563 = vmatprep.mubr.msk.f32.mxu1 %vm13739_vm1, %v21311_v30  ;;  %v14175_v44 = vrot.slane %v22_v4, %v13786_v14  ;;  %v6570_v63 = vcombine.low %v6562_v32, %v6569_v48  ;;  %v6571_v43 = vcombine.low %v14158_v8, %v14170_v6 }
  0x2d   :  { %v14179_v9 = vsel %vm13859_vm9, %v2483_v57, %v2484_v40  ;;  %v14184_v10 = vrot.slane %v1176_v49, %v13786_v14  ;;  %v14191_v0 = vrot.slane %v1177_v13, %v13786_v14  ;;  %v14194_v4 = vrot.slane %v282_v46, %v13786_v14 }
  0x2e   :  { %21314 = vst [vmem:[#allocation53_spill] sm:$0xff] %v14175_v44  ;;  %21315 = vst [vmem:[#allocation54_spill] sm:$0xff] %v14179_v9  ;;  %v14188_v51 = vsel %vm13859_vm9, %v2486_v24, %v2487_v61  ;;  %v14198_v57 = vcombine.high %v14175_v44, %v14175_v44  ;;  %12151 = vmatmul.mubr.msk.f32.gmra.mrb[6].mxu0 %vm1907_vm6, %v6570_v63  ;;  %v6579_v40 = vrot.slane %v6571_v43, %v13786_v14 }
  0x2f   :  { %21316 = vst [vmem:[#allocation55_spill] sm:$0xff] %v14184_v10  ;;  %21317 = vst [vmem:[#allocation56_spill] sm:$0xff] %v14188_v51  ;;  %v6572_v49 = vcombine.low %v14179_v9, %v14188_v51  ;;  %v14206_v32 = vcombine.high %v14133_v28, %v14133_v28  ;;  %v2489_v13 = vrot.slane %v2487_v61, 2  ;;  %12153 = vmatprep.mubr.msk.f32.mxu0 %vm13739_vm1, %v21311_v30  ;;  %v10633_v24 = vrot.slane %v14175_v44, 9 }
  0x30   :  { %21318 = vst [vmem:[#allocation57_spill] sm:$0xff] %v14191_v0  ;;  %21319 = vst [vmem:[#allocation58_spill] sm:$0xff] %v14194_v4  ;;  %v14212_v46 = vcombine.low %v14184_v10, %v14191_v0  ;;  %v14216_v48 = vcombine.high %v14194_v4, %v14194_v4  ;;  %v2494_v43 = vrot.slane %v14198_v57, 7  ;;  %v2497_v61 = vrot.slane %v14194_v4, 7 }
  0x31   :  { %21320 = vst [vmem:[#allocation59_spill] sm:$0xff] %v14198_v57  ;;  %21321 = vst [vmem:[#allocation60_spill] sm:$0xff] %v14206_v32  ;;  %v6586_v63 = vrot.slane %v6572_v49, %v13786_v14  ;;  %v2490_v29 = vrot.slane %v14206_v32, 7  ;;  %v1193_v37 = vcombine.low %v14175_v44, %v14198_v57  ;;  %v24_v57 = vld [vmem:[%s20377_s0 + $0x50] sm:$0xff] }
  0x32   :  { %21322 = vst [vmem:[#allocation61_spill] sm:$0xff] %v14216_v48  ;;  %11564 = vmatmul.mubr.msk.f32.gmra.mrb[12].mxu1 %vm1907_vm6, %v14212_v46  ;;  %v14232_v22 = vsel %vm13859_vm9, %v10633_v24, %v2494_v43  ;;  %v2496_v36 = vrot.slane %v2494_v43, 2  ;;  %v2500_v49 = vrot.slane %v14216_v48, 7  ;;  %v1194_v32 = vcombine.low %v14194_v4, %v14216_v48 }
  0x33   :  { %21323 = vst [vmem:[#allocation62_spill] sm:$0xff] %v14232_v22  ;;  %v6587_v21 = vcombine.low %v6579_v40, %v6586_v63  ;;  %v14242_v34 = vsel %vm13859_vm9, %v2489_v13, %v2490_v29  ;;  %v2499_v56 = vrot.slane %v2497_v61, 2  ;;  %11566 = vmatprep.mubr.msk.f32.mxu1 %vm13739_vm1, %v21311_v30  ;;  %v14247_v24 = vrot.slane %v1193_v37, %v13786_v14 }
  0x34   :  { %21324 = vst [vmem:[#allocation63_spill] sm:$0xff] %v14242_v34  ;;  %v14251_v43 = vsel %vm13859_vm9, %v2496_v36, %v2497_v61  ;;  %v6588_v48 = vcombine.low %v14242_v34, %v14232_v22  ;;  %v14256_v40 = vrot.slane %v1194_v32, %v13786_v14  ;;  %v299_v63 = vcombine.high %v23_v2, %v23_v2  ;;  %v25_v36 = vld [vmem:[%s20377_s0 + $0x58] sm:$0xff] }
  0x35   :  { %21325 = vst [vmem:[#allocation64_spill] sm:$0xff] %v14247_v24  ;;  %21326 = vst [vmem:[#allocation65_spill] sm:$0xff] %v14251_v43  ;;  %12154 = vmatmul.mubr.msk.f32.gmra.mrb[8].mxu0 %vm1907_vm6, %v6587_v21  ;;  %v14261_v29 = vsel %vm13859_vm9, %v2499_v56, %v2500_v49  ;;  %v14264_v37 = vrot.slane %v23_v2, %v13786_v14  ;;  %v2502_v13 = vrot.slane %v2500_v49, 2 }
  0x36   :  { %21327 = vst [vmem:[#allocation66_spill] sm:$0xff] %v14256_v40  ;;  %21328 = vst [vmem:[#allocation67_spill] sm:$0xff] %v14261_v29  ;;  %v315_v4 = vcombine.high %v24_v57, %v24_v57  ;;  %12156 = vmatprep.mubr.msk.f32.mxu0 %vm13739_vm1, %v21311_v30  ;;  %v6589_v32 = vcombine.low %v14251_v43, %v14261_v29  ;;  %v6596_v21 = vrot.slane %v6588_v48, %v13786_v14 }
  0x37   :  { %21329 = vst [vmem:[#allocation68_spill] sm:$0xff] %v14264_v37  ;;  %v1209_v56 = vcombine.low %v14247_v24, %v14256_v40  ;;  %v14277_v2 = vrot.slane %v299_v63, %v13786_v14  ;;  %v14281_v61 = vcombine.high %v14264_v37, %v14264_v37  ;;  %v2503_v49 = vrot.slane %v14264_v37, 7 }
  0x38   :  { %v14285_v0 = vrot.slane %v24_v57, %v13786_v14  ;;  %v14288_v10 = vrot.slane %v315_v4, %v13786_v14  ;;  %v6603_v48 = vrot.slane %v6589_v32, %v13786_v14  ;;  %v332_v35 = vcombine.high %v25_v36, %v25_v36 }
  0x39   :  { %21330 = vst [vmem:[#allocation69_spill] sm:$0xff] %v14277_v2  ;;  %21331 = vst [vmem:[#allocation70_spill] sm:$0xff] %v14281_v61  ;;  %11567 = vmatmul.mubr.msk.f32.gmra.mrb[14].mxu1 %vm1907_vm6, %v1209_v56  ;;  %v14294_v63 = vcombine.high %v14277_v2, %v14277_v2  ;;  %v2509_v24 = vrot.slane %v14277_v2, 7  ;;  %v14299_v62 = vsel %vm13859_vm9, %v2502_v13, %v2503_v49  ;;  %v2505_v57 = vrot.slane %v2503_v49, 2 }
  0x3a   :  { %21332 = vst [vmem:[#allocation71_spill] sm:$0xff] %v14285_v0  ;;  %21333 = vst [vmem:[#allocation72_spill] sm:$0xff] %v14288_v10  ;;  %v2506_v29 = vrot.slane %v14281_v61, 7  ;;  %11569 = vmatprep.mubr.msk.f32.mxu1 %vm13739_vm1, %v21311_v30  ;;  %v1210_v4 = vcombine.low %v14264_v37, %v14281_v61  ;;  %v6604_v32 = vcombine.low %v6596_v21, %v6603_v48 }
  0x3b   :  { %21334 = vst [vmem:[#allocation73_spill] sm:$0xff] %v14299_v62  ;;  %v2511_v56 = vrot.slane %v2509_v24, 2  ;;  %v2512_v22 = vrot.slane %v14294_v63, 7  ;;  %v1211_v43 = vcombine.low %v14277_v2, %v14285_v0  ;;  %v14318_v34 = vcombine.high %v14285_v0, %v14285_v0 }
  0x3c   :  { %v14311_v13 = vsel %vm13859_vm9, %v2505_v57, %v2506_v29  ;;  %v2508_v49 = vrot.slane %v2506_v29, 2  ;;  %v14314_v51 = vrot.slane %v1210_v4, %v13786_v14  ;;  %12157 = vmatmul.mubr.msk.f32.gmra.mrb[10].mxu0 %vm1907_vm6, %v6604_v32  ;;  %v14332_v29 = vcombine.high %v14288_v10, %v14288_v10 }
  0x3d   :  { %21335 = vst [vmem:[#allocation74_spill] sm:$0xff] %v14311_v13  ;;  %21337 = vst [vmem:[#allocation76_spill] sm:$0xff] %v14318_v34  ;;  %v14323_v21 = vsel %vm13859_vm9, %v2511_v56, %v2512_v22  ;;  %v6605_v48 = vcombine.low %v14299_v62, %v14311_v13  ;;  %v14328_v57 = vrot.slane %v1211_v43, %v13786_v14  ;;  %12159 = vmatprep.mubr.msk.f32.mxu0 %vm13739_vm1, %v21311_v30 }
  0x3e   :  { %21336 = vst [vmem:[#allocation75_spill] sm:$0xff] %v14314_v51  ;;  %21338 = vst [vmem:[#allocation77_spill] sm:$0xff] %v14323_v21  ;;  %v14338_v4 = vsel %vm13859_vm9, %v2508_v49, %v2509_v24  ;;  %v14341_v22 = vrot.slane %v25_v36, %v13786_v14  ;;  %v14344_v32 = vrot.slane %v332_v35, %v13786_v14  ;;  %v10634_v43 = vrot.slane %v14285_v0, 9  ;;  %v26_v0 = vld [vmem:[%s20377_s0 + $0x60] sm:$0xff] }
  0x3f   :  { %21339 = vst [vmem:[#allocation78_spill] sm:$0xff] %v14328_v57  ;;  %21340 = vst [vmem:[#allocation79_spill] sm:$0xff] %v14332_v29  ;;  %v6606_v56 = vcombine.low %v14338_v4, %v14323_v21  ;;  %v6613_v61 = vrot.slane %v6605_v48, %v13786_v14  ;;  %v1226_v37 = vcombine.low %v14314_v51, %v14328_v57  ;;  %v2516_v13 = vrot.slane %v14318_v34, 7 }
  0x40   :  { %21341 = vst [vmem:[#allocation80_spill] sm:$0xff] %v14338_v4  ;;  %21342 = vst [vmem:[#allocation81_spill] sm:$0xff] %v14341_v22  ;;  %v2519_v24 = vrot.slane %v14288_v10, 7  ;;  %v2522_v36 = vrot.slane %v14332_v29, 7  ;;  %v2525_v49 = vrot.slane %v14341_v22, 7  ;;  %v1227_v35 = vcombine.low %v14318_v34, %v14288_v10 }
  0x41   :  { %21343 = vst [vmem:[#allocation82_spill] sm:$0xff] %v14344_v32  ;;  %v6620_v48 = vrot.slane %v6606_v56, %v13786_v14  ;;  %11570 = vmatmul.mubr.msk.f32.gmra.mrb[16].mxu1 %vm1907_vm6, %v1226_v37  ;;  %v14365_v57 = vsel %vm13859_vm9, %v10634_v43, %v2516_v13  ;;  %v2518_v21 = vrot.slane %v2516_v13, 2  ;;  %v1228_v4 = vcombine.low %v14332_v29, %v14341_v22 }
  0x42   :  { %21344 = vst [vmem:[#allocation83_spill] sm:$0xff] %v14365_v57  ;;  %v2521_v62 = vrot.slane %v2519_v24, 2  ;;  %v2524_v6 = vrot.slane %v2522_v36, 2  ;;  %11572 = vmatprep.mubr.msk.f32.mxu1 %vm13739_vm1, %v21311_v30  ;;  %v14372_v34 = vrot.slane %v1227_v35, %v13786_v14  ;;  %v14376_v56 = vcombine.high %v14341_v22, %v14341_v22 }
  0x43   :  { %v6621_v37 = vcombine.low %v6613_v61, %v6620_v48  ;;  %v14380_v43 = vsel %vm13859_vm9, %v2518_v21, %v2519_v24  ;;  %v14383_v13 = vrot.slane %v1228_v4, %v13786_v14  ;;  %v14386_v10 = vrot.slane %v26_v0, %v13786_v14 }
  0x44   :  { %21345 = vst [vmem:[#allocation84_spill] sm:$0xff] %v14372_v34  ;;  %21346 = vst [vmem:[#allocation85_spill] sm:$0xff] %v14376_v56  ;;  %v14390_v29 = vsel %vm13859_vm9, %v2521_v62, %v2522_v36  ;;  %v14394_v35 = vsel %vm13859_vm9, %v2524_v6, %v2525_v49  ;;  %v6622_v61 = vcombine.low %v14365_v57, %v14380_v43  ;;  %v2527_v24 = vrot.slane %v2525_v49, 2 }
  0x45   :  { %21347 = vst [vmem:[#allocation86_spill] sm:$0xff] %v14380_v43  ;;  %21348 = vst [vmem:[#allocation87_spill] sm:$0xff] %v14383_v13  ;;  %v14400_v21 = vcombine.high %v14344_v32, %v14344_v32  ;;  %12160 = vmatmul.mubr.msk.f32.gmra.mrb[12].mxu0 %vm1907_vm6, %v6621_v37  ;;  %v6623_v4 = vcombine.low %v14390_v29, %v14394_v35  ;;  %v14407_v62 = vcombine.low %v14372_v34, %v14383_v13 }
  0x46   :  { %21349 = vst [vmem:[#allocation88_spill] sm:$0xff] %v14386_v10  ;;  %21350 = vst [vmem:[#allocation89_spill] sm:$0xff] %v14390_v29  ;;  %v14411_v6 = vcombine.high %v14386_v10, %v14386_v10  ;;  %12162 = vmatprep.mubr.msk.f32.mxu0 %vm13739_vm1, %v21311_v30  ;;  %v6630_v36 = vrot.slane %v6622_v61, %v13786_v14  ;;  %v2528_v48 = vrot.slane %v14376_v56, 7  ;;  %v2531_v37 = vrot.slane %v14344_v32, 7 }
  0x47   :  { %21351 = vst [vmem:[#allocation90_spill] sm:$0xff] %v14394_v35  ;;  %21352 = vst [vmem:[#allocation91_spill] sm:$0xff] %v14400_v21  ;;  %v2534_v22 = vrot.slane %v14400_v21, 7  ;;  %v6637_v35 = vrot.slane %v6623_v4, %v13786_v14  ;;  %11573 = vmatmul.mubr.msk.f32.gmra.mrb[18].mxu1 %vm1907_vm6, %v14407_v62  ;;  %v10635_v13 = vrot.slane %v14386_v10, 9  ;;  %v1244_v34 = vcombine.low %v14376_v56, %v14344_v32  ;;  %v27_v21 = vld [vmem:[%s20377_s0 + $0x68] sm:$0xff] }
  0x48   :  { %21353 = vst [vmem:[#allocation92_spill] sm:$0xff] %v14411_v6  ;;  %v2538_v49 = vrot.slane %v14411_v6, 7  ;;  %v14428_v61 = vsel %vm13859_vm9, %v2527_v24, %v2528_v48  ;;  %v2530_v43 = vrot.slane %v2528_v48, 2  ;;  %v2533_v29 = vrot.slane %v2531_v37, 2  ;;  %11575 = vmatprep.mubr.msk.f32.mxu1 %vm13739_vm1, %v21311_v30 }
  0x49   :  { %21354 = vst [vmem:[#allocation93_spill] sm:$0xff] %v14428_v61  ;;  %v1245_v4 = vcombine.low %v14386_v10, %v14411_v6  ;;  %v6638_v57 = vcombine.low %v6630_v36, %v6637_v35  ;;  %v14442_v24 = vrot.slane %v1244_v34, %v13786_v14  ;;  %v348_v48 = vcombine.high %v26_v0, %v26_v0 }
  0x4a   :  { %v14439_v56 = vsel %vm13859_vm9, %v10635_v13, %v2538_v49  ;;  %v14446_v9 = vsel %vm13859_vm9, %v2530_v43, %v2531_v37  ;;  %v14450_v6 = vsel %vm13859_vm9, %v2533_v29, %v2534_v22  ;;  %v365_v35 = vcombine.high %v27_v21, %v27_v21  ;;  %v28_v29 = vld [vmem:[%s20377_s0 + $0x70] sm:$0xff] }
  0x4b   :  { %21355 = vst [vmem:[#allocation94_spill] sm:$0xff] %v14439_v56  ;;  %21356 = vst [vmem:[#allocation95_spill] sm:$0xff] %v14442_v24  ;;  %v14453_v33 = vrot.slane %v1245_v4, %v13786_v14  ;;  %12163 = vmatmul.mubr.msk.f32.gmra.mrb[14].mxu0 %vm1907_vm6, %v6638_v57  ;;  %v6639_v13 = vcombine.low %v14428_v61, %v14446_v9  ;;  %v6640_v34 = vcombine.low %v14450_v6, %v14439_v56 }
  0x4c   :  { %21357 = vst [vmem:[#allocation96_spill] sm:$0xff] %v14446_v9  ;;  %21358 = vst [vmem:[#allocation97_spill] sm:$0xff] %v14450_v6  ;;  %v14461_v0 = vrot.slane %v348_v48, %v13786_v14  ;;  %v14464_v43 = vrot.slane %v27_v21, %v13786_v14  ;;  %12165 = vmatprep.mubr.msk.f32.mxu0 %vm13739_vm1, %v21311_v30  ;;  %v14474_v22 = vrot.slane %v365_v35, %v13786_v14 }
  0x4d   :  { %21359 = vst [vmem:[#allocation98_spill] sm:$0xff] %v14453_v33  ;;  %v1260_v57 = vcombine.low %v14442_v24, %v14453_v33  ;;  %v2540_v36 = vrot.slane %v2538_v49, 2  ;;  %v381_v37 = vcombine.high %v28_v29, %v28_v29  ;;  %v6647_v4 = vrot.slane %v6639_v13, %v13786_v14 }
  0x4e   :  { %21360 = vst [vmem:[#allocation99_spill] sm:$0xff] %v14461_v0  ;;  %21361 = vst [vmem:[#allocation100_spill] sm:$0xff] %v14464_v43  ;;  %v6654_v21 = vrot.slane %v6640_v34, %v13786_v14  ;;  %v14480_v48 = vcombine.high %v14461_v0, %v14461_v0  ;;  %v14484_v56 = vcombine.high %v14464_v43, %v14464_v43  ;;  %v2541_v33 = vrot.slane %v14461_v0, 7 }
  0x4f   :  { %21362 = vst [vmem:[#allocation101_spill] sm:$0xff] %v14474_v22  ;;  %11576 = vmatmul.mubr.msk.f32.gmra.mrb[20].mxu1 %vm1907_vm6, %v1260_v57  ;;  %v2547_v35 = vrot.slane %v14464_v43, 7  ;;  %v14490_v49 = vrot.slane %v28_v29, %v13786_v14  ;;  %v14493_v13 = vrot.slane %v381_v37, %v13786_v14 }
  0x50   :  { %21363 = vst [vmem:[#allocation102_spill] sm:$0xff] %v14480_v48  ;;  %21364 = vst [vmem:[#allocation103_spill] sm:$0xff] %v14484_v56  ;;  %v6655_v34 = vcombine.low %v6647_v4, %v6654_v21  ;;  %v2544_v9 = vrot.slane %v14480_v48, 7  ;;  %v2550_v6 = vrot.slane %v14484_v56, 7  ;;  %11578 = vmatprep.mubr.msk.f32.mxu1 %vm13739_vm1, %v21311_v30  ;;  %v1261_v57 = vcombine.low %v14461_v0, %v14480_v48 }
  0x51   :  { %21365 = vst [vmem:[#allocation104_spill] sm:$0xff] %v14490_v49  ;;  %21366 = vst [vmem:[#allocation105_spill] sm:$0xff] %v14493_v13  ;;  %v14503_v61 = vsel %vm13859_vm9, %v2540_v36, %v2541_v33  ;;  %v2543_v29 = vrot.slane %v2541_v33, 2  ;;  %v2549_v8 = vrot.slane %v2547_v35, 2  ;;  %v1262_v37 = vcombine.low %v14464_v43, %v14484_v56 }
  0x52   :  { %21367 = vst [vmem:[#allocation106_spill] sm:$0xff] %v14503_v61  ;;  %12166 = vmatmul.mubr.msk.f32.gmra.mrb[16].mxu0 %vm1907_vm6, %v6655_v34  ;;  %v2546_v4 = vrot.slane %v2544_v9, 2  ;;  %v14509_v21 = vrot.slane %v1261_v57, %v13786_v14  ;;  %v14513_v1 = vcombine.high %v14490_v49, %v14490_v49  ;;  %v14517_v48 = vcombine.high %v14474_v22, %v14474_v22 }
  0x53   :  { %12168 = vmatprep.mubr.msk.f32.mxu0 %vm13739_vm1, %v21311_v30  ;;  %v14523_v33 = vsel %vm13859_vm9, %v2543_v29, %v2544_v9  ;;  %v14527_v36 = vsel %vm13859_vm9, %v2549_v8, %v2550_v6  ;;  %v14530_v34 = vrot.slane %v1262_v37, %v13786_v14  ;;  %v2552_v57 = vrot.slane %v2550_v6, 2 }
  0x54   :  { %21368 = vst [vmem:[#allocation107_spill] sm:$0xff] %v14509_v21  ;;  %21369 = vst [vmem:[#allocation108_spill] sm:$0xff] %v14513_v1  ;;  %v14534_v56 = vsel %vm13859_vm9, %v2546_v4, %v2547_v35  ;;  %v6656_v43 = vcombine.low %v14503_v61, %v14523_v33  ;;  %v2553_v0 = vrot.slane %v14474_v22, 7  ;;  %v2556_v9 = vrot.slane %v14517_v48, 7 }
  0x55   :  { %21370 = vst [vmem:[#allocation109_spill] sm:$0xff] %v14523_v33  ;;  %21371 = vst [vmem:[#allocation110_spill] sm:$0xff] %v14527_v36  ;;  %v6657_v29 = vcombine.low %v14534_v56, %v14527_v36  ;;  %v14544_v8 = vcombine.low %v14509_v21, %v14530_v34  ;;  %v10636_v6 = vrot.slane %v14490_v49, 9  ;;  %v2560_v37 = vrot.slane %v14513_v1, 7 }
  0x56   :  { %21372 = vst [vmem:[#allocation111_spill] sm:$0xff] %v14530_v34  ;;  %21373 = vst [vmem:[#allocation112_spill] sm:$0xff] %v14534_v56  ;;  %v6664_v35 = vrot.slane %v6656_v43, %v13786_v14  ;;  %v14551_v4 = vsel %vm13859_vm9, %v2552_v57, %v2553_v0  ;;  %v2555_v33 = vrot.slane %v2553_v0, 2  ;;  %v2563_v61 = vrot.slane %v14493_v13, 7  ;;  %v29_v57 = vld [vmem:[%s20377_s0 + $0x78] sm:$0xff] }
  0x57   :  { %21374 = vst [vmem:[#allocation113_spill] sm:$0xff] %v14551_v4  ;;  %v6671_v39 = vrot.slane %v6657_v29, %v13786_v14  ;;  %11579 = vmatmul.mubr.msk.f32.gmra.mrb[22].mxu1 %vm1907_vm6, %v14544_v8  ;;  %v14559_v34 = vsel %vm13859_vm9, %v10636_v6, %v2560_v37  ;;  %v2562_v21 = vrot.slane %v2560_v37, 2  ;;  %v1278_v43 = vcombine.low %v14474_v22, %v14490_v49  ;;  %v30_v49 = vld [vmem:[%s20377_s0 + $0x80] sm:$0xff] }
  0x58   :  { %21375 = vst [vmem:[#allocation114_spill] sm:$0xff] %v14559_v34  ;;  %v14568_v0 = vsel %vm13859_vm9, %v2555_v33, %v2556_v9  ;;  %11581 = vmatprep.mubr.msk.f32.mxu1 %vm13739_vm1, %v21311_v30  ;;  %v1279_v29 = vcombine.low %v14513_v1, %v14493_v13  ;;  %v14576_v6 = vcombine.high %v14493_v13, %v14493_v13 }
  0x59   :  { %21376 = vst [vmem:[#allocation115_spill] sm:$0xff] %v14568_v0  ;;  %v398_v37 = vcombine.high %v29_v57, %v29_v57  ;;  %v6672_v36 = vcombine.low %v6664_v35, %v6671_v39  ;;  %v14583_v33 = vsel %vm13859_vm9, %v2562_v21, %v2563_v61  ;;  %v6673_v9 = vcombine.low %v14551_v4, %v14568_v0 }
  0x5a   :  { %21377 = vst [vmem:[#allocation116_spill] sm:$0xff] %v14576_v6  ;;  %21378 = vst [vmem:[#allocation117_spill] sm:$0xff] %v14583_v33  ;;  %v14588_v56 = vrot.slane %v1278_v43, %v13786_v14  ;;  %v6674_v1 = vcombine.low %v14559_v34, %v14583_v33  ;;  %v14593_v13 = vrot.slane %v1279_v29, %v13786_v14  ;;  %v2565_v35 = vrot.slane %v2563_v61, 2 }
  0x5b   :  { %v14596_v16 = vrot.slane %v29_v57, %v13786_v14  ;;  %v14599_v39 = vrot.slane %v398_v37, %v13786_v14  ;;  %12169 = vmatmul.mubr.msk.f32.gmra.mrb[18].mxu0 %vm1907_vm6, %v6672_v36  ;;  %v6681_v21 = vrot.slane %v6673_v9, %v13786_v14  ;;  %v2566_v43 = vrot.slane %v14576_v6, 7 }
  0x5c   :  { %21379 = vst [vmem:[#allocation118_spill] sm:$0xff] %v14588_v56  ;;  %21380 = vst [vmem:[#allocation119_spill] sm:$0xff] %v14593_v13  ;;  %v414_v0 = vcombine.high %v30_v49, %v30_v49  ;;  %12171 = vmatprep.mubr.msk.f32.mxu0 %vm13739_vm1, %v21311_v30  ;;  %v6688_v29 = vrot.slane %v6674_v1, %v13786_v14  ;;  %v1294_v57 = vcombine.low %v14588_v56, %v14593_v13 }
  0x5d   :  { %21381 = vst [vmem:[#allocation120_spill] sm:$0xff] %v14596_v16  ;;  %21382 = vst [vmem:[#allocation121_spill] sm:$0xff] %v14599_v39  ;;  %v14611_v37 = vcombine.high %v14596_v16, %v14596_v16  ;;  %v2569_v36 = vrot.slane %v14596_v16, 7  ;;  %v14616_v61 = vsel %vm13859_vm9, %v2565_v35, %v2566_v43  ;;  %v2568_v9 = vrot.slane %v2566_v43, 2 }
  0x5e   :  { %21384 = vst [vmem:[#allocation123_spill] sm:$0xff] %v14616_v61  ;;  %v2575_v33 = vrot.slane %v14599_v39, 7  ;;  %v1295_v34 = vcombine.low %v14576_v6, %v14596_v16  ;;  %v6689_v1 = vcombine.low %v6681_v21, %v6688_v29  ;;  %11582 = vmatmul.mubr.msk.f32.gmra.mrb[24].mxu1 %vm1907_vm6, %v1294_v57  ;;  %v14635_v21 = vrot.slane %v30_v49, %v13786_v14 }
  0x5f   :  { %21383 = vst [vmem:[#allocation122_spill] sm:$0xff] %v14611_v37  ;;  %v2571_v56 = vrot.slane %v2569_v36, 2  ;;  %v2572_v4 = vrot.slane %v14611_v37, 7  ;;  %v1296_v11 = vcombine.low %v14611_v37, %v14599_v39  ;;  %v14627_v42 = vsel %vm13859_vm9, %v2568_v9, %v2569_v36  ;;  %11584 = vmatprep.mubr.msk.f32.mxu1 %vm13739_vm1, %v21311_v30 }
  0x60   :  { %21385 = vst [vmem:[#allocation124_spill] sm:$0xff] %v14627_v42  ;;  %v14632_v35 = vrot.slane %v1295_v34, %v13786_v14  ;;  %21387 = vst [vmem:[#allocation126_spill] sm:$0xff] %v14635_v21  ;;  %v14638_v43 = vrot.slane %v414_v0, %v13786_v14  ;;  %12172 = vmatmul.mubr.msk.f32.gmra.mrb[20].mxu0 %vm1907_vm6, %v6689_v1  ;;  %v6690_v36 = vcombine.low %v14616_v61, %v14627_v42 }
  0x61   :  { %v14643_v29 = vsel %vm13859_vm9, %v2571_v56, %v2572_v4  ;;  %v2574_v57 = vrot.slane %v2572_v4, 2  ;;  %v14648_v9 = vrot.slane %v1296_v11, %v13786_v14  ;;  %12174 = vmatprep.mubr.msk.f32.mxu0 %vm13739_vm1, %v21311_v30  ;;  %v14654_v49 = vcombine.high %v14635_v21, %v14635_v21  ;;  %v31_v11 = vld [vmem:[%s20377_s0 + $0x88] sm:$0xff] }
  0x62   :  { %21386 = vst [vmem:[#allocation125_spill] sm:$0xff] %v14632_v35  ;;  %21388 = vst [vmem:[#allocation127_spill] sm:$0xff] %v14638_v43  ;;  %v14658_v34 = vcombine.high %v14638_v43, %v14638_v43  ;;  %v14662_v56 = vcombine.high %v14599_v39, %v14599_v39  ;;  %v2577_v4 = vrot.slane %v2575_v33, 2  ;;  %v6698_v1 = vrot.slane %v6690_v36, %v13786_v14 }
  0x63   :  { %21389 = vst [vmem:[#allocation128_spill] sm:$0xff] %v14643_v29  ;;  %21390 = vst [vmem:[#allocation129_spill] sm:$0xff] %v14648_v9  ;;  %v14669_v0 = vsel %vm13859_vm9, %v2574_v57, %v2575_v33  ;;  %v14674_v16 = vcombine.low %v14632_v35, %v14648_v9  ;;  %v10637_v37 = vrot.slane %v14635_v21, 9  ;;  %v2582_v61 = vrot.slane %v14654_v49, 7 }
  0x64   :  { %21391 = vst [vmem:[#allocation130_spill] sm:$0xff] %v14654_v49  ;;  %21392 = vst [vmem:[#allocation131_spill] sm:$0xff] %v14658_v34  ;;  %v6691_v6 = vcombine.low %v14643_v29, %v14669_v0  ;;  %v2578_v42 = vrot.slane %v14662_v56, 7  ;;  %v2585_v53 = vrot.slane %v14638_v43, 7  ;;  %v2588_v33 = vrot.slane %v14658_v34, 7 }
  0x65   :  { %21393 = vst [vmem:[#allocation132_spill] sm:$0xff] %v14662_v56  ;;  %21394 = vst [vmem:[#allocation133_spill] sm:$0xff] %v14669_v0  ;;  %11585 = vmatmul.mubr.msk.f32.gmra.mrb[26].mxu1 %vm1907_vm6, %v14674_v16  ;;  %v1312_v57 = vcombine.low %v14635_v21, %v14654_v49  ;;  %v1313_v36 = vcombine.low %v14638_v43, %v14658_v34  ;;  %v431_v9 = vcombine.high %v31_v11, %v31_v11  ;;  %v32_v43 = vld [vmem:[%s20377_s0 + $0x90] sm:$0xff] }
  0x66   :  { %v6705_v35 = vrot.slane %v6691_v6, %v13786_v14  ;;  %v14692_v56 = vsel %vm13859_vm9, %v2577_v4, %v2578_v42  ;;  %v14696_v0 = vsel %vm13859_vm9, %v10637_v37, %v2582_v61  ;;  %v2584_v29 = vrot.slane %v2582_v61, 2  ;;  %11587 = vmatprep.mubr.msk.f32.mxu1 %vm13739_vm1, %v21311_v30 }
  0x67   :  { %21395 = vst [vmem:[#allocation134_spill] sm:$0xff] %v14692_v56  ;;  %21396 = vst [vmem:[#allocation135_spill] sm:$0xff] %v14696_v0  ;;  %v2587_v7 = vrot.slane %v2585_v53, 2  ;;  %v6707_v49 = vcombine.low %v14692_v56, %v14696_v0  ;;  %v14703_v34 = vrot.slane %v1312_v57, %v13786_v14  ;;  %v14706_v6 = vrot.slane %v1313_v36, %v13786_v14  ;;  %v33_v57 = vld [vmem:[%s20377_s0 + $0x98] sm:$0xff] }
  0x68   :  { %v6706_v42 = vcombine.low %v6698_v1, %v6705_v35  ;;  %v14710_v4 = vsel %vm13859_vm9, %v2584_v29, %v2585_v53  ;;  %v14713_v37 = vrot.slane %v31_v11, %v13786_v14  ;;  %v14716_v61 = vrot.slane %v431_v9, %v13786_v14 }
  0x69   :  { %21397 = vst [vmem:[#allocation136_spill] sm:$0xff] %v14703_v34  ;;  %21398 = vst [vmem:[#allocation137_spill] sm:$0xff] %v14706_v6  ;;  %v14726_v35 = vsel %vm13859_vm9, %v2587_v7, %v2588_v33  ;;  %v6715_v53 = vrot.slane %v6707_v49, %v13786_v14  ;;  %v1328_v29 = vcombine.low %v14703_v34, %v14706_v6  ;;  %v2590_v11 = vrot.slane %v2588_v33, 2 }
  0x6a   :  { %21399 = vst [vmem:[#allocation138_spill] sm:$0xff] %v14710_v4  ;;  %21400 = vst [vmem:[#allocation139_spill] sm:$0xff] %v14713_v37  ;;  %12175 = vmatmul.mubr.msk.f32.gmra.mrb[22].mxu0 %vm1907_vm6, %v6706_v42  ;;  %v6708_v9 = vcombine.low %v14710_v4, %v14726_v35  ;;  %v14736_v1 = vcombine.high %v14713_v37, %v14713_v37  ;;  %v14740_v36 = vcombine.high %v14716_v61, %v14716_v61 }
  0x6b   :  { %21401 = vst [vmem:[#allocation140_spill] sm:$0xff] %v14716_v61  ;;  %21402 = vst [vmem:[#allocation141_spill] sm:$0xff] %v14726_v35  ;;  %v2591_v7 = vrot.slane %v14713_v37, 7  ;;  %12177 = vmatprep.mubr.msk.f32.mxu0 %vm13739_vm1, %v21311_v30  ;;  %11588 = vmatmul.mubr.msk.f32.gmra.mrb[28].mxu1 %vm1907_vm6, %v1328_v29  ;;  %v2597_v49 = vrot.slane %v14716_v61, 7  ;;  %v447_v33 = vcombine.high %v32_v43, %v32_v43 }
  0x6c   :  { %21403 = vst [vmem:[#allocation142_spill] sm:$0xff] %v14736_v1  ;;  %v14748_v42 = vrot.slane %v32_v43, %v13786_v14  ;;  %v464_v34 = vcombine.high %v33_v57, %v33_v57  ;;  %v6722_v35 = vrot.slane %v6708_v9, %v13786_v14  ;;  %v2594_v56 = vrot.slane %v14736_v1, 7  ;;  %11590 = vmatprep.mubr.msk.f32.mxu1 %vm13739_vm1, %v21311_v30 }
  0x6d   :  { %v14753_v0 = vsel %vm13859_vm9, %v2590_v11, %v2591_v7  ;;  %v2593_v4 = vrot.slane %v2591_v7, 2  ;;  %v2599_v29 = vrot.slane %v2597_v49, 2  ;;  %v2600_v23 = vrot.slane %v14740_v36, 7 }
  0x6e   :  { %21404 = vst [vmem:[#allocation143_spill] sm:$0xff] %v14748_v42  ;;  %21405 = vst [vmem:[#allocation144_spill] sm:$0xff] %v14753_v0  ;;  %v1329_v43 = vcombine.low %v14713_v37, %v14736_v1  ;;  %v1330_v59 = vcombine.low %v14716_v61, %v14748_v42  ;;  %v6723_v9 = vcombine.low %v6715_v53, %v6722_v35  ;;  %v2596_v7 = vrot.slane %v2594_v56, 2 }
  0x6f   :  { %v14765_v11 = vsel %vm13859_vm9, %v2593_v4, %v2594_v56  ;;  %v14768_v3 = vrot.slane %v447_v33, %v13786_v14  ;;  %v14772_v50 = vsel %vm13859_vm9, %v2599_v29, %v2600_v23  ;;  %v14789_v4 = vcombine.high %v14748_v42, %v14748_v42 }
  0x70   :  { %21406 = vst [vmem:[#allocation145_spill] sm:$0xff] %v14765_v11  ;;  %21408 = vst [vmem:[#allocation147_spill] sm:$0xff] %v14772_v50  ;;  %v6724_v27 = vcombine.low %v14753_v0, %v14765_v11  ;;  %v14777_v1 = vrot.slane %v1329_v43, %v13786_v14  ;;  %v14780_v35 = vrot.slane %v1330_v59, %v13786_v14  ;;  %12178 = vmatmul.mubr.msk.f32.gmra.mrb[24].mxu0 %vm1907_vm6, %v6723_v9  ;;  %v35_v0 = vld [vmem:[%s20377_s0 + $0xa8] sm:$0xff] }
  0x71   :  { %21407 = vst [vmem:[#allocation146_spill] sm:$0xff] %v14768_v3  ;;  %v14785_v56 = vsel %vm13859_vm9, %v2596_v7, %v2597_v49  ;;  %21412 = vst [vmem:[#allocation151_spill] sm:$0xff] %v14789_v4  ;;  %v14793_v23 = vcombine.high %v14768_v3, %v14768_v3  ;;  %v14796_v53 = vrot.slane %v33_v57, %v13786_v14  ;;  %12180 = vmatprep.mubr.msk.f32.mxu0 %vm13739_vm1, %v21311_v30 }
  0x72   :  { %21409 = vst [vmem:[#allocation148_spill] sm:$0xff] %v14777_v1  ;;  %21410 = vst [vmem:[#allocation149_spill] sm:$0xff] %v14780_v35  ;;  %v6725_v59 = vcombine.low %v14785_v56, %v14772_v50  ;;  %v6732_v49 = vrot.slane %v6724_v27, %v13786_v14  ;;  %v1345_v33 = vcombine.low %v14777_v1, %v14780_v35  ;;  %v10638_v43 = vrot.slane %v14748_v42, 9  ;;  %v34_v42 = vld [vmem:[%s20377_s0 + $0xa0] sm:$0xff] }
  0x73   :  { %21411 = vst [vmem:[#allocation150_spill] sm:$0xff] %v14785_v56  ;;  %21413 = vst [vmem:[#allocation152_spill] sm:$0xff] %v14793_v23  ;;  %v14806_v29 = vrot.slane %v464_v34, %v13786_v14  ;;  %v2604_v9 = vrot.slane %v14789_v4, 7  ;;  %v2607_v57 = vrot.slane %v14768_v3, 7  ;;  %v2610_v7 = vrot.slane %v14793_v23, 7 }
  0x74   :  { %21414 = vst [vmem:[#allocation153_spill] sm:$0xff] %v14796_v53  ;;  %v6739_v37 = vrot.slane %v6725_v59, %v13786_v14  ;;  %11591 = vmatmul.mubr.msk.f32.gmra.mrb[30].mxu1 %vm1907_vm6, %v1345_v33  ;;  %v2613_v27 = vrot.slane %v14796_v53, 7  ;;  %v1346_v35 = vcombine.low %v14789_v4, %v14768_v3  ;;  %v1347_v34 = vcombine.low %v14793_v23, %v14796_v53 }
  0x75   :  { %21415 = vst [vmem:[#allocation154_spill] sm:$0xff] %v14806_v29  ;;  %v14824_v50 = vsel %vm13859_vm9, %v10638_v43, %v2604_v9  ;;  %v2606_v11 = vrot.slane %v2604_v9, 2  ;;  %v2609_v59 = vrot.slane %v2607_v57, 2  ;;  %v2612_v56 = vrot.slane %v2610_v7, 2  ;;  %11593 = vmatprep.mubr.msk.f32.mxu1 %vm13739_vm1, %v21311_v30 }
  0x76   :  { %21416 = vst [vmem:[#allocation155_spill] sm:$0xff] %v14824_v50  ;;  %v6740_v33 = vcombine.low %v6732_v49, %v6739_v37  ;;  %v14829_v4 = vrot.slane %v1346_v35, %v13786_v14  ;;  %v14832_v3 = vrot.slane %v1347_v34, %v13786_v14  ;;  %v14836_v23 = vcombine.high %v14796_v53, %v14796_v53 }
  0x77   :  { %v14840_v43 = vsel %vm13859_vm9, %v2606_v11, %v2607_v57  ;;  %v14844_v9 = vsel %vm13859_vm9, %v2609_v59, %v2610_v7  ;;  %v14848_v37 = vsel %vm13859_vm9, %v2612_v56, %v2613_v27  ;;  %v14851_v35 = vrot.slane %v34_v42, %v13786_v14 }
  0x78   :  { %21417 = vst [vmem:[#allocation156_spill] sm:$0xff] %v14829_v4  ;;  %21418 = vst [vmem:[#allocation157_spill] sm:$0xff] %v14832_v3  ;;  %12181 = vmatmul.mubr.msk.f32.gmra.mrb[26].mxu0 %vm1907_vm6, %v6740_v33  ;;  %v6741_v49 = vcombine.low %v14824_v50, %v14840_v43  ;;  %v6742_v11 = vcombine.low %v14844_v9, %v14848_v37  ;;  %v14860_v57 = vcombine.low %v14829_v4, %v14832_v3 }
  0x79   :  { %21419 = vst [vmem:[#allocation158_spill] sm:$0xff] %v14836_v23  ;;  %21420 = vst [vmem:[#allocation159_spill] sm:$0xff] %v14840_v43  ;;  %v14864_v7 = vcombine.high %v14806_v29, %v14806_v29  ;;  %12183 = vmatprep.mubr.msk.f32.mxu0 %vm13739_vm1, %v21311_v30  ;;  %v14870_v56 = vcombine.high %v14851_v35, %v14851_v35  ;;  %v2615_v34 = vrot.slane %v2613_v27, 2  ;;  %v2616_v59 = vrot.slane %v14836_v23, 7 }
  0x7a   :  { %21421 = vst [vmem:[#allocation160_spill] sm:$0xff] %v14844_v9  ;;  %21422 = vst [vmem:[#allocation161_spill] sm:$0xff] %v14848_v37  ;;  %v2619_v33 = vrot.slane %v14806_v29, 7  ;;  %v6749_v53 = vrot.slane %v6741_v49, %v13786_v14  ;;  %v6756_v3 = vrot.slane %v6742_v11, %v13786_v14  ;;  %11594 = vmatmul.mubr.msk.f32.gmra.mrb[32].mxu1 %vm1907_vm6, %v14860_v57  ;;  %v10639_v37 = vrot.slane %v14851_v35, 9 }
  0x7b   :  { %21423 = vst [vmem:[#allocation162_spill] sm:$0xff] %v14851_v35  ;;  %21424 = vst [vmem:[#allocation163_spill] sm:$0xff] %v14860_v57  ;;  %v2622_v4 = vrot.slane %v14864_v7, 7  ;;  %v14882_v43 = vsel %vm13859_vm9, %v2615_v34, %v2616_v59  ;;  %v2618_v27 = vrot.slane %v2616_v59, 2  ;;  %v2626_v50 = vrot.slane %v14870_v56, 7  ;;  %11596 = vmatprep.mubr.msk.f32.mxu1 %vm13739_vm1, %v21311_v30 }
  0x7c   :  { %21425 = vst [vmem:[#allocation164_spill] sm:$0xff] %v14864_v7  ;;  %21426 = vst [vmem:[#allocation165_spill] sm:$0xff] %v14870_v56  ;;  %v2621_v9 = vrot.slane %v2619_v33, 2  ;;  %v6757_v49 = vcombine.low %v6749_v53, %v6756_v3  ;;  %v1363_v11 = vcombine.low %v14836_v23, %v14806_v29  ;;  %v1364_v7 = vcombine.low %v14851_v35, %v14870_v56 }
  0x7d   :  { %21427 = vst [vmem:[#allocation166_spill] sm:$0xff] %v14882_v43  ;;  %v480_v34 = vcombine.high %v34_v42, %v34_v42  ;;  %v14896_v59 = vsel %vm13859_vm9, %v2618_v27, %v2619_v33  ;;  %v14904_v3 = vsel %vm13859_vm9, %v10639_v37, %v2626_v50  ;;  %v497_v53 = vcombine.high %v35_v0, %v35_v0 }
  0x7e   :  { %21428 = vst [vmem:[#allocation167_spill] sm:$0xff] %v14896_v59  ;;  %v14900_v20 = vsel %vm13859_vm9, %v2621_v9, %v2622_v4  ;;  %21430 = vst [vmem:[#allocation169_spill] sm:$0xff] %v14904_v3  ;;  %12184 = vmatmul.mubr.msk.f32.gmra.mrb[28].mxu0 %vm1907_vm6, %v6757_v49  ;;  %v6758_v56 = vcombine.low %v14882_v43, %v14896_v59  ;;  %v14912_v33 = vrot.slane %v1363_v11, %v13786_v14  ;;  %v36_v11 = vld [vmem:[%s20377_s0 + $0xb0] sm:$0xff] }
  0x7f   :  { %21429 = vst [vmem:[#allocation168_spill] sm:$0xff] %v14900_v20  ;;  %v6759_v42 = vcombine.low %v14900_v20, %v14904_v3  ;;  %v14915_v27 = vrot.slane %v1364_v7, %v13786_v14  ;;  %12186 = vmatprep.mubr.msk.f32.mxu0 %vm13739_vm1, %v21311_v30  ;;  %v14920_v4 = vrot.slane %v480_v34, %v13786_v14  ;;  %v2628_v49 = vrot.slane %v2626_v50, 2 }
  0x80   :  { %21431 = vst [vmem:[#allocation170_spill] sm:$0xff] %v14912_v33  ;;  %v14923_v9 = vrot.slane %v35_v0, %v13786_v14  ;;  %v14926_v37 = vrot.slane %v497_v53, %v13786_v14  ;;  %v6766_v7 = vrot.slane %v6758_v56, %v13786_v14  ;;  %v513_v34 = vcombine.high %v36_v11, %v36_v11 }
  0x81   :  { %21432 = vst [vmem:[#allocation171_spill] sm:$0xff] %v14915_v27  ;;  %21433 = vst [vmem:[#allocation172_spill] sm:$0xff] %v14920_v4  ;;  %v6773_v23 = vrot.slane %v6759_v42, %v13786_v14  ;;  %v1379_v3 = vcombine.low %v14912_v33, %v14915_v27  ;;  %v14937_v0 = vcombine.high %v14920_v4, %v14920_v4  ;;  %v2629_v50 = vrot.slane %v14920_v4, 7 }
  0x82   :  { %21434 = vst [vmem:[#allocation173_spill] sm:$0xff] %v14923_v9  ;;  %21435 = vst [vmem:[#allocation174_spill] sm:$0xff] %v14926_v37  ;;  %v14941_v53 = vcombine.high %v14923_v9, %v14923_v9  ;;  %v2635_v59 = vrot.slane %v14923_v9, 7  ;;  %v14947_v56 = vrot.slane %v36_v11, %v13786_v14  ;;  %v14950_v42 = vrot.slane %v513_v34, %v13786_v14 }
  0x83   :  { %21436 = vst [vmem:[#allocation175_spill] sm:$0xff] %v14937_v0  ;;  %v6774_v20 = vcombine.low %v6766_v7, %v6773_v23  ;;  %11597 = vmatmul.mubr.msk.f32.gmra.mrb[34].mxu1 %vm1907_vm6, %v1379_v3  ;;  %v14954_v27 = vcombine.high %v14926_v37, %v14926_v37  ;;  %v14958_v43 = vsel %vm13859_vm9, %v2628_v49, %v2629_v50  ;;  %v2631_v19 = vrot.slane %v2629_v50, 2 }
  0x84   :  { %21437 = vst [vmem:[#allocation176_spill] sm:$0xff] %v14941_v53  ;;  %21438 = vst [vmem:[#allocation177_spill] sm:$0xff] %v14947_v56  ;;  %v2632_v41 = vrot.slane %v14937_v0, 7  ;;  %v2637_v23 = vrot.slane %v2635_v59, 2  ;;  %11599 = vmatprep.mubr.msk.f32.mxu1 %vm13739_vm1, %v21311_v30  ;;  %v2638_v3 = vrot.slane %v14941_v53, 7  ;;  %v1380_v11 = vcombine.low %v14920_v4, %v14937_v0 }
  0x85   :  { %21439 = vst [vmem:[#allocation178_spill] sm:$0xff] %v14950_v42  ;;  %21440 = vst [vmem:[#allocation179_spill] sm:$0xff] %v14958_v43  ;;  %12187 = vmatmul.mubr.msk.f32.gmra.mrb[30].mxu0 %vm1907_vm6, %v6774_v20  ;;  %v1381_v7 = vcombine.low %v14923_v9, %v14941_v53  ;;  %v14971_v49 = vcombine.high %v14947_v56, %v14947_v56  ;;  %v2641_v50 = vrot.slane %v14926_v37, 7  ;;  %v2644_v45 = vrot.slane %v14954_v27, 7 }
  0x86   :  { %12189 = vmatprep.mubr.msk.f32.mxu0 %vm13739_vm1, %v21311_v30  ;;  %v14977_v34 = vsel %vm13859_vm9, %v2631_v19, %v2632_v41  ;;  %v2634_v20 = vrot.slane %v2632_v41, 2  ;;  %v14983_v0 = vsel %vm13859_vm9, %v2637_v23, %v2638_v3  ;;  %v14988_v9 = vrot.slane %v1380_v11, %v13786_v14 }
  0x87   :  { %21441 = vst [vmem:[#allocation180_spill] sm:$0xff] %v14971_v49  ;;  %21442 = vst [vmem:[#allocation181_spill] sm:$0xff] %v14977_v34  ;;  %v6775_v53 = vcombine.low %v14958_v43, %v14977_v34  ;;  %v14991_v4 = vrot.slane %v1381_v7, %v13786_v14  ;;  %v2640_v41 = vrot.slane %v2638_v3, 2  ;;  %v2643_v54 = vrot.slane %v2641_v50, 2 }
  0x88   :  { %21443 = vst [vmem:[#allocation182_spill] sm:$0xff] %v14983_v0  ;;  %21444 = vst [vmem:[#allocation183_spill] sm:$0xff] %v14988_v9  ;;  %v14995_v19 = vsel %vm13859_vm9, %v2634_v20, %v2635_v59  ;;  %v10640_v15 = vrot.slane %v14947_v56, 9  ;;  %v2648_v7 = vrot.slane %v14971_v49, 7  ;;  %v2651_v3 = vrot.slane %v14950_v42, 7 }
  0x89   :  { %21445 = vst [vmem:[#allocation184_spill] sm:$0xff] %v14991_v4  ;;  %21446 = vst [vmem:[#allocation185_spill] sm:$0xff] %v14995_v19  ;;  %v6776_v23 = vcombine.low %v14995_v19, %v14983_v0  ;;  %v6783_v26 = vrot.slane %v6775_v53, %v13786_v14  ;;  %v15003_v11 = vcombine.low %v14988_v9, %v14991_v4  ;;  %v37_v53 = vld [vmem:[%s20377_s0 + $0xb8] sm:$0xff] }
  0x8a   :  { %v15008_v34 = vsel %vm13859_vm9, %v2640_v41, %v2641_v50  ;;  %v15012_v59 = vsel %vm13859_vm9, %v2643_v54, %v2644_v45  ;;  %v1397_v20 = vcombine.low %v14926_v37, %v14947_v56  ;;  %v15025_v50 = vsel %vm13859_vm9, %v10640_v15, %v2648_v7 }
  0x8b   :  { %21447 = vst [vmem:[#allocation186_spill] sm:$0xff] %v15003_v11  ;;  %21448 = vst [vmem:[#allocation187_spill] sm:$0xff] %v15008_v34  ;;  %v6790_v4 = vrot.slane %v6776_v23, %v13786_v14  ;;  %11600 = vmatmul.mubr.msk.f32.gmra.mrb[36].mxu1 %vm1907_vm6, %v15003_v11  ;;  %v2650_v54 = vrot.slane %v2648_v7, 2  ;;  %v6792_v45 = vcombine.low %v15008_v34, %v15012_v59 }
  0x8c   :  { %21449 = vst [vmem:[#allocation188_spill] sm:$0xff] %v15012_v59  ;;  %21450 = vst [vmem:[#allocation189_spill] sm:$0xff] %v15025_v50  ;;  %11602 = vmatprep.mubr.msk.f32.mxu1 %vm13739_vm1, %v21311_v30  ;;  %v1398_v41 = vcombine.low %v14971_v49, %v14950_v42  ;;  %v15034_v56 = vrot.slane %v1397_v20, %v13786_v14  ;;  %v15038_v23 = vcombine.high %v14950_v42, %v14950_v42  ;;  %v38_v20 = vld [vmem:[%s20377_s0 + $0xc0] sm:$0xff] }
  0x8d   :  { %v530_v9 = vcombine.high %v37_v53, %v37_v53  ;;  %v6791_v15 = vcombine.low %v6783_v26, %v6790_v4  ;;  %v15042_v7 = vsel %vm13859_vm9, %v2650_v54, %v2651_v3  ;;  %v6800_v59 = vrot.slane %v6792_v45, %v13786_v14 }
  0x8e   :  { %21451 = vst [vmem:[#allocation190_spill] sm:$0xff] %v15034_v56  ;;  %21452 = vst [vmem:[#allocation191_spill] sm:$0xff] %v15038_v23  ;;  %v15046_v0 = vrot.slane %v37_v53, %v13786_v14  ;;  %v6793_v49 = vcombine.low %v15025_v50, %v15042_v7  ;;  %v15054_v42 = vrot.slane %v1398_v41, %v13786_v14  ;;  %v2653_v4 = vrot.slane %v2651_v3, 2 }
  0x8f   :  { %21453 = vst [vmem:[#allocation192_spill] sm:$0xff] %v15042_v7  ;;  %v15057_v26 = vrot.slane %v530_v9, %v13786_v14  ;;  %12190 = vmatmul.mubr.msk.f32.gmra.mrb[32].mxu0 %vm1907_vm6, %v6791_v15  ;;  %v2654_v54 = vrot.slane %v15038_v23, 7  ;;  %v546_v15 = vcombine.high %v38_v20, %v38_v20 }
  0x90   :  { %21454 = vst [vmem:[#allocation193_spill] sm:$0xff] %v15046_v0  ;;  %21455 = vst [vmem:[#allocation194_spill] sm:$0xff] %v15054_v42  ;;  %v15062_v53 = vcombine.high %v15046_v0, %v15046_v0  ;;  %v2657_v45 = vrot.slane %v15046_v0, 7  ;;  %v1414_v7 = vcombine.low %v15038_v23, %v15046_v0  ;;  %12192 = vmatprep.mubr.msk.f32.mxu0 %vm13739_vm1, %v21311_v30 }
  0x91   :  { %21456 = vst [vmem:[#allocation195_spill] sm:$0xff] %v15057_v26  ;;  %v6807_v9 = vrot.slane %v6793_v49, %v13786_v14  ;;  %v1413_v3 = vcombine.low %v15034_v56, %v15054_v42  ;;  %v2663_v41 = vrot.slane %v15057_v26, 7  ;;  %v15076_v50 = vsel %vm13859_vm9, %v2653_v4, %v2654_v54 }
  0x92   :  { %21457 = vst [vmem:[#allocation196_spill] sm:$0xff] %v15062_v53  ;;  %21458 = vst [vmem:[#allocation197_spill] sm:$0xff] %v15076_v50  ;;  %v2656_v34 = vrot.slane %v2654_v54, 2  ;;  %v2659_v19 = vrot.slane %v2657_v45, 2  ;;  %v2660_v43 = vrot.slane %v15062_v53, 7  ;;  %v1415_v49 = vcombine.low %v15062_v53, %v15057_v26 }
  0x93   :  { %v6808_v0 = vcombine.low %v6800_v59, %v6807_v9  ;;  %11603 = vmatmul.mubr.msk.f32.gmra.mrb[38].mxu1 %vm1907_vm6, %v1413_v3  ;;  %v15083_v23 = vrot.slane %v1414_v7, %v13786_v14  ;;  %v15086_v56 = vrot.slane %v38_v20, %v13786_v14  ;;  %v15099_v9 = vrot.slane %v546_v15, %v13786_v14  ;;  %v39_v15 = vld [vmem:[%s20377_s0 + $0xc8] sm:$0xff] }
  0x94   :  { %v15090_v4 = vsel %vm13859_vm9, %v2656_v34, %v2657_v45  ;;  %v15094_v54 = vsel %vm13859_vm9, %v2659_v19, %v2660_v43  ;;  %v2662_v59 = vrot.slane %v2660_v43, 2  ;;  %11605 = vmatprep.mubr.msk.f32.mxu1 %vm13739_vm1, %v21311_v30  ;;  %v15105_v20 = vrot.slane %v1415_v49, %v13786_v14 }
  0x95   :  { %21459 = vst [vmem:[#allocation198_spill] sm:$0xff] %v15083_v23  ;;  %21460 = vst [vmem:[#allocation199_spill] sm:$0xff] %v15086_v56  ;;  %12193 = vmatmul.mubr.msk.f32.gmra.mrb[34].mxu0 %vm1907_vm6, %v6808_v0  ;;  %v6809_v7 = vcombine.low %v15076_v50, %v15090_v4  ;;  %v15109_v34 = vcombine.high %v15086_v56, %v15086_v56  ;;  %v15113_v43 = vcombine.high %v15057_v26, %v15057_v26 }
  0x96   :  { %21461 = vst [vmem:[#allocation200_spill] sm:$0xff] %v15090_v4  ;;  %21462 = vst [vmem:[#allocation201_spill] sm:$0xff] %v15094_v54  ;;  %12195 = vmatprep.mubr.msk.f32.mxu0 %vm13739_vm1, %v21311_v30  ;;  %v15119_v0 = vsel %vm13859_vm9, %v2662_v59, %v2663_v41  ;;  %v15123_v19 = vcombine.high %v15099_v9, %v15099_v9  ;;  %v2665_v45 = vrot.slane %v2663_v41, 2  ;;  %v10641_v3 = vrot.slane %v15086_v56, 9 }
  0x97   :  { %21463 = vst [vmem:[#allocation202_spill] sm:$0xff] %v15099_v9  ;;  %21464 = vst [vmem:[#allocation203_spill] sm:$0xff] %v15105_v20  ;;  %v6810_v49 = vcombine.low %v15094_v54, %v15119_v0  ;;  %v6817_v53 = vrot.slane %v6809_v7, %v13786_v14  ;;  %v15134_v59 = vcombine.low %v15083_v23, %v15105_v20  ;;  %v2666_v4 = vrot.slane %v15113_v43, 7 }
  0x98   :  { %21465 = vst [vmem:[#allocation204_spill] sm:$0xff] %v15109_v34  ;;  %21466 = vst [vmem:[#allocation205_spill] sm:$0xff] %v15113_v43  ;;  %v2670_v50 = vrot.slane %v15109_v34, 7  ;;  %v2673_v41 = vrot.slane %v15099_v9, 7  ;;  %v2676_v26 = vrot.slane %v15123_v19, 7  ;;  %v1431_v11 = vcombine.low %v15086_v56, %v15109_v34 }
  0x99   :  { %21467 = vst [vmem:[#allocation206_spill] sm:$0xff] %v15119_v0  ;;  %21468 = vst [vmem:[#allocation207_spill] sm:$0xff] %v15123_v19  ;;  %v6824_v42 = vrot.slane %v6810_v49, %v13786_v14  ;;  %11606 = vmatmul.mubr.msk.f32.gmra.mrb[40].mxu1 %vm1907_vm6, %v15134_v59  ;;  %v15147_v7 = vsel %vm13859_vm9, %v2665_v45, %v2666_v4  ;;  %v1432_v43 = vcombine.low %v15099_v9, %v15123_v19 }
  0x9a   :  { %21469 = vst [vmem:[#allocation208_spill] sm:$0xff] %v15134_v59  ;;  %21470 = vst [vmem:[#allocation209_spill] sm:$0xff] %v15147_v7  ;;  %v563_v20 = vcombine.high %v39_v15, %v39_v15  ;;  %v15153_v23 = vsel %vm13859_vm9, %v10641_v3, %v2670_v50  ;;  %v2672_v0 = vrot.slane %v2670_v50, 2  ;;  %v2675_v54 = vrot.slane %v2673_v41, 2  ;;  %11608 = vmatprep.mubr.msk.f32.mxu1 %vm13739_vm1, %v21311_v30  ;;  %v40_v50 = vld [vmem:[%s20377_s0 + $0xd0] sm:$0xff] }
  0x9b   :  { %21471 = vst [vmem:[#allocation210_spill] sm:$0xff] %v15153_v23  ;;  %v15158_v49 = vrot.slane %v1431_v11, %v13786_v14  ;;  %v6825_v34 = vcombine.low %v6817_v53, %v6824_v42  ;;  %v6826_v4 = vcombine.low %v15147_v7, %v15153_v23  ;;  %v15163_v45 = vrot.slane %v1432_v43, %v13786_v14 }
  0x9c   :  { %v15166_v19 = vrot.slane %v39_v15, %v13786_v14  ;;  %v15173_v3 = vsel %vm13859_vm9, %v2672_v0, %v2673_v41  ;;  %v15177_v42 = vsel %vm13859_vm9, %v2675_v54, %v2676_v26  ;;  %v15180_v11 = vrot.slane %v563_v20, %v13786_v14 }
  0x9d   :  { %21472 = vst [vmem:[#allocation211_spill] sm:$0xff] %v15158_v49  ;;  %21473 = vst [vmem:[#allocation212_spill] sm:$0xff] %v15163_v45  ;;  %v2678_v53 = vrot.slane %v2676_v26, 2  ;;  %12196 = vmatmul.mubr.msk.f32.gmra.mrb[36].mxu0 %vm1907_vm6, %v6825_v34  ;;  %v6827_v43 = vcombine.low %v15173_v3, %v15177_v42  ;;  %v6834_v15 = vrot.slane %v6826_v4, %v13786_v14 }
  0x9e   :  { %21474 = vst [vmem:[#allocation213_spill] sm:$0xff] %v15166_v19  ;;  %21475 = vst [vmem:[#allocation214_spill] sm:$0xff] %v15173_v3  ;;  %v1447_v9 = vcombine.low %v15158_v49, %v15163_v45  ;;  %v15190_v0 = vcombine.high %v15166_v19, %v15166_v19  ;;  %12198 = vmatprep.mubr.msk.f32.mxu0 %vm13739_vm1, %v21311_v30  ;;  %v15196_v26 = vcombine.high %v15180_v11, %v15180_v11 }
  0x9f   :  { %21476 = vst [vmem:[#allocation215_spill] sm:$0xff] %v15177_v42  ;;  %21477 = vst [vmem:[#allocation216_spill] sm:$0xff] %v15180_v11  ;;  %v2679_v54 = vrot.slane %v15166_v19, 7  ;;  %v2685_v20 = vrot.slane %v15180_v11, 7  ;;  %v579_v34 = vcombine.high %v40_v50, %v40_v50  ;;  %v6841_v41 = vrot.slane %v6827_v43, %v13786_v14 }
  0xa0   :  { %21478 = vst [vmem:[#allocation217_spill] sm:$0xff] %v15190_v0  ;;  %21479 = vst [vmem:[#allocation218_spill] sm:$0xff] %v15196_v26  ;;  %11609 = vmatmul.mubr.msk.f32.gmra.mrb[42].mxu1 %vm1907_vm6, %v1447_v9  ;;  %v2682_v4 = vrot.slane %v15190_v0, 7  ;;  %v15204_v49 = vrot.slane %v40_v50, %v13786_v14  ;;  %v1448_v42 = vcombine.low %v15166_v19, %v15190_v0  ;;  %v2688_v45 = vrot.slane %v15196_v26, 7  ;;  %v41_v9 = vld [vmem:[%s20377_s0 + $0xd8] sm:$0xff] }
  0xa1   :  { %v15210_v23 = vsel %vm13859_vm9, %v2678_v53, %v2679_v54  ;;  %v2681_v3 = vrot.slane %v2679_v54, 2  ;;  %v2687_v7 = vrot.slane %v2685_v20, 2  ;;  %11611 = vmatprep.mubr.msk.f32.mxu1 %vm13739_vm1, %v21311_v30  ;;  %v6842_v50 = vcombine.low %v6834_v15, %v6841_v41 }
  0xa2   :  { %21480 = vst [vmem:[#allocation219_spill] sm:$0xff] %v15204_v49  ;;  %21481 = vst [vmem:[#allocation220_spill] sm:$0xff] %v15210_v23  ;;  %v2684_v43 = vrot.slane %v2682_v4, 2  ;;  %v1449_v0 = vcombine.low %v15180_v11, %v15204_v49  ;;  %v15221_v19 = vrot.slane %v1448_v42, %v13786_v14  ;;  %v15232_v59 = vrot.slane %v579_v34, %v13786_v14 }
  0xa3   :  { %v15225_v53 = vsel %vm13859_vm9, %v2681_v3, %v2682_v4  ;;  %v15229_v54 = vsel %vm13859_vm9, %v2687_v7, %v2688_v45  ;;  %v15236_v15 = vcombine.high %v15204_v49, %v15204_v49  ;;  %12199 = vmatmul.mubr.msk.f32.gmra.mrb[38].mxu0 %vm1907_vm6, %v6842_v50  ;;  %v596_v7 = vcombine.high %v41_v9, %v41_v9 }
  0xa4   :  { %21482 = vst [vmem:[#allocation221_spill] sm:$0xff] %v15221_v19  ;;  %21483 = vst [vmem:[#allocation222_spill] sm:$0xff] %v15225_v53  ;;  %v15241_v42 = vsel %vm13859_vm9, %v2684_v43, %v2685_v20  ;;  %v6843_v3 = vcombine.low %v15210_v23, %v15225_v53  ;;  %v15246_v41 = vrot.slane %v1449_v0, %v13786_v14  ;;  %12201 = vmatprep.mubr.msk.f32.mxu0 %vm13739_vm1, %v21311_v30 }
  0xa5   :  { %21484 = vst [vmem:[#allocation223_spill] sm:$0xff] %v15229_v54  ;;  %21485 = vst [vmem:[#allocation224_spill] sm:$0xff] %v15232_v59  ;;  %v6844_v45 = vcombine.low %v15241_v42, %v15229_v54  ;;  %v15254_v34 = vcombine.high %v15232_v59, %v15232_v59  ;;  %v15257_v20 = vrot.slane %v41_v9, %v13786_v14  ;;  %v10642_v4 = vrot.slane %v15204_v49, 9 }
  0xa6   :  { %21486 = vst [vmem:[#allocation225_spill] sm:$0xff] %v15236_v15  ;;  %21487 = vst [vmem:[#allocation226_spill] sm:$0xff] %v15241_v42  ;;  %v6851_v50 = vrot.slane %v6843_v3, %v13786_v14  ;;  %v1464_v0 = vcombine.low %v15221_v19, %v15246_v41  ;;  %v15264_v43 = vrot.slane %v596_v7, %v13786_v14  ;;  %v2692_v53 = vrot.slane %v15236_v15, 7 }
  0xa7   :  { %21488 = vst [vmem:[#allocation227_spill] sm:$0xff] %v15246_v41  ;;  %21489 = vst [vmem:[#allocation228_spill] sm:$0xff] %v15254_v34  ;;  %v6858_v54 = vrot.slane %v6844_v45, %v13786_v14  ;;  %v2695_v42 = vrot.slane %v15232_v59, 7  ;;  %v2698_v23 = vrot.slane %v15254_v34, 7  ;;  %v2701_v9 = vrot.slane %v15257_v20, 7 }
  0xa8   :  { %21490 = vst [vmem:[#allocation229_spill] sm:$0xff] %v15257_v20  ;;  %21491 = vst [vmem:[#allocation230_spill] sm:$0xff] %v15264_v43  ;;  %11612 = vmatmul.mubr.msk.f32.gmra.mrb[44].mxu1 %vm1907_vm6, %v1464_v0  ;;  %v15274_v3 = vsel %vm13859_vm9, %v10642_v4, %v2692_v53  ;;  %v2694_v49 = vrot.slane %v2692_v53, 2  ;;  %v1465_v7 = vcombine.low %v15236_v15, %v15232_v59 }
  0xa9   :  { %21492 = vst [vmem:[#allocation231_spill] sm:$0xff] %v15274_v3  ;;  %v1466_v41 = vcombine.low %v15254_v34, %v15257_v20  ;;  %v6859_v45 = vcombine.low %v6851_v50, %v6858_v54  ;;  %v2697_v19 = vrot.slane %v2695_v42, 2  ;;  %v2700_v11 = vrot.slane %v2698_v23, 2  ;;  %11614 = vmatprep.mubr.msk.f32.mxu1 %vm13739_vm1, %v21311_v30  ;;  %v42_v54 = vld [vmem:[%s20377_s0 + $0xe0] sm:$0xff] }
  0xaa   :  { %v15284_v0 = vcombine.high %v15257_v20, %v15257_v20  ;;  %v15288_v4 = vsel %vm13859_vm9, %v2694_v49, %v2695_v42  ;;  %v15291_v53 = vrot.slane %v1465_v7, %v13786_v14  ;;  %v15301_v50 = vcombine.high %v15264_v43, %v15264_v43 }
  0xab   :  { %21494 = vst [vmem:[#allocation233_spill] sm:$0xff] %v15288_v4  ;;  %v15294_v15 = vrot.slane %v1466_v41, %v13786_v14  ;;  %12202 = vmatmul.mubr.msk.f32.gmra.mrb[40].mxu0 %vm1907_vm6, %v6859_v45  ;;  %v15306_v49 = vsel %vm13859_vm9, %v2697_v19, %v2698_v23  ;;  %v15310_v42 = vsel %vm13859_vm9, %v2700_v11, %v2701_v9  ;;  %v2703_v7 = vrot.slane %v2701_v9, 2  ;;  %v46_v11 = vld [vmem:[%s20377_s0 + $0x100] sm:$0xff] }
  0xac   :  { %21493 = vst [vmem:[#allocation232_spill] sm:$0xff] %v15284_v0  ;;  %21495 = vst [vmem:[#allocation234_spill] sm:$0xff] %v15291_v53  ;;  %v6860_v41 = vcombine.low %v15274_v3, %v15288_v4  ;;  %12204 = vmatprep.mubr.msk.f32.mxu0 %vm13739_vm1, %v21311_v30  ;;  %v6861_v20 = vcombine.low %v15306_v49, %v15310_v42  ;;  %v2704_v23 = vrot.slane %v15284_v0, 7  ;;  %v2707_v19 = vrot.slane %v15264_v43, 7 }
  0xad   :  { %21496 = vst [vmem:[#allocation235_spill] sm:$0xff] %v15294_v15  ;;  %21497 = vst [vmem:[#allocation236_spill] sm:$0xff] %v15301_v50  ;;  %v15320_v45 = vcombine.low %v15291_v53, %v15294_v15  ;;  %v2710_v59 = vrot.slane %v15301_v50, 7  ;;  %v15330_v34 = vrot.slane %v42_v54, %v13786_v14  ;;  %v1482_v3 = vcombine.low %v15284_v0, %v15264_v43 }
  0xae   :  { %21498 = vst [vmem:[#allocation237_spill] sm:$0xff] %v15306_v49  ;;  %21499 = vst [vmem:[#allocation238_spill] sm:$0xff] %v15310_v42  ;;  %v6868_v9 = vrot.slane %v6860_v41, %v13786_v14  ;;  %v612_v42 = vcombine.high %v46_v11, %v46_v11  ;;  %v6875_v4 = vrot.slane %v6861_v20, %v13786_v14  ;;  %v2706_v53 = vrot.slane %v2704_v23, 2 }
  0xaf   :  { %21500 = vst [vmem:[#allocation239_spill] sm:$0xff] %v15320_v45  ;;  %21501 = vst [vmem:[#allocation240_spill] sm:$0xff] %v15330_v34  ;;  %11615 = vmatmul.mubr.msk.f32.gmra.mrb[46].mxu1 %vm1907_vm6, %v15320_v45  ;;  %v15337_v15 = vsel %vm13859_vm9, %v2703_v7, %v2704_v23  ;;  %v2709_v49 = vrot.slane %v2707_v19, 2  ;;  %v15341_v41 = vcombine.high %v15330_v34, %v15330_v34  ;;  %v10821_v50 = vrot.slane %v15330_v34, 9  ;;  %v43_v7 = vld [vmem:[%s20377_s0 + $0xe8] sm:$0xff] }
  0xb0   :  { %21502 = vst [vmem:[#allocation241_spill] sm:$0xff] %v15337_v15  ;;  %11617 = vmatprep.mubr.msk.f32.mxu1 %vm13739_vm1, %v21311_v30  ;;  %v15347_v20 = vrot.slane %v46_v11, %v13786_v14  ;;  %v6876_v23 = vcombine.low %v6868_v9, %v6875_v4  ;;  %v15356_v45 = vsel %vm13859_vm9, %v2706_v53, %v2707_v19 }
  0xb1   :  { %21503 = vst [vmem:[#allocation242_spill] sm:$0xff] %v15341_v41  ;;  %21505 = vst [vmem:[#allocation244_spill] sm:$0xff] %v15356_v45  ;;  %v15360_v34 = vsel %vm13859_vm9, %v2709_v49, %v2710_v59  ;;  %v5610_v26 = vcombine.high %v42_v54, %v42_v54  ;;  %v6461_v11 = vrot.slane %v15341_v41, 7  ;;  %v6877_v56 = vcombine.low %v15337_v15, %v15356_v45 }
  0xb2   :  { %21504 = vst [vmem:[#allocation243_spill] sm:$0xff] %v15347_v20  ;;  %21506 = vst [vmem:[#allocation245_spill] sm:$0xff] %v15360_v34  ;;  %v15367_v0 = vcombine.high %v15347_v20, %v15347_v20  ;;  %v15370_v4 = vrot.slane %v1482_v3, %v13786_v14  ;;  %12205 = vmatmul.mubr.msk.f32.gmra.mrb[42].mxu0 %vm1907_vm6, %v6876_v23  ;;  %v5627_v59 = vcombine.high %v43_v7, %v43_v7 }
  0xb3   :  { %v15374_v53 = vrot.slane %v5610_v26, %v13786_v14  ;;  %v15377_v54 = vrot.slane %v43_v7, %v13786_v14  ;;  %v15380_v49 = vrot.slane %v612_v42, %v13786_v14  ;;  %12207 = vmatprep.mubr.msk.f32.mxu0 %vm13739_vm1, %v21311_v30  ;;  %v15386_v19 = vsel %vm13859_vm9, %v10821_v50, %v6461_v11 }
  0xb4   :  { %21507 = vst [vmem:[#allocation246_spill] sm:$0xff] %v15367_v0  ;;  %21508 = vst [vmem:[#allocation247_spill] sm:$0xff] %v15370_v4  ;;  %v6885_v3 = vrot.slane %v6877_v56, %v13786_v14  ;;  %v1483_v26 = vcombine.low %v15347_v20, %v15367_v0  ;;  %v6463_v9 = vrot.slane %v6461_v11, 2  ;;  %v6878_v7 = vcombine.low %v15360_v34, %v15386_v19 }
  0xb5   :  { %21509 = vst [vmem:[#allocation248_spill] sm:$0xff] %v15374_v53  ;;  %21510 = vst [vmem:[#allocation249_spill] sm:$0xff] %v15377_v54  ;;  %v15395_v42 = vcombine.high %v15374_v53, %v15374_v53  ;;  %v15398_v23 = vrot.slane %v5627_v59, %v13786_v14  ;;  %v15402_v50 = vcombine.high %v15377_v54, %v15377_v54  ;;  %v6464_v41 = vrot.slane %v15374_v53, 7 }
  0xb6   :  { %21511 = vst [vmem:[#allocation250_spill] sm:$0xff] %v15380_v49  ;;  %21512 = vst [vmem:[#allocation251_spill] sm:$0xff] %v15386_v19  ;;  %v1497_v56 = vrot.slane %v1483_v26, %v13786_v14  ;;  %v6470_v11 = vrot.slane %v15377_v54, 7  ;;  %v47_v19 = vld [vmem:[%s20377_s0 + $0x108] sm:$0xff]  ;;  %v15412_v45 = vcombine.high %v15380_v49, %v15380_v49  ;;  %v6892_v59 = vrot.slane %v6878_v7, %v13786_v14 }
  0xb7   :  { %21513 = vst [vmem:[#allocation252_spill] sm:$0xff] %v15395_v42  ;;  %21514 = vst [vmem:[#allocation253_spill] sm:$0xff] %v15398_v23  ;;  %v6467_v34 = vrot.slane %v15395_v42, 7  ;;  %v6473_v15 = vrot.slane %v15402_v50, 7  ;;  %v629_v0 = vcombine.high %v47_v19, %v47_v19  ;;  %v15420_v20 = vsel %vm13859_vm9, %v6463_v9, %v6464_v41 }
  0xb8   :  { %21515 = vst [vmem:[#allocation254_spill] sm:$0xff] %v15402_v50  ;;  %21516 = vst [vmem:[#allocation255_spill] sm:$0xff] %v15412_v45  ;;  %v1498_v26 = vcombine.low %v15370_v4, %v1497_v56  ;;  %v6466_v54 = vrot.slane %v6464_v41, 2  ;;  %v6472_v53 = vrot.slane %v6470_v11, 2  ;;  %v6893_v43 = vcombine.low %v6885_v3, %v6892_v59  ;;  %v48_v50 = vld [vmem:[%s20377_s0 + $0x110] sm:$0xff] }
  0xb9   :  { %21517 = vst [vmem:[#allocation256_spill] sm:$0xff] %v15420_v20  ;;  %v6469_v57 = vrot.slane %v6467_v34, 2  ;;  %v15423_v37 = vrot.slane %v47_v19, %v13786_v14  ;;  %v15426_v7 = vrot.slane %v629_v0, %v13786_v14  ;;  %v1499_v19 = vcombine.low %v15380_v49, %v15412_v45 }
  0xba   :  { %11618 = vmatmul.mubr.msk.f32.gmra.mrb[48].mxu1 %vm1907_vm6, %v1498_v26  ;;  %v15434_v9 = vsel %vm13859_vm9, %v6466_v54, %v6467_v34  ;;  %v15438_v41 = vsel %vm13859_vm9, %v6472_v53, %v6473_v15  ;;  %v645_v3 = vcombine.high %v48_v50, %v48_v50  ;;  %12208 = vmatmul.mubr.msk.f32.gmra.mrb[44].mxu0 %vm1907_vm6, %v6893_v43  ;;  %v6475_v53 = vrot.slane %v6473_v15, 2 }
  0xbb   :  { %21518 = vst [vmem:[#allocation257_spill] sm:$0xff] %v15423_v37  ;;  %21519 = vst [vmem:[#allocation258_spill] sm:$0xff] %v15426_v7  ;;  %v15445_v0 = vsel %vm13859_vm9, %v6469_v57, %v6470_v11  ;;  %v6894_v56 = vcombine.low %v15420_v20, %v15434_v9  ;;  %11620 = vmatprep.mubr.msk.f32.mxu1 %vm13739_vm1, %v21311_v30  ;;  %v15453_v34 = vcombine.high %v15423_v37, %v15423_v37 }
  0xbc   :  { %21520 = vst [vmem:[#allocation259_spill] sm:$0xff] %v15434_v9  ;;  %21521 = vst [vmem:[#allocation260_spill] sm:$0xff] %v15438_v41  ;;  %12210 = vmatprep.mubr.msk.f32.mxu0 %vm13739_vm1, %v21311_v30  ;;  %v6895_v43 = vcombine.low %v15445_v0, %v15438_v41  ;;  %v1507_v57 = vrot.slane %v1499_v19, %v13786_v14  ;;  %v15461_v54 = vrot.slane %v48_v50, %v13786_v14 }
  0xbd   :  { %21522 = vst [vmem:[#allocation261_spill] sm:$0xff] %v15445_v0  ;;  %21523 = vst [vmem:[#allocation262_spill] sm:$0xff] %v15453_v34  ;;  %v15464_v11 = vrot.slane %v645_v3, %v13786_v14  ;;  %v6902_v59 = vrot.slane %v6894_v56, %v13786_v14  ;;  %v1500_v26 = vcombine.low %v15423_v37, %v15453_v34  ;;  %v6476_v9 = vrot.slane %v15398_v23, 7  ;;  %v49_v56 = vld [vmem:[%s20377_s0 + $0x118] sm:$0xff] }
  0xbe   :  { %21524 = vst [vmem:[#allocation263_spill] sm:$0xff] %v15461_v54  ;;  %v15471_v15 = vcombine.high %v15398_v23, %v15398_v23  ;;  %v6909_v41 = vrot.slane %v6895_v43, %v13786_v14  ;;  %v15477_v50 = vcombine.high %v15461_v54, %v15461_v54  ;;  %v10644_v19 = vrot.slane %v15461_v54, 9 }
  0xbf   :  { %21525 = vst [vmem:[#allocation264_spill] sm:$0xff] %v15464_v11  ;;  %v1514_v0 = vrot.slane %v1500_v26, %v13786_v14  ;;  %v15487_v20 = vsel %vm13859_vm9, %v6475_v53, %v6476_v9  ;;  %v6478_v34 = vrot.slane %v6476_v9, 2  ;;  %v1516_v49 = vcombine.low %v15426_v7, %v15461_v54 }
  0xc0   :  { %21526 = vst [vmem:[#allocation265_spill] sm:$0xff] %v15477_v50  ;;  %21527 = vst [vmem:[#allocation266_spill] sm:$0xff] %v15487_v20  ;;  %v6479_v43 = vrot.slane %v15471_v15, 7  ;;  %v6910_v37 = vcombine.low %v6902_v59, %v6909_v41  ;;  %v2736_v45 = vrot.slane %v15477_v50, 7  ;;  %v1517_v3 = vcombine.low %v15477_v50, %v15464_v11  ;;  %v50_v41 = vld [vmem:[%s20377_s0 + $0x120] sm:$0xff] }
  0xc1   :  { %v1515_v23 = vcombine.low %v1507_v57, %v1514_v0  ;;  %v15501_v53 = vcombine.high %v15464_v11, %v15464_v11  ;;  %v662_v9 = vcombine.high %v49_v56, %v49_v56  ;;  %v1524_v57 = vrot.slane %v1516_v49, %v13786_v14 }
  0xc2   :  { %v15497_v26 = vsel %vm13859_vm9, %v6478_v34, %v6479_v43  ;;  %12211 = vmatmul.mubr.msk.f32.gmra.mrb[46].mxu0 %vm1907_vm6, %v6910_v37  ;;  %v15509_v59 = vsel %vm13859_vm9, %v10644_v19, %v2736_v45  ;;  %v2738_v0 = vrot.slane %v2736_v45, 2  ;;  %v15518_v43 = vrot.slane %v1517_v3, %v13786_v14  ;;  %v51_v45 = vld [vmem:[%s20377_s0 + $0x128] sm:$0xff] }
  0xc3   :  { %21528 = vst [vmem:[#allocation267_spill] sm:$0xff] %v15497_v26  ;;  %21529 = vst [vmem:[#allocation268_spill] sm:$0xff] %v15501_v53  ;;  %v6911_v34 = vcombine.low %v15487_v20, %v15497_v26  ;;  %11621 = vmatmul.mubr.msk.f32.gmra.mrb[50].mxu1 %vm1907_vm6, %v1515_v23  ;;  %12213 = vmatprep.mubr.msk.f32.mxu0 %vm13739_vm1, %v21311_v30  ;;  %v15521_v37 = vrot.slane %v49_v56, %v13786_v14  ;;  %v21532_v49 = vrot.slane %v15464_v11, 7 }
  0xc4   :  { %21530 = vst [vmem:[#allocation269_spill] sm:$0xff] %v15509_v59  ;;  %v15524_v19 = vrot.slane %v662_v9, %v13786_v14  ;;  %11623 = vmatprep.mubr.msk.f32.mxu1 %vm13739_vm1, %v21311_v30  ;;  %v678_v3 = vcombine.high %v50_v41, %v50_v41  ;;  %v1532_v9 = vcombine.low %v1524_v57, %v15518_v43  ;;  %v52_v57 = vld [vmem:[%s20377_s0 + $0x130] sm:$0xff] }
  0xc5   :  { %21531 = vst [vmem:[#allocation270_spill] sm:$0xff] %v15521_v37  ;;  %v15533_v23 = vsel %vm13859_vm9, %v2738_v0, %v21532_v49  ;;  %v6919_v50 = vrot.slane %v6911_v34, %v13786_v14  ;;  %v15543_v26 = vcombine.high %v15521_v37, %v15521_v37  ;;  %v1533_v20 = vcombine.low %v15501_v53, %v15521_v37 }
  0xc6   :  { %21533 = vst [vmem:[#allocation271_spill] sm:$0xff] %v15533_v23  ;;  %v6912_v56 = vcombine.low %v15509_v59, %v15533_v23  ;;  %v10873_v0 = vcombine.high %v13882_v47, %v13923_v5  ;;  %v15550_v34 = vrot.slane %v50_v41, %v13786_v14  ;;  %v15553_v49 = vrot.slane %v678_v3, %v13786_v14 }
  0xc7   :  { %21534 = vst [vmem:[#allocation272_spill] sm:$0xff] %v15543_v26  ;;  %v695_v54 = vcombine.high %v51_v45, %v51_v45  ;;  %11624 = vmatmul.mubr.msk.f32.gmra.mrb[52].mxu1 %vm1907_vm6, %v1532_v9  ;;  %v1534_v59 = vcombine.low %v15543_v26, %v15524_v19  ;;  %v1541_v5 = vrot.slane %v1533_v20, %v13786_v14 }
  0xc8   :  { %21535 = vst [vmem:[#allocation273_spill] sm:$0xff] %v15550_v34  ;;  %21536 = vst [vmem:[#allocation274_spill] sm:$0xff] %v15553_v49  ;;  %v6926_v23 = vrot.slane %v6912_v56, %v13786_v14  ;;  %v15564_v41 = vrot.slane %v51_v45, %v13786_v14  ;;  %11626 = vmatprep.mubr.msk.f32.mxu1 %vm13739_vm1, %v21311_v30  ;;  %v15570_v3 = vcombine.high %v15550_v34, %v15550_v34 }
  0xc9   :  { %v15574_v56 = vcombine.high %v15553_v49, %v15553_v49  ;;  %v15577_v9 = vrot.slane %v695_v54, %v13786_v14  ;;  %v1548_v20 = vrot.slane %v1534_v59, %v13786_v14  ;;  %v15585_v7 = vrot.slane %v52_v57, %v13786_v14  ;;  %v53_v54 = vld [vmem:[%s20377_s0 + $0x138] sm:$0xff] }
  0xca   :  { %21537 = vst [vmem:[#allocation275_spill] sm:$0xff] %v15564_v41  ;;  %21538 = vst [vmem:[#allocation276_spill] sm:$0xff] %v15570_v3  ;;  %v6927_v47 = vcombine.low %v6919_v50, %v6926_v23  ;;  %v15582_v45 = vcombine.high %v15564_v41, %v15564_v41  ;;  %v7803_v26 = vrot.slane %v10873_v0, %v13786_v14 }
  0xcb   :  { %21539 = vst [vmem:[#allocation277_spill] sm:$0xff] %v15574_v56  ;;  %21541 = vst [vmem:[#allocation279_spill] sm:$0xff] %v15585_v7  ;;  %v1550_v37 = vcombine.low %v15550_v34, %v15570_v3  ;;  %v1551_v53 = vcombine.low %v15553_v49, %v15574_v56  ;;  %v711_v50 = vcombine.high %v52_v57, %v52_v57  ;;  %v54_v57 = vld [vmem:[%s20377_s0 + $0x140] sm:$0xff] }
  0xcc   :  { %21540 = vst [vmem:[#allocation278_spill] sm:$0xff] %v15582_v45  ;;  %12214 = vmatmul.mubr.msk.f32.gmra.mrb[48].mxu0 %vm1907_vm6, %v6927_v47  ;;  %v15596_v59 = vcombine.low %v1541_v5, %v1548_v20  ;;  %v1567_v23 = vcombine.low %v15564_v41, %v15582_v45  ;;  %v1568_v0 = vcombine.low %v15577_v9, %v15585_v7  ;;  %v84_v20 = vld [vmem:[%s20376_s1 + $0x18] sm:$0x7] }
  0xcd   :  { %v15604_v3 = vcombine.high %v15585_v7, %v15585_v7  ;;  %12290 = vmatprep.mubr.msk.f32.mxu0 %vm13739_vm1, %v21311_v30  ;;  %v15609_v56 = vrot.slane %v1550_v37, %v13786_v14  ;;  %v15612_v47 = vrot.slane %v1551_v53, %v13786_v14  ;;  %v15615_v5 = vrot.slane %v711_v50, %v13786_v14 }
  0xce   :  { %11627 = vmatmul.mubr.msk.f32.gmra.mrb[54].mxu1 %vm1907_vm6, %v15596_v59  ;;  %v15626_v37 = vrot.slane %v1567_v23, %v13786_v14  ;;  %v15629_v53 = vrot.slane %v1568_v0, %v13786_v14  ;;  %v728_v7 = vcombine.high %v53_v54, %v53_v54  ;;  %v15632_v50 = vrot.slane %v53_v54, %v13786_v14 }
  0xcf   :  { %21542 = vst [vmem:[#allocation280_spill] sm:$0xff] %v15604_v3  ;;  %21543 = vst [vmem:[#allocation281_spill] sm:$0xff] %v15609_v56  ;;  %11629 = vmatprep.mubr.msk.f32.mxu1 %vm13739_vm1, %v21311_v30  ;;  %v1566_v41 = vcombine.low %v15609_v56, %v15612_v47  ;;  %v7805_v45 = vcombine.low %v14009_v60, %v14064_v52  ;;  %v15642_v23 = vcombine.high %v15615_v5, %v15615_v5  ;;  %v55_v60 = vld [vmem:[%s20377_s0 + $0x148] sm:$0xff] }
  0xd0   :  { %21544 = vst [vmem:[#allocation282_spill] sm:$0xff] %v15612_v47  ;;  %21545 = vst [vmem:[#allocation283_spill] sm:$0xff] %v15615_v5  ;;  %v1584_v0 = vcombine.low %v15604_v3, %v15615_v5  ;;  %12291 = vmatmul.mubr.msk.f32.vlgmr.msra.gmra.mrb[0].mxu0 %vm1907_vm6, %v13938_v12  ;;  %v7804_v54 = vcombine.low %v13992_v55, %v7803_v26  ;;  %v15650_v49 = vrot.slane %v728_v7, %v13786_v14 }
  0xd1   :  { %21546 = vst [vmem:[#allocation284_spill] sm:$0xff] %v15626_v37  ;;  %21547 = vst [vmem:[#allocation285_spill] sm:$0xff] %v15629_v53  ;;  %v15654_v56 = vcombine.high %v15632_v50, %v15632_v50  ;;  %v15657_v52 = vrot.slane %v54_v57, %v13786_v14  ;;  %12438 = vmatpush3.msk.msra.mxu0 %vm2006_vm0, %v84_v20  ;;  %12293 = vmatprep.mubr.msk.f32.mxu0 %vm13739_vm1, %v21311_v30 }
  0xd2   :  { %21548 = vst [vmem:[#allocation286_spill] sm:$0xff] %v15632_v50  ;;  %21549 = vst [vmem:[#allocation287_spill] sm:$0xff] %v15642_v23  ;;  %v1583_v12 = vcombine.low %v15626_v37, %v15629_v53  ;;  %v1585_v55 = vcombine.low %v15642_v23, %v15632_v50  ;;  %v15670_v7 = vrot.slane %v1584_v0, %v13786_v14  ;;  %11630 = vmatmul.mubr.msk.f32.gmra.mrb[56].mxu1 %vm1907_vm6, %v1566_v41  ;;  %v56_v41 = vld [vmem:[%s20377_s0 + $0x150] sm:$0xff] }
  0xd3   :  { %21550 = vst [vmem:[#allocation288_spill] sm:$0xff] %v15650_v49  ;;  %21551 = vst [vmem:[#allocation289_spill] sm:$0xff] %v15654_v56  ;;  %v15675_v26 = vcombine.high %v15657_v52, %v15657_v52  ;;  %v1601_v20 = vcombine.low %v15654_v56, %v15650_v49  ;;  %v744_v5 = vcombine.high %v54_v57, %v54_v57  ;;  %11632 = vmatprep.mubr.msk.f32.mxu1 %vm13739_vm1, %v21311_v30 }
  0xd4   :  { %21552 = vst [vmem:[#allocation290_spill] sm:$0xff] %v15657_v52  ;;  %21553 = vst [vmem:[#allocation291_spill] sm:$0xff] %v15670_v7  ;;  %v761_v3 = vcombine.high %v55_v60, %v55_v60  ;;  %v7812_v53 = vrot.slane %v7805_v45, %v13786_v14  ;;  %v15683_v50 = vrot.slane %v1585_v55, %v13786_v14  ;;  %12294 = vmatmul.mubr.msk.f32.gmra.mrb[2].mxu0 %vm1907_vm6, %v7804_v54  ;;  %v57_v45 = vld [vmem:[%s20377_s0 + $0x158] sm:$0xff] }
  0xd5   :  { %21554 = vst [vmem:[#allocation292_spill] sm:$0xff] %v15675_v26  ;;  %v15686_v0 = vrot.slane %v55_v60, %v13786_v14  ;;  %v1602_v57 = vcombine.low %v15657_v52, %v15675_v26  ;;  %v15695_v56 = vrot.slane %v744_v5, %v13786_v14  ;;  %12296 = vmatprep.mubr.msk.f32.mxu0 %vm13739_vm1, %v21311_v30 }
  0xd6   :  { %21555 = vst [vmem:[#allocation293_spill] sm:$0xff] %v15683_v50  ;;  %v15704_v60 = vcombine.low %v15670_v7, %v15683_v50  ;;  %v15707_v55 = vrot.slane %v1601_v20, %v13786_v14  ;;  %v15710_v54 = vrot.slane %v761_v3, %v13786_v14  ;;  %11633 = vmatmul.mubr.msk.f32.gmra.mrb[58].mxu1 %vm1907_vm6, %v1583_v12 }
  0xd7   :  { %21556 = vst [vmem:[#allocation294_spill] sm:$0xff] %v15686_v0  ;;  %21557 = vst [vmem:[#allocation295_spill] sm:$0xff] %v15695_v56  ;;  %v15714_v5 = vcombine.high %v15686_v0, %v15686_v0  ;;  %v15718_v26 = vrot.slane %v1602_v57, %v13786_v14  ;;  %v15722_v23 = vcombine.high %v15695_v56, %v15695_v56  ;;  %11635 = vmatprep.mubr.msk.f32.mxu1 %vm13739_vm1, %v21311_v30 }
  0xd8   :  { %21558 = vst [vmem:[#allocation296_spill] sm:$0xff] %v15707_v55  ;;  %v777_v50 = vcombine.high %v56_v41, %v56_v41  ;;  %v15725_v20 = vrot.slane %v56_v41, %v13786_v14  ;;  %v7813_v3 = vcombine.low %v7812_v53, %v14127_v31  ;;  %v794_v12 = vcombine.high %v57_v45, %v57_v45 }
  0xd9   :  { %21559 = vst [vmem:[#allocation297_spill] sm:$0xff] %v15714_v5  ;;  %21560 = vst [vmem:[#allocation298_spill] sm:$0xff] %v15718_v26  ;;  %v1619_v7 = vcombine.low %v15686_v0, %v15714_v5  ;;  %v15733_v57 = vrot.slane %v57_v45, %v13786_v14  ;;  %12297 = vmatmul.mubr.msk.f32.gmra.mrb[4].mxu0 %vm1907_vm6, %v14076_v58  ;;  %v10874_v11 = vcombine.high %v14133_v28, %v14175_v44  ;;  %v58_v45 = vld [vmem:[%s20377_s0 + $0x160] sm:$0xff] }
  0xda   :  { %21561 = vst [vmem:[#allocation299_spill] sm:$0xff] %v15722_v23  ;;  %21562 = vst [vmem:[#allocation300_spill] sm:$0xff] %v15725_v20  ;;  %v1618_v41 = vcombine.low %v15695_v56, %v15722_v23  ;;  %v15742_v53 = vrot.slane %v777_v50, %v13786_v14  ;;  %v15746_v31 = vcombine.high %v15725_v20, %v15725_v20  ;;  %12299 = vmatprep.mubr.msk.f32.mxu0 %vm13739_vm1, %v21311_v30 }
  0xdb   :  { %21563 = vst [vmem:[#allocation301_spill] sm:$0xff] %v15733_v57  ;;  %v1617_v58 = vcombine.low %v15707_v55, %v15718_v26  ;;  %v1635_v44 = vcombine.low %v15710_v54, %v15725_v20  ;;  %v15758_v50 = vrot.slane %v794_v12, %v13786_v14  ;;  %v15762_v28 = vcombine.high %v15733_v57, %v15733_v57  ;;  %v59_v20 = vld [vmem:[%s20377_s0 + $0x168] sm:$0xff] }
  0xdc   :  { %21564 = vst [vmem:[#allocation302_spill] sm:$0xff] %v15742_v53  ;;  %21565 = vst [vmem:[#allocation303_spill] sm:$0xff] %v15746_v31  ;;  %11636 = vmatmul.mubr.msk.f32.gmra.mrb[60].mxu1 %vm1907_vm6, %v15704_v60  ;;  %v15767_v5 = vrot.slane %v1618_v41, %v13786_v14  ;;  %v15770_v56 = vrot.slane %v1619_v7, %v13786_v14  ;;  %v1636_v26 = vcombine.low %v15746_v31, %v15742_v53 }
  0xdd   :  { %21566 = vst [vmem:[#allocation304_spill] sm:$0xff] %v15758_v50  ;;  %21567 = vst [vmem:[#allocation305_spill] sm:$0xff] %v15762_v28  ;;  %v15776_v12 = vcombine.high %v15742_v53, %v15742_v53  ;;  %11638 = vmatprep.mubr.msk.f32.mxu1 %vm13739_vm1, %v21311_v30  ;;  %v7823_v41 = vcombine.low %v14277_v2, %v14294_v63  ;;  %v810_v0 = vcombine.high %v58_v45, %v58_v45 }
  0xde   :  { %21568 = vst [vmem:[#allocation306_spill] sm:$0xff] %v15767_v5  ;;  %21569 = vst [vmem:[#allocation307_spill] sm:$0xff] %v15770_v56  ;;  %v15786_v7 = vrot.slane %v58_v45, %v13786_v14  ;;  %12300 = vmatmul.mubr.msk.f32.gmra.mrb[6].mxu0 %vm1907_vm6, %v7813_v3  ;;  %v7821_v31 = vrot.slane %v10874_v11, %v13786_v14  ;;  %v15791_v53 = vrot.slane %v1635_v44, %v13786_v14  ;;  %v60_v44 = vld [vmem:[%s20377_s0 + $0x170] sm:$0xff] }
  0xdf   :  { %21570 = vst [vmem:[#allocation308_spill] sm:$0xff] %v15776_v12  ;;  %v1652_v23 = vcombine.low %v15776_v12, %v15733_v57  ;;  %v1653_v55 = vcombine.low %v15762_v28, %v15758_v50  ;;  %12302 = vmatprep.mubr.msk.f32.mxu0 %vm13739_vm1, %v21311_v30  ;;  %v15800_v63 = vrot.slane %v1636_v26, %v13786_v14 }
  0xe0   :  { %21571 = vst [vmem:[#allocation309_spill] sm:$0xff] %v15786_v7  ;;  %21572 = vst [vmem:[#allocation310_spill] sm:$0xff] %v15791_v53  ;;  %v15803_v45 = vrot.slane %v810_v0, %v13786_v14  ;;  %v15807_v11 = vcombine.high %v15786_v7, %v15786_v7  ;;  %v827_v3 = vcombine.high %v59_v20, %v59_v20  ;;  %11639 = vmatmul.mubr.msk.f32.gmra.mrb[62].mxu1 %vm1907_vm6, %v1617_v58 }
  0xe1   :  { %21573 = vst [vmem:[#allocation311_spill] sm:$0xff] %v15800_v63  ;;  %v15815_v2 = vcombine.low %v15767_v5, %v15770_v56  ;;  %v15818_v26 = vrot.slane %v59_v20, %v13786_v14  ;;  %11641 = vmatprep.mubr.msk.f32.mxu1 %vm13739_vm1, %v21311_v30  ;;  %v7830_v0 = vrot.slane %v7823_v41, %v13786_v14 }
  0xe2   :  { %21574 = vst [vmem:[#allocation312_spill] sm:$0xff] %v15803_v45  ;;  %21575 = vst [vmem:[#allocation313_spill] sm:$0xff] %v15807_v11  ;;  %v15825_v12 = vcombine.high %v15803_v45, %v15803_v45  ;;  %12303 = vmatmul.mubr.msk.f32.gmra.mrb[8].mxu0 %vm1907_vm6, %v14212_v46  ;;  %v7822_v58 = vcombine.low %v7821_v31, %v14256_v40  ;;  %v15831_v56 = vrot.slane %v1652_v23, %v13786_v14 }
  0xe3   :  { %21576 = vst [vmem:[#allocation314_spill] sm:$0xff] %v15818_v26  ;;  %v15834_v20 = vrot.slane %v1653_v55, %v13786_v14  ;;  %v843_v5 = vcombine.high %v60_v44, %v60_v44  ;;  %12305 = vmatprep.mubr.msk.f32.mxu0 %vm13739_vm1, %v21311_v30  ;;  %v1651_v41 = vcombine.low %v15791_v53, %v15800_v63  ;;  %v61_v53 = vld [vmem:[%s20377_s0 + $0x178] sm:$0xff] }
  0xe4   :  { %21577 = vst [vmem:[#allocation315_spill] sm:$0xff] %v15825_v12  ;;  %21578 = vst [vmem:[#allocation316_spill] sm:$0xff] %v15831_v56  ;;  %v1669_v28 = vcombine.low %v15786_v7, %v15807_v11  ;;  %v15843_v46 = vrot.slane %v827_v3, %v13786_v14  ;;  %11642 = vmatmul.mubr.msk.f32.gmra.mrb[64].mxu1 %vm1907_vm6, %v15815_v2  ;;  %v1670_v31 = vcombine.low %v15803_v45, %v15825_v12  ;;  %v62_v11 = vld [vmem:[%s20377_s0 + $0x180] sm:$0xff] }
  0xe5   :  { %21579 = vst [vmem:[#allocation317_spill] sm:$0xff] %v15834_v20  ;;  %v15851_v23 = vcombine.high %v15818_v26, %v15818_v26  ;;  %v15854_v55 = vrot.slane %v60_v44, %v13786_v14  ;;  %v15860_v3 = vrot.slane %v843_v5, %v13786_v14  ;;  %v7831_v12 = vcombine.low %v14314_v51, %v7830_v0 }
  0xe6   :  { %21580 = vst [vmem:[#allocation318_spill] sm:$0xff] %v15843_v46  ;;  %11644 = vmatprep.mubr.msk.f32.mxu1 %vm13739_vm1, %v21311_v30  ;;  %12306 = vmatmul.mubr.msk.f32.gmra.mrb[10].mxu0 %vm1907_vm6, %v7822_v58  ;;  %v15871_v44 = vcombine.low %v15831_v56, %v15834_v20  ;;  %v10875_v45 = vcombine.high %v14344_v32, %v14386_v10 }
  0xe7   :  { %21581 = vst [vmem:[#allocation319_spill] sm:$0xff] %v15851_v23  ;;  %21582 = vst [vmem:[#allocation320_spill] sm:$0xff] %v15854_v55  ;;  %v15877_v5 = vcombine.high %v15854_v55, %v15854_v55  ;;  %v860_v57 = vcombine.high %v61_v53, %v61_v53  ;;  %12308 = vmatprep.mubr.msk.f32.mxu0 %vm13739_vm1, %v21311_v30  ;;  %v15882_v0 = vrot.slane %v1669_v28, %v13786_v14 }
  0xe8   :  { %21583 = vst [vmem:[#allocation321_spill] sm:$0xff] %v15860_v3  ;;  %v15886_v58 = vcombine.high %v15860_v3, %v15860_v3  ;;  %v15889_v20 = vrot.slane %v61_v53, %v13786_v14  ;;  %v15892_v10 = vrot.slane %v62_v11, %v13786_v14  ;;  %11645 = vmatmul.mubr.msk.f32.gmra.mrb[66].mxu1 %vm1907_vm6, %v1651_v41  ;;  %v63_v53 = vld [vmem:[%s20377_s0 + $0x188] sm:$0xff] }
  0xe9   :  { %21584 = vst [vmem:[#allocation322_spill] sm:$0xff] %v15877_v5  ;;  %21585 = vst [vmem:[#allocation323_spill] sm:$0xff] %v15882_v0  ;;  %v15896_v56 = vrot.slane %v1670_v31, %v13786_v14  ;;  %v1686_v32 = vcombine.low %v15818_v26, %v15851_v23  ;;  %v1687_v28 = vcombine.low %v15843_v46, %v15854_v55  ;;  %11647 = vmatprep.mubr.msk.f32.mxu1 %vm13739_vm1, %v21311_v30 }
  0xea   :  { %21586 = vst [vmem:[#allocation324_spill] sm:$0xff] %v15886_v58  ;;  %21587 = vst [vmem:[#allocation325_spill] sm:$0xff] %v15889_v20  ;;  %v876_v40 = vcombine.high %v62_v11, %v62_v11  ;;  %12309 = vmatmul.mubr.msk.f32.gmra.mrb[12].mxu0 %vm1907_vm6, %v7831_v12  ;;  %v7839_v41 = vrot.slane %v10875_v45, %v13786_v14  ;;  %v15910_v31 = vrot.slane %v860_v57, %v13786_v14 }
  0xeb   :  { %21588 = vst [vmem:[#allocation326_spill] sm:$0xff] %v15892_v10  ;;  %21589 = vst [vmem:[#allocation327_spill] sm:$0xff] %v15896_v56  ;;  %v1703_v26 = vcombine.low %v15877_v5, %v15860_v3  ;;  %v15916_v11 = vcombine.high %v15889_v20, %v15889_v20  ;;  %12311 = vmatprep.mubr.msk.f32.mxu0 %vm13739_vm1, %v21311_v30  ;;  %v1704_v55 = vcombine.low %v15886_v58, %v15889_v20  ;;  %v64_v58 = vld [vmem:[%s20377_s0 + $0x190] sm:$0xff] }
  0xec   :  { %21590 = vst [vmem:[#allocation328_spill] sm:$0xff] %v15910_v31  ;;  %v15924_v12 = vcombine.high %v15892_v10, %v15892_v10  ;;  %v15927_v57 = vrot.slane %v876_v40, %v13786_v14  ;;  %11648 = vmatmul.mubr.msk.f32.gmra.mrb[68].mxu1 %vm1907_vm6, %v15871_v44  ;;  %v1685_v45 = vcombine.low %v15882_v0, %v15896_v56 }
  0xed   :  { %21591 = vst [vmem:[#allocation329_spill] sm:$0xff] %v15916_v11  ;;  %v15934_v5 = vrot.slane %v1686_v32, %v13786_v14  ;;  %v15937_v3 = vrot.slane %v1687_v28, %v13786_v14  ;;  %v15940_v20 = vrot.slane %v63_v53, %v13786_v14  ;;  %11650 = vmatprep.mubr.msk.f32.mxu1 %vm13739_vm1, %v21311_v30 }
  0xee   :  { %21592 = vst [vmem:[#allocation330_spill] sm:$0xff] %v15924_v12  ;;  %21593 = vst [vmem:[#allocation331_spill] sm:$0xff] %v15927_v57  ;;  %v7841_v40 = vcombine.low %v14474_v22, %v14517_v48  ;;  %12312 = vmatmul.mubr.msk.f32.gmra.mrb[14].mxu0 %vm1907_vm6, %v14407_v62  ;;  %v7840_v32 = vcombine.low %v14442_v24, %v7839_v41  ;;  %v15953_v28 = vrot.slane %v1703_v26, %v13786_v14  ;;  %v65_v26 = vld [vmem:[%s20377_s0 + $0x198] sm:$0xff] }
  0xef   :  { %21594 = vst [vmem:[#allocation332_spill] sm:$0xff] %v15934_v5  ;;  %21595 = vst [vmem:[#allocation333_spill] sm:$0xff] %v15937_v3  ;;  %v1720_v0 = vcombine.low %v15916_v11, %v15910_v31  ;;  %12314 = vmatprep.mubr.msk.f32.mxu0 %vm13739_vm1, %v21311_v30  ;;  %v15960_v48 = vrot.slane %v1704_v55, %v13786_v14  ;;  %v1721_v22 = vcombine.low %v15892_v10, %v15924_v12 }
  0xf0   :  { %21596 = vst [vmem:[#allocation334_spill] sm:$0xff] %v15940_v20  ;;  %21597 = vst [vmem:[#allocation335_spill] sm:$0xff] %v15953_v28  ;;  %v15966_v62 = vcombine.high %v15927_v57, %v15927_v57  ;;  %v893_v41 = vcombine.high %v63_v53, %v63_v53  ;;  %11651 = vmatmul.mubr.msk.f32.gmra.mrb[70].mxu1 %vm1907_vm6, %v1685_v45  ;;  %v1702_v11 = vcombine.low %v15934_v5, %v15937_v3  ;;  %v66_v45 = vld [vmem:[%s20377_s0 + $0x1a0] sm:$0xff] }
  0xf1   :  { %21598 = vst [vmem:[#allocation336_spill] sm:$0xff] %v15960_v48  ;;  %v15976_v55 = vcombine.high %v15940_v20, %v15940_v20  ;;  %v909_v23 = vcombine.high %v64_v58, %v64_v58  ;;  %v15979_v12 = vrot.slane %v64_v58, %v13786_v14  ;;  %11653 = vmatprep.mubr.msk.f32.mxu1 %vm13739_vm1, %v21311_v30 }
  0xf2   :  { %21599 = vst [vmem:[#allocation337_spill] sm:$0xff] %v15966_v62  ;;  %v7848_v53 = vrot.slane %v7841_v40, %v13786_v14  ;;  %12315 = vmatmul.mubr.msk.f32.gmra.mrb[16].mxu0 %vm1907_vm6, %v7840_v32  ;;  %v15989_v3 = vrot.slane %v1720_v0, %v13786_v14  ;;  %v926_v24 = vcombine.high %v65_v26, %v65_v26 }
  0xf3   :  { %21600 = vst [vmem:[#allocation338_spill] sm:$0xff] %v15976_v55  ;;  %21601 = vst [vmem:[#allocation339_spill] sm:$0xff] %v15979_v12  ;;  %v15992_v51 = vrot.slane %v65_v26, %v13786_v14  ;;  %12317 = vmatprep.mubr.msk.f32.mxu0 %vm13739_vm1, %v21311_v30  ;;  %v15998_v58 = vcombine.low %v15953_v28, %v15960_v48  ;;  %v16001_v40 = vrot.slane %v1721_v22, %v13786_v14 }
  0xf4   :  { %21602 = vst [vmem:[#allocation340_spill] sm:$0xff] %v15989_v3  ;;  %v16004_v31 = vrot.slane %v893_v41, %v13786_v14  ;;  %v1737_v0 = vcombine.low %v15927_v57, %v15966_v62  ;;  %11654 = vmatmul.mubr.msk.f32.gmra.mrb[72].mxu1 %vm1907_vm6, %v1702_v11  ;;  %v1738_v32 = vcombine.low %v15940_v20, %v15976_v55 }
  0xf5   :  { %21603 = vst [vmem:[#allocation341_spill] sm:$0xff] %v15992_v51  ;;  %21604 = vst [vmem:[#allocation342_spill] sm:$0xff] %v16001_v40  ;;  %v16012_v26 = vrot.slane %v909_v23, %v13786_v14  ;;  %v16016_v48 = vcombine.high %v15979_v12, %v15979_v12  ;;  %v942_v22 = vcombine.high %v66_v45, %v66_v45  ;;  %11656 = vmatprep.mubr.msk.f32.mxu1 %vm13739_vm1, %v21311_v30 }
  0xf6   :  { %21605 = vst [vmem:[#allocation343_spill] sm:$0xff] %v16004_v31  ;;  %v7849_v28 = vcombine.low %v7848_v53, %v14593_v13  ;;  %12318 = vmatmul.mubr.msk.f32.gmra.mrb[18].mxu0 %vm1907_vm6, %v14544_v8  ;;  %v10876_v11 = vcombine.high %v14599_v39, %v14635_v21  ;;  %v16030_v41 = vrot.slane %v926_v24, %v13786_v14 }
  0xf7   :  { %21606 = vst [vmem:[#allocation344_spill] sm:$0xff] %v16012_v26  ;;  %21607 = vst [vmem:[#allocation345_spill] sm:$0xff] %v16016_v48  ;;  %v16027_v23 = vcombine.high %v16012_v26, %v16012_v26  ;;  %v16034_v55 = vcombine.high %v15992_v51, %v15992_v51  ;;  %12320 = vmatprep.mubr.msk.f32.mxu0 %vm13739_vm1, %v21311_v30  ;;  %v1736_v8 = vcombine.low %v15989_v3, %v16001_v40 }
  0xf8   :  { %21609 = vst [vmem:[#allocation347_spill] sm:$0xff] %v16030_v41  ;;  %v1754_v53 = vcombine.low %v16004_v31, %v15979_v12  ;;  %v16043_v21 = vrot.slane %v66_v45, %v13786_v14  ;;  %11657 = vmatmul.mubr.msk.f32.gmra.mrb[74].mxu1 %vm1907_vm6, %v15998_v58  ;;  %v16048_v24 = vrot.slane %v1737_v0, %v13786_v14  ;;  %v67_v45 = vld [vmem:[%s20377_s0 + $0x1a8] sm:$0xff]  ;;  %v68_v0 = vld [vmem:[%s20377_s0 + $0x1b0] sm:$0xff] }
  0xf9   :  { %21608 = vst [vmem:[#allocation346_spill] sm:$0xff] %v16027_v23  ;;  %21610 = vst [vmem:[#allocation348_spill] sm:$0xff] %v16034_v55  ;;  %v16051_v39 = vrot.slane %v1738_v32, %v13786_v14  ;;  %v1755_v20 = vcombine.low %v16016_v48, %v16012_v26  ;;  %v16056_v40 = vrot.slane %v942_v22, %v13786_v14  ;;  %11659 = vmatprep.mubr.msk.f32.mxu1 %vm13739_vm1, %v21311_v30 }
  0xfa   :  { %21611 = vst [vmem:[#allocation349_spill] sm:$0xff] %v16043_v21  ;;  %21612 = vst [vmem:[#allocation350_spill] sm:$0xff] %v16048_v24  ;;  %12321 = vmatmul.mubr.msk.f32.gmra.mrb[20].mxu0 %vm1907_vm6, %v7849_v28  ;;  %v7857_v32 = vrot.slane %v10876_v11, %v13786_v14  ;;  %v7859_v12 = vcombine.low %v14716_v61, %v14740_v36  ;;  %v1771_v22 = vcombine.low %v16027_v23, %v15992_v51 }
  0xfb   :  { %21613 = vst [vmem:[#allocation351_spill] sm:$0xff] %v16051_v39  ;;  %21614 = vst [vmem:[#allocation352_spill] sm:$0xff] %v16056_v40  ;;  %v1772_v26 = vcombine.low %v16034_v55, %v16030_v41  ;;  %12323 = vmatprep.mubr.msk.f32.mxu0 %vm13739_vm1, %v21311_v30  ;;  %v16077_v48 = vrot.slane %v1754_v53, %v13786_v14  ;;  %v16081_v28 = vcombine.high %v16043_v21, %v16043_v21 }
  0xfc   :  { %v959_v11 = vcombine.high %v67_v45, %v67_v45  ;;  %v16084_v57 = vrot.slane %v67_v45, %v13786_v14  ;;  %11660 = vmatmul.mubr.msk.f32.gmra.mrb[76].mxu1 %vm1907_vm6, %v1736_v8  ;;  %v16089_v36 = vcombine.low %v16048_v24, %v16051_v39  ;;  %v16092_v61 = vrot.slane %v1755_v20, %v13786_v14 }
  0xfd   :  { %21615 = vst [vmem:[#allocation353_spill] sm:$0xff] %v16077_v48  ;;  %21616 = vst [vmem:[#allocation354_spill] sm:$0xff] %v16081_v28  ;;  %v16096_v53 = vcombine.high %v16056_v40, %v16056_v40  ;;  %v975_v55 = vcombine.high %v68_v0, %v68_v0  ;;  %v2406_v51 = vrot.slane %v13820_v25, 7  ;;  %11662 = vmatprep.mubr.msk.f32.mxu1 %vm13739_vm1, %v21311_v30  ;;  %12586 = vmatprep.subr.mxu0 %v21311_v30 }
  0xfe   :  { %21617 = vst [vmem:[#allocation355_spill] sm:$0xff] %v16084_v57  ;;  %21618 = vst [vmem:[#allocation356_spill] sm:$0xff] %v16089_v36  ;;  %12324 = vmatmul.mubr.msk.f32.gmra.mrb[22].mxu0 %vm1907_vm6, %v14674_v16  ;;  %v7858_v8 = vcombine.low %v7857_v32, %v14706_v6  ;;  %v7866_v45 = vrot.slane %v7859_v12, %v13786_v14  ;;  %v16106_v20 = vrot.slane %v1771_v22, %v13786_v14 }
  0xff   :  { %21619 = vst [vmem:[#allocation357_spill] sm:$0xff] %v16092_v61  ;;  %21620 = vst [vmem:[#allocation358_spill] sm:$0xff] %v16096_v53  ;;  %v16109_v39 = vrot.slane %v1772_v26, %v13786_v14  ;;  %12326 = vmatprep.mubr.msk.f32.mxu0 %vm13739_vm1, %v21311_v30  ;;  %v1788_v24 = vcombine.low %v16043_v21, %v16081_v28  ;;  %v16116_v25 = vrot.slane %v959_v11, %v13786_v14  ;;  %v70_v26 = vld [vmem:[%s20377_s0 + $0x1c0] sm:$0xff]  ;;  %v69_v11 = vld [vmem:[%s20377_s0 + $0x1b8] sm:$0xff] }
 0x100   :  { %21621 = vst [vmem:[#allocation359_spill] sm:$0xff] %v16106_v20  ;;  %v16120_v16 = vcombine.high %v16084_v57, %v16084_v57  ;;  %v16123_v12 = vrot.slane %v68_v0, %v13786_v14  ;;  %11663 = vmatmul.mubr.msk.f32.gmra.mrb[78].mxu1 %vm1907_vm6, %v16089_v36  ;;  %v1770_v32 = vcombine.low %v16077_v48, %v16092_v61  ;;  %v10629_v28 = vrot.slane %v13797_v17, 9 }
 0x101   :  { %21622 = vst [vmem:[#allocation360_spill] sm:$0xff] %v16109_v39  ;;  %21623 = vst [vmem:[#allocation361_spill] sm:$0xff] %v16116_v25  ;;  %v1789_v22 = vcombine.low %v16056_v40, %v16096_v53  ;;  %v16138_v0 = vrot.slane %v975_v55, %v13786_v14  ;;  %11665 = vmatprep.mubr.msk.f32.mxu1 %vm13739_vm1, %v21311_v30  ;;  %v10877_v23 = vcombine.high %v14806_v29, %v14851_v35 }
 0x102   :  { %21624 = vst [vmem:[#allocation362_spill] sm:$0xff] %v16120_v16  ;;  %21625 = vst [vmem:[#allocation363_spill] sm:$0xff] %v16123_v12  ;;  %v992_v6 = vcombine.high %v69_v11, %v69_v11  ;;  %v2408_v48 = vrot.slane %v2406_v51, 2  ;;  %12327 = vmatmul.mubr.msk.f32.gmra.mrb[24].mxu0 %vm1907_vm6, %v7858_v8  ;;  %v7867_v53 = vcombine.low %v14777_v1, %v7866_v45 }
 0x103   :  { %21626 = vst [vmem:[#allocation364_spill] sm:$0xff] %v16138_v0  ;;  %v16149_v40 = vcombine.low %v16106_v20, %v16109_v39  ;;  %v16152_v55 = vrot.slane %v70_v26, %v13786_v14  ;;  %12329 = vmatprep.mubr.msk.f32.mxu0 %vm13739_vm1, %v21311_v30  ;;  %v16157_v17 = vrot.slane %v1788_v24, %v13786_v14  ;;  %v71_v39 = vld [vmem:[%s20377_s0 + $0x1c8] sm:$0xff] }
 0x104   :  { %v1805_v35 = vcombine.low %v16084_v57, %v16120_v16  ;;  %v1806_v8 = vcombine.low %v16116_v25, %v16123_v12  ;;  %v16165_v45 = vcombine.high %v16123_v12, %v16123_v12  ;;  %11666 = vmatmul.mubr.msk.f32.gmra.mrb[80].mxu1 %vm1907_vm6, %v1770_v32  ;;  %v16172_v20 = vrot.slane %v1789_v22, %v13786_v14 }
 0x105   :  { %21627 = vst [vmem:[#allocation365_spill] sm:$0xff] %v16149_v40  ;;  %21628 = vst [vmem:[#allocation366_spill] sm:$0xff] %v16152_v55  ;;  %v16176_v24 = vcombine.high %v16138_v0, %v16138_v0  ;;  %v16179_v29 = vrot.slane %v69_v11, %v13786_v14  ;;  %v1008_v57 = vcombine.high %v70_v26, %v70_v26  ;;  %11668 = vmatprep.mubr.msk.f32.mxu1 %vm13739_vm1, %v21311_v30 }
 0x106   :  { %21629 = vst [vmem:[#allocation367_spill] sm:$0xff] %v16157_v17  ;;  %21630 = vst [vmem:[#allocation368_spill] sm:$0xff] %v16165_v45  ;;  %v7875_v12 = vrot.slane %v10877_v23, %v13786_v14  ;;  %v16185_v16 = vrot.slane %v992_v6, %v13786_v14  ;;  %v2409_v32 = vrot.slane %v13800_v18, 7  ;;  %12330 = vmatmul.mubr.msk.f32.gmra.mrb[26].mxu0 %vm1907_vm6, %v7867_v53 }
 0x107   :  { %21631 = vst [vmem:[#allocation369_spill] sm:$0xff] %v16172_v20  ;;  %21632 = vst [vmem:[#allocation370_spill] sm:$0xff] %v16176_v24  ;;  %v16191_v22 = vcombine.high %v16179_v29, %v16179_v29  ;;  %v16195_v11 = vcombine.high %v16152_v55, %v16152_v55  ;;  %v16198_v26 = vrot.slane %v71_v39, %v13786_v14  ;;  %12332 = vmatprep.mubr.msk.f32.mxu0 %vm13739_vm1, %v21311_v30 }
 0x108   :  { %21633 = vst [vmem:[#allocation371_spill] sm:$0xff] %v16179_v29  ;;  %21634 = vst [vmem:[#allocation372_spill] sm:$0xff] %v16185_v16  ;;  %v16202_v23 = vsel %vm13859_vm9, %v10629_v28, %v2406_v51  ;;  %v16207_v6 = vrot.slane %v1805_v35, %v13786_v14  ;;  %v16210_v53 = vrot.slane %v1806_v8, %v13786_v14  ;;  %11669 = vmatmul.mubr.msk.f32.gmra.mrb[82].mxu1 %vm1907_vm6, %v16149_v40  ;;  %v21657_v40 = vld [vmem:[#allocation32_spill] sm:$0xff] }
 0x109   :  { %21635 = vst [vmem:[#allocation373_spill] sm:$0xff] %v16191_v22  ;;  %21636 = vst [vmem:[#allocation374_spill] sm:$0xff] %v16195_v11  ;;  %v1822_v18 = vcombine.low %v16165_v45, %v16138_v0  ;;  %v16216_v1 = vsel %vm13859_vm9, %v2408_v48, %v2409_v32  ;;  %v1804_v51 = vcombine.low %v16157_v17, %v16172_v20  ;;  %11671 = vmatprep.mubr.msk.f32.mxu1 %vm13739_vm1, %v21311_v30  ;;  %v21641_v48 = vld [vmem:[#allocation174_spill] sm:$0xff]  ;;  %v72_v17 = vld [vmem:[%s20377_s0 + $0x1d0] sm:$0xff] }
 0x10a   :  { %21637 = vst [vmem:[#allocation375_spill] sm:$0xff] %v16198_v26  ;;  %21638 = vst [vmem:[#allocation376_spill] sm:$0xff] %v16207_v6  ;;  %v1823_v35 = vcombine.low %v16176_v24, %v16179_v29  ;;  %v16225_v28 = vrot.slane %v1008_v57, %v13786_v14  ;;  %v7876_v8 = vcombine.low %v14912_v33, %v7875_v12  ;;  %v21642_v24 = vld [vmem:[#allocation163_spill] sm:$0xff]  ;;  %v21648_v45 = vld [vmem:[#allocation8_spill] sm:$0xff] }
 0x10b   :  { %21639 = vst [vmem:[#allocation377_spill] sm:$0xff] %v16210_v53  ;;  %v7877_v0 = vcombine.low %v21641_v48, %v14954_v27  ;;  %12333 = vmatmul.mubr.msk.f32.gmra.mrb[28].mxu0 %vm1907_vm6, %v21642_v24  ;;  %v1839_v57 = vcombine.low %v16191_v22, %v16185_v16  ;;  %v1840_v12 = vcombine.low %v16152_v55, %v16195_v11 }
 0x10c   :  { %21640 = vst [vmem:[#allocation378_spill] sm:$0xff] %v16225_v28  ;;  %v1025_v33 = vcombine.high %v71_v39, %v71_v39  ;;  %v16246_v27 = vcombine.high %v16198_v26, %v16198_v26  ;;  %12335 = vmatprep.mubr.msk.f32.mxu0 %vm13739_vm1, %v21311_v30  ;;  %v1821_v29 = vcombine.low %v16207_v6, %v16210_v53  ;;  %v73_v53 = vld [vmem:[%s20377_s0 + $0x1d8] sm:$0xff]  ;;  %v21659_v6 = vld [vmem:[#allocation186_spill] sm:$0xff] }
 0x10d   :  { %v16253_v48 = vrot.slane %v1822_v18, %v13786_v14  ;;  %11672 = vmatmul.mubr.msk.f32.gmra.mrb[84].mxu1 %vm1907_vm6, %v1804_v51  ;;  %v16257_v24 = vrot.slane %v1823_v35, %v13786_v14  ;;  %v16261_v39 = vcombine.high %v16225_v28, %v16225_v28  ;;  %v1041_v11 = vcombine.high %v72_v17, %v72_v17 }
 0x10e   :  { %21643 = vst [vmem:[#allocation163_spill] sm:$0xff] %v16246_v27  ;;  %v16264_v22 = vrot.slane %v72_v17, %v13786_v14  ;;  %v2412_v18 = vrot.slane %v21648_v45, 7  ;;  %11674 = vmatprep.mubr.msk.f32.mxu1 %vm13739_vm1, %v21311_v30  ;;  %v7884_v51 = vrot.slane %v7877_v0, %v13786_v14  ;;  %v16275_v35 = vrot.slane %v1839_v57, %v13786_v14 }
 0x10f   :  { %21644 = vst [vmem:[#allocation379_spill] sm:$0xff] %v16253_v48  ;;  %21645 = vst [vmem:[#allocation380_spill] sm:$0xff] %v16257_v24  ;;  %12336 = vmatmul.mubr.msk.f32.gmra.mrb[30].mxu0 %vm1907_vm6, %v7876_v8  ;;  %v16278_v62 = vrot.slane %v1840_v12, %v13786_v14  ;;  %v16281_v17 = vrot.slane %v1025_v33, %v13786_v14  ;;  %v1857_v13 = vcombine.low %v16198_v26, %v16246_v27  ;;  %v21656_v26 = vld [vmem:[#allocation194_spill] sm:$0xff] }
 0x110   :  { %21646 = vst [vmem:[#allocation381_spill] sm:$0xff] %v16261_v39  ;;  %21647 = vst [vmem:[#allocation382_spill] sm:$0xff] %v16264_v22  ;;  %12338 = vmatprep.mubr.msk.f32.mxu0 %vm13739_vm1, %v21311_v30  ;;  %v1058_v45 = vcombine.high %v73_v53, %v73_v53  ;;  %v16288_v0 = vrot.slane %v73_v53, %v13786_v14  ;;  %v16293_v8 = vcombine.low %v16253_v48, %v16257_v24  ;;  %v21658_v24 = vld [vmem:[#allocation27_spill] sm:$0xff] }
 0x111   :  { %21649 = vst [vmem:[#allocation383_spill] sm:$0xff] %v16275_v35  ;;  %21650 = vst [vmem:[#allocation384_spill] sm:$0xff] %v16278_v62  ;;  %11675 = vmatmul.mubr.msk.f32.gmra.mrb[86].mxu1 %vm1907_vm6, %v1821_v29  ;;  %v1856_v33 = vcombine.low %v16225_v28, %v16261_v39  ;;  %v16298_v57 = vrot.slane %v1041_v11, %v13786_v14  ;;  %v16302_v12 = vcombine.high %v16264_v22, %v16264_v22  ;;  %v21660_v39 = vld [vmem:[#allocation199_spill] sm:$0xff] }
 0x112   :  { %21651 = vst [vmem:[#allocation385_spill] sm:$0xff] %v16281_v17  ;;  %21652 = vst [vmem:[#allocation386_spill] sm:$0xff] %v16288_v0  ;;  %v2414_v27 = vrot.slane %v2412_v18, 2  ;;  %v7885_v53 = vcombine.low %v7884_v51, %v21656_v26  ;;  %11677 = vmatprep.mubr.msk.f32.mxu1 %vm13739_vm1, %v21311_v30  ;;  %v2411_v29 = vrot.slane %v2409_v32, 2  ;;  %v3072_v48 = vcombine.low %v21658_v24, %v21657_v40  ;;  %v21661_v28 = vld [vmem:[#allocation195_spill] sm:$0xff]  ;;  %v21666_v24 = vld [vmem:[#allocation37_spill] sm:$0xff] }
 0x113   :  { %21653 = vst [vmem:[#allocation387_spill] sm:$0xff] %v16293_v8  ;;  %21654 = vst [vmem:[#allocation388_spill] sm:$0xff] %v16298_v57  ;;  %12339 = vmatmul.mubr.msk.f32.gmra.mrb[32].mxu0 %vm1907_vm6, %v21659_v6  ;;  %v1855_v11 = vcombine.low %v16275_v35, %v16278_v62  ;;  %v10878_v20 = vcombine.high %v21661_v28, %v21660_v39  ;;  %v16316_v36 = vrot.slane %v1857_v13, %v13786_v14  ;;  %v21667_v13 = vld [vmem:[#allocation36_spill] sm:$0xff]  ;;  %v21669_v26 = vld [vmem:[#allocation3_spill] sm:$0xff] }
 0x114   :  { %21655 = vst [vmem:[#allocation389_spill] sm:$0xff] %v16302_v12  ;;  %v1873_v51 = vcombine.low %v16281_v17, %v16264_v22  ;;  %12341 = vmatprep.mubr.msk.f32.mxu0 %vm13739_vm1, %v21311_v30  ;;  %v16324_v40 = vcombine.high %v16298_v57, %v16298_v57  ;;  %v16327_v32 = vrot.slane %v1058_v45, %v13786_v14  ;;  %v2415_v22 = vrot.slane %v21669_v26, 7  ;;  %v21670_v45 = vld [vmem:[#allocation4_spill] sm:$0xff]  ;;  %v21671_v17 = vld [vmem:[#allocation9_spill] sm:$0xff] }
 0x115   :  { %21662 = vst [vmem:[#allocation32_spill] sm:$0xff] %v16316_v36  ;;  %v16331_v6 = vcombine.high %v16288_v0, %v16288_v0  ;;  %v3088_v39 = vcombine.low %v21667_v13, %v21666_v24  ;;  %11678 = vmatmul.mubr.msk.f32.gmra.mrb[88].mxu1 %vm1907_vm6, %v16293_v8  ;;  %v16338_v62 = vrot.slane %v1856_v33, %v13786_v14  ;;  %v2418_v61 = vrot.slane %v21671_v17, 7 }
 0x116   :  { %21663 = vst [vmem:[#allocation27_spill] sm:$0xff] %v16324_v40  ;;  %21664 = vst [vmem:[#allocation186_spill] sm:$0xff] %v16327_v32  ;;  %v1874_v28 = vcombine.low %v16302_v12, %v16298_v57  ;;  %v2369_v35 = vcombine.high %v21670_v45, %v21670_v45  ;;  %11680 = vmatprep.mubr.msk.f32.mxu1 %vm13739_vm1, %v21311_v30  ;;  %v2421_v24 = vrot.slane %v21670_v45, 7  ;;  %v21674_v57 = vld [vmem:[#allocation218_spill] sm:$0xff]  ;;  %v21675_v12 = vld [vmem:[#allocation216_spill] sm:$0xff]  ;;  %v2417_v45 = vrot.slane %v2415_v22, 2 }
 0x117   :  { %21665 = vst [vmem:[#allocation390_spill] sm:$0xff] %v16331_v6  ;;  %21668 = vst [vmem:[#allocation37_spill] sm:$0xff] %v16338_v62  ;;  %v16350_v13 = vrot.slane %v3072_v48, %v13786_v14  ;;  %v16353_v33 = vrot.slane %v3088_v39, %v13786_v14  ;;  %12342 = vmatmul.mubr.msk.f32.gmra.mrb[34].mxu0 %vm1907_vm6, %v7885_v53  ;;  %v7893_v26 = vrot.slane %v10878_v20, %v13786_v14 }
 0x118   :  { %v7895_v8 = vcombine.low %v21675_v12, %v21674_v57  ;;  %12344 = vmatprep.mubr.msk.f32.mxu0 %vm13739_vm1, %v21311_v30  ;;  %v16362_v17 = vrot.slane %v1873_v51, %v13786_v14  ;;  %v1890_v48 = vcombine.low %v16324_v40, %v16288_v0  ;;  %v1891_v39 = vcombine.low %v16331_v6, %v16327_v32  ;;  %v21677_v0 = vld [vmem:[#allocation208_spill] sm:$0xff] }
 0x119   :  { %21672 = vst [vmem:[#allocation36_spill] sm:$0xff] %v16350_v13  ;;  %21673 = vst [vmem:[#allocation391_spill] sm:$0xff] %v16353_v33  ;;  %11681 = vmatmul.mubr.msk.f32.gmra.mrb[90].mxu1 %vm1907_vm6, %v1855_v11  ;;  %v16373_v20 = vcombine.low %v16338_v62, %v16316_v36  ;;  %v16376_v57 = vrot.slane %v1874_v28, %v13786_v14  ;;  %v2413_v51 = vsel %vm13859_vm9, %v2411_v29, %v2412_v18  ;;  %v21678_v36 = vld [vmem:[#allocation212_spill] sm:$0xff]  ;;  %v21681_v29 = vld [vmem:[#allocation221_spill] sm:$0xff] }
 0x11a   :  { %21676 = vst [vmem:[#allocation218_spill] sm:$0xff] %v16362_v17  ;;  %v2416_v12 = vsel %vm13859_vm9, %v2414_v27, %v2415_v22  ;;  %11683 = vmatprep.mubr.msk.f32.mxu1 %vm13739_vm1, %v21311_v30  ;;  %v2420_v53 = vrot.slane %v2418_v61, 2  ;;  %v2423_v6 = vrot.slane %v2421_v24, 2  ;;  %v2424_v11 = vrot.slane %v2369_v35, 7 }
 0x11b   :  { %12345 = vmatmul.mubr.msk.f32.gmra.mrb[36].mxu0 %vm1907_vm6, %v21677_v0  ;;  %v7894_v62 = vcombine.low %v7893_v26, %v21678_v36  ;;  %v7902_v28 = vrot.slane %v7895_v8, %v13786_v14  ;;  %v16391_v18 = vrot.slane %v1890_v48, %v13786_v14  ;;  %v16394_v27 = vrot.slane %v1891_v39, %v13786_v14  ;;  %v21682_v39 = vld [vmem:[#allocation240_spill] sm:$0xff]  ;;  %v21683_v36 = vld [vmem:[#allocation230_spill] sm:$0xff] }
 0x11c   :  { %12347 = vmatprep.mubr.msk.f32.mxu0 %vm13739_vm1, %v21311_v30  ;;  %v1889_v22 = vcombine.low %v16362_v17, %v16376_v57  ;;  %v3021_v35 = vcombine.low %v2413_v51, %v2416_v12  ;;  %v2419_v26 = vsel %vm13859_vm9, %v2417_v45, %v2418_v61  ;;  %v2422_v0 = vsel %vm13859_vm9, %v2420_v53, %v2421_v24  ;;  %v21685_v24 = vld [vmem:[#allocation14_spill] sm:$0xff] }
 0x11d   :  { %21679 = vst [vmem:[#allocation208_spill] sm:$0xff] %v16391_v18  ;;  %21680 = vst [vmem:[#allocation392_spill] sm:$0xff] %v16394_v27  ;;  %11684 = vmatmul.mubr.msk.f32.gmra.mrb[92].mxu1 %vm1907_vm6, %v16373_v20  ;;  %v2425_v8 = vsel %vm13859_vm9, %v2423_v6, %v2424_v11  ;;  %v7903_v48 = vcombine.low %v21681_v29, %v7902_v28  ;;  %v10879_v17 = vcombine.high %v21683_v36, %v21682_v39  ;;  %v21686_v11 = vld [vmem:[#allocation248_spill] sm:$0xff] }
 0x11e   :  { %11686 = vmatprep.mubr.msk.f32.mxu1 %vm13739_vm1, %v21311_v30  ;;  %v16416_v12 = vcombine.low %v16391_v18, %v16394_v27  ;;  %v21684_v61 = vcombine.low %v16202_v23, %v16216_v1  ;;  %v3037_v45 = vcombine.low %v2419_v26, %v2422_v0  ;;  %v3038_v53 = vcombine.low %v2425_v8, %v21685_v24  ;;  %v21688_v27 = vld [vmem:[#allocation249_spill] sm:$0xff]  ;;  %v21690_v23 = vld [vmem:[#allocation15_spill] sm:$0xff]  ;;  %v21691_v8 = vld [vmem:[#allocation22_spill] sm:$0xff] }
 0x11f   :  { %12348 = vmatmul.mubr.msk.f32.gmra.mrb[38].mxu0 %vm1907_vm6, %v7894_v62  ;;  %v3035_v62 = vrot.slane %v3021_v35, %v13786_v14  ;;  %v7911_v51 = vrot.slane %v10879_v17, %v13786_v14  ;;  %v7913_v28 = vcombine.low %v21686_v11, %v15395_v42  ;;  %v21689_v1 = vld [vmem:[#allocation17_spill] sm:$0xff]  ;;  %v21693_v24 = vld [vmem:[#allocation239_spill] sm:$0xff]  ;;  %v21729_v11 = vld [vmem:[#allocation90_spill] sm:$0xff] }
 0x120   :  { %12350 = vmatprep.mubr.msk.f32.mxu0 %vm13739_vm1, %v21311_v30  ;;  %v3028_v6 = vrot.slane %v21684_v61, %v13786_v14  ;;  %v3054_v35 = vcombine.low %v21690_v23, %v21689_v1  ;;  %v3045_v0 = vrot.slane %v3037_v45, %v13786_v14  ;;  %v3052_v17 = vrot.slane %v3038_v53, %v13786_v14  ;;  %v80_v53 = vld [vmem:[%s20376_s1 + $0x8] sm:$0x7] }
 0x121   :  { %11687 = vmatmul.mubr.msk.f32.gmra.mrb[94].mxu1 %vm1907_vm6, %v1889_v22  ;;  %v21687_v22 = vld [vmem:[#allocation254_spill] sm:$0xff]  ;;  %v16449_v1 = vrot.slane %v7913_v28, %v13786_v14 }
 0x122   :  { %11689 = vmatprep.mubr.msk.f32.mxu1 %vm13739_vm1, %v21311_v30  ;;  %v7914_v18 = vcombine.low %v21688_v27, %v21687_v22  ;;  %v3036_v26 = vcombine.low %v3028_v6, %v3035_v62  ;;  %v7912_v22 = vcombine.low %v15370_v4, %v7911_v51  ;;  %v21696_v62 = vld [vmem:[#allocation253_spill] sm:$0xff]  ;;  %v3053_v23 = vcombine.low %v3045_v0, %v3052_v17 }
 0x123   :  { %12351 = vmatmul.mubr.msk.f32.gmra.mrb[40].mxu0 %vm1907_vm6, %v7903_v48  ;;  %v21692_v48 = vld [vmem:[#allocation19_spill] sm:$0xff]  ;;  %21694 = vst [vmem:[#allocation14_spill] sm:$0xff] %v16449_v1  ;;  %v7930_v45 = vcombine.low %v21696_v62, %v15471_v15  ;;  %v3062_v51 = vrot.slane %v3054_v35, %v13786_v14  ;;  %v21699_v17 = vld [vmem:[#allocation41_spill] sm:$0xff] }
 0x124   :  { %12353 = vmatprep.mubr.msk.f32.mxu0 %vm13739_vm1, %v21311_v30  ;;  %v3055_v61 = vcombine.low %v21692_v48, %v21691_v8  ;;  %v16452_v6 = vrot.slane %v7914_v18, %v13786_v14  ;;  %v21697_v8 = vld [vmem:[#allocation26_spill] sm:$0xff]  ;;  %v21698_v18 = vld [vmem:[#allocation23_spill] sm:$0xff] }
 0x125   :  { %11690 = vmatmul.mubr.msk.f32.gmra.mrb[96].mxu1 %vm1907_vm6, %v16416_v12  ;;  %v3071_v48 = vcombine.low %v21698_v18, %v21697_v8  ;;  %v21703_v8 = vld [vmem:[#allocation51_spill] sm:$0xff]  ;;  %v21704_v18 = vld [vmem:[#allocation49_spill] sm:$0xff] }
 0x126   :  { %11694 = vmatprep.mubr.msk.f32.mxu1 %vm13739_vm1, %v21311_v30  ;;  %21695 = vst [vmem:[#allocation17_spill] sm:$0xff] %v16452_v6  ;;  %v3069_v28 = vrot.slane %v3055_v61, %v13786_v14  ;;  %v7929_v15 = vcombine.low %v16449_v1, %v16452_v6  ;;  %v21700_v61 = vld [vmem:[#allocation39_spill] sm:$0xff] }
 0x127   :  { %12354 = vmatmul.mubr.msk.f32.gmra.mrb[42].mxu0 %vm1907_vm6, %v21693_v24  ;;  %v3079_v0 = vrot.slane %v3071_v48, %v13786_v14  ;;  %v3089_v24 = vcombine.low %v21700_v61, %v21699_v17  ;;  %v3106_v48 = vcombine.low %v21704_v18, %v21703_v8 }
 0x128   :  { %12356 = vmatprep.mubr.msk.f32.mxu0 %vm13739_vm1, %v21311_v30  ;;  %v3070_v35 = vcombine.low %v3062_v51, %v3069_v28  ;;  %v21702_v51 = vld [vmem:[#allocation44_spill] sm:$0xff] }
 0x129   :  { %11695 = vmatmul.mubr.msk.f32.vlgmr.msra.gmra.mrb[0].mxu1 %vm1907_vm6, %v3036_v26  ;;  %v7937_v26 = vrot.slane %v7930_v45, %v13786_v14  ;;  %v10880_v45 = vcombine.high %v15524_v19, %v15550_v34 }
 0x12a   :  { %11697 = vmatprep.mubr.msk.f32.mxu1 %vm13739_vm1, %v21311_v30  ;;  %11842 = vmatpush3.msk.msra.mxu1 %vm2006_vm0, %v80_v53  ;;  %v16488_v53 = vcombine.high %v15577_v9, %v15577_v9 }
 0x12b   :  { %12357 = vmatmul.mubr.msk.f32.gmra.mrb[44].mxu0 %vm1907_vm6, %v7912_v22  ;;  %11990 = vmatprep.subr.mxu1 %v21311_v30  ;;  %v7938_v22 = vcombine.low %v7937_v26, %v15518_v43  ;;  %v3087_v43 = vcombine.low %v3079_v0, %v16350_v13  ;;  %v7946_v26 = vrot.slane %v10880_v45, %v13786_v14 }
 0x12c   :  { %12359 = vmatprep.mubr.msk.f32.mxu0 %vm13739_vm1, %v21311_v30  ;;  %v7948_v17 = vcombine.low %v15577_v9, %v16488_v53  ;;  %v16513_v0 = vrot.slane %v3106_v48, %v13786_v14 }
 0x12d   :  { %11698 = vmatmul.mubr.msk.f32.gmra.mrb[2].mxu1 %vm1907_vm6, %v3053_v23  ;;  %v21701_v23 = vld [vmem:[#allocation45_spill] sm:$0xff] }
 0x12e   :  { %11700 = vmatprep.mubr.msk.f32.mxu1 %vm13739_vm1, %v21311_v30  ;;  %v3105_v28 = vcombine.low %v21702_v51, %v21701_v23  ;;  %21707 = vst [vmem:[#allocation19_spill] sm:$0xff] %v16513_v0  ;;  %v21710_v23 = vld [vmem:[#allocation63_spill] sm:$0xff]  ;;  %v21711_v51 = vld [vmem:[#allocation56_spill] sm:$0xff]  ;;  %v7955_v18 = vrot.slane %v7948_v17, %v13786_v14 }
 0x12f   :  { %12360 = vmatmul.mubr.msk.f32.gmra.mrb[46].mxu0 %vm1907_vm6, %v7929_v15  ;;  %v16499_v15 = vrot.slane %v3089_v24, %v13786_v14  ;;  %v21708_v24 = vld [vmem:[#allocation54_spill] sm:$0xff]  ;;  %v3123_v8 = vcombine.low %v21711_v51, %v21710_v23  ;;  %v21717_v51 = vld [vmem:[#allocation67_spill] sm:$0xff] }
 0x130   :  { %12362 = vmatprep.mubr.msk.f32.mxu0 %vm13739_vm1, %v21311_v30  ;;  %v7956_v42 = vcombine.low %v15626_v37, %v7955_v18  ;;  %v21722_v18 = vld [vmem:[#allocation83_spill] sm:$0xff] }
 0x131   :  { %11701 = vmatmul.mubr.msk.f32.gmra.mrb[4].mxu1 %vm1907_vm6, %v3070_v35  ;;  %21705 = vst [vmem:[#allocation15_spill] sm:$0xff] %v16499_v15  ;;  %v16510_v35 = vrot.slane %v3105_v28, %v13786_v14  ;;  %v3104_v61 = vcombine.low %v16353_v33, %v16499_v15  ;;  %v7947_v28 = vcombine.low %v7946_v26, %v15612_v47  ;;  %v21716_v26 = vld [vmem:[#allocation73_spill] sm:$0xff]  ;;  %v21739_v15 = vld [vmem:[#allocation268_spill] sm:$0xff]  ;;  %v21799_v47 = vld [vmem:[#allocation243_spill] sm:$0xff] }
 0x132   :  { %11703 = vmatprep.mubr.msk.f32.mxu1 %vm13739_vm1, %v21311_v30  ;;  %v3140_v17 = vcombine.low %v21717_v51, %v21716_v26  ;;  %v21723_v26 = vld [vmem:[#allocation77_spill] sm:$0xff] }
 0x133   :  { %12363 = vmatmul.mubr.msk.f32.gmra.mrb[48].mxu0 %vm1907_vm6, %v7938_v22  ;;  %21706 = vst [vmem:[#allocation22_spill] sm:$0xff] %v16510_v35  ;;  %v21709_v22 = vld [vmem:[#allocation52_spill] sm:$0xff]  ;;  %v3121_v48 = vcombine.low %v16510_v35, %v16513_v0  ;;  %v3157_v51 = vcombine.low %v21723_v26, %v21722_v18  ;;  %v21728_v26 = vld [vmem:[#allocation93_spill] sm:$0xff]  ;;  %v21744_v35 = vld [vmem:[#allocation110_spill] sm:$0xff] }
 0x134   :  { %12365 = vmatprep.mubr.msk.f32.mxu0 %vm13739_vm1, %v21311_v30  ;;  %v3122_v45 = vcombine.low %v21709_v22, %v21708_v24  ;;  %v16537_v24 = vrot.slane %v3123_v8, %v13786_v14  ;;  %v21714_v22 = vld [vmem:[#allocation65_spill] sm:$0xff]  ;;  %v21719_v8 = vld [vmem:[#allocation74_spill] sm:$0xff] }
 0x135   :  { %11704 = vmatmul.mubr.msk.f32.gmra.mrb[6].mxu1 %vm1907_vm6, %v3087_v43 }
 0x136   :  { %11706 = vmatprep.mubr.msk.f32.mxu1 %vm13739_vm1, %v21311_v30  ;;  %v16534_v43 = vrot.slane %v3122_v45, %v13786_v14  ;;  %21713 = vst [vmem:[#allocation26_spill] sm:$0xff] %v16537_v24  ;;  %v21718_v45 = vld [vmem:[#allocation80_spill] sm:$0xff] }
 0x137   :  { %12366 = vmatmul.mubr.msk.f32.gmra.mrb[50].mxu0 %vm1907_vm6, %v15596_v59  ;;  %v21715_v59 = vld [vmem:[#allocation62_spill] sm:$0xff]  ;;  %v3156_v27 = vcombine.low %v21719_v8, %v21718_v45  ;;  %v16581_v8 = vrot.slane %v3157_v51, %v13786_v14  ;;  %v21732_v51 = vld [vmem:[#allocation96_spill] sm:$0xff] }
 0x138   :  { %12368 = vmatprep.mubr.msk.f32.mxu0 %vm13739_vm1, %v21311_v30  ;;  %21712 = vst [vmem:[#allocation239_spill] sm:$0xff] %v16534_v43  ;;  %v3139_v23 = vcombine.low %v21715_v59, %v21714_v22  ;;  %v3138_v22 = vcombine.low %v16534_v43, %v16537_v24  ;;  %v3174_v24 = vcombine.low %v21729_v11, %v21728_v26 }
 0x139   :  { %11707 = vmatmul.mubr.msk.f32.gmra.mrb[8].mxu1 %vm1907_vm6, %v3104_v61  ;;  %v10881_v61 = vcombine.high %v15650_v49, %v15657_v52  ;;  %21725 = vst [vmem:[#allocation45_spill] sm:$0xff] %v16581_v8 }
 0x13a   :  { %11709 = vmatprep.mubr.msk.f32.mxu1 %vm13739_vm1, %v21311_v30  ;;  %v16557_v59 = vrot.slane %v3139_v23, %v13786_v14  ;;  %v16575_v23 = vrot.slane %v3156_v27, %v13786_v14  ;;  %v21730_v27 = vld [vmem:[#allocation296_spill] sm:$0xff] }
 0x13b   :  { %12369 = vmatmul.mubr.msk.f32.gmra.mrb[52].mxu0 %vm1907_vm6, %v7947_v28  ;;  %v16560_v28 = vrot.slane %v3140_v17, %v13786_v14  ;;  %v7964_v45 = vrot.slane %v10881_v61, %v13786_v14  ;;  %v21727_v61 = vld [vmem:[#allocation86_spill] sm:$0xff] }
 0x13c   :  { %12371 = vmatprep.mubr.msk.f32.mxu0 %vm13739_vm1, %v21311_v30  ;;  %21720 = vst [vmem:[#allocation23_spill] sm:$0xff] %v16557_v59  ;;  %21724 = vst [vmem:[#allocation39_spill] sm:$0xff] %v16575_v23  ;;  %v3172_v11 = vcombine.low %v16575_v23, %v16581_v8  ;;  %v21743_v23 = vld [vmem:[#allocation113_spill] sm:$0xff] }
 0x13d   :  { %11710 = vmatmul.mubr.msk.f32.gmra.mrb[10].mxu1 %vm1907_vm6, %v3121_v48  ;;  %21721 = vst [vmem:[#allocation41_spill] sm:$0xff] %v16560_v28  ;;  %v16570_v48 = vcombine.high %v15710_v54, %v15710_v54  ;;  %v3155_v17 = vcombine.low %v16557_v59, %v16560_v28  ;;  %v21731_v59 = vld [vmem:[#allocation97_spill] sm:$0xff]  ;;  %v3208_v33 = vcombine.low %v21744_v35, %v21743_v23 }
 0x13e   :  { %11712 = vmatprep.mubr.msk.f32.mxu1 %vm13739_vm1, %v21311_v30  ;;  %v3190_v0 = vcombine.low %v21732_v51, %v21731_v59  ;;  %v21737_v59 = vld [vmem:[#allocation264_spill] sm:$0xff]  ;;  %v16639_v35 = vcombine.high %v15843_v46, %v15843_v46 }
 0x13f   :  { %12372 = vmatmul.mubr.msk.f32.gmra.mrb[54].mxu0 %vm1907_vm6, %v7956_v42  ;;  %v21726_v42 = vld [vmem:[#allocation89_spill] sm:$0xff]  ;;  %v7966_v28 = vcombine.low %v15710_v54, %v16570_v48  ;;  %v21738_v51 = vrot.slane %v21737_v59, 7 }
 0x140   :  { %12374 = vmatprep.mubr.msk.f32.mxu0 %vm13739_vm1, %v21311_v30  ;;  %v3173_v18 = vcombine.low %v21727_v61, %v21726_v42  ;;  %v21736_v61 = vld [vmem:[#allocation94_spill] sm:$0xff]  ;;  %21748 = vst [vmem:[#allocation52_spill] sm:$0xff] %v16639_v35 }
 0x141   :  { %11713 = vmatmul.mubr.msk.f32.gmra.mrb[12].mxu1 %vm1907_vm6, %v3138_v22  ;;  %v7965_v22 = vcombine.low %v21730_v27, %v7964_v45  ;;  %v21735_v45 = vld [vmem:[#allocation106_spill] sm:$0xff]  ;;  %v2741_v43 = vrot.slane %v21738_v51, 2  ;;  %v7973_v8 = vrot.slane %v7966_v28, %v13786_v14  ;;  %v21798_v27 = vld [vmem:[#allocation188_spill] sm:$0xff] }
 0x142   :  { %11715 = vmatprep.mubr.msk.f32.mxu1 %vm13739_vm1, %v21311_v30  ;;  %v16602_v42 = vrot.slane %v3173_v18, %v13786_v14  ;;  %v3191_v26 = vcombine.low %v21736_v61, %v21735_v45  ;;  %v16617_v18 = vrot.slane %v3190_v0, %v13786_v14  ;;  %v21742_v45 = vld [vmem:[#allocation109_spill] sm:$0xff]  ;;  %v21745_v51 = vld [vmem:[#allocation270_spill] sm:$0xff] }
 0x143   :  { %12375 = vmatmul.mubr.msk.f32.gmra.mrb[56].mxu0 %vm1907_vm6, %v15704_v60  ;;  %v16605_v60 = vrot.slane %v3174_v24, %v13786_v14  ;;  %v21741_v24 = vld [vmem:[#allocation112_spill] sm:$0xff]  ;;  %v2745_v59 = vrot.slane %v21745_v51, 7  ;;  %v21756_v51 = vld [vmem:[#allocation117_spill] sm:$0xff] }
 0x144   :  { %12377 = vmatprep.mubr.msk.f32.mxu0 %vm13739_vm1, %v21311_v30  ;;  %21733 = vst [vmem:[#allocation44_spill] sm:$0xff] %v16602_v42  ;;  %21740 = vst [vmem:[#allocation49_spill] sm:$0xff] %v16617_v18  ;;  %v3207_v61 = vcombine.low %v21742_v45, %v21741_v24  ;;  %v16630_v0 = vrot.slane %v3191_v26, %v13786_v14  ;;  %v7974_v24 = vcombine.low %v7973_v8, %v15800_v63  ;;  %v21797_v63 = vld [vmem:[#allocation189_spill] sm:$0xff] }
 0x145   :  { %11716 = vmatmul.mubr.msk.f32.gmra.mrb[14].mxu1 %vm1907_vm6, %v3155_v17  ;;  %21734 = vst [vmem:[#allocation51_spill] sm:$0xff] %v16605_v60  ;;  %v2742_v17 = vrot.slane %v21739_v15, 7  ;;  %v3189_v28 = vcombine.low %v16602_v42, %v16605_v60  ;;  %v21747_v15 = vld [vmem:[#allocation272_spill] sm:$0xff]  ;;  %v2747_v26 = vrot.slane %v2745_v59, 2  ;;  %v21755_v60 = vld [vmem:[#allocation123_spill] sm:$0xff] }
 0x146   :  { %11718 = vmatprep.mubr.msk.f32.mxu1 %vm13739_vm1, %v21311_v30  ;;  %21746 = vst [vmem:[#allocation54_spill] sm:$0xff] %v16630_v0  ;;  %v2748_v36 = vrot.slane %v21747_v15, 7  ;;  %v3206_v8 = vcombine.low %v16617_v18, %v16630_v0  ;;  %v3225_v42 = vcombine.low %v21756_v51, %v21755_v60  ;;  %v21789_v18 = vld [vmem:[#allocation179_spill] sm:$0xff] }
 0x147   :  { %12378 = vmatmul.mubr.msk.f32.gmra.mrb[58].mxu0 %vm1907_vm6, %v7965_v22  ;;  %v2744_v13 = vrot.slane %v2742_v17, 2  ;;  %v10882_v22 = vcombine.high %v15758_v50, %v15786_v7  ;;  %v16643_v23 = vsel %vm13859_vm9, %v2741_v43, %v2742_v17  ;;  %v16658_v43 = vrot.slane %v3207_v61, %v13786_v14  ;;  %v21754_v17 = vld [vmem:[#allocation115_spill] sm:$0xff] }
 0x148   :  { %12380 = vmatprep.mubr.msk.f32.mxu0 %vm13739_vm1, %v21311_v30  ;;  %21749 = vst [vmem:[#allocation63_spill] sm:$0xff] %v16643_v23  ;;  %v2750_v45 = vrot.slane %v2748_v36, 2  ;;  %v16672_v15 = vsel %vm13859_vm9, %v2747_v26, %v2748_v36  ;;  %v21758_v61 = vrot.slane %v15524_v19, 7  ;;  %v7984_v36 = vcombine.low %v15843_v46, %v16639_v35  ;;  %v21857_v35 = vld [vmem:[#allocation277_spill] sm:$0xff] }
 0x149   :  { %11719 = vmatmul.mubr.msk.f32.gmra.mrb[16].mxu1 %vm1907_vm6, %v3172_v11  ;;  %v16647_v11 = vsel %vm13859_vm9, %v2744_v13, %v2745_v59  ;;  %21751 = vst [vmem:[#allocation65_spill] sm:$0xff] %v16658_v43  ;;  %v16661_v13 = vrot.slane %v3208_v33, %v13786_v14  ;;  %v21753_v59 = vld [vmem:[#allocation114_spill] sm:$0xff]  ;;  %21757 = vst [vmem:[#allocation73_spill] sm:$0xff] %v16672_v15  ;;  %v7982_v60 = vrot.slane %v10882_v22, %v13786_v14 }
 0x14a   :  { %11721 = vmatprep.mubr.msk.f32.mxu1 %vm13739_vm1, %v21311_v30  ;;  %21750 = vst [vmem:[#allocation56_spill] sm:$0xff] %v16647_v11  ;;  %v16678_v33 = vsel %vm13859_vm9, %v2750_v45, %v21758_v61  ;;  %v16697_v45 = vrot.slane %v3225_v42, %v13786_v14  ;;  %v21765_v61 = vld [vmem:[#allocation133_spill] sm:$0xff]  ;;  %v21766_v42 = vld [vmem:[#allocation138_spill] sm:$0xff] }
 0x14b   :  { %12381 = vmatmul.mubr.msk.f32.gmra.mrb[60].mxu0 %vm1907_vm6, %v15815_v2  ;;  %21752 = vst [vmem:[#allocation62_spill] sm:$0xff] %v16661_v13  ;;  %v3224_v2 = vcombine.low %v21754_v17, %v21753_v59  ;;  %21759 = vst [vmem:[#allocation67_spill] sm:$0xff] %v16678_v33  ;;  %v3223_v51 = vcombine.low %v16658_v43, %v16661_v13  ;;  %v21763_v59 = vld [vmem:[#allocation124_spill] sm:$0xff]  ;;  %v21764_v17 = vld [vmem:[#allocation134_spill] sm:$0xff]  ;;  %v16747_v43 = vcombine.high %v16004_v31, %v16004_v31 }
 0x14c   :  { %12383 = vmatprep.mubr.msk.f32.mxu0 %vm13739_vm1, %v21311_v30  ;;  %21761 = vst [vmem:[#allocation74_spill] sm:$0xff] %v16697_v45  ;;  %v21767_v13 = vld [vmem:[#allocation135_spill] sm:$0xff] }
 0x14d   :  { %11722 = vmatmul.mubr.msk.f32.gmra.mrb[18].mxu1 %vm1907_vm6, %v3189_v28  ;;  %v16694_v26 = vrot.slane %v3224_v2, %v13786_v14  ;;  %v3242_v28 = vcombine.low %v21765_v61, %v21764_v17  ;;  %v7991_v2 = vrot.slane %v7984_v36, %v13786_v14  ;;  %v3258_v0 = vcombine.low %v21767_v13, %v21766_v42  ;;  %v21771_v17 = vld [vmem:[#allocation141_spill] sm:$0xff] }
 0x14e   :  { %11724 = vmatprep.mubr.msk.f32.mxu1 %vm13739_vm1, %v21311_v30  ;;  %v21775_v42 = vld [vmem:[#allocation145_spill] sm:$0xff]  ;;  %21779 = vst [vmem:[#allocation93_spill] sm:$0xff] %v16747_v43 }
 0x14f   :  { %12384 = vmatmul.mubr.msk.f32.gmra.mrb[62].mxu0 %vm1907_vm6, %v7974_v24  ;;  %21760 = vst [vmem:[#allocation80_spill] sm:$0xff] %v16694_v26  ;;  %v21762_v24 = vld [vmem:[#allocation128_spill] sm:$0xff]  ;;  %v7992_v13 = vcombine.low %v15934_v5, %v7991_v2  ;;  %v21777_v2 = vld [vmem:[#allocation155_spill] sm:$0xff] }
 0x150   :  { %12386 = vmatprep.mubr.msk.f32.mxu0 %vm13739_vm1, %v21311_v30  ;;  %v3241_v22 = vcombine.low %v21763_v59, %v21762_v24  ;;  %v3240_v24 = vcombine.low %v16694_v26, %v16697_v45  ;;  %v21795_v5 = vld [vmem:[#allocation187_spill] sm:$0xff] }
 0x151   :  { %11725 = vmatmul.mubr.msk.f32.gmra.mrb[20].mxu1 %vm1907_vm6, %v3206_v8  ;;  %v7983_v8 = vcombine.low %v7982_v60, %v15896_v56  ;;  %v21770_v60 = vld [vmem:[#allocation144_spill] sm:$0xff] }
 0x152   :  { %11727 = vmatprep.mubr.msk.f32.mxu1 %vm13739_vm1, %v21311_v30  ;;  %v16717_v59 = vrot.slane %v3241_v22, %v13786_v14  ;;  %v3259_v36 = vcombine.low %v21771_v17, %v21770_v60  ;;  %v16733_v22 = vrot.slane %v3258_v0, %v13786_v14  ;;  %v21778_v17 = vld [vmem:[#allocation147_spill] sm:$0xff] }
 0x153   :  { %12387 = vmatmul.mubr.msk.f32.gmra.mrb[64].mxu0 %vm1907_vm6, %v15871_v44  ;;  %v16720_v44 = vrot.slane %v3242_v28, %v13786_v14  ;;  %v21774_v28 = vld [vmem:[#allocation150_spill] sm:$0xff]  ;;  %v3276_v26 = vcombine.low %v21778_v17, %v21777_v2 }
 0x154   :  { %12389 = vmatprep.mubr.msk.f32.mxu0 %vm13739_vm1, %v21311_v30  ;;  %21768 = vst [vmem:[#allocation83_spill] sm:$0xff] %v16717_v59  ;;  %21773 = vst [vmem:[#allocation89_spill] sm:$0xff] %v16733_v22  ;;  %v3275_v45 = vcombine.low %v21775_v42, %v21774_v28  ;;  %v21782_v42 = vld [vmem:[#allocation166_spill] sm:$0xff] }
 0x155   :  { %11728 = vmatmul.mubr.msk.f32.gmra.mrb[22].mxu1 %vm1907_vm6, %v3223_v51  ;;  %21769 = vst [vmem:[#allocation77_spill] sm:$0xff] %v16720_v44  ;;  %v21772_v51 = vld [vmem:[#allocation328_spill] sm:$0xff]  ;;  %v3257_v60 = vcombine.low %v16717_v59, %v16720_v44  ;;  %v21783_v44 = vld [vmem:[#allocation161_spill] sm:$0xff] }
 0x156   :  { %11730 = vmatprep.mubr.msk.f32.mxu1 %vm13739_vm1, %v21311_v30  ;;  %v10883_v61 = vcombine.high %v21772_v51, %v15892_v10  ;;  %v3293_v2 = vcombine.low %v21783_v44, %v21782_v42  ;;  %v16763_v59 = vrot.slane %v3275_v45, %v13786_v14  ;;  %v21787_v45 = vld [vmem:[#allocation168_spill] sm:$0xff]  ;;  %v10884_v44 = vcombine.high %v16030_v41, %v16043_v21  ;;  %v21842_v21 = vld [vmem:[#allocation262_spill] sm:$0xff] }
 0x157   :  { %12390 = vmatmul.mubr.msk.f32.gmra.mrb[66].mxu0 %vm1907_vm6, %v7983_v8  ;;  %v16741_v8 = vrot.slane %v3259_v36, %v13786_v14  ;;  %v21781_v36 = vld [vmem:[#allocation159_spill] sm:$0xff]  ;;  %v2764_v51 = vrot.slane %v21857_v35, 7 }
 0x158   :  { %12392 = vmatprep.mubr.msk.f32.mxu0 %vm13739_vm1, %v21311_v30  ;;  %v8000_v0 = vrot.slane %v10883_v61, %v13786_v14  ;;  %21784 = vst [vmem:[#allocation90_spill] sm:$0xff] %v16763_v59  ;;  %v8002_v61 = vcombine.low %v16004_v31, %v16747_v43  ;;  %v16794_v56 = vrot.slane %v3293_v2, %v13786_v14 }
 0x159   :  { %11731 = vmatmul.mubr.msk.f32.gmra.mrb[24].mxu1 %vm1907_vm6, %v3240_v24  ;;  %21776 = vst [vmem:[#allocation86_spill] sm:$0xff] %v16741_v8  ;;  %v21780_v24 = vld [vmem:[#allocation160_spill] sm:$0xff]  ;;  %v3274_v17 = vcombine.low %v16733_v22, %v16741_v8  ;;  %v21790_v8 = vld [vmem:[#allocation169_spill] sm:$0xff]  ;;  %v16826_v1 = vrot.slane %v10884_v44, %v13786_v14 }
 0x15a   :  { %11733 = vmatprep.mubr.msk.f32.mxu1 %vm13739_vm1, %v21311_v30  ;;  %v3292_v28 = vcombine.low %v21781_v36, %v21780_v24  ;;  %v21788_v36 = vld [vmem:[#allocation167_spill] sm:$0xff]  ;;  %v3310_v24 = vcombine.low %v21790_v8, %v21789_v18  ;;  %21792 = vst [vmem:[#allocation94_spill] sm:$0xff] %v16794_v56  ;;  %v8009_v8 = vrot.slane %v8002_v61, %v13786_v14 }
 0x15b   :  { %12393 = vmatmul.mubr.msk.f32.gmra.mrb[68].mxu0 %vm1907_vm6, %v7992_v13  ;;  %v16766_v13 = vrot.slane %v3276_v26, %v13786_v14  ;;  %v8001_v26 = vcombine.low %v15989_v3, %v8000_v0  ;;  %v3309_v42 = vcombine.low %v21788_v36, %v21787_v45  ;;  %v21794_v0 = vld [vmem:[#allocation181_spill] sm:$0xff]  ;;  %v21796_v45 = vld [vmem:[#allocation182_spill] sm:$0xff] }
 0x15c   :  { %12395 = vmatprep.mubr.msk.f32.mxu0 %vm13739_vm1, %v21311_v30  ;;  %v16791_v22 = vrot.slane %v3292_v28, %v13786_v14  ;;  %v3327_v36 = vcombine.low %v21796_v45, %v21795_v5  ;;  %v3343_v28 = vcombine.low %v21798_v27, %v21797_v63  ;;  %v21801_v5 = vld [vmem:[#allocation192_spill] sm:$0xff]  ;;  %v16823_v37 = vrot.slane %v3310_v24, %v13786_v14  ;;  %v21810_v24 = vld [vmem:[#allocation357_spill] sm:$0xff] }
 0x15d   :  { %11734 = vmatmul.mubr.msk.f32.gmra.mrb[26].mxu1 %vm1907_vm6, %v3257_v60  ;;  %21785 = vst [vmem:[#allocation97_spill] sm:$0xff] %v16766_v13  ;;  %v16777_v60 = vcombine.high %v16116_v25, %v16116_v25  ;;  %v3291_v18 = vcombine.low %v16763_v59, %v16766_v13  ;;  %v21803_v45 = vld [vmem:[#allocation200_spill] sm:$0xff]  ;;  %v21804_v13 = vld [vmem:[#allocation209_spill] sm:$0xff]  ;;  %v21805_v59 = vld [vmem:[#allocation206_spill] sm:$0xff]  ;;  %v16820_v27 = vrot.slane %v3309_v42, %v13786_v14 }
 0x15e   :  { %11736 = vmatprep.mubr.msk.f32.mxu1 %vm13739_vm1, %v21311_v30  ;;  %21791 = vst [vmem:[#allocation106_spill] sm:$0xff] %v16791_v22  ;;  %v3361_v61 = vcombine.low %v21805_v59, %v21804_v13  ;;  %21807 = vst [vmem:[#allocation109_spill] sm:$0xff] %v16823_v37  ;;  %v16836_v13 = vrot.slane %v3327_v36, %v13786_v14  ;;  %v8010_v44 = vcombine.low %v8009_v8, %v21810_v24  ;;  %v21814_v63 = vld [vmem:[#allocation220_spill] sm:$0xff] }
 0x15f   :  { %21786 = vst [vmem:[#allocation96_spill] sm:$0xff] %v16777_v60  ;;  %12396 = vmatmul.mubr.msk.f32.gmra.mrb[70].mxu0 %vm1907_vm6, %v15998_v58  ;;  %v21793_v58 = vld [vmem:[#allocation185_spill] sm:$0xff]  ;;  %v8020_v2 = vcombine.low %v16116_v25, %v16777_v60  ;;  %21806 = vst [vmem:[#allocation112_spill] sm:$0xff] %v16820_v27  ;;  %v16843_v42 = vrot.slane %v3343_v28, %v13786_v14  ;;  %v21819_v28 = vld [vmem:[#allocation356_spill] sm:$0xff] }
 0x160   :  { %12398 = vmatprep.mubr.msk.f32.mxu0 %vm13739_vm1, %v21311_v30  ;;  %v3326_v3 = vcombine.low %v21794_v0, %v21793_v58  ;;  %v21800_v58 = vld [vmem:[#allocation197_spill] sm:$0xff]  ;;  %21809 = vst [vmem:[#allocation110_spill] sm:$0xff] %v16836_v13  ;;  %v16861_v8 = vrot.slane %v3361_v61, %v13786_v14 }
 0x161   :  { %11737 = vmatmul.mubr.msk.f32.gmra.mrb[28].mxu1 %vm1907_vm6, %v3274_v17  ;;  %v3344_v0 = vcombine.low %v21801_v5, %v21800_v58  ;;  %v21802_v17 = vld [vmem:[#allocation201_spill] sm:$0xff]  ;;  %v3308_v58 = vcombine.low %v16791_v22, %v16794_v56  ;;  %21811 = vst [vmem:[#allocation114_spill] sm:$0xff] %v16843_v42  ;;  %v21812_v5 = vld [vmem:[#allocation214_spill] sm:$0xff]  ;;  %v21815_v56 = vld [vmem:[#allocation215_spill] sm:$0xff]  ;;  %v16852_v36 = vrot.slane %v8020_v2, %v13786_v14 }
 0x162   :  { %11739 = vmatprep.mubr.msk.f32.mxu1 %vm13739_vm1, %v21311_v30  ;;  %v3360_v6 = vcombine.low %v21803_v45, %v21802_v17  ;;  %v16833_v59 = vrot.slane %v3326_v3, %v13786_v14  ;;  %v21813_v17 = vld [vmem:[#allocation210_spill] sm:$0xff]  ;;  %v3378_v3 = vcombine.low %v21815_v56, %v21814_v63  ;;  %21818 = vst [vmem:[#allocation117_spill] sm:$0xff] %v16861_v8  ;;  %v21820_v63 = vld [vmem:[#allocation369_spill] sm:$0xff] }
 0x163   :  { %12399 = vmatmul.mubr.msk.f32.gmra.mrb[72].mxu0 %vm1907_vm6, %v8001_v26  ;;  %v10885_v26 = vcombine.high %v16185_v16, %v16152_v55  ;;  %v3377_v45 = vcombine.low %v21813_v17, %v21812_v5  ;;  %v16855_v22 = vrot.slane %v3344_v0, %v13786_v14  ;;  %v3325_v56 = vcombine.low %v16820_v27, %v16823_v37  ;;  %v21821_v2 = vld [vmem:[#allocation226_spill] sm:$0xff]  ;;  %v21824_v37 = vld [vmem:[#allocation231_spill] sm:$0xff] }
 0x164   :  { %12401 = vmatprep.mubr.msk.f32.mxu0 %vm13739_vm1, %v21311_v30  ;;  %21808 = vst [vmem:[#allocation113_spill] sm:$0xff] %v16833_v59  ;;  %v8019_v5 = vcombine.low %v16826_v1, %v21820_v63  ;;  %v21822_v17 = vld [vmem:[#allocation222_spill] sm:$0xff]  ;;  %v21825_v27 = vld [vmem:[#allocation223_spill] sm:$0xff] }
 0x165   :  { %11740 = vmatmul.mubr.msk.f32.gmra.mrb[30].mxu1 %vm1907_vm6, %v3291_v18  ;;  %21816 = vst [vmem:[#allocation115_spill] sm:$0xff] %v16855_v22  ;;  %v16858_v18 = vrot.slane %v3360_v6, %v13786_v14  ;;  %v3394_v24 = vcombine.low %v21822_v17, %v21821_v2  ;;  %v21823_v0 = vld [vmem:[#allocation246_spill] sm:$0xff]  ;;  %v3342_v6 = vcombine.low %v16833_v59, %v16836_v13  ;;  %v21828_v13 = vld [vmem:[#allocation385_spill] sm:$0xff] }
 0x166   :  { %11742 = vmatprep.mubr.msk.f32.mxu1 %vm13739_vm1, %v21311_v30  ;;  %v2714_v62 = vrot.slane %v21823_v0, 7  ;;  %v3395_v4 = vcombine.low %v21825_v27, %v21824_v37  ;;  %v74_v1 = vld [vmem:[%s20377_s0 + $0x1e0] sm:$0xff]  ;;  %v16887_v2 = vrot.slane %v3377_v45, %v13786_v14  ;;  %v16890_v17 = vrot.slane %v3378_v3, %v13786_v14  ;;  %v21831_v59 = vld [vmem:[#allocation233_spill] sm:$0xff]  ;;  %v21832_v37 = vld [vmem:[#allocation376_spill] sm:$0xff] }
 0x167   :  { %21817 = vst [vmem:[#allocation123_spill] sm:$0xff] %v16858_v18  ;;  %12402 = vmatmul.mubr.msk.f32.gmra.mrb[74].mxu0 %vm1907_vm6, %v21819_v28  ;;  %v16878_v28 = vrot.slane %v10885_v26, %v13786_v14  ;;  %v16894_v61 = vcombine.high %v21828_v13, %v21828_v13  ;;  %v21830_v26 = vld [vmem:[#allocation237_spill] sm:$0xff]  ;;  %v21834_v63 = vld [vmem:[#allocation238_spill] sm:$0xff]  ;;  %v16910_v29 = vrot.slane %v3394_v24, %v13786_v14  ;;  %v75_v27 = vld [vmem:[%s20377_s0 + $0x1e8] sm:$0xff] }
 0x168   :  { %12404 = vmatprep.mubr.msk.f32.mxu0 %vm13739_vm1, %v21311_v30  ;;  %21826 = vst [vmem:[#allocation128_spill] sm:$0xff] %v16887_v2  ;;  %21827 = vst [vmem:[#allocation124_spill] sm:$0xff] %v16890_v17  ;;  %v3411_v0 = vcombine.low %v21831_v59, %v21830_v26  ;;  %v21833_v3 = vld [vmem:[#allocation241_spill] sm:$0xff]  ;;  %v2716_v59 = vrot.slane %v2714_v62, 2  ;;  %v21836_v26 = vld [vmem:[#allocation250_spill] sm:$0xff]  ;;  %v5643_v55 = vcombine.high %v74_v1, %v74_v1 }
 0x169   :  { %11743 = vmatmul.mubr.msk.f32.gmra.mrb[32].mxu1 %vm1907_vm6, %v3308_v58  ;;  %21829 = vst [vmem:[#allocation134_spill] sm:$0xff] %v16894_v61  ;;  %v3359_v58 = vcombine.low %v16843_v42, %v16855_v22  ;;  %v3412_v39 = vcombine.low %v21834_v63, %v21833_v3  ;;  %21835 = vst [vmem:[#allocation133_spill] sm:$0xff] %v16910_v29  ;;  %v2717_v40 = vrot.slane %v21836_v26, 7  ;;  %v21837_v45 = vld [vmem:[#allocation383_spill] sm:$0xff]  ;;  %v21840_v3 = vld [vmem:[#allocation257_spill] sm:$0xff]  ;;  %v2726_v22 = vrot.slane %v21842_v21, 7 }
 0x16a   :  { %11745 = vmatprep.mubr.msk.f32.mxu1 %vm13739_vm1, %v21311_v30  ;;  %v16921_v63 = vrot.slane %v3395_v4, %v13786_v14  ;;  %v2723_v42 = vrot.slane %v21840_v3, 7  ;;  %v8038_v16 = vcombine.low %v21828_v13, %v16894_v61  ;;  %v16931_v60 = vrot.slane %v3411_v0, %v13786_v14  ;;  %v21846_v61 = vld [vmem:[#allocation365_spill] sm:$0xff]  ;;  %v21848_v13 = vld [vmem:[#allocation258_spill] sm:$0xff] }
 0x16b   :  { %12405 = vmatmul.mubr.msk.f32.gmra.mrb[76].mxu0 %vm1907_vm6, %v8010_v44  ;;  %v21839_v44 = vld [vmem:[#allocation255_spill] sm:$0xff]  ;;  %v16937_v4 = vrot.slane %v3412_v39, %v13786_v14  ;;  %v16944_v26 = vrot.slane %v74_v1, %v13786_v14  ;;  %v5660_v3 = vcombine.high %v75_v27, %v75_v27  ;;  %v2718_v0 = vsel %vm13859_vm9, %v2716_v59, %v2717_v40  ;;  %v21850_v59 = vld [vmem:[#allocation244_spill] sm:$0xff] }
 0x16c   :  { %12407 = vmatprep.mubr.msk.f32.mxu0 %vm13739_vm1, %v21311_v30  ;;  %21838 = vst [vmem:[#allocation138_spill] sm:$0xff] %v16921_v63  ;;  %v2720_v24 = vrot.slane %v21839_v44, 7  ;;  %21841 = vst [vmem:[#allocation135_spill] sm:$0xff] %v16931_v60  ;;  %v21844_v44 = vrot.slane %v21799_v47, 9  ;;  %v16951_v21 = vrot.slane %v5643_v55, %v13786_v14  ;;  %v2719_v39 = vrot.slane %v2717_v40, 2  ;;  %v21849_v40 = vld [vmem:[#allocation245_spill] sm:$0xff] }
 0x16d   :  { %11746 = vmatmul.mubr.msk.f32.gmra.mrb[34].mxu1 %vm1907_vm6, %v3325_v56  ;;  %21843 = vst [vmem:[#allocation144_spill] sm:$0xff] %v16937_v4  ;;  %21845 = vst [vmem:[#allocation141_spill] sm:$0xff] %v16944_v26  ;;  %v2383_v47 = vcombine.high %v21848_v13, %v21848_v13  ;;  %v16965_v55 = vrot.slane %v8038_v16, %v13786_v14  ;;  %v3428_v25 = vcombine.low %v21850_v59, %v21849_v40 }
 0x16e   :  { %11748 = vmatprep.mubr.msk.f32.mxu1 %vm13739_vm1, %v21311_v30  ;;  %v2715_v56 = vsel %vm13859_vm9, %v21844_v44, %v2714_v62  ;;  %21847 = vst [vmem:[#allocation150_spill] sm:$0xff] %v16951_v21  ;;  %v2722_v1 = vrot.slane %v2720_v24, 2  ;;  %v2725_v44 = vrot.slane %v2723_v42, 2  ;;  %v2728_v43 = vrot.slane %v2726_v22, 2 }
 0x16f   :  { %12408 = vmatmul.mubr.msk.f32.gmra.mrb[78].mxu0 %vm1907_vm6, %v21846_v61  ;;  %v16961_v61 = vcombine.high %v15524_v19, %v15524_v19  ;;  %v2729_v41 = vrot.slane %v21848_v13, 7  ;;  %v3429_v62 = vcombine.low %v2715_v56, %v2718_v0  ;;  %v10886_v31 = vcombine.high %v16327_v32, %v16944_v26  ;;  %v21856_v26 = vld [vmem:[#allocation274_spill] sm:$0xff] }
 0x170   :  { %12410 = vmatprep.mubr.msk.f32.mxu0 %vm13739_vm1, %v21311_v30  ;;  %v16975_v10 = vrot.slane %v75_v27, %v13786_v14  ;;  %v16983_v16 = vcombine.high %v16951_v21, %v16951_v21  ;;  %v2721_v40 = vsel %vm13859_vm9, %v2719_v39, %v2720_v24  ;;  %v2732_v56 = vrot.slane %v2383_v47, 7  ;;  %v21855_v39 = vld [vmem:[#allocation276_spill] sm:$0xff] }
 0x171   :  { %11749 = vmatmul.mubr.msk.f32.gmra.mrb[36].mxu1 %vm1907_vm6, %v3342_v6  ;;  %v16978_v6 = vrot.slane %v5660_v3, %v13786_v14  ;;  %v2731_v59 = vrot.slane %v2729_v41, 2  ;;  %v2724_v27 = vsel %vm13859_vm9, %v2722_v1, %v2723_v42  ;;  %v2727_v3 = vsel %vm13859_vm9, %v2725_v44, %v2726_v22  ;;  %v21862_v44 = vld [vmem:[#allocation278_spill] sm:$0xff] }
 0x172   :  { %11751 = vmatprep.mubr.msk.f32.mxu1 %vm13739_vm1, %v21311_v30  ;;  %21851 = vst [vmem:[#allocation145_spill] sm:$0xff] %v16975_v10  ;;  %21853 = vst [vmem:[#allocation147_spill] sm:$0xff] %v16983_v16  ;;  %v2754_v13 = vrot.slane %v16961_v61, 7  ;;  %v2730_v24 = vsel %vm13859_vm9, %v2728_v43, %v2729_v41  ;;  %v2758_v47 = vrot.slane %v21855_v39, 7  ;;  %v2761_v32 = vrot.slane %v21856_v26, 7 }
 0x173   :  { %21852 = vst [vmem:[#allocation155_spill] sm:$0xff] %v16978_v6  ;;  %12411 = vmatmul.mubr.msk.f32.gmra.mrb[80].mxu0 %vm1907_vm6, %v8019_v5  ;;  %v21854_v5 = vrot.slane %v15524_v19, 7  ;;  %v17005_v22 = vrot.slane %v3428_v25, %v13786_v14  ;;  %v17008_v42 = vrot.slane %v3429_v62, %v13786_v14  ;;  %v17016_v41 = vcombine.high %v16978_v6, %v16978_v6 }
 0x174   :  { %12413 = vmatprep.mubr.msk.f32.mxu0 %vm13739_vm1, %v21311_v30  ;;  %v21861_v43 = vcombine.low %v21832_v37, %v16852_v36  ;;  %v8048_v25 = vcombine.low %v16951_v21, %v16983_v16  ;;  %v17025_v1 = vrot.slane %v10886_v31, %v13786_v14  ;;  %v2733_v62 = vsel %vm13859_vm9, %v2731_v59, %v2732_v56  ;;  %v21865_v21 = vld [vmem:[#allocation275_spill] sm:$0xff] }
 0x175   :  { %v2753_v0 = vrot.slane %v21854_v5, 2  ;;  %11752 = vmatmul.mubr.msk.f32.gmra.mrb[38].mxu1 %vm1907_vm6, %v3359_v58  ;;  %21858 = vst [vmem:[#allocation160_spill] sm:$0xff] %v17005_v22  ;;  %v17012_v58 = vcombine.high %v16975_v10, %v16975_v10  ;;  %21860 = vst [vmem:[#allocation166_spill] sm:$0xff] %v17016_v41  ;;  %v2770_v5 = vrot.slane %v21862_v44, 7  ;;  %v3445_v35 = vcombine.low %v2721_v40, %v2724_v27  ;;  %v21866_v27 = vld [vmem:[#allocation269_spill] sm:$0xff] }
 0x176   :  { %11754 = vmatprep.mubr.msk.f32.mxu1 %vm13739_vm1, %v21311_v30  ;;  %v3446_v39 = vcombine.low %v2727_v3, %v2730_v24  ;;  %v21864_v31 = vcombine.low %v16858_v18, %v16861_v8  ;;  %v2760_v16 = vrot.slane %v2758_v47, 2  ;;  %v2763_v59 = vrot.slane %v2761_v32, 2 }
 0x177   :  { %21859 = vst [vmem:[#allocation159_spill] sm:$0xff] %v17012_v58  ;;  %12414 = vmatmul.mubr.msk.f32.gmra.mrb[82].mxu0 %vm1907_vm6, %v21861_v43  ;;  %v17034_v36 = vsel %vm13859_vm9, %v2753_v0, %v2754_v13  ;;  %v10645_v43 = vrot.slane %v15550_v34, 9  ;;  %v2766_v56 = vrot.slane %v2764_v51, 2  ;;  %v2767_v44 = vrot.slane %v21865_v21, 7  ;;  %v21867_v0 = vld [vmem:[#allocation271_spill] sm:$0xff] }
 0x178   :  { %12416 = vmatprep.mubr.msk.f32.mxu0 %vm13739_vm1, %v21311_v30  ;;  %21863 = vst [vmem:[#allocation161_spill] sm:$0xff] %v17034_v36  ;;  %v8064_v40 = vcombine.low %v16975_v10, %v17012_v58  ;;  %v8065_v13 = vcombine.low %v16978_v6, %v17016_v41  ;;  %v3462_v3 = vcombine.low %v2733_v62, %v21866_v27  ;;  %v2772_v21 = vrot.slane %v2770_v5, 2  ;;  %v21883_v58 = vld [vmem:[#allocation47_spill] sm:$0xff]  ;;  %v21893_v10 = vld [vmem:[#allocation286_spill] sm:$0xff] }
 0x179   :  { %11755 = vmatmul.mubr.msk.f32.gmra.mrb[40].mxu1 %vm1907_vm6, %v21864_v31  ;;  %v3463_v24 = vcombine.low %v21867_v0, %v16643_v23  ;;  %v21868_v31 = vld [vmem:[#allocation387_spill] sm:$0xff]  ;;  %v3479_v34 = vcombine.low %v16647_v11, %v16672_v15  ;;  %v3480_v8 = vcombine.low %v16678_v33, %v17034_v36  ;;  %v2769_v18 = vrot.slane %v2767_v44, 2  ;;  %v21897_v15 = vld [vmem:[#allocation289_spill] sm:$0xff] }
 0x17a   :  { %11757 = vmatprep.mubr.msk.f32.mxu1 %vm13739_vm1, %v21311_v30  ;;  %v17060_v41 = vrot.slane %v8048_v25, %v13786_v14  ;;  %v17063_v62 = vrot.slane %v3445_v35, %v13786_v14  ;;  %v17066_v27 = vrot.slane %v3446_v39, %v13786_v14  ;;  %v17070_v0 = vsel %vm13859_vm9, %v10645_v43, %v2758_v47  ;;  %v21898_v23 = vld [vmem:[#allocation299_spill] sm:$0xff] }
 0x17b   :  { %12417 = vmatmul.mubr.msk.f32.gmra.mrb[84].mxu0 %vm1907_vm6, %v21868_v31  ;;  %21869 = vst [vmem:[#allocation168_spill] sm:$0xff] %v17070_v0  ;;  %v21870_v31 = vcombine.low %v16887_v2, %v16890_v17  ;;  %v17078_v36 = vsel %vm13859_vm9, %v2760_v16, %v2761_v32  ;;  %v17082_v35 = vsel %vm13859_vm9, %v2763_v59, %v2764_v51  ;;  %v2773_v47 = vrot.slane %v15577_v9, 7  ;;  %v21900_v17 = vld [vmem:[#allocation295_spill] sm:$0xff]  ;;  %v21901_v2 = vld [vmem:[#allocation297_spill] sm:$0xff] }
 0x17c   :  { %12419 = vmatprep.mubr.msk.f32.mxu0 %vm13739_vm1, %v21311_v30  ;;  %21871 = vst [vmem:[#allocation167_spill] sm:$0xff] %v17078_v36  ;;  %21872 = vst [vmem:[#allocation179_spill] sm:$0xff] %v17082_v35  ;;  %v17086_v39 = vsel %vm13859_vm9, %v2766_v56, %v2767_v44  ;;  %v17092_v25 = vrot.slane %v8064_v40, %v13786_v14  ;;  %v17095_v43 = vrot.slane %v8065_v13, %v13786_v14 }
 0x17d   :  { %11758 = vmatmul.mubr.msk.f32.gmra.mrb[42].mxu1 %vm1907_vm6, %v21870_v31  ;;  %21873 = vst [vmem:[#allocation169_spill] sm:$0xff] %v17086_v39  ;;  %v3470_v32 = vrot.slane %v3462_v3, %v13786_v14  ;;  %v3477_v51 = vrot.slane %v3463_v24, %v13786_v14  ;;  %v21874_v16 = vcombine.low %v21837_v45, %v16878_v28  ;;  %v2775_v13 = vrot.slane %v2773_v47, 2  ;;  %v21878_v3 = vld [vmem:[#allocation279_spill] sm:$0xff]  ;;  %v21879_v24 = vld [vmem:[#allocation280_spill] sm:$0xff] }
 0x17e   :  { %11760 = vmatprep.mubr.msk.f32.mxu1 %vm13739_vm1, %v21311_v30  ;;  %v17104_v44 = vrot.slane %v3479_v34, %v13786_v14  ;;  %v17107_v59 = vrot.slane %v3480_v8, %v13786_v14  ;;  %v17111_v56 = vsel %vm13859_vm9, %v2769_v18, %v2770_v5  ;;  %v17115_v40 = vsel %vm13859_vm9, %v2772_v21, %v2773_v47 }
 0x17f   :  { %12420 = vmatmul.mubr.msk.f32.gmra.mrb[86].mxu0 %vm1907_vm6, %v21874_v16  ;;  %21875 = vst [vmem:[#allocation185_spill] sm:$0xff] %v17111_v56  ;;  %21876 = vst [vmem:[#allocation181_spill] sm:$0xff] %v17115_v40  ;;  %v8046_v28 = vcombine.low %v16965_v55, %v16376_v57  ;;  %v3427_v34 = vcombine.low %v16931_v60, %v16937_v4  ;;  %v3496_v8 = vcombine.low %v17070_v0, %v17078_v36  ;;  %v21881_v0 = vld [vmem:[#allocation34_spill] sm:$0xff] }
 0x180   :  { %12422 = vmatprep.mubr.msk.f32.mxu0 %vm13739_vm1, %v21311_v30  ;;  %v3497_v18 = vcombine.low %v17082_v35, %v17086_v39  ;;  %v21877_v5 = vcombine.low %v16910_v29, %v16921_v63  ;;  %v3444_v21 = vcombine.low %v17005_v22, %v17008_v42  ;;  %v10646_v55 = vrot.slane %v21878_v3, 9  ;;  %v21880_v35 = vld [vmem:[#allocation46_spill] sm:$0xff] }
 0x181   :  { %v2780_v31 = vrot.slane %v21879_v24, 7  ;;  %v3461_v39 = vcombine.low %v17063_v62, %v17066_v27  ;;  %v3513_v42 = vcombine.low %v17111_v56, %v17115_v40  ;;  %v17147_v47 = vcombine.low %v3470_v32, %v3477_v51  ;;  %v21882_v24 = vld [vmem:[#allocation55_spill] sm:$0xff]  ;;  %v21887_v32 = vld [vmem:[#allocation57_spill] sm:$0xff]  ;;  %v21899_v22 = vld [vmem:[#allocation294_spill] sm:$0xff] }
 0x182   :  { %11761 = vmatmul.mubr.msk.f32.gmra.mrb[44].mxu1 %vm1907_vm6, %v21877_v5  ;;  %v17158_v27 = vrot.slane %v3496_v8, %v13786_v14  ;;  %v17161_v5 = vrot.slane %v3497_v18, %v13786_v14  ;;  %v21888_v40 = vld [vmem:[#allocation283_spill] sm:$0xff]  ;;  %v21889_v16 = vrot.slane %v16488_v53, 7  ;;  %v2789_v33 = vrot.slane %v21893_v10, 7 }
 0x183   :  { %11763 = vmatprep.mubr.msk.f32.mxu1 %vm13739_vm1, %v21311_v30  ;;  %12423 = vmatmul.mubr.msk.f32.gmra.mrb[88].mxu0 %vm1907_vm6, %v16373_v20  ;;  %v21886_v20 = vld [vmem:[#allocation64_spill] sm:$0xff]  ;;  %v2783_v36 = vrot.slane %v21888_v40, 7  ;;  %v17175_v8 = vsel %vm13859_vm9, %v10646_v55, %v2780_v31  ;;  %v21892_v56 = vld [vmem:[#allocation287_spill] sm:$0xff]  ;;  %v17182_v51 = vrot.slane %v3513_v42, %v13786_v14  ;;  %v17186_v53 = vcombine.high %v15650_v49, %v15650_v49  ;;  %v21905_v40 = vld [vmem:[#allocation66_spill] sm:$0xff] }
 0x184   :  { %12425 = vmatprep.mubr.msk.f32.mxu0 %vm13739_vm1, %v21311_v30  ;;  %21884 = vst [vmem:[#allocation187_spill] sm:$0xff] %v17158_v27  ;;  %21885 = vst [vmem:[#allocation182_spill] sm:$0xff] %v17161_v5  ;;  %v17171_v62 = vsel %vm13859_vm9, %v2775_v13, %v21889_v16  ;;  %v2786_v18 = vrot.slane %v21892_v56, 7  ;;  %v21896_v13 = vld [vmem:[#allocation292_spill] sm:$0xff]  ;;  %v2782_v55 = vrot.slane %v2780_v31, 2  ;;  %v2792_v11 = vrot.slane %v21897_v15, 7 }
 0x185   :  { %21890 = vst [vmem:[#allocation189_spill] sm:$0xff] %v17171_v62  ;;  %21891 = vst [vmem:[#allocation188_spill] sm:$0xff] %v17175_v8  ;;  %v2802_v16 = vrot.slane %v21896_v13, 7  ;;  %v2808_v4 = vrot.slane %v21898_v23, 7  ;;  %v2811_v63 = vrot.slane %v21899_v22, 7  ;;  %v3514_v42 = vcombine.low %v17171_v62, %v17175_v8 }
 0x186   :  { %11764 = vmatmul.mubr.msk.f32.gmra.mrb[46].mxu1 %vm1907_vm6, %v3427_v34  ;;  %21894 = vst [vmem:[#allocation243_spill] sm:$0xff] %v17182_v51  ;;  %21895 = vst [vmem:[#allocation197_spill] sm:$0xff] %v17186_v53  ;;  %v2795_v34 = vrot.slane %v15650_v49, 7  ;;  %v2785_v60 = vrot.slane %v2783_v36, 2  ;;  %v2805_v29 = vrot.slane %v21900_v17, 7  ;;  %v2814_v13 = vrot.slane %v21901_v2, 7 }
 0x187   :  { %11766 = vmatprep.mubr.msk.f32.mxu1 %vm13739_vm1, %v21311_v30  ;;  %12426 = vmatmul.mubr.msk.f32.gmra.mrb[90].mxu0 %vm1907_vm6, %v8046_v28  ;;  %v2788_v28 = vrot.slane %v2786_v18, 2  ;;  %v2791_v31 = vrot.slane %v2789_v33, 2  ;;  %v2794_v49 = vrot.slane %v2792_v11, 2  ;;  %v10647_v23 = vrot.slane %v15657_v52, 9 }
 0x188   :  { %12428 = vmatprep.mubr.msk.f32.mxu0 %vm13739_vm1, %v21311_v30  ;;  %v2797_v22 = vrot.slane %v2795_v34, 2  ;;  %v2798_v10 = vrot.slane %v17186_v53, 7  ;;  %v2804_v15 = vrot.slane %v2802_v16, 2  ;;  %v2807_v8 = vrot.slane %v2805_v29, 2  ;;  %v21904_v53 = vld [vmem:[#allocation75_spill] sm:$0xff] }
 0x189   :  { %v2810_v2 = vrot.slane %v2808_v4, 2  ;;  %v2813_v52 = vrot.slane %v2811_v63, 2  ;;  %v17217_v17 = vsel %vm13859_vm9, %v2785_v60, %v2786_v18  ;;  %v2817_v3 = vrot.slane %v15710_v54, 7 }
 0x18a   :  { %11767 = vmatmul.mubr.msk.f32.gmra.mrb[48].mxu1 %vm1907_vm6, %v3444_v21  ;;  %v17211_v21 = vsel %vm13859_vm9, %v2782_v55, %v2783_v36  ;;  %21903 = vst [vmem:[#allocation201_spill] sm:$0xff] %v17217_v17  ;;  %v17224_v36 = vrot.slane %v3514_v42, %v13786_v14  ;;  %v17228_v55 = vsel %vm13859_vm9, %v2788_v28, %v2789_v33  ;;  %v21922_v42 = vld [vmem:[#allocation305_spill] sm:$0xff] }
 0x18b   :  { %11769 = vmatprep.mubr.msk.f32.mxu1 %vm13739_vm1, %v21311_v30  ;;  %12429 = vmatmul.mubr.msk.f32.gmra.mrb[92].mxu0 %vm1907_vm6, %v16416_v12  ;;  %21902 = vst [vmem:[#allocation192_spill] sm:$0xff] %v17211_v21  ;;  %v2816_v12 = vrot.slane %v2814_v13, 2  ;;  %21907 = vst [vmem:[#allocation209_spill] sm:$0xff] %v17228_v55  ;;  %v17232_v62 = vsel %vm13859_vm9, %v2791_v31, %v2792_v11  ;;  %v17236_v60 = vsel %vm13859_vm9, %v2794_v49, %v2795_v34  ;;  %v21920_v34 = vld [vmem:[#allocation302_spill] sm:$0xff] }
 0x18c   :  { %12431 = vmatprep.mubr.msk.f32.mxu0 %vm13739_vm1, %v21311_v30  ;;  %21906 = vst [vmem:[#allocation200_spill] sm:$0xff] %v17224_v36  ;;  %21908 = vst [vmem:[#allocation206_spill] sm:$0xff] %v17232_v62  ;;  %v17246_v18 = vsel %vm13859_vm9, %v10647_v23, %v2802_v16  ;;  %v17250_v33 = vsel %vm13859_vm9, %v2804_v15, %v2805_v29  ;;  %v17254_v11 = vsel %vm13859_vm9, %v2807_v8, %v2808_v4  ;;  %v21917_v29 = vld [vmem:[#allocation303_spill] sm:$0xff] }
 0x18d   :  { %21909 = vst [vmem:[#allocation214_spill] sm:$0xff] %v17236_v60  ;;  %21911 = vst [vmem:[#allocation220_spill] sm:$0xff] %v17246_v18  ;;  %v21914_v49 = vcombine.low %v17025_v1, %v17060_v41  ;;  %v17266_v23 = vsel %vm13859_vm9, %v2813_v52, %v2814_v13  ;;  %v2824_v15 = vrot.slane %v21917_v29, 7  ;;  %v17273_v4 = vsel %vm13859_vm9, %v2816_v12, %v2817_v3  ;;  %v21919_v1 = vld [vmem:[#allocation300_spill] sm:$0xff] }
 0x18e   :  { %11770 = vmatmul.mubr.msk.f32.gmra.mrb[50].mxu1 %vm1907_vm6, %v3461_v39  ;;  %v17242_v39 = vsel %vm13859_vm9, %v2797_v22, %v2798_v10  ;;  %21912 = vst [vmem:[#allocation215_spill] sm:$0xff] %v17250_v33  ;;  %21913 = vst [vmem:[#allocation356_spill] sm:$0xff] %v17254_v11  ;;  %v17262_v10 = vsel %vm13859_vm9, %v2810_v2, %v2811_v63  ;;  %v2819_v22 = vrot.slane %v2817_v3, 2  ;;  %v10648_v8 = vrot.slane %v21919_v1, 9  ;;  %v21921_v2 = vld [vmem:[#allocation301_spill] sm:$0xff] }
 0x18f   :  { %11772 = vmatprep.mubr.msk.f32.mxu1 %vm13739_vm1, %v21311_v30  ;;  %21910 = vst [vmem:[#allocation210_spill] sm:$0xff] %v17242_v39  ;;  %12432 = vmatmul.mubr.msk.f32.gmra.mrb[94].mxu0 %vm1907_vm6, %v21914_v49  ;;  %21915 = vst [vmem:[#allocation226_spill] sm:$0xff] %v17262_v10  ;;  %v2827_v16 = vrot.slane %v21920_v34, 7  ;;  %v2833_v63 = vrot.slane %v21921_v2, 7  ;;  %v3530_v52 = vcombine.low %v17211_v21, %v17217_v17  ;;  %v2836_v28 = vrot.slane %v21922_v42, 7  ;;  %v21923_v49 = vld [vmem:[#allocation308_spill] sm:$0xff] }
 0x190   :  { %21916 = vst [vmem:[#allocation222_spill] sm:$0xff] %v17266_v23  ;;  %12434 = vmatprep.mubr.msk.f32.mxu0 %vm13739_vm1, %v21311_v30  ;;  %21918 = vst [vmem:[#allocation231_spill] sm:$0xff] %v17273_v4  ;;  %v17284_v13 = vcombine.high %v15758_v50, %v15758_v50  ;;  %v2839_v3 = vrot.slane %v15758_v50, 7  ;;  %v3531_v31 = vcombine.low %v17228_v55, %v17232_v62  ;;  %v2830_v56 = vrot.slane %v21923_v49, 7 }
 0x191   :  { %v3548_v12 = vcombine.low %v17246_v18, %v17250_v33  ;;  %v21924_v17 = vcombine.low %v17092_v25, %v17095_v43  ;;  %v3564_v21 = vcombine.low %v17254_v11, %v17262_v10  ;;  %v3565_v29 = vcombine.low %v17266_v23, %v17273_v4  ;;  %v85_v4 = vld [vmem:[%s20376_s1 + $0x1c] sm:$0x7] }
 0x192   :  { %11773 = vmatmul.mubr.msk.f32.gmra.mrb[52].mxu1 %vm1907_vm6, %v17147_v47  ;;  %v3547_v47 = vcombine.low %v17236_v60, %v17242_v39  ;;  %v21925_v62 = vrot.slane %v16570_v48, 7  ;;  %v2826_v33 = vrot.slane %v2824_v15, 2  ;;  %v17315_v43 = vsel %vm13859_vm9, %v10648_v8, %v2824_v15  ;;  %v21934_v60 = vld [vmem:[#allocation33_spill] sm:$0xff] }
 0x193   :  { %11775 = vmatprep.mubr.msk.f32.mxu1 %vm13739_vm1, %v21311_v30  ;;  %12435 = vmatmul.mubr.msk.f32.gmra.mrb[96].mxu0 %vm1907_vm6, %v21924_v17  ;;  %21927 = vst [vmem:[#allocation237_spill] sm:$0xff] %v17315_v43  ;;  %v2829_v17 = vrot.slane %v2827_v16, 2  ;;  %v2832_v18 = vrot.slane %v2830_v56, 2  ;;  %v2835_v10 = vrot.slane %v2833_v63, 2  ;;  %v21928_v48 = vcombine.low %v17104_v44, %v17107_v59 }
 0x194   :  { %v17309_v39 = vsel %vm13859_vm9, %v2819_v22, %v21925_v62  ;;  %12439 = vmatprep.mubr.msk.f32.mxu0 %vm13739_vm1, %v21311_v30  ;;  %v3529_v62 = vcombine.low %v17182_v51, %v17224_v36  ;;  %v2838_v22 = vrot.slane %v2836_v28, 2  ;;  %v2841_v23 = vrot.slane %v2839_v3, 2 }
 0x195   :  { %21926 = vst [vmem:[#allocation223_spill] sm:$0xff] %v17309_v39  ;;  %v2842_v15 = vrot.slane %v17284_v13, 7  ;;  %v17330_v8 = vrot.slane %v3530_v52, %v13786_v14  ;;  %v17333_v11 = vrot.slane %v3531_v31, %v13786_v14  ;;  %v17336_v44 = vrot.slane %v3547_v47, %v13786_v14 }
 0x196   :  { %11776 = vmatmul.mubr.msk.f32.gmra.mrb[54].mxu1 %vm1907_vm6, %v21928_v48  ;;  %v17339_v59 = vrot.slane %v3548_v12, %v13786_v14  ;;  %v21933_v48 = vld [vmem:[#allocation28_spill] sm:$0xff]  ;;  %v17346_v36 = vrot.slane %v3564_v21, %v13786_v14  ;;  %v17349_v52 = vrot.slane %v3565_v29, %v13786_v14  ;;  %v17353_v31 = vsel %vm13859_vm9, %v2826_v33, %v2827_v16  ;;  %v21942_v33 = vld [vmem:[#allocation313_spill] sm:$0xff]  ;;  %v21947_v12 = vld [vmem:[#allocation315_spill] sm:$0xff] }
 0x197   :  { %11778 = vmatprep.mubr.msk.f32.mxu1 %vm13739_vm1, %v21311_v30  ;;  %21929 = vst [vmem:[#allocation233_spill] sm:$0xff] %v17330_v8  ;;  %21930 = vst [vmem:[#allocation376_spill] sm:$0xff] %v17333_v11  ;;  %v21935_v55 = vcombine.low %v21933_v48, %v21934_v60  ;;  %v3581_v47 = vcombine.low %v17309_v39, %v17315_v43  ;;  %v17366_v21 = vsel %vm13859_vm9, %v2832_v18, %v2833_v63  ;;  %v21946_v18 = vld [vmem:[#allocation312_spill] sm:$0xff]  ;;  %v21949_v48 = vld [vmem:[#allocation78_spill] sm:$0xff] }
 0x198   :  { %21931 = vst [vmem:[#allocation241_spill] sm:$0xff] %v17336_v44  ;;  %21932 = vst [vmem:[#allocation238_spill] sm:$0xff] %v17339_v59  ;;  %v17370_v60 = vsel %vm13859_vm9, %v2835_v10, %v2836_v28  ;;  %v2846_v29 = vrot.slane %v21942_v33, 7  ;;  %v17379_v16 = vsel %vm13859_vm9, %v2838_v22, %v2839_v3  ;;  %v2849_v63 = vrot.slane %v21946_v18, 7  ;;  %v21950_v22 = vld [vmem:[#allocation95_spill] sm:$0xff]  ;;  %v21957_v43 = vld [vmem:[#allocation314_spill] sm:$0xff] }
 0x199   :  { %12440 = vmatmul.mubr.msk.f32.vlgmr.msra.gmra.mrb[0].mxu0 %vm1907_vm6, %v21935_v55  ;;  %21936 = vst [vmem:[#allocation383_spill] sm:$0xff] %v17346_v36  ;;  %21937 = vst [vmem:[#allocation365_spill] sm:$0xff] %v17349_v52  ;;  %v17362_v55 = vsel %vm13859_vm9, %v2829_v17, %v2830_v56  ;;  %v17383_v56 = vsel %vm13859_vm9, %v2841_v23, %v2842_v15  ;;  %v2852_v10 = vrot.slane %v21947_v12, 7  ;;  %v21948_v17 = vld [vmem:[#allocation84_spill] sm:$0xff]  ;;  %v21952_v23 = vld [vmem:[#allocation319_spill] sm:$0xff] }
 0x19a   :  { %21938 = vst [vmem:[#allocation245_spill] sm:$0xff] %v17353_v31  ;;  %12587 = vmatpush3.msk.msra.mxu0 %vm2006_vm0, %v85_v4  ;;  %12442 = vmatprep.mubr.msk.f32.mxu0 %vm13739_vm1, %v21311_v30  ;;  %21939 = vst [vmem:[#allocation244_spill] sm:$0xff] %v17362_v55  ;;  %v21943_v4 = vcombine.low %v17158_v27, %v17161_v5  ;;  %v3546_v28 = vcombine.low %v17330_v8, %v17333_v11  ;;  %v2858_v15 = vrot.slane %v21952_v23, 7  ;;  %v21955_v3 = vld [vmem:[#allocation107_spill] sm:$0xff]  ;;  %v21956_v8 = vld [vmem:[#allocation98_spill] sm:$0xff] }
 0x19b   :  { %21940 = vst [vmem:[#allocation274_spill] sm:$0xff] %v17366_v21  ;;  %21941 = vst [vmem:[#allocation269_spill] sm:$0xff] %v17370_v60  ;;  %12735 = vmatprep.subr.mxu0 %v21311_v30  ;;  %v21953_v39 = vcombine.low %v21881_v0, %v21880_v35  ;;  %v3563_v5 = vcombine.low %v17336_v44, %v17339_v59  ;;  %v3582_v51 = vcombine.low %v17353_v31, %v17362_v55  ;;  %v21958_v44 = vld [vmem:[#allocation118_spill] sm:$0xff]  ;;  %v21963_v12 = vld [vmem:[#allocation324_spill] sm:$0xff] }
 0x19c   :  { %11779 = vmatmul.mubr.msk.f32.gmra.mrb[56].mxu1 %vm1907_vm6, %v21943_v4  ;;  %21944 = vst [vmem:[#allocation271_spill] sm:$0xff] %v17379_v16  ;;  %21945 = vst [vmem:[#allocation387_spill] sm:$0xff] %v17383_v56  ;;  %v21951_v4 = vld [vmem:[#allocation87_spill] sm:$0xff]  ;;  %v17406_v11 = vrot.slane %v3581_v47, %v13786_v14  ;;  %v3598_v0 = vcombine.low %v17366_v21, %v17370_v60  ;;  %v3599_v35 = vcombine.low %v17379_v16, %v17383_v56  ;;  %v21964_v33 = vld [vmem:[#allocation325_spill] sm:$0xff] }
 0x19d   :  { %11781 = vmatprep.mubr.msk.f32.mxu1 %vm13739_vm1, %v21311_v30  ;;  %12443 = vmatmul.mubr.msk.f32.gmra.mrb[2].mxu0 %vm1907_vm6, %v21953_v39  ;;  %v10649_v39 = vrot.slane %v15786_v7, 9  ;;  %v2855_v59 = vrot.slane %v21957_v43, 7  ;;  %v3580_v47 = vcombine.low %v17346_v36, %v17349_v52  ;;  %v2848_v55 = vrot.slane %v2846_v29, 2  ;;  %v21959_v60 = vld [vmem:[#allocation111_spill] sm:$0xff]  ;;  %v21962_v52 = vld [vmem:[#allocation321_spill] sm:$0xff] }
 0x19e   :  { %21954 = vst [vmem:[#allocation46_spill] sm:$0xff] %v17406_v11  ;;  %12445 = vmatprep.mubr.msk.f32.mxu0 %vm13739_vm1, %v21311_v30  ;;  %v2851_v27 = vrot.slane %v2849_v63, 2  ;;  %v2854_v31 = vrot.slane %v2852_v10, 2  ;;  %v2860_v56 = vrot.slane %v2858_v15, 2  ;;  %v2861_v16 = vrot.slane %v15843_v46, 7 }
 0x19f   :  { %v2857_v23 = vrot.slane %v2855_v59, 2  ;;  %v21960_v7 = vcombine.low %v21883_v58, %v21882_v24  ;;  %v2871_v36 = vrot.slane %v21962_v52, 7  ;;  %v2874_v43 = vrot.slane %v21963_v12, 7  ;;  %v21968_v58 = vld [vmem:[#allocation322_spill] sm:$0xff]  ;;  %v21979_v12 = vld [vmem:[#allocation328_spill] sm:$0xff] }
 0x1a0   :  { %11782 = vmatmul.mubr.msk.f32.gmra.mrb[58].mxu1 %vm1907_vm6, %v3529_v62  ;;  %v17431_v62 = vrot.slane %v3582_v51, %v13786_v14  ;;  %v2877_v18 = vrot.slane %v21964_v33, 7  ;;  %v17439_v21 = vrot.slane %v3598_v0, %v13786_v14  ;;  %v17442_v46 = vrot.slane %v3599_v35, %v13786_v14  ;;  %v21972_v35 = vld [vmem:[#allocation320_spill] sm:$0xff] }
 0x1a1   :  { %11784 = vmatprep.mubr.msk.f32.mxu1 %vm13739_vm1, %v21311_v30  ;;  %12446 = vmatmul.mubr.msk.f32.gmra.mrb[4].mxu0 %vm1907_vm6, %v21960_v7  ;;  %v17446_v7 = vsel %vm13859_vm9, %v10649_v39, %v2846_v29  ;;  %v2868_v24 = vrot.slane %v21968_v58, 7  ;;  %v17452_v51 = vsel %vm13859_vm9, %v2848_v55, %v2849_v63  ;;  %v17456_v33 = vsel %vm13859_vm9, %v2851_v27, %v2852_v10  ;;  %v21976_v39 = vld [vmem:[#allocation329_spill] sm:$0xff] }
 0x1a2   :  { %21961 = vst [vmem:[#allocation34_spill] sm:$0xff] %v17431_v62  ;;  %12448 = vmatprep.mubr.msk.f32.mxu0 %vm13739_vm1, %v21311_v30  ;;  %21965 = vst [vmem:[#allocation55_spill] sm:$0xff] %v17439_v21  ;;  %v17460_v0 = vsel %vm13859_vm9, %v2854_v31, %v2855_v59  ;;  %v10650_v52 = vrot.slane %v21972_v35, 9  ;;  %v17467_v29 = vsel %vm13859_vm9, %v2857_v23, %v2858_v15  ;;  %v2863_v63 = vrot.slane %v2861_v16, 2  ;;  %v21978_v15 = vld [vmem:[#allocation119_spill] sm:$0xff] }
 0x1a3   :  { %21966 = vst [vmem:[#allocation47_spill] sm:$0xff] %v17442_v46  ;;  %21967 = vst [vmem:[#allocation64_spill] sm:$0xff] %v17446_v7  ;;  %v17471_v55 = vsel %vm13859_vm9, %v2860_v56, %v2861_v16  ;;  %v2870_v27 = vrot.slane %v2868_v24, 2  ;;  %v21975_v10 = vcombine.low %v21887_v32, %v21886_v20  ;;  %v2873_v59 = vrot.slane %v2871_v36, 2  ;;  %v21977_v56 = vld [vmem:[#allocation125_spill] sm:$0xff]  ;;  %v21981_v16 = vld [vmem:[#allocation52_spill] sm:$0xff] }
 0x1a4   :  { %11785 = vmatmul.mubr.msk.f32.gmra.mrb[60].mxu1 %vm1907_vm6, %v3546_v28  ;;  %21969 = vst [vmem:[#allocation57_spill] sm:$0xff] %v17452_v51  ;;  %21970 = vst [vmem:[#allocation75_spill] sm:$0xff] %v17456_v33  ;;  %v2876_v31 = vrot.slane %v2874_v43, 2  ;;  %v2879_v28 = vrot.slane %v2877_v18, 2  ;;  %v2880_v58 = vrot.slane %v21976_v39, 7  ;;  %v3597_v23 = vcombine.low %v17406_v11, %v17431_v62  ;;  %v21980_v11 = vld [vmem:[#allocation330_spill] sm:$0xff] }
 0x1a5   :  { %21971 = vst [vmem:[#allocation66_spill] sm:$0xff] %v17460_v0  ;;  %11787 = vmatprep.mubr.msk.f32.mxu1 %vm13739_vm1, %v21311_v30  ;;  %21973 = vst [vmem:[#allocation300_spill] sm:$0xff] %v17467_v29  ;;  %12449 = vmatmul.mubr.msk.f32.gmra.mrb[6].mxu0 %vm1907_vm6, %v21975_v10  ;;  %v17486_v35 = vcombine.high %v21979_v12, %v21979_v12  ;;  %v2883_v20 = vrot.slane %v21979_v12, 7  ;;  %v3614_v32 = vcombine.low %v17439_v21, %v17442_v46  ;;  %v21998_v46 = vld [vmem:[#allocation129_spill] sm:$0xff] }
 0x1a6   :  { %21974 = vst [vmem:[#allocation302_spill] sm:$0xff] %v17471_v55  ;;  %12451 = vmatprep.mubr.msk.f32.mxu0 %vm13739_vm1, %v21311_v30  ;;  %v3615_v10 = vcombine.low %v17446_v7, %v17452_v51  ;;  %v3616_v62 = vcombine.low %v17456_v33, %v17460_v0  ;;  %v2890_v39 = vrot.slane %v21980_v11, 7  ;;  %v21982_v50 = vrot.slane %v21981_v16, 7  ;;  %v21993_v16 = vld [vmem:[#allocation334_spill] sm:$0xff] }
 0x1a7   :  { %v3632_v51 = vcombine.low %v17467_v29, %v17471_v55  ;;  %v17513_v0 = vsel %vm13859_vm9, %v2870_v27, %v2871_v36  ;;  %v21986_v33 = vcombine.low %v21905_v40, %v21904_v53  ;;  %v2885_v36 = vrot.slane %v2883_v20, 2  ;;  %v21990_v53 = vld [vmem:[#allocation326_spill] sm:$0xff]  ;;  %v21991_v27 = vld [vmem:[#allocation337_spill] sm:$0xff] }
 0x1a8   :  { %11788 = vmatmul.mubr.msk.f32.gmra.mrb[62].mxu1 %vm1907_vm6, %v3563_v5  ;;  %v17503_v12 = vsel %vm13859_vm9, %v2863_v63, %v21982_v50  ;;  %v17507_v5 = vsel %vm13859_vm9, %v10650_v52, %v2868_v24  ;;  %21985 = vst [vmem:[#allocation308_spill] sm:$0xff] %v17513_v0  ;;  %v17521_v50 = vsel %vm13859_vm9, %v2873_v59, %v2874_v43  ;;  %v2882_v63 = vrot.slane %v2880_v58, 2 }
 0x1a9   :  { %11790 = vmatprep.mubr.msk.f32.mxu1 %vm13739_vm1, %v21311_v30  ;;  %21983 = vst [vmem:[#allocation301_spill] sm:$0xff] %v17503_v12  ;;  %21984 = vst [vmem:[#allocation305_spill] sm:$0xff] %v17507_v5  ;;  %12452 = vmatmul.mubr.msk.f32.gmra.mrb[8].mxu0 %vm1907_vm6, %v21986_v33  ;;  %v17525_v52 = vsel %vm13859_vm9, %v2876_v31, %v2877_v18  ;;  %v17529_v24 = vsel %vm13859_vm9, %v2879_v28, %v2880_v58  ;;  %v2886_v40 = vrot.slane %v17486_v35, 7  ;;  %v21992_v18 = vld [vmem:[#allocation331_spill] sm:$0xff]  ;;  %v21994_v28 = vld [vmem:[#allocation338_spill] sm:$0xff] }
 0x1aa   :  { %21987 = vst [vmem:[#allocation28_spill] sm:$0xff] %v17521_v50  ;;  %21988 = vst [vmem:[#allocation33_spill] sm:$0xff] %v17525_v52  ;;  %12454 = vmatprep.mubr.msk.f32.mxu0 %vm13739_vm1, %v21311_v30  ;;  %v10651_v33 = vrot.slane %v21990_v53, 9  ;;  %v2896_v43 = vrot.slane %v21991_v27, 7  ;;  %v2892_v59 = vrot.slane %v2890_v39, 2  ;;  %v2893_v31 = vrot.slane %v21992_v18, 7 }
 0x1ab   :  { %21989 = vst [vmem:[#allocation84_spill] sm:$0xff] %v17529_v24  ;;  %v2899_v55 = vrot.slane %v21993_v16, 7  ;;  %v2902_v29 = vrot.slane %v21994_v28, 7  ;;  %v17543_v58 = vrot.slane %v3615_v10, %v13786_v14  ;;  %v17546_v7 = vrot.slane %v3616_v62, %v13786_v14 }
 0x1ac   :  { %11791 = vmatmul.mubr.msk.f32.gmra.mrb[64].mxu1 %vm1907_vm6, %v3580_v47  ;;  %v3633_v53 = vcombine.low %v17503_v12, %v17507_v5  ;;  %v21997_v47 = vld [vmem:[#allocation136_spill] sm:$0xff]  ;;  %v21999_v27 = vcombine.low %v21949_v48, %v21948_v17  ;;  %v17557_v28 = vrot.slane %v3632_v51, %v13786_v14  ;;  %v3649_v10 = vcombine.low %v17513_v0, %v17521_v50 }
 0x1ad   :  { %11793 = vmatprep.mubr.msk.f32.mxu1 %vm13739_vm1, %v21311_v30  ;;  %21995 = vst [vmem:[#allocation78_spill] sm:$0xff] %v17543_v58  ;;  %21996 = vst [vmem:[#allocation95_spill] sm:$0xff] %v17546_v7  ;;  %v3650_v62 = vcombine.low %v17525_v52, %v17529_v24  ;;  %v17565_v5 = vsel %vm13859_vm9, %v2882_v63, %v2883_v20  ;;  %v17571_v17 = vsel %vm13859_vm9, %v2885_v36, %v2886_v40  ;;  %v22005_v24 = vld [vmem:[#allocation343_spill] sm:$0xff]  ;;  %v22007_v40 = vld [vmem:[#allocation345_spill] sm:$0xff] }
 0x1ae   :  { %12455 = vmatmul.mubr.msk.f32.gmra.mrb[10].mxu0 %vm1907_vm6, %v21999_v27  ;;  %22000 = vst [vmem:[#allocation87_spill] sm:$0xff] %v17557_v28  ;;  %22001 = vst [vmem:[#allocation107_spill] sm:$0xff] %v17565_v5  ;;  %v17575_v48 = vsel %vm13859_vm9, %v10651_v33, %v2890_v39  ;;  %v2895_v51 = vrot.slane %v2893_v31, 2  ;;  %v2898_v27 = vrot.slane %v2896_v43, 2  ;;  %v17580_v21 = vsel %vm13859_vm9, %v2892_v59, %v2893_v31  ;;  %v22012_v12 = vld [vmem:[#allocation148_spill] sm:$0xff] }
 0x1af   :  { %12457 = vmatprep.mubr.msk.f32.mxu0 %vm13739_vm1, %v21311_v30  ;;  %22002 = vst [vmem:[#allocation98_spill] sm:$0xff] %v17571_v17  ;;  %22003 = vst [vmem:[#allocation118_spill] sm:$0xff] %v17575_v48  ;;  %v2901_v20 = vrot.slane %v2899_v55, 2  ;;  %v2904_v63 = vrot.slane %v2902_v29, 2  ;;  %v2905_v50 = vrot.slane %v22005_v24, 7  ;;  %v3631_v36 = vcombine.low %v17543_v58, %v17546_v7  ;;  %v22013_v7 = vld [vmem:[#allocation137_spill] sm:$0xff] }
 0x1b0   :  { %11794 = vmatmul.mubr.msk.f32.gmra.mrb[66].mxu1 %vm1907_vm6, %v3597_v23  ;;  %22004 = vst [vmem:[#allocation111_spill] sm:$0xff] %v17580_v21  ;;  %v17588_v39 = vrot.slane %v3633_v53, %v13786_v14  ;;  %v2912_v33 = vrot.slane %v22007_v40, 7  ;;  %v22008_v23 = vld [vmem:[#allocation344_spill] sm:$0xff]  ;;  %v22009_v59 = vcombine.low %v21951_v4, %v21950_v22  ;;  %v17597_v31 = vrot.slane %v3649_v10, %v13786_v14 }
 0x1b1   :  { %11796 = vmatprep.mubr.msk.f32.mxu1 %vm13739_vm1, %v21311_v30  ;;  %v2915_v52 = vrot.slane %v22008_v23, 7  ;;  %v17600_v0 = vrot.slane %v3650_v62, %v13786_v14  ;;  %v3666_v53 = vcombine.low %v17565_v5, %v17571_v17  ;;  %v3667_v22 = vcombine.low %v17575_v48, %v17580_v21  ;;  %v22016_v62 = vld [vmem:[#allocation339_spill] sm:$0xff]  ;;  %v22019_v48 = vld [vmem:[#allocation346_spill] sm:$0xff] }
 0x1b2   :  { %22006 = vst [vmem:[#allocation125_spill] sm:$0xff] %v17588_v39  ;;  %12458 = vmatmul.mubr.msk.f32.gmra.mrb[12].mxu0 %vm1907_vm6, %v22009_v59  ;;  %22010 = vst [vmem:[#allocation119_spill] sm:$0xff] %v17597_v31  ;;  %v17612_v4 = vsel %vm13859_vm9, %v2895_v51, %v2896_v43  ;;  %v17616_v10 = vsel %vm13859_vm9, %v2898_v27, %v2899_v55  ;;  %v10652_v59 = vrot.slane %v22016_v62, 9  ;;  %v2907_v21 = vrot.slane %v2905_v50, 2  ;;  %v22020_v27 = vld [vmem:[#allocation347_spill] sm:$0xff] }
 0x1b3   :  { %22011 = vst [vmem:[#allocation330_spill] sm:$0xff] %v17600_v0  ;;  %12460 = vmatprep.mubr.msk.f32.mxu0 %vm13739_vm1, %v21311_v30  ;;  %22014 = vst [vmem:[#allocation52_spill] sm:$0xff] %v17612_v4  ;;  %v17622_v58 = vsel %vm13859_vm9, %v2901_v20, %v2902_v29  ;;  %v17626_v17 = vsel %vm13859_vm9, %v2904_v63, %v2905_v50  ;;  %v2918_v43 = vrot.slane %v22019_v48, 7  ;;  %v2914_v55 = vrot.slane %v2912_v33, 2  ;;  %v22024_v20 = vld [vmem:[#allocation156_spill] sm:$0xff]  ;;  %v22025_v63 = vld [vmem:[#allocation149_spill] sm:$0xff] }
 0x1b4   :  { %22015 = vst [vmem:[#allocation331_spill] sm:$0xff] %v17616_v10  ;;  %11797 = vmatmul.mubr.msk.f32.gmra.mrb[68].mxu1 %vm1907_vm6, %v3614_v32  ;;  %22017 = vst [vmem:[#allocation334_spill] sm:$0xff] %v17622_v58  ;;  %v2917_v51 = vrot.slane %v2915_v52, 2  ;;  %v17633_v5 = vcombine.high %v22020_v27, %v22020_v27  ;;  %v22022_v32 = vld [vmem:[#allocation341_spill] sm:$0xff]  ;;  %v22023_v29 = vcombine.low %v21956_v8, %v21955_v3  ;;  %v22026_v48 = vld [vmem:[#allocation348_spill] sm:$0xff]  ;;  %v2927_v24 = vrot.slane %v22020_v27, 7 }
 0x1b5   :  { %22018 = vst [vmem:[#allocation136_spill] sm:$0xff] %v17626_v17  ;;  %11799 = vmatprep.mubr.msk.f32.mxu1 %vm13739_vm1, %v21311_v30  ;;  %v2921_v40 = vrot.slane %v22022_v32, 7  ;;  %v3648_v50 = vcombine.low %v17557_v28, %v17588_v39  ;;  %v2924_v62 = vrot.slane %v22026_v48, 7  ;;  %v17649_v32 = vrot.slane %v3666_v53, %v13786_v14  ;;  %v22029_v39 = vld [vmem:[#allocation93_spill] sm:$0xff] }
 0x1b6   :  { %22021 = vst [vmem:[#allocation129_spill] sm:$0xff] %v17633_v5  ;;  %12461 = vmatmul.mubr.msk.f32.gmra.mrb[14].mxu0 %vm1907_vm6, %v22023_v29  ;;  %v17652_v8 = vrot.slane %v3667_v22, %v13786_v14  ;;  %v3683_v3 = vcombine.low %v17612_v4, %v17616_v10  ;;  %v3684_v29 = vcombine.low %v17622_v58, %v17626_v17  ;;  %v22030_v28 = vrot.slane %v22029_v39, 7  ;;  %v22036_v10 = vld [vmem:[#allocation354_spill] sm:$0xff]  ;;  %v22037_v4 = vld [vmem:[#allocation352_spill] sm:$0xff] }
 0x1b7   :  { %12463 = vmatprep.mubr.msk.f32.mxu0 %vm13739_vm1, %v21311_v30  ;;  %22027 = vst [vmem:[#allocation148_spill] sm:$0xff] %v17649_v32  ;;  %v3665_v23 = vcombine.low %v17597_v31, %v17600_v0  ;;  %v17669_v22 = vsel %vm13859_vm9, %v10652_v59, %v2912_v33  ;;  %v2920_v27 = vrot.slane %v2918_v43, 2  ;;  %v17679_v17 = vsel %vm13859_vm9, %v2917_v51, %v2918_v43  ;;  %v22041_v31 = vld [vmem:[#allocation362_spill] sm:$0xff] }
 0x1b8   :  { %22028 = vst [vmem:[#allocation137_spill] sm:$0xff] %v17652_v8  ;;  %11800 = vmatmul.mubr.msk.f32.gmra.mrb[70].mxu1 %vm1907_vm6, %v3631_v36  ;;  %v17665_v53 = vsel %vm13859_vm9, %v2907_v21, %v22030_v28  ;;  %22032 = vst [vmem:[#allocation149_spill] sm:$0xff] %v17669_v22  ;;  %v17675_v36 = vsel %vm13859_vm9, %v2914_v55, %v2915_v52  ;;  %v2923_v39 = vrot.slane %v2921_v40, 2  ;;  %v2930_v21 = vrot.slane %v17633_v5, 7  ;;  %v22056_v5 = vld [vmem:[#allocation371_spill] sm:$0xff] }
 0x1b9   :  { %22031 = vst [vmem:[#allocation156_spill] sm:$0xff] %v17665_v53  ;;  %11802 = vmatprep.mubr.msk.f32.mxu1 %vm13739_vm1, %v21311_v30  ;;  %22033 = vst [vmem:[#allocation348_spill] sm:$0xff] %v17675_v36  ;;  %v22035_v28 = vcombine.low %v21959_v60, %v21958_v44  ;;  %v2926_v33 = vrot.slane %v2924_v62, 2  ;;  %v2929_v59 = vrot.slane %v2927_v24, 2  ;;  %v2934_v58 = vrot.slane %v22036_v10, 7  ;;  %v22040_v44 = vld [vmem:[#allocation358_spill] sm:$0xff] }
 0x1ba   :  { %22034 = vst [vmem:[#allocation93_spill] sm:$0xff] %v17679_v17  ;;  %v2937_v0 = vrot.slane %v22037_v4, 7  ;;  %v3682_v52 = vcombine.low %v17649_v32, %v17652_v8  ;;  %v17693_v43 = vrot.slane %v3683_v3, %v13786_v14  ;;  %v17696_v55 = vrot.slane %v3684_v29, %v13786_v14  ;;  %v22042_v4 = vld [vmem:[#allocation361_spill] sm:$0xff] }
 0x1bb   :  { %12464 = vmatmul.mubr.msk.f32.gmra.mrb[16].mxu0 %vm1907_vm6, %v22035_v28  ;;  %v2940_v60 = vrot.slane %v22040_v44, 7  ;;  %v3700_v51 = vcombine.low %v17665_v53, %v17669_v22  ;;  %v3701_v28 = vcombine.low %v17675_v36, %v17679_v17  ;;  %v2946_v10 = vrot.slane %v22041_v31, 7  ;;  %v22045_v29 = vld [vmem:[#allocation349_spill] sm:$0xff]  ;;  %v22046_v53 = vld [vmem:[#allocation355_spill] sm:$0xff] }
 0x1bc   :  { %12466 = vmatprep.mubr.msk.f32.mxu0 %vm13739_vm1, %v21311_v30  ;;  %22038 = vst [vmem:[#allocation393_spill] sm:$0xff] %v17693_v43  ;;  %22039 = vst [vmem:[#allocation394_spill] sm:$0xff] %v17696_v55  ;;  %11803 = vmatmul.mubr.msk.f32.gmra.mrb[72].mxu1 %vm1907_vm6, %v3648_v50  ;;  %v2949_v8 = vrot.slane %v22042_v4, 7  ;;  %v17710_v3 = vsel %vm13859_vm9, %v2920_v27, %v2921_v40  ;;  %v17714_v50 = vsel %vm13859_vm9, %v2923_v39, %v2924_v62  ;;  %v22050_v31 = vld [vmem:[#allocation363_spill] sm:$0xff] }
 0x1bd   :  { %11805 = vmatprep.mubr.msk.f32.mxu1 %vm13739_vm1, %v21311_v30  ;;  %22043 = vst [vmem:[#allocation395_spill] sm:$0xff] %v17710_v3  ;;  %22044 = vst [vmem:[#allocation396_spill] sm:$0xff] %v17714_v50  ;;  %v10653_v22 = vrot.slane %v22045_v29, 9  ;;  %v2943_v32 = vrot.slane %v22046_v53, 7  ;;  %v22047_v17 = vcombine.low %v21978_v15, %v21977_v56  ;;  %v17724_v36 = vsel %vm13859_vm9, %v2926_v33, %v2927_v24  ;;  %v22051_v56 = vld [vmem:[#allocation368_spill] sm:$0xff] }
 0x1be   :  { %22048 = vst [vmem:[#allocation397_spill] sm:$0xff] %v17724_v36  ;;  %v17728_v40 = vsel %vm13859_vm9, %v2929_v59, %v2930_v21  ;;  %v2936_v27 = vrot.slane %v2934_v58, 2  ;;  %v2939_v62 = vrot.slane %v2937_v0, 2  ;;  %v2942_v39 = vrot.slane %v2940_v60, 2  ;;  %v22052_v21 = vld [vmem:[#allocation364_spill] sm:$0xff] }
 0x1bf   :  { %12467 = vmatmul.mubr.msk.f32.gmra.mrb[18].mxu0 %vm1907_vm6, %v22047_v17  ;;  %22049 = vst [vmem:[#allocation398_spill] sm:$0xff] %v17728_v40  ;;  %v2945_v29 = vrot.slane %v2943_v32, 2  ;;  %v10654_v4 = vrot.slane %v22050_v31, 9  ;;  %v2956_v15 = vrot.slane %v22051_v56, 7  ;;  %v3699_v24 = vcombine.low %v17693_v43, %v17696_v55  ;;  %v22055_v31 = vld [vmem:[#allocation370_spill] sm:$0xff] }
 0x1c0   :  { %12469 = vmatprep.mubr.msk.f32.mxu0 %vm13739_vm1, %v21311_v30  ;;  %11806 = vmatmul.mubr.msk.f32.gmra.mrb[74].mxu1 %vm1907_vm6, %v3665_v23  ;;  %v2948_v17 = vrot.slane %v2946_v10, 2  ;;  %v2951_v33 = vrot.slane %v2949_v8, 2  ;;  %v2959_v59 = vrot.slane %v22052_v21, 7  ;;  %v17741_v44 = vrot.slane %v3700_v51, %v13786_v14 }
 0x1c1   :  { %11808 = vmatprep.mubr.msk.f32.mxu1 %vm13739_vm1, %v21311_v30  ;;  %v17744_v53 = vrot.slane %v3701_v28, %v13786_v14  ;;  %v2962_v56 = vrot.slane %v22055_v31, 7  ;;  %v2965_v23 = vrot.slane %v22056_v5, 7  ;;  %v22057_v55 = vcombine.low %v21998_v46, %v21997_v47 }
 0x1c2   :  { %22053 = vst [vmem:[#allocation399_spill] sm:$0xff] %v17741_v44  ;;  %v3717_v43 = vcombine.low %v17710_v3, %v17714_v50  ;;  %v3718_v21 = vcombine.low %v17724_v36, %v17728_v40  ;;  %v17758_v51 = vsel %vm13859_vm9, %v10653_v22, %v2934_v58  ;;  %v17762_v28 = vsel %vm13859_vm9, %v2936_v27, %v2937_v0  ;;  %v22065_v22 = vld [vmem:[#allocation96_spill] sm:$0xff]  ;;  %v22073_v50 = vld [vmem:[#allocation374_spill] sm:$0xff] }
 0x1c3   :  { %22054 = vst [vmem:[#allocation400_spill] sm:$0xff] %v17744_v53  ;;  %12470 = vmatmul.mubr.msk.f32.gmra.mrb[20].mxu0 %vm1907_vm6, %v22057_v55  ;;  %22058 = vst [vmem:[#allocation370_spill] sm:$0xff] %v17758_v51  ;;  %v17768_v46 = vsel %vm13859_vm9, %v2939_v62, %v2940_v60  ;;  %v17772_v47 = vsel %vm13859_vm9, %v2942_v39, %v2943_v32  ;;  %v17776_v55 = vsel %vm13859_vm9, %v2945_v29, %v2946_v10  ;;  %v22068_v29 = vld [vmem:[#allocation373_spill] sm:$0xff] }
 0x1c4   :  { %22059 = vst [vmem:[#allocation371_spill] sm:$0xff] %v17762_v28  ;;  %12472 = vmatprep.mubr.msk.f32.mxu0 %vm13739_vm1, %v21311_v30  ;;  %22060 = vst [vmem:[#allocation401_spill] sm:$0xff] %v17768_v46  ;;  %v17780_v58 = vsel %vm13859_vm9, %v10654_v4, %v2956_v15  ;;  %11809 = vmatmul.mubr.msk.f32.gmra.mrb[76].mxu1 %vm1907_vm6, %v3682_v52  ;;  %v17785_v0 = vsel %vm13859_vm9, %v2948_v17, %v2949_v8  ;;  %v22066_v60 = vrot.slane %v22065_v22, 7  ;;  %v22069_v52 = vld [vmem:[#allocation372_spill] sm:$0xff]  ;;  %v22071_v17 = vld [vmem:[#allocation170_spill] sm:$0xff] }
 0x1c5   :  { %22061 = vst [vmem:[#allocation402_spill] sm:$0xff] %v17772_v47  ;;  %22062 = vst [vmem:[#allocation403_spill] sm:$0xff] %v17776_v55  ;;  %v2958_v27 = vrot.slane %v2956_v15, 2  ;;  %v2961_v62 = vrot.slane %v2959_v59, 2  ;;  %11811 = vmatprep.mubr.msk.f32.mxu1 %vm13739_vm1, %v21311_v30  ;;  %v2964_v10 = vrot.slane %v2962_v56, 2  ;;  %v2967_v4 = vrot.slane %v2965_v23, 2 }
 0x1c6   :  { %22063 = vst [vmem:[#allocation404_spill] sm:$0xff] %v17780_v58  ;;  %22064 = vst [vmem:[#allocation405_spill] sm:$0xff] %v17785_v0  ;;  %v17791_v32 = vsel %vm13859_vm9, %v2951_v33, %v22066_v60  ;;  %v2968_v39 = vrot.slane %v22068_v29, 7  ;;  %v2971_v40 = vrot.slane %v22069_v52, 7  ;;  %v22070_v8 = vcombine.low %v22013_v7, %v22012_v12  ;;  %v22072_v22 = vld [vmem:[#allocation157_spill] sm:$0xff] }
 0x1c7   :  { %22067 = vst [vmem:[#allocation96_spill] sm:$0xff] %v17791_v32  ;;  %v8584_v33 = vcombine.low %v22072_v22, %v22071_v17  ;;  %v3716_v15 = vcombine.low %v17741_v44, %v17744_v53  ;;  %v17807_v60 = vcombine.high %v22069_v52, %v22069_v52  ;;  %v2978_v36 = vrot.slane %v22073_v50, 7 }
 0x1c8   :  { %12473 = vmatmul.mubr.msk.f32.gmra.mrb[22].mxu0 %vm1907_vm6, %v22070_v8  ;;  %v17813_v3 = vrot.slane %v3717_v43, %v13786_v14  ;;  %v17816_v12 = vrot.slane %v3718_v21, %v13786_v14  ;;  %v3734_v7 = vcombine.low %v17758_v51, %v17762_v28  ;;  %v3735_v8 = vcombine.low %v17768_v46, %v17772_v47  ;;  %v22086_v51 = vld [vmem:[#allocation375_spill] sm:$0xff] }
 0x1c9   :  { %12475 = vmatprep.mubr.msk.f32.mxu0 %vm13739_vm1, %v21311_v30  ;;  %11812 = vmatmul.mubr.msk.f32.gmra.mrb[78].mxu1 %vm1907_vm6, %v3699_v24  ;;  %v3751_v17 = vcombine.low %v17776_v55, %v17785_v0  ;;  %v3752_v22 = vcombine.low %v17791_v32, %v17780_v58  ;;  %v17829_v43 = vsel %vm13859_vm9, %v2958_v27, %v2959_v59  ;;  %v2970_v58 = vrot.slane %v2968_v39, 2  ;;  %v22081_v27 = vld [vmem:[#allocation366_spill] sm:$0xff] }
 0x1ca   :  { %22074 = vst [vmem:[#allocation373_spill] sm:$0xff] %v17813_v3  ;;  %22075 = vst [vmem:[#allocation170_spill] sm:$0xff] %v17816_v12  ;;  %v17833_v21 = vsel %vm13859_vm9, %v2961_v62, %v2962_v56  ;;  %11814 = vmatprep.mubr.msk.f32.mxu1 %vm13739_vm1, %v21311_v30  ;;  %v17839_v24 = vsel %vm13859_vm9, %v2964_v10, %v2965_v23  ;;  %v17843_v0 = vsel %vm13859_vm9, %v2967_v4, %v2968_v39  ;;  %v22082_v55 = vld [vmem:[#allocation378_spill] sm:$0xff]  ;;  %v22083_v23 = vld [vmem:[#allocation183_spill] sm:$0xff] }
 0x1cb   :  { %22076 = vst [vmem:[#allocation157_spill] sm:$0xff] %v17829_v43  ;;  %22077 = vst [vmem:[#allocation406_spill] sm:$0xff] %v17833_v21  ;;  %v2973_v32 = vrot.slane %v2971_v40, 2  ;;  %v22080_v59 = vcombine.low %v22025_v63, %v22024_v20  ;;  %v2974_v56 = vrot.slane %v17807_v60, 7  ;;  %v10655_v62 = vrot.slane %v22081_v27, 9  ;;  %v22084_v10 = vld [vmem:[#allocation171_spill] sm:$0xff] }
 0x1cc   :  { %22078 = vst [vmem:[#allocation407_spill] sm:$0xff] %v17839_v24  ;;  %22079 = vst [vmem:[#allocation408_spill] sm:$0xff] %v17843_v0  ;;  %v2980_v47 = vrot.slane %v2978_v36, 2  ;;  %v2981_v28 = vrot.slane %v22082_v55, 7  ;;  %v8585_v4 = vcombine.low %v22084_v10, %v22083_v23  ;;  %v22085_v39 = vld [vmem:[#allocation381_spill] sm:$0xff]  ;;  %v2987_v53 = vrot.slane %v22086_v51, 7 }
 0x1cd   :  { %12476 = vmatmul.mubr.msk.f32.gmra.mrb[24].mxu0 %vm1907_vm6, %v22080_v59  ;;  %v2984_v46 = vrot.slane %v22085_v39, 7  ;;  %v22087_v20 = vld [vmem:[#allocation163_spill] sm:$0xff]  ;;  %11815 = vmatmul.mubr.msk.f32.gmra.mrb[80].mxu1 %vm1907_vm6, %v3716_v15  ;;  %v3733_v59 = vcombine.low %v17813_v3, %v17816_v12  ;;  %v17863_v27 = vrot.slane %v3734_v7, %v13786_v14  ;;  %v17866_v44 = vrot.slane %v3735_v8, %v13786_v14  ;;  %v22101_v3 = vld [vmem:[#allocation184_spill] sm:$0xff] }
 0x1ce   :  { %12478 = vmatprep.mubr.msk.f32.mxu0 %vm13739_vm1, %v21311_v30  ;;  %v2990_v63 = vrot.slane %v22087_v20, 7  ;;  %v17869_v50 = vrot.slane %v3751_v17, %v13786_v14  ;;  %11817 = vmatprep.mubr.msk.f32.mxu1 %vm13739_vm1, %v21311_v30  ;;  %v17874_v23 = vrot.slane %v3752_v22, %v13786_v14  ;;  %v3768_v15 = vcombine.low %v17829_v43, %v17833_v21 }
 0x1cf   :  { %22088 = vst [vmem:[#allocation378_spill] sm:$0xff] %v17863_v27  ;;  %22089 = vst [vmem:[#allocation183_spill] sm:$0xff] %v17866_v44  ;;  %v3769_v10 = vcombine.low %v17839_v24, %v17843_v0  ;;  %v17882_v7 = vsel %vm13859_vm9, %v2970_v58, %v2971_v40  ;;  %v17887_v8 = vsel %vm13859_vm9, %v2973_v32, %v2974_v56  ;;  %v2983_v21 = vrot.slane %v2981_v28, 2 }
 0x1d0   :  { %22090 = vst [vmem:[#allocation171_spill] sm:$0xff] %v17869_v50  ;;  %22091 = vst [vmem:[#allocation381_spill] sm:$0xff] %v17874_v23  ;;  %v17891_v17 = vsel %vm13859_vm9, %v10655_v62, %v2978_v36  ;;  %v17895_v22 = vsel %vm13859_vm9, %v2980_v47, %v2981_v28  ;;  %v2986_v40 = vrot.slane %v2984_v46, 2  ;;  %v2989_v58 = vrot.slane %v2987_v53, 2  ;;  %v22097_v36 = vld [vmem:[#allocation389_spill] sm:$0xff]  ;;  %v22098_v62 = vld [vmem:[#allocation388_spill] sm:$0xff] }
 0x1d1   :  { %22092 = vst [vmem:[#allocation375_spill] sm:$0xff] %v17882_v7  ;;  %12479 = vmatmul.mubr.msk.f32.gmra.mrb[26].mxu0 %vm1907_vm6, %v8584_v33  ;;  %22093 = vst [vmem:[#allocation409_spill] sm:$0xff] %v17887_v8  ;;  %v2992_v0 = vrot.slane %v2990_v63, 2  ;;  %v22096_v33 = vld [vmem:[#allocation385_spill] sm:$0xff]  ;;  %11818 = vmatmul.mubr.msk.f32.gmra.mrb[82].mxu1 %vm1907_vm6, %v3733_v59  ;;  %v3750_v32 = vcombine.low %v17863_v27, %v17866_v44  ;;  %v3000_v56 = vrot.slane %v22097_v36, 7  ;;  %v3003_v43 = vrot.slane %v22098_v62, 7 }
 0x1d2   :  { %22094 = vst [vmem:[#allocation410_spill] sm:$0xff] %v17891_v17  ;;  %22095 = vst [vmem:[#allocation411_spill] sm:$0xff] %v17895_v22  ;;  %12481 = vmatprep.mubr.msk.f32.mxu0 %vm13739_vm1, %v21311_v30  ;;  %v2993_v24 = vrot.slane %v22096_v33, 7  ;;  %v22099_v47 = vld [vmem:[#allocation134_spill] sm:$0xff]  ;;  %11820 = vmatprep.mubr.msk.f32.mxu1 %vm13739_vm1, %v21311_v30  ;;  %v3767_v33 = vcombine.low %v17869_v50, %v17874_v23  ;;  %v17913_v59 = vrot.slane %v3768_v15, %v13786_v14 }
 0x1d3   :  { %v2996_v12 = vrot.slane %v22099_v47, 7  ;;  %v22100_v28 = vld [vmem:[#allocation190_spill] sm:$0xff]  ;;  %v17917_v36 = vrot.slane %v3769_v10, %v13786_v14  ;;  %v3785_v47 = vcombine.low %v17882_v7, %v17887_v8  ;;  %v17931_v15 = vsel %vm13859_vm9, %v2986_v40, %v2987_v53  ;;  %v22109_v7 = vld [vmem:[#allocation27_spill] sm:$0xff] }
 0x1d4   :  { %v8586_v20 = vcombine.low %v22101_v3, %v22100_v28  ;;  %22102 = vst [vmem:[#allocation134_spill] sm:$0xff] %v17913_v59  ;;  %v3786_v3 = vcombine.low %v17891_v17, %v17895_v22  ;;  %v17925_v28 = vsel %vm13859_vm9, %v2983_v21, %v2984_v46  ;;  %22105 = vst [vmem:[#allocation412_spill] sm:$0xff] %v17931_v15  ;;  %v2995_v22 = vrot.slane %v2993_v24, 2  ;;  %v22108_v46 = vld [vmem:[#allocation382_spill] sm:$0xff] }
 0x1d5   :  { %12482 = vmatmul.mubr.msk.f32.gmra.mrb[28].mxu0 %vm1907_vm6, %v8585_v4  ;;  %22103 = vst [vmem:[#allocation190_spill] sm:$0xff] %v17917_v36  ;;  %22104 = vst [vmem:[#allocation184_spill] sm:$0xff] %v17925_v28  ;;  %v17935_v4 = vsel %vm13859_vm9, %v2989_v58, %v2990_v63  ;;  %v17939_v10 = vsel %vm13859_vm9, %v2992_v0, %v2993_v24  ;;  %11821 = vmatmul.mubr.msk.f32.gmra.mrb[84].mxu1 %vm1907_vm6, %v3750_v32  ;;  %v10656_v21 = vrot.slane %v22108_v46, 9  ;;  %v22110_v53 = vld [vmem:[#allocation186_spill] sm:$0xff] }
 0x1d6   :  { %12484 = vmatprep.mubr.msk.f32.mxu0 %vm13739_vm1, %v21311_v30  ;;  %22106 = vst [vmem:[#allocation413_spill] sm:$0xff] %v17935_v4  ;;  %22107 = vst [vmem:[#allocation414_spill] sm:$0xff] %v17939_v10  ;;  %v3002_v8 = vrot.slane %v3000_v56, 2  ;;  %v3005_v17 = vrot.slane %v3003_v43, 2  ;;  %v3006_v23 = vrot.slane %v22109_v7, 7  ;;  %11823 = vmatprep.mubr.msk.f32.mxu1 %vm13739_vm1, %v21311_v30  ;;  %v17948_v63 = vcombine.high %v22110_v53, %v22110_v53  ;;  %v22111_v40 = vld [vmem:[#allocation386_spill] sm:$0xff] }
 0x1d7   :  { %v3009_v58 = vrot.slane %v22111_v40, 7  ;;  %v22112_v0 = vld [vmem:[#allocation390_spill] sm:$0xff]  ;;  %v3015_v24 = vrot.slane %v22110_v53, 7  ;;  %v3784_v62 = vcombine.low %v17913_v59, %v17917_v36  ;;  %v17959_v7 = vrot.slane %v3785_v47, %v13786_v14  ;;  %v22158_v36 = vld [vmem:[#allocation16_spill] sm:$0xff] }
 0x1d8   :  { %v3012_v44 = vrot.slane %v22112_v0, 7  ;;  %v22113_v32 = vld [vmem:[#allocation198_spill] sm:$0xff]  ;;  %v17964_v40 = vrot.slane %v3786_v3, %v13786_v14  ;;  %v3802_v53 = vcombine.low %v17925_v28, %v17931_v15  ;;  %v17977_v47 = vsel %vm13859_vm9, %v10656_v21, %v3000_v56  ;;  %v22121_v56 = vld [vmem:[#allocation211_spill] sm:$0xff] }
 0x1d9   :  { %12485 = vmatmul.mubr.msk.f32.gmra.mrb[30].mxu0 %vm1907_vm6, %v8586_v20  ;;  %v22114_v50 = vld [vmem:[#allocation194_spill] sm:$0xff]  ;;  %22115 = vst [vmem:[#allocation390_spill] sm:$0xff] %v17959_v7  ;;  %v3803_v20 = vcombine.low %v17935_v4, %v17939_v10  ;;  %11824 = vmatmul.mubr.msk.f32.gmra.mrb[86].mxu1 %vm1907_vm6, %v3767_v33  ;;  %22118 = vst [vmem:[#allocation415_spill] sm:$0xff] %v17977_v47  ;;  %v17981_v3 = vsel %vm13859_vm9, %v3002_v8, %v3003_v43  ;;  %v3008_v15 = vrot.slane %v3006_v23, 2  ;;  %v22122_v21 = vld [vmem:[#allocation203_spill] sm:$0xff] }
 0x1da   :  { %v8587_v27 = vcombine.low %v22114_v50, %v22113_v32  ;;  %12487 = vmatprep.mubr.msk.f32.mxu0 %vm13739_vm1, %v21311_v30  ;;  %22116 = vst [vmem:[#allocation198_spill] sm:$0xff] %v17964_v40  ;;  %v17972_v50 = vsel %vm13859_vm9, %v2995_v22, %v2996_v12  ;;  %22119 = vst [vmem:[#allocation416_spill] sm:$0xff] %v17981_v3  ;;  %v17985_v32 = vsel %vm13859_vm9, %v3005_v17, %v3006_v23  ;;  %v44_v8 = vld [vmem:[%s20377_s0 + $0xf0] sm:$0xff] }
 0x1db   :  { %22117 = vst [vmem:[#allocation194_spill] sm:$0xff] %v17972_v50  ;;  %22120 = vst [vmem:[#allocation417_spill] sm:$0xff] %v17985_v32  ;;  %11826 = vmatprep.mubr.msk.f32.mxu1 %vm13739_vm1, %v21311_v30  ;;  %v3011_v12 = vrot.slane %v3009_v58, 2  ;;  %v3014_v22 = vrot.slane %v3012_v44, 2  ;;  %v3017_v10 = vrot.slane %v3015_v24, 2  ;;  %v3018_v33 = vrot.slane %v17948_v63, 7 }
 0x1dc   :  { %v8588_v4 = vcombine.low %v22122_v21, %v22121_v56  ;;  %v17996_v43 = vrot.slane %v3802_v53, %v13786_v14  ;;  %v17999_v23 = vrot.slane %v3803_v20, %v13786_v14  ;;  %v3819_v17 = vcombine.low %v17972_v50, %v17977_v47  ;;  %v22130_v47 = vld [vmem:[#allocation212_spill] sm:$0xff] }
 0x1dd   :  { %12488 = vmatmul.mubr.msk.f32.gmra.mrb[32].mxu0 %vm1907_vm6, %v8587_v27  ;;  %11827 = vmatmul.mubr.msk.f32.gmra.mrb[88].mxu1 %vm1907_vm6, %v3784_v62  ;;  %v3801_v27 = vcombine.low %v17959_v7, %v17964_v40  ;;  %v3820_v56 = vcombine.low %v17981_v3, %v17985_v32  ;;  %v18015_v53 = vsel %vm13859_vm9, %v3008_v15, %v3009_v58  ;;  %v22129_v32 = vld [vmem:[#allocation221_spill] sm:$0xff] }
 0x1de   :  { %12490 = vmatprep.mubr.msk.f32.mxu0 %vm13739_vm1, %v21311_v30  ;;  %22123 = vst [vmem:[#allocation211_spill] sm:$0xff] %v17996_v43  ;;  %22124 = vst [vmem:[#allocation203_spill] sm:$0xff] %v17999_v23  ;;  %11829 = vmatprep.mubr.msk.f32.mxu1 %vm13739_vm1, %v21311_v30  ;;  %v18019_v20 = vsel %vm13859_vm9, %v3011_v12, %v3012_v44  ;;  %v18023_v62 = vsel %vm13859_vm9, %v3014_v22, %v3015_v24  ;;  %v22133_v24 = vld [vmem:[#allocation242_spill] sm:$0xff] }
 0x1df   :  { %22125 = vst [vmem:[#allocation418_spill] sm:$0xff] %v18015_v53  ;;  %22126 = vst [vmem:[#allocation419_spill] sm:$0xff] %v18019_v20  ;;  %v18027_v21 = vsel %vm13859_vm9, %v3017_v10, %v3018_v33  ;;  %v8589_v3 = vcombine.low %v22130_v47, %v22129_v32  ;;  %v8505_v50 = vcombine.high %v44_v8, %v44_v8  ;;  %v22134_v47 = vld [vmem:[#allocation240_spill] sm:$0xff]  ;;  %v22136_v22 = vld [vmem:[#allocation234_spill] sm:$0xff] }
 0x1e0   :  { %22127 = vst [vmem:[#allocation420_spill] sm:$0xff] %v18023_v62  ;;  %22128 = vst [vmem:[#allocation421_spill] sm:$0xff] %v18027_v21  ;;  %v3818_v44 = vcombine.low %v17996_v43, %v17999_v23  ;;  %v18038_v15 = vrot.slane %v3819_v17, %v13786_v14  ;;  %v18041_v10 = vrot.slane %v3820_v56, %v13786_v14  ;;  %v22137_v33 = vld [vmem:[#allocation227_spill] sm:$0xff]  ;;  %v22139_v56 = vld [vmem:[#allocation2_spill] sm:$0xff] }
 0x1e1   :  { %12491 = vmatmul.mubr.msk.f32.gmra.mrb[34].mxu0 %vm1907_vm6, %v8588_v4  ;;  %11830 = vmatmul.mubr.msk.f32.gmra.mrb[90].mxu1 %vm1907_vm6, %v3801_v27  ;;  %v3836_v4 = vcombine.low %v18015_v53, %v18019_v20  ;;  %v3837_v58 = vcombine.low %v18023_v62, %v18027_v21  ;;  %v8592_v32 = vcombine.low %v22134_v47, %v22133_v24  ;;  %v22140_v20 = vld [vmem:[#allocation7_spill] sm:$0xff]  ;;  %v22142_v53 = vld [vmem:[#allocation8_spill] sm:$0xff]  ;;  %v22153_v43 = vld [vmem:[#allocation14_spill] sm:$0xff] }
 0x1e2   :  { %12493 = vmatprep.mubr.msk.f32.mxu0 %vm13739_vm1, %v21311_v30  ;;  %22131 = vst [vmem:[#allocation221_spill] sm:$0xff] %v18038_v15  ;;  %22132 = vst [vmem:[#allocation212_spill] sm:$0xff] %v18041_v10  ;;  %11832 = vmatprep.mubr.msk.f32.mxu1 %vm13739_vm1, %v21311_v30  ;;  %v18052_v12 = vrot.slane %v44_v8, %v13786_v14  ;;  %v8590_v27 = vcombine.low %v22137_v33, %v22136_v22  ;;  %v22141_v62 = vld [vmem:[#allocation3_spill] sm:$0xff]  ;;  %v45_v8 = vld [vmem:[%s20377_s0 + $0xf8] sm:$0xff] }
 0x1e3   :  { %v18058_v17 = vrot.slane %v8505_v50, %v13786_v14  ;;  %v4313_v21 = vcombine.low %v22140_v20, %v22139_v56  ;;  %v4314_v28 = vcombine.low %v22142_v53, %v22141_v62  ;;  %v18073_v50 = vrot.slane %v3836_v4, %v13786_v14  ;;  %v22145_v22 = vld [vmem:[#allocation247_spill] sm:$0xff]  ;;  %v22147_v62 = vld [vmem:[#allocation253_spill] sm:$0xff]  ;;  %v22150_v24 = vld [vmem:[#allocation4_spill] sm:$0xff] }
 0x1e4   :  { %22135 = vst [vmem:[#allocation422_spill] sm:$0xff] %v18052_v12  ;;  %v18076_v20 = vrot.slane %v3837_v58, %v13786_v14  ;;  %v22146_v33 = vld [vmem:[#allocation235_spill] sm:$0xff]  ;;  %v8599_v53 = vrot.slane %v8592_v32, %v13786_v14  ;;  %v18088_v4 = vcombine.high %v18052_v12, %v18052_v12  ;;  %v22160_v47 = vld [vmem:[#allocation17_spill] sm:$0xff] }
 0x1e5   :  { %12494 = vmatmul.mubr.msk.f32.gmra.mrb[36].mxu0 %vm1907_vm6, %v8589_v3  ;;  %22138 = vst [vmem:[#allocation234_spill] sm:$0xff] %v18058_v17  ;;  %11833 = vmatmul.mubr.msk.f32.gmra.mrb[92].mxu1 %vm1907_vm6, %v3818_v44  ;;  %v3835_v3 = vcombine.low %v18038_v15, %v18041_v10  ;;  %22143 = vst [vmem:[#allocation227_spill] sm:$0xff] %v18073_v50  ;;  %v8591_v56 = vcombine.low %v22146_v33, %v22145_v22  ;;  %v22151_v10 = vld [vmem:[#allocation9_spill] sm:$0xff] }
 0x1e6   :  { %12496 = vmatprep.mubr.msk.f32.mxu0 %vm13739_vm1, %v21311_v30  ;;  %22144 = vst [vmem:[#allocation2_spill] sm:$0xff] %v18076_v20  ;;  %11835 = vmatprep.mubr.msk.f32.mxu1 %vm13739_vm1, %v21311_v30  ;;  %v8601_v44 = vcombine.low %v22147_v62, %v18052_v12  ;;  %v18092_v58 = vcombine.high %v18058_v17, %v18058_v17  ;;  %v22152_v15 = vld [vmem:[#allocation5_spill] sm:$0xff] }
 0x1e7   :  { %v18095_v22 = vrot.slane %v45_v8, %v13786_v14  ;;  %v8522_v33 = vcombine.high %v45_v8, %v45_v8  ;;  %v4321_v32 = vrot.slane %v4313_v21, %v13786_v14  ;;  %v4328_v62 = vrot.slane %v4314_v28, %v13786_v14 }
 0x1e8   :  { %22148 = vst [vmem:[#allocation7_spill] sm:$0xff] %v18092_v58  ;;  %v4330_v23 = vcombine.low %v22151_v10, %v22150_v24  ;;  %v10707_v40 = vcombine.high %v22150_v24, %v22152_v15  ;;  %v8600_v8 = vcombine.low %v8599_v53, %v22153_v43  ;;  %v8608_v21 = vrot.slane %v8601_v44, %v13786_v14  ;;  %v22156_v44 = vld [vmem:[#allocation11_spill] sm:$0xff] }
 0x1e9   :  { %12497 = vmatmul.mubr.msk.f32.gmra.mrb[38].mxu0 %vm1907_vm6, %v8590_v27  ;;  %22149 = vst [vmem:[#allocation3_spill] sm:$0xff] %v18095_v22  ;;  %11836 = vmatmul.mubr.msk.f32.gmra.mrb[94].mxu1 %vm1907_vm6, %v3835_v3  ;;  %v3852_v27 = vcombine.low %v18073_v50, %v18076_v20  ;;  %v8610_v28 = vcombine.low %v18088_v4, %v18058_v17  ;;  %v22157_v20 = vld [vmem:[#allocation6_spill] sm:$0xff] }
 0x1ea   :  { %12499 = vmatprep.mubr.msk.f32.mxu0 %vm13739_vm1, %v21311_v30  ;;  %11838 = vmatprep.mubr.msk.f32.mxu1 %vm13739_vm1, %v21311_v30  ;;  %v8611_v3 = vcombine.low %v18092_v58, %v18095_v22  ;;  %v18118_v10 = vrot.slane %v8522_v33, %v13786_v14  ;;  %v18122_v24 = vcombine.high %v18095_v22, %v18095_v22  ;;  %v22159_v33 = vld [vmem:[#allocation12_spill] sm:$0xff] }
 0x1eb   :  { %v4329_v43 = vcombine.low %v4321_v32, %v4328_v62  ;;  %v4345_v53 = vrot.slane %v10707_v40, %v13786_v14  ;;  %v4347_v50 = vcombine.low %v22157_v20, %v22156_v44  ;;  %v4348_v7 = vcombine.low %v22159_v33, %v22158_v36  ;;  %v22161_v36 = vld [vmem:[#allocation20_spill] sm:$0xff]  ;;  %v22162_v20 = vld [vmem:[#allocation13_spill] sm:$0xff] }
 0x1ec   :  { %22154 = vst [vmem:[#allocation8_spill] sm:$0xff] %v18118_v10  ;;  %22155 = vst [vmem:[#allocation247_spill] sm:$0xff] %v18122_v24  ;;  %v8609_v59 = vcombine.low %v22160_v47, %v8608_v21  ;;  %v8618_v62 = vrot.slane %v8610_v28, %v13786_v14  ;;  %v8625_v32 = vrot.slane %v8611_v3, %v13786_v14  ;;  %v22165_v28 = vld [vmem:[#allocation24_spill] sm:$0xff]  ;;  %v22166_v3 = vld [vmem:[#allocation21_spill] sm:$0xff] }
 0x1ed   :  { %12500 = vmatmul.mubr.msk.f32.gmra.mrb[40].mxu0 %vm1907_vm6, %v8591_v56  ;;  %11839 = vmatmul.mubr.msk.f32.gmra.mrb[96].mxu1 %vm1907_vm6, %v3852_v27  ;;  %v4338_v56 = vrot.slane %v4330_v23, %v13786_v14  ;;  %v8627_v40 = vcombine.low %v18122_v24, %v18118_v10  ;;  %v81_v23 = vld [vmem:[%s20376_s1 + $0xc] sm:$0x7]  ;;  %v4364_v27 = vcombine.low %v22162_v20, %v22161_v36  ;;  %v22172_v36 = vld [vmem:[#allocation281_spill] sm:$0xff] }
 0x1ee   :  { %12502 = vmatprep.mubr.msk.f32.mxu0 %vm13739_vm1, %v21311_v30  ;;  %11843 = vmatprep.mubr.msk.f32.mxu1 %vm13739_vm1, %v21311_v30  ;;  %v18153_v21 = vrot.slane %v4348_v7, %v13786_v14  ;;  %v4365_v44 = vcombine.low %v22166_v3, %v22165_v28  ;;  %v8626_v33 = vcombine.low %v8618_v62, %v8625_v32  ;;  %v22170_v32 = vld [vmem:[#allocation30_spill] sm:$0xff] }
 0x1ef   :  { %v4346_v47 = vcombine.low %v4338_v56, %v4345_v53  ;;  %v4372_v7 = vrot.slane %v4364_v27, %v13786_v14  ;;  %v22168_v53 = vld [vmem:[#allocation25_spill] sm:$0xff] }
 0x1f0   :  { %22164 = vst [vmem:[#allocation4_spill] sm:$0xff] %v18153_v21  ;;  %v18170_v56 = vrot.slane %v4365_v44, %v13786_v14 }
 0x1f1   :  { %12503 = vmatmul.mubr.msk.f32.gmra.mrb[42].mxu0 %vm1907_vm6, %v8600_v8  ;;  %11844 = vmatmul.mubr.msk.f32.vlgmr.msra.gmra.mrb[0].mxu1 %vm1907_vm6, %v4329_v43  ;;  %v18150_v8 = vrot.slane %v4347_v50, %v13786_v14  ;;  %v8634_v43 = vrot.slane %v8627_v40, %v13786_v14  ;;  %v22171_v40 = vld [vmem:[#allocation31_spill] sm:$0xff] }
 0x1f2   :  { %12505 = vmatprep.mubr.msk.f32.mxu0 %vm13739_vm1, %v21311_v30  ;;  %11846 = vmatprep.mubr.msk.f32.mxu1 %vm13739_vm1, %v21311_v30  ;;  %22167 = vst [vmem:[#allocation9_spill] sm:$0xff] %v18170_v56  ;;  %v4380_v3 = vcombine.low %v4372_v7, %v18170_v56  ;;  %v22185_v56 = vld [vmem:[#allocation48_spill] sm:$0xff] }
 0x1f3   :  { %22163 = vst [vmem:[#allocation235_spill] sm:$0xff] %v18150_v8  ;;  %11991 = vmatpush3.msk.msra.mxu1 %vm2006_vm0, %v81_v23  ;;  %v4363_v50 = vcombine.low %v18150_v8, %v18153_v21  ;;  %v4382_v23 = vcombine.low %v22171_v40, %v22170_v32  ;;  %v8635_v27 = vcombine.low %v8634_v43, %v22172_v36  ;;  %v22178_v43 = vld [vmem:[#allocation284_spill] sm:$0xff] }
 0x1f4   :  { %12884 = vmatprep.subr.mxu1 %v21311_v30  ;;  %v22334_v8 = vld [vmem:[#allocation392_spill] sm:$0xff] }
 0x1f5   :  { %12506 = vmatmul.mubr.msk.f32.gmra.mrb[44].mxu0 %vm1907_vm6, %v8609_v59  ;;  %11847 = vmatmul.mubr.msk.f32.gmra.mrb[2].mxu1 %vm1907_vm6, %v4346_v47  ;;  %v22169_v59 = vld [vmem:[#allocation29_spill] sm:$0xff]  ;;  %v22173_v47 = vld [vmem:[#allocation35_spill] sm:$0xff] }
 0x1f6   :  { %12508 = vmatprep.mubr.msk.f32.mxu0 %vm13739_vm1, %v21311_v30  ;;  %v4381_v62 = vcombine.low %v22169_v59, %v22168_v53  ;;  %11849 = vmatprep.mubr.msk.f32.mxu1 %vm13739_vm1, %v21311_v30  ;;  %v10708_v28 = vcombine.high %v22170_v32, %v22173_v47  ;;  %v18190_v53 = vrot.slane %v4382_v23, %v13786_v14  ;;  %v22176_v59 = vld [vmem:[#allocation42_spill] sm:$0xff] }
 0x1f7   :  { %v22179_v32 = vld [vmem:[#allocation282_spill] sm:$0xff] }
 0x1f8   :  { %v18187_v44 = vrot.slane %v4381_v62, %v13786_v14  ;;  %22175 = vst [vmem:[#allocation14_spill] sm:$0xff] %v18190_v53  ;;  %v8636_v36 = vcombine.low %v22179_v32, %v22178_v43  ;;  %v18202_v7 = vrot.slane %v10708_v28, %v13786_v14  ;;  %v22182_v23 = vld [vmem:[#allocation50_spill] sm:$0xff]  ;;  %v22186_v28 = vld [vmem:[#allocation291_spill] sm:$0xff]  ;;  %v22187_v32 = vld [vmem:[#allocation285_spill] sm:$0xff] }
 0x1f9   :  { %12509 = vmatmul.mubr.msk.f32.gmra.mrb[46].mxu0 %vm1907_vm6, %v8626_v33  ;;  %11850 = vmatmul.mubr.msk.f32.gmra.mrb[4].mxu1 %vm1907_vm6, %v4363_v50  ;;  %v22177_v33 = vld [vmem:[#allocation38_spill] sm:$0xff] }
 0x1fa   :  { %12511 = vmatprep.mubr.msk.f32.mxu0 %vm13739_vm1, %v21311_v30  ;;  %22174 = vst [vmem:[#allocation5_spill] sm:$0xff] %v18187_v44  ;;  %v4399_v40 = vcombine.low %v22177_v33, %v22176_v59  ;;  %11852 = vmatprep.mubr.msk.f32.mxu1 %vm13739_vm1, %v21311_v30  ;;  %22180 = vst [vmem:[#allocation11_spill] sm:$0xff] %v18202_v7  ;;  %v4397_v50 = vcombine.low %v18187_v44, %v18190_v53  ;;  %v22183_v59 = vld [vmem:[#allocation43_spill] sm:$0xff]  ;;  %v22184_v33 = vld [vmem:[#allocation60_spill] sm:$0xff] }
 0x1fb   :  { %v4416_v43 = vcombine.low %v22185_v56, %v22184_v33  ;;  %v22188_v53 = vld [vmem:[#allocation58_spill] sm:$0xff]  ;;  %v22193_v56 = vld [vmem:[#allocation61_spill] sm:$0xff] }
 0x1fc   :  { %v18208_v62 = vrot.slane %v4399_v40, %v13786_v14  ;;  %v22189_v40 = vld [vmem:[#allocation59_spill] sm:$0xff] }
 0x1fd   :  { %12512 = vmatmul.mubr.msk.f32.gmra.mrb[48].mxu0 %vm1907_vm6, %v8635_v27  ;;  %11853 = vmatmul.mubr.msk.f32.gmra.mrb[6].mxu1 %vm1907_vm6, %v4380_v3  ;;  %v4415_v27 = vcombine.low %v22183_v59, %v22182_v23  ;;  %v8637_v3 = vcombine.low %v22187_v32, %v22186_v28  ;;  %v4432_v44 = vcombine.low %v22189_v40, %v22188_v53  ;;  %v22194_v53 = vld [vmem:[#allocation296_spill] sm:$0xff]  ;;  %v22195_v32 = vld [vmem:[#allocation293_spill] sm:$0xff] }
 0x1fe   :  { %12514 = vmatprep.mubr.msk.f32.mxu0 %vm13739_vm1, %v21311_v30  ;;  %22181 = vst [vmem:[#allocation6_spill] sm:$0xff] %v18208_v62  ;;  %11855 = vmatprep.mubr.msk.f32.mxu1 %vm13739_vm1, %v21311_v30  ;;  %v4414_v23 = vcombine.low %v18202_v7, %v18208_v62  ;;  %v18230_v33 = vrot.slane %v4416_v43, %v13786_v14  ;;  %v22196_v40 = vld [vmem:[#allocation69_spill] sm:$0xff] }
 0x1ff   :  { %v18227_v59 = vrot.slane %v4415_v27, %v13786_v14  ;;  %v22197_v27 = vld [vmem:[#allocation70_spill] sm:$0xff] }
 0x200   :  { %22191 = vst [vmem:[#allocation12_spill] sm:$0xff] %v18230_v33  ;;  %v4449_v7 = vcombine.low %v22197_v27, %v22196_v40  ;;  %v22202_v27 = vld [vmem:[#allocation298_spill] sm:$0xff] }
 0x201   :  { %12515 = vmatmul.mubr.msk.f32.gmra.mrb[50].mxu0 %vm1907_vm6, %v8636_v36  ;;  %11856 = vmatmul.mubr.msk.f32.gmra.mrb[8].mxu1 %vm1907_vm6, %v4397_v50  ;;  %22190 = vst [vmem:[#allocation16_spill] sm:$0xff] %v18227_v59  ;;  %v22192_v36 = vld [vmem:[#allocation68_spill] sm:$0xff]  ;;  %v8638_v50 = vcombine.low %v22195_v32, %v22194_v53  ;;  %v4431_v43 = vcombine.low %v18227_v59, %v18230_v33  ;;  %v22201_v32 = vld [vmem:[#allocation306_spill] sm:$0xff]  ;;  %v22203_v33 = vld [vmem:[#allocation79_spill] sm:$0xff] }
 0x202   :  { %12517 = vmatprep.mubr.msk.f32.mxu0 %vm13739_vm1, %v21311_v30  ;;  %v4433_v28 = vcombine.low %v22193_v56, %v22192_v36  ;;  %11858 = vmatprep.mubr.msk.f32.mxu1 %vm13739_vm1, %v21311_v30  ;;  %v18247_v56 = vrot.slane %v4432_v44, %v13786_v14  ;;  %v22204_v44 = vld [vmem:[#allocation72_spill] sm:$0xff]  ;;  %v22208_v59 = vld [vmem:[#allocation81_spill] sm:$0xff] }
 0x203   :  { %v4466_v62 = vcombine.low %v22204_v44, %v22203_v33  ;;  %v22209_v33 = vld [vmem:[#allocation310_spill] sm:$0xff]  ;;  %v22213_v44 = vld [vmem:[#allocation91_spill] sm:$0xff] }
 0x204   :  { %22198 = vst [vmem:[#allocation17_spill] sm:$0xff] %v18247_v56  ;;  %v18250_v36 = vrot.slane %v4433_v28, %v13786_v14 }
 0x205   :  { %12518 = vmatmul.mubr.msk.f32.gmra.mrb[52].mxu0 %vm1907_vm6, %v8637_v3  ;;  %11859 = vmatmul.mubr.msk.f32.gmra.mrb[10].mxu1 %vm1907_vm6, %v4414_v23  ;;  %v22200_v3 = vld [vmem:[#allocation71_spill] sm:$0xff]  ;;  %v8639_v23 = vcombine.low %v22202_v27, %v22201_v32 }
 0x206   :  { %12520 = vmatprep.mubr.msk.f32.mxu0 %vm13739_vm1, %v21311_v30  ;;  %22199 = vst [vmem:[#allocation20_spill] sm:$0xff] %v18250_v36  ;;  %v10709_v53 = vcombine.high %v22196_v40, %v22200_v3  ;;  %11861 = vmatprep.mubr.msk.f32.mxu1 %vm13739_vm1, %v21311_v30  ;;  %v4448_v28 = vcombine.low %v18247_v56, %v18250_v36  ;;  %v22210_v27 = vld [vmem:[#allocation307_spill] sm:$0xff]  ;;  %v22216_v56 = vld [vmem:[#allocation92_spill] sm:$0xff] }
 0x207   :  { %v18267_v40 = vrot.slane %v4449_v7, %v13786_v14  ;;  %v18282_v7 = vrot.slane %v4466_v62, %v13786_v14  ;;  %v22215_v36 = vld [vmem:[#allocation99_spill] sm:$0xff]  ;;  %v22217_v62 = vld [vmem:[#allocation316_spill] sm:$0xff] }
 0x208   :  { %v18270_v3 = vrot.slane %v10709_v53, %v13786_v14 }
 0x209   :  { %12521 = vmatmul.mubr.msk.f32.gmra.mrb[54].mxu0 %vm1907_vm6, %v8638_v50  ;;  %11862 = vmatmul.mubr.msk.f32.gmra.mrb[12].mxu1 %vm1907_vm6, %v4431_v43  ;;  %22205 = vst [vmem:[#allocation24_spill] sm:$0xff] %v18267_v40  ;;  %v22207_v50 = vld [vmem:[#allocation85_spill] sm:$0xff]  ;;  %v8640_v43 = vcombine.low %v22210_v27, %v22209_v33  ;;  %22211 = vst [vmem:[#allocation25_spill] sm:$0xff] %v18282_v7  ;;  %v4484_v33 = vcombine.low %v22216_v56, %v22215_v36  ;;  %v22218_v27 = vld [vmem:[#allocation311_spill] sm:$0xff] }
 0x20a   :  { %12523 = vmatprep.mubr.msk.f32.mxu0 %vm13739_vm1, %v21311_v30  ;;  %22206 = vst [vmem:[#allocation21_spill] sm:$0xff] %v18270_v3  ;;  %v4467_v32 = vcombine.low %v22208_v59, %v22207_v50  ;;  %11864 = vmatprep.mubr.msk.f32.mxu1 %vm13739_vm1, %v21311_v30  ;;  %v4465_v53 = vcombine.low %v18267_v40, %v18270_v3  ;;  %v22214_v50 = vld [vmem:[#allocation82_spill] sm:$0xff]  ;;  %v22219_v3 = vld [vmem:[#allocation100_spill] sm:$0xff] }
 0x20b   :  { %v18310_v36 = vrot.slane %v4484_v33, %v13786_v14 }
 0x20c   :  { %v18288_v59 = vrot.slane %v4467_v32, %v13786_v14  ;;  %v22220_v32 = vld [vmem:[#allocation102_spill] sm:$0xff] }
 0x20d   :  { %12524 = vmatmul.mubr.msk.f32.gmra.mrb[56].mxu0 %vm1907_vm6, %v8639_v23  ;;  %11865 = vmatmul.mubr.msk.f32.gmra.mrb[14].mxu1 %vm1907_vm6, %v4448_v28  ;;  %v4483_v23 = vcombine.low %v22214_v50, %v22213_v44  ;;  %v8641_v28 = vcombine.low %v22218_v27, %v22217_v62  ;;  %v4500_v40 = vcombine.low %v22220_v32, %v22219_v3  ;;  %v22224_v50 = vld [vmem:[#allocation103_spill] sm:$0xff]  ;;  %v22226_v27 = vld [vmem:[#allocation317_spill] sm:$0xff]  ;;  %v22227_v32 = vld [vmem:[#allocation104_spill] sm:$0xff] }
 0x20e   :  { %12526 = vmatprep.mubr.msk.f32.mxu0 %vm13739_vm1, %v21311_v30  ;;  %22212 = vst [vmem:[#allocation29_spill] sm:$0xff] %v18288_v59  ;;  %11867 = vmatprep.mubr.msk.f32.mxu1 %vm13739_vm1, %v21311_v30  ;;  %v4482_v44 = vcombine.low %v18282_v7, %v18288_v59  ;;  %22222 = vst [vmem:[#allocation31_spill] sm:$0xff] %v18310_v36  ;;  %v22225_v3 = vld [vmem:[#allocation323_spill] sm:$0xff]  ;;  %v22231_v7 = vld [vmem:[#allocation105_spill] sm:$0xff] }
 0x20f   :  { %v18307_v56 = vrot.slane %v4483_v23, %v13786_v14 }
 0x211   :  { %12527 = vmatmul.mubr.msk.f32.gmra.mrb[58].mxu0 %vm1907_vm6, %v8640_v43  ;;  %11868 = vmatmul.mubr.msk.f32.gmra.mrb[16].mxu1 %vm1907_vm6, %v4465_v53  ;;  %22221 = vst [vmem:[#allocation30_spill] sm:$0xff] %v18307_v56  ;;  %v22223_v43 = vld [vmem:[#allocation101_spill] sm:$0xff]  ;;  %v8642_v53 = vcombine.low %v22226_v27, %v22225_v3  ;;  %v4499_v33 = vcombine.low %v18307_v56, %v18310_v36  ;;  %v22233_v27 = vld [vmem:[#allocation327_spill] sm:$0xff]  ;;  %v22234_v56 = vld [vmem:[#allocation122_spill] sm:$0xff] }
 0x212   :  { %12529 = vmatprep.mubr.msk.f32.mxu0 %vm13739_vm1, %v21311_v30  ;;  %v4501_v62 = vcombine.low %v22224_v50, %v22223_v43  ;;  %11870 = vmatprep.mubr.msk.f32.mxu1 %vm13739_vm1, %v21311_v30  ;;  %v10710_v23 = vcombine.high %v22223_v43, %v22227_v32  ;;  %v18327_v50 = vrot.slane %v4500_v40, %v13786_v14  ;;  %v22232_v43 = vld [vmem:[#allocation332_spill] sm:$0xff]  ;;  %v22239_v32 = vld [vmem:[#allocation121_spill] sm:$0xff] }
 0x213   :  { %v22235_v40 = vld [vmem:[#allocation120_spill] sm:$0xff] }
 0x214   :  { %22228 = vst [vmem:[#allocation281_spill] sm:$0xff] %v18327_v50  ;;  %v18330_v59 = vrot.slane %v4501_v62, %v13786_v14  ;;  %v4534_v36 = vcombine.low %v22235_v40, %v22234_v56  ;;  %v22240_v56 = vld [vmem:[#allocation335_spill] sm:$0xff] }
 0x215   :  { %12530 = vmatmul.mubr.msk.f32.gmra.mrb[60].mxu0 %vm1907_vm6, %v8641_v28  ;;  %11871 = vmatmul.mubr.msk.f32.gmra.mrb[18].mxu1 %vm1907_vm6, %v4482_v44  ;;  %v22230_v28 = vld [vmem:[#allocation116_spill] sm:$0xff]  ;;  %v8643_v44 = vcombine.low %v22233_v27, %v22232_v43  ;;  %v22241_v27 = vld [vmem:[#allocation333_spill] sm:$0xff] }
 0x216   :  { %12532 = vmatprep.mubr.msk.f32.mxu0 %vm13739_vm1, %v21311_v30  ;;  %22229 = vst [vmem:[#allocation42_spill] sm:$0xff] %v18330_v59  ;;  %v4518_v3 = vcombine.low %v22231_v7, %v22230_v28  ;;  %11873 = vmatprep.mubr.msk.f32.mxu1 %vm13739_vm1, %v21311_v30  ;;  %v4516_v62 = vcombine.low %v18327_v50, %v18330_v59  ;;  %v22246_v59 = vld [vmem:[#allocation139_spill] sm:$0xff] }
 0x217   :  { %v18347_v7 = vrot.slane %v10710_v23, %v13786_v14  ;;  %v18362_v23 = vrot.slane %v4534_v36, %v13786_v14  ;;  %v22247_v50 = vld [vmem:[#allocation131_spill] sm:$0xff]  ;;  %v22248_v36 = vld [vmem:[#allocation340_spill] sm:$0xff] }
 0x218   :  { %v18350_v28 = vrot.slane %v4518_v3, %v13786_v14 }
 0x219   :  { %12533 = vmatmul.mubr.msk.f32.gmra.mrb[62].mxu0 %vm1907_vm6, %v8642_v53  ;;  %11874 = vmatmul.mubr.msk.f32.gmra.mrb[20].mxu1 %vm1907_vm6, %v4499_v33  ;;  %22236 = vst [vmem:[#allocation38_spill] sm:$0xff] %v18347_v7  ;;  %v22238_v53 = vld [vmem:[#allocation132_spill] sm:$0xff]  ;;  %v8644_v33 = vcombine.low %v22241_v27, %v22240_v56  ;;  %22242 = vst [vmem:[#allocation282_spill] sm:$0xff] %v18362_v23  ;;  %v4552_v56 = vcombine.low %v22247_v50, %v22246_v59 }
 0x21a   :  { %12535 = vmatprep.mubr.msk.f32.mxu0 %vm13739_vm1, %v21311_v30  ;;  %22237 = vst [vmem:[#allocation284_spill] sm:$0xff] %v18350_v28  ;;  %v4535_v43 = vcombine.low %v22239_v32, %v22238_v53  ;;  %11876 = vmatprep.mubr.msk.f32.mxu1 %vm13739_vm1, %v21311_v30  ;;  %v4533_v3 = vcombine.low %v18347_v7, %v18350_v28  ;;  %v22244_v53 = vld [vmem:[#allocation127_spill] sm:$0xff]  ;;  %v22245_v32 = vld [vmem:[#allocation130_spill] sm:$0xff]  ;;  %v22249_v27 = vld [vmem:[#allocation336_spill] sm:$0xff] }
 0x21b   :  { %v22250_v7 = vld [vmem:[#allocation140_spill] sm:$0xff]  ;;  %v18390_v50 = vrot.slane %v4552_v56, %v13786_v14 }
 0x21c   :  { %v18368_v40 = vrot.slane %v4535_v43, %v13786_v14  ;;  %v22251_v43 = vld [vmem:[#allocation142_spill] sm:$0xff] }
 0x21d   :  { %12536 = vmatmul.mubr.msk.f32.gmra.mrb[64].mxu0 %vm1907_vm6, %v8643_v44  ;;  %11877 = vmatmul.mubr.msk.f32.gmra.mrb[22].mxu1 %vm1907_vm6, %v4516_v62  ;;  %v4551_v44 = vcombine.low %v22245_v32, %v22244_v53  ;;  %v8645_v62 = vcombine.low %v22249_v27, %v22248_v36  ;;  %v4568_v28 = vcombine.low %v22251_v43, %v22250_v7  ;;  %v22255_v36 = vld [vmem:[#allocation350_spill] sm:$0xff]  ;;  %v22257_v43 = vld [vmem:[#allocation152_spill] sm:$0xff] }
 0x21e   :  { %12538 = vmatprep.mubr.msk.f32.mxu0 %vm13739_vm1, %v21311_v30  ;;  %22243 = vst [vmem:[#allocation50_spill] sm:$0xff] %v18368_v40  ;;  %11879 = vmatprep.mubr.msk.f32.mxu1 %vm13739_vm1, %v21311_v30  ;;  %v4550_v32 = vcombine.low %v18362_v23, %v18368_v40  ;;  %22253 = vst [vmem:[#allocation60_spill] sm:$0xff] %v18390_v50  ;;  %v22256_v27 = vld [vmem:[#allocation342_spill] sm:$0xff]  ;;  %v22262_v23 = vld [vmem:[#allocation153_spill] sm:$0xff] }
 0x21f   :  { %v18387_v59 = vrot.slane %v4551_v44, %v13786_v14  ;;  %v22258_v44 = vld [vmem:[#allocation146_spill] sm:$0xff] }
 0x220   :  { %v4585_v40 = vcombine.low %v22258_v44, %v22257_v43  ;;  %v22264_v43 = vld [vmem:[#allocation351_spill] sm:$0xff]  ;;  %v22265_v44 = vld [vmem:[#allocation164_spill] sm:$0xff] }
 0x221   :  { %12539 = vmatmul.mubr.msk.f32.gmra.mrb[66].mxu0 %vm1907_vm6, %v8644_v33  ;;  %11880 = vmatmul.mubr.msk.f32.gmra.mrb[24].mxu1 %vm1907_vm6, %v4533_v3  ;;  %22252 = vst [vmem:[#allocation43_spill] sm:$0xff] %v18387_v59  ;;  %v22254_v33 = vld [vmem:[#allocation143_spill] sm:$0xff]  ;;  %v8646_v3 = vcombine.low %v22256_v27, %v22255_v36  ;;  %v4567_v56 = vcombine.low %v18387_v59, %v18390_v50  ;;  %v22263_v27 = vld [vmem:[#allocation353_spill] sm:$0xff] }
 0x222   :  { %12541 = vmatprep.mubr.msk.f32.mxu0 %vm13739_vm1, %v21311_v30  ;;  %v10711_v53 = vcombine.high %v22250_v7, %v22254_v33  ;;  %11882 = vmatprep.mubr.msk.f32.mxu1 %vm13739_vm1, %v21311_v30  ;;  %v18407_v7 = vrot.slane %v4568_v28, %v13786_v14  ;;  %v22266_v28 = vld [vmem:[#allocation154_spill] sm:$0xff]  ;;  %v22270_v59 = vld [vmem:[#allocation165_spill] sm:$0xff] }
 0x223   :  { %v4602_v50 = vcombine.low %v22266_v28, %v22265_v44  ;;  %v22272_v44 = vld [vmem:[#allocation357_spill] sm:$0xff]  ;;  %v22277_v28 = vld [vmem:[#allocation174_spill] sm:$0xff] }
 0x224   :  { %22259 = vst [vmem:[#allocation291_spill] sm:$0xff] %v18407_v7  ;;  %v18410_v33 = vrot.slane %v10711_v53, %v13786_v14 }
 0x225   :  { %12542 = vmatmul.mubr.msk.f32.gmra.mrb[68].mxu0 %vm1907_vm6, %v8645_v62  ;;  %11883 = vmatmul.mubr.msk.f32.gmra.mrb[26].mxu1 %vm1907_vm6, %v4550_v32  ;;  %v22261_v62 = vld [vmem:[#allocation158_spill] sm:$0xff]  ;;  %v8647_v32 = vcombine.low %v22264_v43, %v22263_v27  ;;  %v22271_v43 = vld [vmem:[#allocation359_spill] sm:$0xff] }
 0x226   :  { %12544 = vmatprep.mubr.msk.f32.mxu0 %vm13739_vm1, %v21311_v30  ;;  %22260 = vst [vmem:[#allocation285_spill] sm:$0xff] %v18410_v33  ;;  %v4586_v36 = vcombine.low %v22262_v23, %v22261_v62  ;;  %11885 = vmatprep.mubr.msk.f32.mxu1 %vm13739_vm1, %v21311_v30  ;;  %v4584_v53 = vcombine.low %v18407_v7, %v18410_v33  ;;  %v22276_v33 = vld [vmem:[#allocation175_spill] sm:$0xff]  ;;  %v22278_v7 = vld [vmem:[#allocation176_spill] sm:$0xff] }
 0x227   :  { %v18427_v23 = vrot.slane %v4585_v40, %v13786_v14  ;;  %v18442_v40 = vrot.slane %v4602_v50, %v13786_v14  ;;  %v22279_v50 = vld [vmem:[#allocation367_spill] sm:$0xff] }
 0x228   :  { %v18430_v62 = vrot.slane %v4586_v36, %v13786_v14 }
 0x229   :  { %12545 = vmatmul.mubr.msk.f32.gmra.mrb[70].mxu0 %vm1907_vm6, %v8646_v3  ;;  %11886 = vmatmul.mubr.msk.f32.gmra.mrb[28].mxu1 %vm1907_vm6, %v4567_v56  ;;  %22267 = vst [vmem:[#allocation58_spill] sm:$0xff] %v18427_v23  ;;  %v22269_v3 = vld [vmem:[#allocation172_spill] sm:$0xff]  ;;  %v8648_v56 = vcombine.low %v22272_v44, %v22271_v43  ;;  %22273 = vst [vmem:[#allocation68_spill] sm:$0xff] %v18442_v40  ;;  %v4620_v43 = vcombine.low %v22278_v7, %v22277_v28 }
 0x22a   :  { %12547 = vmatprep.mubr.msk.f32.mxu0 %vm13739_vm1, %v21311_v30  ;;  %22268 = vst [vmem:[#allocation59_spill] sm:$0xff] %v18430_v62  ;;  %v4603_v27 = vcombine.low %v22270_v59, %v22269_v3  ;;  %11888 = vmatprep.mubr.msk.f32.mxu1 %vm13739_vm1, %v21311_v30  ;;  %v4601_v36 = vcombine.low %v18427_v23, %v18430_v62  ;;  %v22275_v3 = vld [vmem:[#allocation173_spill] sm:$0xff]  ;;  %v22280_v44 = vld [vmem:[#allocation360_spill] sm:$0xff]  ;;  %v22285_v23 = vld [vmem:[#allocation178_spill] sm:$0xff] }
 0x22b   :  { %v22281_v62 = vld [vmem:[#allocation177_spill] sm:$0xff] }
 0x22c   :  { %v18448_v59 = vrot.slane %v4603_v27, %v13786_v14  ;;  %v10712_v27 = vcombine.high %v22277_v28, %v22281_v62  ;;  %v22286_v28 = vld [vmem:[#allocation369_spill] sm:$0xff] }
 0x22d   :  { %12548 = vmatmul.mubr.msk.f32.gmra.mrb[72].mxu0 %vm1907_vm6, %v8647_v32  ;;  %11889 = vmatmul.mubr.msk.f32.gmra.mrb[30].mxu1 %vm1907_vm6, %v4584_v53  ;;  %v4619_v32 = vcombine.low %v22276_v33, %v22275_v3  ;;  %v8649_v53 = vcombine.low %v22280_v44, %v22279_v50  ;;  %v18470_v3 = vrot.slane %v4620_v43, %v13786_v14  ;;  %v22287_v44 = vld [vmem:[#allocation196_spill] sm:$0xff] }
 0x22e   :  { %12550 = vmatprep.mubr.msk.f32.mxu0 %vm13739_vm1, %v21311_v30  ;;  %22274 = vst [vmem:[#allocation61_spill] sm:$0xff] %v18448_v59  ;;  %11891 = vmatprep.mubr.msk.f32.mxu1 %vm13739_vm1, %v21311_v30  ;;  %v4618_v33 = vcombine.low %v18442_v40, %v18448_v59  ;;  %v22292_v59 = vld [vmem:[#allocation195_spill] sm:$0xff] }
 0x22f   :  { %v18467_v7 = vrot.slane %v4619_v32, %v13786_v14  ;;  %22283 = vst [vmem:[#allocation293_spill] sm:$0xff] %v18470_v3  ;;  %v22288_v32 = vld [vmem:[#allocation193_spill] sm:$0xff] }
 0x230   :  { %v4653_v40 = vcombine.low %v22288_v32, %v22287_v44  ;;  %v22294_v44 = vld [vmem:[#allocation377_spill] sm:$0xff]  ;;  %v22295_v32 = vld [vmem:[#allocation202_spill] sm:$0xff] }
 0x231   :  { %12551 = vmatmul.mubr.msk.f32.gmra.mrb[74].mxu0 %vm1907_vm6, %v8648_v56  ;;  %11892 = vmatmul.mubr.msk.f32.gmra.mrb[32].mxu1 %vm1907_vm6, %v4601_v36  ;;  %22282 = vst [vmem:[#allocation296_spill] sm:$0xff] %v18467_v7  ;;  %v22284_v56 = vld [vmem:[#allocation191_spill] sm:$0xff]  ;;  %v8650_v36 = vcombine.low %v22286_v28, %v21832_v37  ;;  %v4635_v43 = vcombine.low %v18467_v7, %v18470_v3 }
 0x232   :  { %12553 = vmatprep.mubr.msk.f32.mxu0 %vm13739_vm1, %v21311_v30  ;;  %v4637_v50 = vcombine.low %v22285_v23, %v22284_v56  ;;  %11894 = vmatprep.mubr.msk.f32.mxu1 %vm13739_vm1, %v21311_v30  ;;  %v18487_v23 = vrot.slane %v10712_v27, %v13786_v14  ;;  %v22293_v28 = vld [vmem:[#allocation379_spill] sm:$0xff]  ;;  %v22296_v27 = vld [vmem:[#allocation204_spill] sm:$0xff] }
 0x233   :  { %v4670_v3 = vcombine.low %v22296_v27, %v22295_v32  ;;  %v22300_v7 = vld [vmem:[#allocation207_spill] sm:$0xff]  ;;  %v22304_v32 = vld [vmem:[#allocation216_spill] sm:$0xff]  ;;  %v22305_v27 = vld [vmem:[#allocation217_spill] sm:$0xff] }
 0x234   :  { %22289 = vst [vmem:[#allocation69_spill] sm:$0xff] %v18487_v23  ;;  %v18490_v56 = vrot.slane %v4637_v50, %v13786_v14 }
 0x235   :  { %12554 = vmatmul.mubr.msk.f32.gmra.mrb[76].mxu0 %vm1907_vm6, %v8649_v53  ;;  %11895 = vmatmul.mubr.msk.f32.gmra.mrb[34].mxu1 %vm1907_vm6, %v4618_v33  ;;  %v22291_v53 = vld [vmem:[#allocation205_spill] sm:$0xff]  ;;  %v8651_v33 = vcombine.low %v22294_v44, %v22293_v28  ;;  %v22301_v44 = vld [vmem:[#allocation380_spill] sm:$0xff] }
 0x236   :  { %12556 = vmatprep.mubr.msk.f32.mxu0 %vm13739_vm1, %v21311_v30  ;;  %22290 = vst [vmem:[#allocation70_spill] sm:$0xff] %v18490_v56  ;;  %v4654_v37 = vcombine.low %v22292_v59, %v22291_v53  ;;  %11897 = vmatprep.mubr.msk.f32.mxu1 %vm13739_vm1, %v21311_v30  ;;  %v4652_v50 = vcombine.low %v18487_v23, %v18490_v56 }
 0x237   :  { %v18507_v53 = vrot.slane %v4653_v40, %v13786_v14  ;;  %v18522_v40 = vrot.slane %v4670_v3, %v13786_v14 }
 0x238   :  { %v18510_v59 = vrot.slane %v4654_v37, %v13786_v14 }
 0x239   :  { %12557 = vmatmul.mubr.msk.f32.gmra.mrb[78].mxu0 %vm1907_vm6, %v8650_v36  ;;  %11898 = vmatmul.mubr.msk.f32.gmra.mrb[36].mxu1 %vm1907_vm6, %v4635_v43  ;;  %22297 = vst [vmem:[#allocation306_spill] sm:$0xff] %v18507_v53  ;;  %v22299_v36 = vld [vmem:[#allocation213_spill] sm:$0xff]  ;;  %v8652_v43 = vcombine.low %v22301_v44, %v21837_v45  ;;  %22302 = vst [vmem:[#allocation79_spill] sm:$0xff] %v18522_v40 }
 0x23a   :  { %12559 = vmatprep.mubr.msk.f32.mxu0 %vm13739_vm1, %v21311_v30  ;;  %22298 = vst [vmem:[#allocation298_spill] sm:$0xff] %v18510_v59  ;;  %v4671_v28 = vcombine.low %v22300_v7, %v22299_v36  ;;  %11900 = vmatprep.mubr.msk.f32.mxu1 %vm13739_vm1, %v21311_v30  ;;  %v4669_v37 = vcombine.low %v18507_v53, %v18510_v59  ;;  %v22306_v36 = vld [vmem:[#allocation219_spill] sm:$0xff]  ;;  %v22307_v44 = vld [vmem:[#allocation141_spill] sm:$0xff]  ;;  %v22310_v59 = vld [vmem:[#allocation384_spill] sm:$0xff] }
 0x23b   :  { %v10713_v45 = vcombine.high %v22304_v32, %v22306_v36  ;;  %v18538_v3 = vcombine.high %v22307_v44, %v22307_v44  ;;  %v22316_v53 = vld [vmem:[#allocation229_spill] sm:$0xff] }
 0x23c   :  { %v18528_v7 = vrot.slane %v4671_v28, %v13786_v14  ;;  %v22311_v28 = vld [vmem:[#allocation228_spill] sm:$0xff] }
 0x23d   :  { %12560 = vmatmul.mubr.msk.f32.gmra.mrb[80].mxu0 %vm1907_vm6, %v8651_v33  ;;  %11901 = vmatmul.mubr.msk.f32.gmra.mrb[38].mxu1 %vm1907_vm6, %v4652_v50  ;;  %v4687_v33 = vcombine.low %v22305_v27, %v22304_v32  ;;  %22308 = vst [vmem:[#allocation85_spill] sm:$0xff] %v18538_v3  ;;  %v22309_v50 = vld [vmem:[#allocation37_spill] sm:$0xff]  ;;  %v22312_v27 = vld [vmem:[#allocation224_spill] sm:$0xff] }
 0x23e   :  { %12562 = vmatprep.mubr.msk.f32.mxu0 %vm13739_vm1, %v21311_v30  ;;  %22303 = vst [vmem:[#allocation72_spill] sm:$0xff] %v18528_v7  ;;  %11903 = vmatprep.mubr.msk.f32.mxu1 %vm13739_vm1, %v21311_v30  ;;  %v8653_v23 = vcombine.low %v22310_v59, %v22309_v50  ;;  %v4704_v56 = vcombine.low %v22312_v27, %v22311_v28  ;;  %v76_v32 = vld [vmem:[%s20377_s0 + $0x1f0] sm:$0xff] }
 0x23f   :  { %v4686_v36 = vcombine.low %v18522_v40, %v18528_v7  ;;  %v18557_v59 = vrot.slane %v10713_v45, %v13786_v14  ;;  %v22315_v50 = vld [vmem:[#allocation232_spill] sm:$0xff]  ;;  %v8656_v28 = vcombine.low %v22307_v44, %v18538_v3  ;;  %v8538_v40 = vcombine.high %v76_v32, %v76_v32  ;;  %v77_v45 = vld [vmem:[%s20377_s0 + $0x1f8] sm:$0xff]  ;;  %v22324_v44 = vld [vmem:[#allocation250_spill] sm:$0xff] }
 0x240   :  { %v4705_v62 = vcombine.low %v22316_v53, %v22315_v50  ;;  %v22318_v27 = vld [vmem:[#allocation32_spill] sm:$0xff]  ;;  %v18574_v53 = vrot.slane %v4704_v56, %v13786_v14  ;;  %v22325_v3 = vld [vmem:[#allocation246_spill] sm:$0xff] }
 0x241   :  { %12563 = vmatmul.mubr.msk.f32.gmra.mrb[82].mxu0 %vm1907_vm6, %v8652_v43  ;;  %11904 = vmatmul.mubr.msk.f32.gmra.mrb[40].mxu1 %vm1907_vm6, %v4669_v37  ;;  %v18554_v43 = vrot.slane %v4687_v33, %v13786_v14  ;;  %22314 = vst [vmem:[#allocation310_spill] sm:$0xff] %v18557_v59  ;;  %v22317_v37 = vld [vmem:[#allocation218_spill] sm:$0xff]  ;;  %v18569_v33 = vrot.slane %v76_v32, %v13786_v14  ;;  %v22322_v32 = vld [vmem:[#allocation236_spill] sm:$0xff] }
 0x242   :  { %12565 = vmatprep.mubr.msk.f32.mxu0 %vm13739_vm1, %v21311_v30  ;;  %11906 = vmatprep.mubr.msk.f32.mxu1 %vm13739_vm1, %v21311_v30  ;;  %v8654_v7 = vcombine.low %v22318_v27, %v22317_v37  ;;  %22320 = vst [vmem:[#allocation91_spill] sm:$0xff] %v18574_v53  ;;  %v18583_v50 = vrot.slane %v4705_v62, %v13786_v14  ;;  %v22323_v37 = vld [vmem:[#allocation230_spill] sm:$0xff]  ;;  %v22326_v56 = vld [vmem:[#allocation208_spill] sm:$0xff] }
 0x243   :  { %22313 = vst [vmem:[#allocation81_spill] sm:$0xff] %v18554_v43  ;;  %22319 = vst [vmem:[#allocation307_spill] sm:$0xff] %v18569_v33  ;;  %v4721_v27 = vcombine.low %v22323_v37, %v22322_v32  ;;  %v4722_v47 = vcombine.low %v22325_v3, %v22324_v44  ;;  %v8655_v21 = vcombine.low %v16376_v57, %v22326_v56  ;;  %v22329_v57 = vld [vmem:[#allocation257_spill] sm:$0xff]  ;;  %v22330_v3 = vld [vmem:[#allocation255_spill] sm:$0xff] }
 0x244   :  { %22321 = vst [vmem:[#allocation99_spill] sm:$0xff] %v18583_v50  ;;  %v18600_v62 = vcombine.high %v18569_v33, %v18569_v33  ;;  %v8555_v32 = vcombine.high %v77_v45, %v77_v45  ;;  %v18603_v44 = vrot.slane %v77_v45, %v13786_v14  ;;  %v4738_v56 = vcombine.low %v22330_v3, %v22329_v57  ;;  %v22333_v37 = vld [vmem:[#allocation262_spill] sm:$0xff]  ;;  %v22338_v3 = vld [vmem:[#allocation263_spill] sm:$0xff] }
 0x245   :  { %12566 = vmatmul.mubr.msk.f32.gmra.mrb[84].mxu0 %vm1907_vm6, %v8653_v23  ;;  %11907 = vmatmul.mubr.msk.f32.gmra.mrb[42].mxu1 %vm1907_vm6, %v4686_v36  ;;  %v4703_v23 = vcombine.low %v18554_v43, %v18557_v59  ;;  %v8663_v36 = vrot.slane %v8656_v28, %v13786_v14  ;;  %v18596_v59 = vrot.slane %v8538_v40, %v13786_v14  ;;  %v22332_v43 = vld [vmem:[#allocation258_spill] sm:$0xff] }
 0x246   :  { %12568 = vmatprep.mubr.msk.f32.mxu0 %vm13739_vm1, %v21311_v30  ;;  %11909 = vmatprep.mubr.msk.f32.mxu1 %vm13739_vm1, %v21311_v30  ;;  %22328 = vst [vmem:[#allocation316_spill] sm:$0xff] %v18603_v44  ;;  %v4720_v40 = vcombine.low %v18574_v53, %v18583_v50  ;;  %v4736_v28 = vrot.slane %v4722_v47, %v13786_v14  ;;  %v22340_v50 = vld [vmem:[#allocation264_spill] sm:$0xff] }
 0x247   :  { %22327 = vst [vmem:[#allocation92_spill] sm:$0xff] %v18596_v59  ;;  %v4739_v45 = vcombine.low %v22333_v37, %v22332_v43  ;;  %v8664_v20 = vcombine.low %v22334_v8, %v8663_v36  ;;  %v8666_v57 = vcombine.low %v16978_v6, %v18569_v33  ;;  %v18631_v47 = vrot.slane %v8555_v32, %v13786_v14  ;;  %v22339_v32 = vld [vmem:[#allocation268_spill] sm:$0xff] }
 0x248   :  { %v18635_v8 = vcombine.high %v18603_v44, %v18603_v44  ;;  %v4746_v37 = vrot.slane %v4738_v56, %v13786_v14  ;;  %v10714_v33 = vcombine.high %v22332_v43, %v22338_v3  ;;  %v4756_v53 = vcombine.low %v22340_v50, %v22339_v32  ;;  %v22341_v50 = vld [vmem:[#allocation272_spill] sm:$0xff] }
 0x249   :  { %12569 = vmatmul.mubr.msk.f32.gmra.mrb[86].mxu0 %vm1907_vm6, %v8654_v7  ;;  %11910 = vmatmul.mubr.msk.f32.gmra.mrb[44].mxu1 %vm1907_vm6, %v4703_v23  ;;  %v18613_v7 = vrot.slane %v4721_v27, %v13786_v14  ;;  %v8667_v23 = vcombine.low %v18600_v62, %v18596_v59  ;;  %v18628_v27 = vcombine.high %v18596_v59, %v18596_v59 }
 0x24a   :  { %12571 = vmatprep.mubr.msk.f32.mxu0 %vm13739_vm1, %v21311_v30  ;;  %11912 = vmatprep.mubr.msk.f32.mxu1 %vm13739_vm1, %v21311_v30  ;;  %22336 = vst [vmem:[#allocation102_spill] sm:$0xff] %v18631_v47  ;;  %22337 = vst [vmem:[#allocation101_spill] sm:$0xff] %v18635_v8  ;;  %v4753_v36 = vrot.slane %v4739_v45, %v13786_v14  ;;  %v8665_v59 = vcombine.low %v17060_v41, %v17092_v25  ;;  %v22342_v41 = vld [vmem:[#allocation270_spill] sm:$0xff] }
 0x24b   :  { %22331 = vst [vmem:[#allocation311_spill] sm:$0xff] %v18613_v7  ;;  %22335 = vst [vmem:[#allocation100_spill] sm:$0xff] %v18628_v27  ;;  %v8674_v56 = vrot.slane %v8666_v57, %v13786_v14  ;;  %v8684_v43 = vcombine.low %v18635_v8, %v18631_v47  ;;  %v4772_v25 = vcombine.low %v22342_v41, %v22341_v50 }
 0x24c   :  { %v4754_v45 = vcombine.low %v4746_v37, %v4753_v36  ;;  %v18665_v57 = vrot.slane %v4756_v53, %v13786_v14  ;;  %v22343_v37 = vld [vmem:[#allocation276_spill] sm:$0xff]  ;;  %v22345_v36 = vld [vmem:[#allocation277_spill] sm:$0xff] }
 0x24d   :  { %12572 = vmatmul.mubr.msk.f32.gmra.mrb[88].mxu0 %vm1907_vm6, %v8655_v21  ;;  %11913 = vmatmul.mubr.msk.f32.gmra.mrb[46].mxu1 %vm1907_vm6, %v4720_v40  ;;  %v4737_v21 = vcombine.low %v18613_v7, %v4736_v28  ;;  %v8681_v40 = vrot.slane %v8667_v23, %v13786_v14  ;;  %v8683_v28 = vcombine.low %v18628_v27, %v18603_v44 }
 0x24e   :  { %12574 = vmatprep.mubr.msk.f32.mxu0 %vm13739_vm1, %v21311_v30  ;;  %11915 = vmatprep.mubr.msk.f32.mxu1 %vm13739_vm1, %v21311_v30  ;;  %v4773_v23 = vcombine.low %v15524_v19, %v16961_v61  ;;  %v8698_v50 = vrot.slane %v8684_v43, %v13786_v14 }
 0x24f   :  { %v8682_v32 = vcombine.low %v8674_v56, %v8681_v40  ;;  %v8691_v7 = vrot.slane %v8683_v28, %v13786_v14  ;;  %v22346_v28 = vld [vmem:[#allocation278_spill] sm:$0xff] }
 0x250   :  { %v4787_v53 = vrot.slane %v4773_v23, %v13786_v14  ;;  %v4806_v43 = vcombine.low %v22346_v28, %v15577_v9  ;;  %v86_v23 = vld [vmem:[%s20376_s1 + $0x20] sm:$0x7] }
 0x251   :  { %12575 = vmatmul.mubr.msk.f32.gmra.mrb[90].mxu0 %vm1907_vm6, %v8664_v20  ;;  %11916 = vmatmul.mubr.msk.f32.gmra.mrb[48].mxu1 %vm1907_vm6, %v4737_v21  ;;  %v4763_v20 = vrot.slane %v10714_v33, %v13786_v14  ;;  %v18677_v33 = vrot.slane %v4772_v25, %v13786_v14  ;;  %v22344_v21 = vld [vmem:[#allocation275_spill] sm:$0xff]  ;;  %v8699_v40 = vcombine.low %v8691_v7, %v8698_v50  ;;  %v22357_v28 = vld [vmem:[#allocation22_spill] sm:$0xff] }
 0x252   :  { %12577 = vmatprep.mubr.msk.f32.mxu0 %vm13739_vm1, %v21311_v30  ;;  %11918 = vmatprep.mubr.msk.f32.mxu1 %vm13739_vm1, %v21311_v30  ;;  %v4790_v56 = vcombine.low %v22345_v36, %v22344_v21  ;;  %v18709_v7 = vrot.slane %v4806_v43, %v13786_v14  ;;  %v22350_v50 = vld [vmem:[#allocation287_spill] sm:$0xff]  ;;  %v22354_v36 = vld [vmem:[#allocation36_spill] sm:$0xff] }
 0x253   :  { %v4771_v61 = vcombine.low %v4763_v20, %v18665_v57  ;;  %v4788_v41 = vcombine.low %v18677_v33, %v4787_v53  ;;  %v22358_v43 = vld [vmem:[#allocation15_spill] sm:$0xff] }
 0x254   :  { %v18699_v25 = vrot.slane %v4790_v56, %v13786_v14  ;;  %v22355_v56 = vld [vmem:[#allocation391_spill] sm:$0xff] }
 0x255   :  { %12578 = vmatmul.mubr.msk.f32.gmra.mrb[92].mxu0 %vm1907_vm6, %v8665_v59  ;;  %11919 = vmatmul.mubr.msk.f32.gmra.mrb[50].mxu1 %vm1907_vm6, %v4754_v45  ;;  %v4789_v59 = vcombine.low %v22343_v37, %v21856_v26  ;;  %v22348_v45 = vld [vmem:[#allocation279_spill] sm:$0xff]  ;;  %v22352_v37 = vld [vmem:[#allocation289_spill] sm:$0xff] }
 0x256   :  { %12580 = vmatprep.mubr.msk.f32.mxu0 %vm13739_vm1, %v21311_v30  ;;  %11921 = vmatprep.mubr.msk.f32.mxu1 %vm13739_vm1, %v21311_v30  ;;  %22347 = vst [vmem:[#allocation103_spill] sm:$0xff] %v18699_v25  ;;  %v10715_v20 = vcombine.high %v15577_v9, %v22348_v45 }
 0x257   :  { %v18696_v26 = vrot.slane %v4789_v59, %v13786_v14  ;;  %v22353_v59 = vld [vmem:[#allocation286_spill] sm:$0xff] }
 0x258   :  { %v4824_v21 = vcombine.low %v22353_v59, %v22352_v37  ;;  %v22361_v37 = vld [vmem:[#allocation295_spill] sm:$0xff]  ;;  %v22362_v59 = vld [vmem:[#allocation292_spill] sm:$0xff] }
 0x259   :  { %12581 = vmatmul.mubr.msk.f32.gmra.mrb[94].mxu0 %vm1907_vm6, %v8682_v32  ;;  %11922 = vmatmul.mubr.msk.f32.gmra.mrb[52].mxu1 %vm1907_vm6, %v4771_v61  ;;  %v4805_v9 = vcombine.low %v18696_v26, %v18699_v25  ;;  %v18718_v32 = vrot.slane %v10715_v20, %v13786_v14  ;;  %v22351_v61 = vld [vmem:[#allocation283_spill] sm:$0xff]  ;;  %v22359_v20 = vld [vmem:[#allocation197_spill] sm:$0xff]  ;;  %v4841_v25 = vcombine.low %v22362_v59, %v22361_v37 }
 0x25a   :  { %12583 = vmatprep.mubr.msk.f32.mxu0 %vm13739_vm1, %v21311_v30  ;;  %11924 = vmatprep.mubr.msk.f32.mxu1 %vm13739_vm1, %v21311_v30  ;;  %v4823_v53 = vcombine.low %v22351_v61, %v22350_v50  ;;  %v22360_v50 = vld [vmem:[#allocation288_spill] sm:$0xff]  ;;  %v22367_v37 = vld [vmem:[#allocation299_spill] sm:$0xff]  ;;  %v22368_v59 = vld [vmem:[#allocation297_spill] sm:$0xff] }
 0x25b   :  { %22349 = vst [vmem:[#allocation323_spill] sm:$0xff] %v18718_v32  ;;  %v4840_v61 = vcombine.low %v22360_v50, %v22359_v20  ;;  %v22366_v20 = vld [vmem:[#allocation294_spill] sm:$0xff] }
 0x25d   :  { %12584 = vmatmul.mubr.msk.f32.gmra.mrb[96].mxu0 %vm1907_vm6, %v8699_v40  ;;  %11925 = vmatmul.mubr.msk.f32.gmra.mrb[54].mxu1 %vm1907_vm6, %v4788_v41  ;;  %v22356_v40 = vcombine.low %v22354_v36, %v22355_v56  ;;  %v9207_v41 = vcombine.low %v22358_v43, %v22357_v28  ;;  %v4822_v36 = vcombine.low %v18709_v7, %v18718_v32  ;;  %v22364_v28 = vld [vmem:[#allocation19_spill] sm:$0xff] }
 0x25e   :  { %12588 = vmatprep.mubr.msk.f32.mxu0 %vm13739_vm1, %v21311_v30  ;;  %11927 = vmatprep.mubr.msk.f32.mxu1 %vm13739_vm1, %v21311_v30  ;;  %v18743_v56 = vrot.slane %v4823_v53, %v13786_v14  ;;  %v18759_v53 = vrot.slane %v4841_v25, %v13786_v14  ;;  %v22383_v32 = vld [vmem:[#allocation315_spill] sm:$0xff] }
 0x261   :  { %12589 = vmatmul.mubr.msk.f32.vlgmr.msra.gmra.mrb[0].mxu0 %vm1907_vm6, %v22356_v40  ;;  %11928 = vmatmul.mubr.msk.f32.gmra.mrb[56].mxu1 %vm1907_vm6, %v4805_v9  ;;  %v18746_v40 = vrot.slane %v4824_v21, %v13786_v14  ;;  %v18756_v9 = vrot.slane %v4840_v61, %v13786_v14  ;;  %v22369_v61 = vld [vmem:[#allocation23_spill] sm:$0xff] }
 0x262   :  { %12736 = vmatpush3.msk.msra.mxu0 %vm2006_vm0, %v86_v23  ;;  %12591 = vmatprep.mubr.msk.f32.mxu0 %vm13739_vm1, %v21311_v30  ;;  %v22363_v23 = vld [vmem:[#allocation239_spill] sm:$0xff] }
 0x263   :  { %11930 = vmatprep.mubr.msk.f32.mxu1 %vm13739_vm1, %v21311_v30  ;;  %v9208_v43 = vcombine.low %v22364_v28, %v22363_v23  ;;  %22365 = vst [vmem:[#allocation317_spill] sm:$0xff] %v18756_v9  ;;  %v4839_v21 = vcombine.low %v18743_v56, %v18746_v40  ;;  %v4858_v23 = vcombine.low %v22368_v59, %v15710_v54  ;;  %v22370_v28 = vld [vmem:[#allocation26_spill] sm:$0xff] }
 0x264   :  { %v9209_v25 = vcombine.low %v22370_v28, %v22369_v61  ;;  %v4875_v59 = vcombine.low %v21920_v34, %v21923_v49  ;;  %v22371_v61 = vld [vmem:[#allocation39_spill] sm:$0xff]  ;;  %v22372_v28 = vld [vmem:[#allocation41_spill] sm:$0xff] }
 0x265   :  { %12592 = vmatmul.mubr.msk.f32.gmra.mrb[2].mxu0 %vm1907_vm6, %v9207_v41  ;;  %11931 = vmatmul.mubr.msk.f32.gmra.mrb[58].mxu1 %vm1907_vm6, %v4822_v36  ;;  %v4857_v41 = vcombine.low %v22367_v37, %v22366_v20  ;;  %v4856_v36 = vcombine.low %v18756_v9, %v18759_v53  ;;  %v18782_v37 = vrot.slane %v4858_v23, %v13786_v14  ;;  %v22373_v23 = vld [vmem:[#allocation304_spill] sm:$0xff]  ;;  %v22382_v9 = vld [vmem:[#allocation314_spill] sm:$0xff] }
 0x266   :  { %12594 = vmatprep.mubr.msk.f32.mxu0 %vm13739_vm1, %v21311_v30  ;;  %11933 = vmatprep.mubr.msk.f32.mxu1 %vm13739_vm1, %v21311_v30 }
 0x267   :  { %v18779_v20 = vrot.slane %v4857_v41, %v13786_v14  ;;  %v4891_v41 = vcombine.low %v21921_v2, %v21922_v42  ;;  %v22376_v2 = vld [vmem:[#allocation44_spill] sm:$0xff]  ;;  %v22377_v42 = vld [vmem:[#allocation45_spill] sm:$0xff] }
 0x269   :  { %12595 = vmatmul.mubr.msk.f32.gmra.mrb[4].mxu0 %vm1907_vm6, %v9208_v43  ;;  %11934 = vmatmul.mubr.msk.f32.gmra.mrb[60].mxu1 %vm1907_vm6, %v4839_v21  ;;  %v10716_v43 = vcombine.high %v15710_v54, %v21919_v1  ;;  %v9210_v21 = vcombine.low %v22372_v28, %v22371_v61  ;;  %v4892_v54 = vcombine.low %v22373_v23, %v17284_v13  ;;  %v22381_v28 = vld [vmem:[#allocation313_spill] sm:$0xff] }
 0x26a   :  { %12597 = vmatprep.mubr.msk.f32.mxu0 %vm13739_vm1, %v21311_v30  ;;  %11936 = vmatprep.mubr.msk.f32.mxu1 %vm13739_vm1, %v21311_v30  ;;  %v4873_v34 = vcombine.low %v18779_v20, %v18782_v37  ;;  %v9211_v61 = vcombine.low %v22377_v42, %v22376_v2  ;;  %v18816_v13 = vrot.slane %v4891_v41, %v13786_v14  ;;  %v22384_v41 = vld [vmem:[#allocation49_spill] sm:$0xff]  ;;  %v22385_v42 = vld [vmem:[#allocation51_spill] sm:$0xff] }
 0x26b   :  { %v18803_v49 = vrot.slane %v10716_v43, %v13786_v14  ;;  %v4909_v2 = vcombine.low %v22383_v32, %v22382_v9  ;;  %v22387_v9 = vld [vmem:[#allocation318_spill] sm:$0xff]  ;;  %v22395_v23 = vld [vmem:[#allocation325_spill] sm:$0xff] }
 0x26c   :  { %22378 = vst [vmem:[#allocation332_spill] sm:$0xff] %v18816_v13 }
 0x26d   :  { %12598 = vmatmul.mubr.msk.f32.gmra.mrb[6].mxu0 %vm1907_vm6, %v9209_v25  ;;  %11937 = vmatmul.mubr.msk.f32.gmra.mrb[62].mxu1 %vm1907_vm6, %v4856_v36  ;;  %22374 = vst [vmem:[#allocation116_spill] sm:$0xff] %v18803_v49  ;;  %v18806_v25 = vrot.slane %v4875_v59, %v13786_v14  ;;  %v18819_v36 = vrot.slane %v4892_v54, %v13786_v14  ;;  %v22380_v59 = vld [vmem:[#allocation312_spill] sm:$0xff] }
 0x26e   :  { %12600 = vmatprep.mubr.msk.f32.mxu0 %vm13739_vm1, %v21311_v30  ;;  %11939 = vmatprep.mubr.msk.f32.mxu1 %vm13739_vm1, %v21311_v30  ;;  %v9212_v54 = vcombine.low %v22385_v42, %v22384_v41  ;;  %v18842_v32 = vrot.slane %v4909_v2, %v13786_v14  ;;  %v22390_v42 = vld [vmem:[#allocation65_spill] sm:$0xff] }
 0x26f   :  { %22375 = vst [vmem:[#allocation105_spill] sm:$0xff] %v18806_v25  ;;  %22379 = vst [vmem:[#allocation327_spill] sm:$0xff] %v18819_v36  ;;  %v4890_v43 = vcombine.low %v18803_v49, %v18806_v25  ;;  %v22389_v49 = vld [vmem:[#allocation320_spill] sm:$0xff]  ;;  %v22393_v2 = vld [vmem:[#allocation321_spill] sm:$0xff] }
 0x270   :  { %22386 = vst [vmem:[#allocation122_spill] sm:$0xff] %v18842_v32  ;;  %v10717_v41 = vcombine.high %v22387_v9, %v22389_v49 }
 0x271   :  { %12601 = vmatmul.mubr.msk.f32.gmra.mrb[8].mxu0 %vm1907_vm6, %v9210_v21  ;;  %11940 = vmatmul.mubr.msk.f32.gmra.mrb[64].mxu1 %vm1907_vm6, %v4873_v34  ;;  %v4908_v21 = vcombine.low %v22381_v28, %v22380_v59  ;;  %v4907_v34 = vcombine.low %v18816_v13, %v18819_v36  ;;  %v22388_v28 = vld [vmem:[#allocation319_spill] sm:$0xff]  ;;  %v22391_v36 = vld [vmem:[#allocation54_spill] sm:$0xff]  ;;  %v22394_v13 = vld [vmem:[#allocation329_spill] sm:$0xff] }
 0x272   :  { %12603 = vmatprep.mubr.msk.f32.mxu0 %vm13739_vm1, %v21311_v30  ;;  %11942 = vmatprep.mubr.msk.f32.mxu1 %vm13739_vm1, %v21311_v30 }
 0x273   :  { %v18839_v59 = vrot.slane %v4908_v21, %v13786_v14  ;;  %v22392_v21 = vld [vmem:[#allocation324_spill] sm:$0xff] }
 0x274   :  { %v4942_v25 = vcombine.low %v22393_v2, %v22392_v21  ;;  %v22403_v2 = vld [vmem:[#allocation74_spill] sm:$0xff] }
 0x275   :  { %12604 = vmatmul.mubr.msk.f32.gmra.mrb[10].mxu0 %vm1907_vm6, %v9211_v61  ;;  %11943 = vmatmul.mubr.msk.f32.gmra.mrb[66].mxu1 %vm1907_vm6, %v4890_v43  ;;  %v4925_v61 = vcombine.low %v22388_v28, %v22387_v9  ;;  %v9213_v43 = vcombine.low %v22391_v36, %v22390_v42  ;;  %v4943_v28 = vcombine.low %v22395_v23, %v22394_v13  ;;  %v22397_v36 = vld [vmem:[#allocation80_spill] sm:$0xff]  ;;  %v22398_v42 = vld [vmem:[#allocation62_spill] sm:$0xff] }
 0x276   :  { %12606 = vmatprep.mubr.msk.f32.mxu0 %vm13739_vm1, %v21311_v30  ;;  %11945 = vmatprep.mubr.msk.f32.mxu1 %vm13739_vm1, %v21311_v30  ;;  %v4924_v9 = vcombine.low %v18839_v59, %v18842_v32  ;;  %v9214_v21 = vcombine.low %v22398_v42, %v22397_v36  ;;  %v18876_v23 = vrot.slane %v4942_v25, %v13786_v14  ;;  %v22402_v25 = vld [vmem:[#allocation83_spill] sm:$0xff] }
 0x277   :  { %v18863_v49 = vrot.slane %v4925_v61, %v13786_v14  ;;  %v18879_v13 = vrot.slane %v4943_v28, %v13786_v14  ;;  %v22401_v61 = vld [vmem:[#allocation328_spill] sm:$0xff]  ;;  %v9215_v28 = vcombine.low %v22403_v2, %v22402_v25  ;;  %v22407_v42 = vld [vmem:[#allocation343_spill] sm:$0xff]  ;;  %v22409_v2 = vld [vmem:[#allocation89_spill] sm:$0xff] }
 0x278   :  { %22399 = vst [vmem:[#allocation132_spill] sm:$0xff] %v18876_v23 }
 0x279   :  { %12607 = vmatmul.mubr.msk.f32.gmra.mrb[12].mxu0 %vm1907_vm6, %v9212_v54  ;;  %11946 = vmatmul.mubr.msk.f32.gmra.mrb[68].mxu1 %vm1907_vm6, %v4907_v34  ;;  %v18866_v54 = vrot.slane %v10717_v41, %v13786_v14  ;;  %22400 = vst [vmem:[#allocation335_spill] sm:$0xff] %v18879_v13  ;;  %v4959_v41 = vcombine.low %v22401_v61, %v17486_v35  ;;  %v22604_v61 = vld [vmem:[#allocation252_spill] sm:$0xff] }
 0x27a   :  { %12609 = vmatprep.mubr.msk.f32.mxu0 %vm13739_vm1, %v21311_v30  ;;  %11948 = vmatprep.mubr.msk.f32.mxu1 %vm13739_vm1, %v21311_v30 }
 0x27b   :  { %22396 = vst [vmem:[#allocation120_spill] sm:$0xff] %v18866_v54  ;;  %v4941_v34 = vcombine.low %v18863_v49, %v18866_v54  ;;  %v18899_v35 = vrot.slane %v4959_v41, %v13786_v14  ;;  %v22410_v54 = vld [vmem:[#allocation77_spill] sm:$0xff]  ;;  %v22411_v41 = vld [vmem:[#allocation339_spill] sm:$0xff] }
 0x27d   :  { %12610 = vmatmul.mubr.msk.f32.gmra.mrb[14].mxu0 %vm1907_vm6, %v9213_v43  ;;  %11949 = vmatmul.mubr.msk.f32.gmra.mrb[70].mxu1 %vm1907_vm6, %v4924_v9  ;;  %v4960_v43 = vcombine.low %v21980_v11, %v21992_v18  ;;  %v4958_v9 = vcombine.low %v18876_v23, %v18879_v13  ;;  %22404 = vst [vmem:[#allocation333_spill] sm:$0xff] %v18899_v35  ;;  %v22406_v18 = vld [vmem:[#allocation337_spill] sm:$0xff]  ;;  %v22412_v13 = vld [vmem:[#allocation346_spill] sm:$0xff]  ;;  %v22413_v23 = vld [vmem:[#allocation344_spill] sm:$0xff] }
 0x27e   :  { %12612 = vmatprep.mubr.msk.f32.mxu0 %vm13739_vm1, %v21311_v30  ;;  %11951 = vmatprep.mubr.msk.f32.mxu1 %vm13739_vm1, %v21311_v30  ;;  %v4976_v36 = vcombine.low %v22406_v18, %v21993_v16  ;;  %v4994_v16 = vcombine.low %v22413_v23, %v22412_v13 }
 0x27f   :  { %v18902_v11 = vrot.slane %v4960_v43, %v13786_v14  ;;  %v10718_v43 = vcombine.high %v22407_v42, %v22411_v41  ;;  %v22599_v41 = vld [vmem:[#allocation212_spill] sm:$0xff] }
 0x280   :  { %v18939_v13 = vrot.slane %v4994_v16, %v13786_v14 }
 0x281   :  { %12613 = vmatmul.mubr.msk.f32.gmra.mrb[16].mxu0 %vm1907_vm6, %v9214_v21  ;;  %11952 = vmatmul.mubr.msk.f32.gmra.mrb[72].mxu1 %vm1907_vm6, %v4941_v34  ;;  %22405 = vst [vmem:[#allocation127_spill] sm:$0xff] %v18902_v11  ;;  %v22408_v21 = vld [vmem:[#allocation338_spill] sm:$0xff]  ;;  %v9216_v34 = vcombine.low %v22410_v54, %v22409_v2  ;;  %v4975_v18 = vcombine.low %v18899_v35, %v18902_v11  ;;  %v22422_v35 = vld [vmem:[#allocation347_spill] sm:$0xff] }
 0x282   :  { %12615 = vmatprep.mubr.msk.f32.mxu0 %vm13739_vm1, %v21311_v30  ;;  %v4977_v25 = vcombine.low %v22408_v21, %v22407_v42  ;;  %11954 = vmatprep.mubr.msk.f32.mxu1 %vm13739_vm1, %v21311_v30  ;;  %v18923_v21 = vrot.slane %v4976_v36, %v13786_v14  ;;  %v22416_v54 = vld [vmem:[#allocation90_spill] sm:$0xff]  ;;  %v18936_v23 = vrot.slane %v10718_v43, %v13786_v14  ;;  %v22420_v36 = vld [vmem:[#allocation341_spill] sm:$0xff] }
 0x283   :  { %v22417_v42 = vld [vmem:[#allocation86_spill] sm:$0xff]  ;;  %22419 = vst [vmem:[#allocation340_spill] sm:$0xff] %v18939_v13 }
 0x284   :  { %22414 = vst [vmem:[#allocation130_spill] sm:$0xff] %v18923_v21  ;;  %v9217_v2 = vcombine.low %v22417_v42, %v22416_v54  ;;  %22418 = vst [vmem:[#allocation131_spill] sm:$0xff] %v18936_v23  ;;  %v22423_v43 = vld [vmem:[#allocation106_spill] sm:$0xff]  ;;  %v22424_v42 = vld [vmem:[#allocation97_spill] sm:$0xff] }
 0x285   :  { %12616 = vmatmul.mubr.msk.f32.gmra.mrb[18].mxu0 %vm1907_vm6, %v9215_v28  ;;  %11955 = vmatmul.mubr.msk.f32.gmra.mrb[74].mxu1 %vm1907_vm6, %v4958_v9  ;;  %v18926_v28 = vrot.slane %v4977_v25, %v13786_v14  ;;  %v5010_v25 = vcombine.low %v22420_v36, %v22026_v48  ;;  %v9218_v16 = vcombine.low %v22424_v42, %v22423_v43  ;;  %v22430_v11 = vld [vmem:[#allocation358_spill] sm:$0xff]  ;;  %v22431_v42 = vld [vmem:[#allocation112_spill] sm:$0xff] }
 0x286   :  { %12618 = vmatprep.mubr.msk.f32.mxu0 %vm13739_vm1, %v21311_v30  ;;  %11957 = vmatprep.mubr.msk.f32.mxu1 %vm13739_vm1, %v21311_v30 }
 0x287   :  { %22415 = vst [vmem:[#allocation139_spill] sm:$0xff] %v18926_v28  ;;  %v4992_v9 = vcombine.low %v18923_v21, %v18926_v28  ;;  %v18959_v48 = vrot.slane %v5010_v25, %v13786_v14  ;;  %v22429_v28 = vld [vmem:[#allocation355_spill] sm:$0xff]  ;;  %v22433_v25 = vld [vmem:[#allocation361_spill] sm:$0xff] }
 0x288   :  { %v5028_v43 = vcombine.low %v22430_v11, %v22429_v28  ;;  %v22435_v21 = vld [vmem:[#allocation363_spill] sm:$0xff] }
 0x289   :  { %12619 = vmatmul.mubr.msk.f32.gmra.mrb[20].mxu0 %vm1907_vm6, %v9216_v34  ;;  %11958 = vmatmul.mubr.msk.f32.gmra.mrb[76].mxu1 %vm1907_vm6, %v4975_v18  ;;  %v22421_v34 = vld [vmem:[#allocation129_spill] sm:$0xff]  ;;  %v5009_v18 = vcombine.low %v18936_v23, %v18939_v13  ;;  %22425 = vst [vmem:[#allocation336_spill] sm:$0xff] %v18959_v48  ;;  %v22432_v23 = vld [vmem:[#allocation94_spill] sm:$0xff] }
 0x28a   :  { %12621 = vmatprep.mubr.msk.f32.mxu0 %vm13739_vm1, %v21311_v30  ;;  %v5011_v54 = vcombine.low %v22422_v35, %v22421_v34  ;;  %11960 = vmatprep.mubr.msk.f32.mxu1 %vm13739_vm1, %v21311_v30  ;;  %v22427_v34 = vld [vmem:[#allocation352_spill] sm:$0xff]  ;;  %v22428_v35 = vld [vmem:[#allocation354_spill] sm:$0xff] }
 0x28c   :  { %v18962_v36 = vrot.slane %v5011_v54, %v13786_v14  ;;  %v22434_v54 = vld [vmem:[#allocation362_spill] sm:$0xff] }
 0x28d   :  { %12622 = vmatmul.mubr.msk.f32.gmra.mrb[22].mxu0 %vm1907_vm6, %v9217_v2  ;;  %11961 = vmatmul.mubr.msk.f32.gmra.mrb[78].mxu1 %vm1907_vm6, %v4992_v9  ;;  %v5027_v2 = vcombine.low %v22428_v35, %v22427_v34  ;;  %v9219_v9 = vcombine.low %v22432_v23, %v22431_v42  ;;  %v5044_v13 = vcombine.low %v22434_v54, %v22433_v25  ;;  %v22438_v23 = vld [vmem:[#allocation113_spill] sm:$0xff] }
 0x28e   :  { %12624 = vmatprep.mubr.msk.f32.mxu0 %vm13739_vm1, %v21311_v30  ;;  %22426 = vst [vmem:[#allocation140_spill] sm:$0xff] %v18962_v36  ;;  %11963 = vmatprep.mubr.msk.f32.mxu1 %vm13739_vm1, %v21311_v30  ;;  %v10719_v35 = vcombine.high %v22433_v25, %v22435_v21  ;;  %v5026_v11 = vcombine.low %v18959_v48, %v18962_v36  ;;  %v22439_v34 = vld [vmem:[#allocation109_spill] sm:$0xff]  ;;  %v22442_v25 = vld [vmem:[#allocation364_spill] sm:$0xff]  ;;  %v9170_v36 = vrot.slane %v18092_v58, 7  ;;  %v22466_v58 = vld [vmem:[#allocation135_spill] sm:$0xff] }
 0x28f   :  { %v18983_v28 = vrot.slane %v5027_v2, %v13786_v14  ;;  %v9220_v42 = vcombine.low %v22439_v34, %v22438_v23  ;;  %v5062_v54 = vcombine.low %v22056_v5, %v22068_v29  ;;  %v22444_v23 = vld [vmem:[#allocation110_spill] sm:$0xff]  ;;  %v5078_v29 = vcombine.low %v22069_v52, %v17807_v60 }
 0x290   :  { %v18999_v2 = vrot.slane %v10719_v35, %v13786_v14  ;;  %v22447_v34 = vld [vmem:[#allocation374_spill] sm:$0xff] }
 0x291   :  { %12625 = vmatmul.mubr.msk.f32.gmra.mrb[24].mxu0 %vm1907_vm6, %v9218_v16  ;;  %11964 = vmatmul.mubr.msk.f32.gmra.mrb[80].mxu1 %vm1907_vm6, %v5009_v18  ;;  %22436 = vst [vmem:[#allocation142_spill] sm:$0xff] %v18983_v28  ;;  %v18986_v16 = vrot.slane %v5028_v43, %v13786_v14  ;;  %v18996_v18 = vrot.slane %v5044_v13, %v13786_v14  ;;  %v22443_v13 = vld [vmem:[#allocation114_spill] sm:$0xff] }
 0x292   :  { %12627 = vmatprep.mubr.msk.f32.mxu0 %vm13739_vm1, %v21311_v30  ;;  %11966 = vmatprep.mubr.msk.f32.mxu1 %vm13739_vm1, %v21311_v30  ;;  %22441 = vst [vmem:[#allocation152_spill] sm:$0xff] %v18999_v2  ;;  %v9221_v35 = vcombine.low %v22444_v23, %v22443_v13  ;;  %v19022_v5 = vrot.slane %v5062_v54, %v13786_v14  ;;  %v22449_v13 = vld [vmem:[#allocation115_spill] sm:$0xff]  ;;  %v22450_v54 = vld [vmem:[#allocation385_spill] sm:$0xff]  ;;  %v22581_v52 = vld [vmem:[#allocation230_spill] sm:$0xff] }
 0x293   :  { %22437 = vst [vmem:[#allocation350_spill] sm:$0xff] %v18986_v16  ;;  %22440 = vst [vmem:[#allocation342_spill] sm:$0xff] %v18996_v18  ;;  %v5043_v43 = vcombine.low %v18983_v28, %v18986_v16  ;;  %v22451_v23 = vld [vmem:[#allocation163_spill] sm:$0xff]  ;;  %v22582_v16 = vld [vmem:[#allocation141_spill] sm:$0xff] }
 0x294   :  { %22446 = vst [vmem:[#allocation158_spill] sm:$0xff] %v19022_v5  ;;  %v5096_v60 = vcombine.low %v22451_v23, %v22450_v54  ;;  %v22459_v23 = vld [vmem:[#allocation388_spill] sm:$0xff] }
 0x295   :  { %12628 = vmatmul.mubr.msk.f32.gmra.mrb[26].mxu0 %vm1907_vm6, %v9219_v9  ;;  %11967 = vmatmul.mubr.msk.f32.gmra.mrb[82].mxu1 %vm1907_vm6, %v5026_v11  ;;  %v5061_v9 = vcombine.low %v22442_v25, %v22055_v31  ;;  %v5060_v11 = vcombine.low %v18996_v18, %v18999_v2  ;;  %v22448_v25 = vld [vmem:[#allocation123_spill] sm:$0xff]  ;;  %v10822_v18 = vrot.slane %v22582_v16, 9 }
 0x296   :  { %12630 = vmatprep.mubr.msk.f32.mxu0 %vm13739_vm1, %v21311_v30  ;;  %11969 = vmatprep.mubr.msk.f32.mxu1 %vm13739_vm1, %v21311_v30 }
 0x297   :  { %v19019_v31 = vrot.slane %v5061_v9, %v13786_v14  ;;  %v5095_v9 = vcombine.low %v22085_v39, %v22086_v51  ;;  %v22454_v51 = vld [vmem:[#allocation128_spill] sm:$0xff]  ;;  %v22455_v39 = vld [vmem:[#allocation117_spill] sm:$0xff] }
 0x299   :  { %12631 = vmatmul.mubr.msk.f32.gmra.mrb[28].mxu0 %vm1907_vm6, %v9220_v42  ;;  %11970 = vmatmul.mubr.msk.f32.gmra.mrb[84].mxu1 %vm1907_vm6, %v5043_v43  ;;  %22445 = vst [vmem:[#allocation146_spill] sm:$0xff] %v19019_v31  ;;  %v5079_v42 = vcombine.low %v22447_v34, %v22082_v55  ;;  %v9222_v43 = vcombine.low %v22449_v13, %v22448_v25 }
 0x29a   :  { %12633 = vmatprep.mubr.msk.f32.mxu0 %vm13739_vm1, %v21311_v30  ;;  %11972 = vmatprep.mubr.msk.f32.mxu1 %vm13739_vm1, %v21311_v30  ;;  %v5077_v55 = vcombine.low %v19019_v31, %v19022_v5  ;;  %v19043_v34 = vrot.slane %v5078_v29, %v13786_v14  ;;  %v9223_v25 = vcombine.low %v22455_v39, %v22454_v51  ;;  %v9164_v39 = vrot.slane %v18088_v4, 7 }
 0x29b   :  { %v19059_v29 = vrot.slane %v5096_v60, %v13786_v14  ;;  %v10720_v13 = vcombine.high %v22450_v54, %v22108_v46  ;;  %v22461_v60 = vld [vmem:[#allocation124_spill] sm:$0xff]  ;;  %v9173_v54 = vrot.slane %v18095_v22, 7 }
 0x29c   :  { %22452 = vst [vmem:[#allocation153_spill] sm:$0xff] %v19043_v34  ;;  %v22468_v22 = vld [vmem:[#allocation256_spill] sm:$0xff] }
 0x29d   :  { %12634 = vmatmul.mubr.msk.f32.gmra.mrb[30].mxu0 %vm1907_vm6, %v9221_v35  ;;  %11973 = vmatmul.mubr.msk.f32.gmra.mrb[86].mxu1 %vm1907_vm6, %v5060_v11  ;;  %v19046_v35 = vrot.slane %v5079_v42, %v13786_v14  ;;  %v19056_v11 = vrot.slane %v5095_v9, %v13786_v14  ;;  %22457 = vst [vmem:[#allocation164_spill] sm:$0xff] %v19059_v29  ;;  %v22460_v9 = vld [vmem:[#allocation133_spill] sm:$0xff] }
 0x29e   :  { %12636 = vmatprep.mubr.msk.f32.mxu0 %vm13739_vm1, %v21311_v30  ;;  %11975 = vmatprep.mubr.msk.f32.mxu1 %vm13739_vm1, %v21311_v30  ;;  %v9224_v2 = vcombine.low %v22461_v60, %v22460_v9  ;;  %v22465_v60 = vld [vmem:[#allocation186_spill] sm:$0xff] }
 0x29f   :  { %22453 = vst [vmem:[#allocation353_spill] sm:$0xff] %v19046_v35  ;;  %22456 = vst [vmem:[#allocation351_spill] sm:$0xff] %v19056_v11  ;;  %v5094_v42 = vcombine.low %v19043_v34, %v19046_v35  ;;  %v9167_v34 = vrot.slane %v18058_v17, 7  ;;  %v5111_v4 = vcombine.low %v19056_v11, %v19059_v29  ;;  %v5130_v17 = vcombine.low %v22465_v60, %v17948_v63  ;;  %v22471_v11 = vld [vmem:[#allocation259_spill] sm:$0xff]  ;;  %v22477_v60 = vld [vmem:[#allocation144_spill] sm:$0xff] }
 0x2a0   :  { %v9172_v63 = vrot.slane %v9170_v36, 2 }
 0x2a1   :  { %12637 = vmatmul.mubr.msk.f32.gmra.mrb[32].mxu0 %vm1907_vm6, %v9222_v43  ;;  %11976 = vmatmul.mubr.msk.f32.gmra.mrb[88].mxu1 %vm1907_vm6, %v5077_v55  ;;  %v22458_v43 = vld [vmem:[#allocation27_spill] sm:$0xff]  ;;  %v10987_v55 = vrot.slane %v18052_v12, 9  ;;  %v22467_v12 = vld [vmem:[#allocation138_spill] sm:$0xff] }
 0x2a2   :  { %12639 = vmatprep.mubr.msk.f32.mxu0 %vm13739_vm1, %v21311_v30  ;;  %v5113_v51 = vcombine.low %v22459_v23, %v22458_v43  ;;  %11978 = vmatprep.mubr.msk.f32.mxu1 %vm13739_vm1, %v21311_v30  ;;  %v22464_v23 = vld [vmem:[#allocation386_spill] sm:$0xff]  ;;  %v9225_v35 = vcombine.low %v22467_v12, %v22466_v58  ;;  %v9175_v12 = vrot.slane %v9173_v54, 2  ;;  %v9176_v58 = vrot.slane %v18122_v24, 7  ;;  %v22476_v24 = vld [vmem:[#allocation160_spill] sm:$0xff] }
 0x2a3   :  { %v5129_v9 = vcombine.low %v22464_v23, %v22112_v0  ;;  %v9165_v0 = vsel %vm13859_vm9, %v10987_v55, %v9164_v39  ;;  %v9169_v23 = vrot.slane %v9167_v34, 2  ;;  %v9226_v5 = vcombine.low %v22477_v60, %v22476_v24 }
 0x2a4   :  { %v19087_v43 = vrot.slane %v5113_v51, %v13786_v14  ;;  %v9166_v51 = vrot.slane %v9164_v39, 2  ;;  %v9174_v60 = vsel %vm13859_vm9, %v9172_v63, %v9173_v54 }
 0x2a5   :  { %12640 = vmatmul.mubr.msk.f32.gmra.mrb[34].mxu0 %vm1907_vm6, %v9223_v25  ;;  %11979 = vmatmul.mubr.msk.f32.gmra.mrb[90].mxu1 %vm1907_vm6, %v5094_v42  ;;  %v19084_v25 = vrot.slane %v10720_v13, %v13786_v14  ;;  %v22469_v42 = vld [vmem:[#allocation251_spill] sm:$0xff]  ;;  %v22470_v13 = vld [vmem:[#allocation261_spill] sm:$0xff]  ;;  %v19118_v55 = vrot.slane %v5129_v9, %v13786_v14  ;;  %v9171_v24 = vsel %vm13859_vm9, %v9169_v23, %v9170_v36 }
 0x2a6   :  { %12642 = vmatprep.mubr.msk.f32.mxu0 %vm13739_vm1, %v21311_v30  ;;  %22463 = vst [vmem:[#allocation165_spill] sm:$0xff] %v19087_v43  ;;  %11981 = vmatprep.mubr.msk.f32.mxu1 %vm13739_vm1, %v21311_v30  ;;  %v9227_v29 = vcombine.low %v22469_v42, %v22468_v22  ;;  %v9228_v46 = vcombine.low %v22471_v11, %v22470_v13  ;;  %v9179_v11 = vrot.slane %v18118_v10, 7  ;;  %v22473_v42 = vld [vmem:[#allocation10_spill] sm:$0xff]  ;;  %v22480_v9 = vld [vmem:[#allocation267_spill] sm:$0xff] }
 0x2a7   :  { %22462 = vst [vmem:[#allocation172_spill] sm:$0xff] %v19084_v25  ;;  %v19109_v22 = vcombine.high %v18118_v10, %v18118_v10  ;;  %v5128_v39 = vcombine.low %v19084_v25, %v19087_v43  ;;  %22474 = vst [vmem:[#allocation357_spill] sm:$0xff] %v19118_v55  ;;  %v19121_v13 = vrot.slane %v5130_v17, %v13786_v14 }
 0x2a8   :  { %v9235_v10 = vrot.slane %v9227_v29, %v13786_v14  ;;  %v9245_v25 = vcombine.low %v22480_v9, %v9165_v0  ;;  %v9168_v17 = vsel %vm13859_vm9, %v9166_v51, %v9167_v34  ;;  %v9178_v29 = vrot.slane %v9176_v58, 2  ;;  %v22481_v34 = vld [vmem:[#allocation18_spill] sm:$0xff]  ;;  %v22482_v51 = vld [vmem:[#allocation13_spill] sm:$0xff] }
 0x2a9   :  { %12643 = vmatmul.mubr.msk.f32.gmra.mrb[36].mxu0 %vm1907_vm6, %v9224_v2  ;;  %22472 = vst [vmem:[#allocation359_spill] sm:$0xff] %v19109_v22  ;;  %v5676_v2 = vcombine.low %v22152_v15, %v22473_v42  ;;  %11982 = vmatmul.mubr.msk.f32.gmra.mrb[92].mxu1 %vm1907_vm6, %v5111_v4  ;;  %22475 = vst [vmem:[#allocation173_spill] sm:$0xff] %v19121_v13  ;;  %v9242_v15 = vrot.slane %v9228_v46, %v13786_v14  ;;  %v22478_v4 = vld [vmem:[#allocation266_spill] sm:$0xff]  ;;  %v22479_v42 = vld [vmem:[#allocation260_spill] sm:$0xff] }
 0x2aa   :  { %12645 = vmatprep.mubr.msk.f32.mxu0 %vm13739_vm1, %v21311_v30  ;;  %11984 = vmatprep.mubr.msk.f32.mxu1 %vm13739_vm1, %v21311_v30  ;;  %v9244_v31 = vcombine.low %v22479_v42, %v22478_v4  ;;  %v9177_v46 = vsel %vm13859_vm9, %v9175_v12, %v9176_v58  ;;  %v9181_v4 = vrot.slane %v9179_v11, 2  ;;  %v5145_v36 = vcombine.low %v19118_v55, %v19121_v13 }
 0x2ab   :  { %v5683_v0 = vrot.slane %v5676_v2, %v13786_v14  ;;  %v5685_v54 = vcombine.low %v22482_v51, %v22481_v34  ;;  %v9243_v23 = vcombine.low %v9235_v10, %v9242_v15  ;;  %v9259_v12 = vrot.slane %v9245_v25, %v13786_v14  ;;  %v22483_v15 = vld [vmem:[#allocation235_spill] sm:$0xff]  ;;  %v22488_v34 = vld [vmem:[#allocation9_spill] sm:$0xff] }
 0x2ac   :  { %v9252_v63 = vrot.slane %v9244_v31, %v13786_v14  ;;  %v9261_v58 = vcombine.low %v9168_v17, %v9171_v24  ;;  %v9262_v2 = vcombine.low %v9174_v60, %v9177_v46  ;;  %v22484_v17 = vld [vmem:[#allocation4_spill] sm:$0xff]  ;;  %v22486_v46 = vld [vmem:[#allocation35_spill] sm:$0xff] }
 0x2ad   :  { %12646 = vmatmul.mubr.msk.f32.gmra.mrb[38].mxu0 %vm1907_vm6, %v9225_v35  ;;  %v9182_v35 = vrot.slane %v19109_v22, 7  ;;  %11985 = vmatmul.mubr.msk.f32.gmra.mrb[94].mxu1 %vm1907_vm6, %v5128_v39  ;;  %v9180_v39 = vsel %vm13859_vm9, %v9178_v29, %v9179_v11  ;;  %v5684_v42 = vcombine.low %v5683_v0, %v22483_v15  ;;  %v22485_v60 = vld [vmem:[#allocation40_spill] sm:$0xff]  ;;  %v22493_v15 = vld [vmem:[#allocation243_spill] sm:$0xff] }
 0x2ae   :  { %12648 = vmatprep.mubr.msk.f32.mxu0 %vm13739_vm1, %v21311_v30  ;;  %11987 = vmatprep.mubr.msk.f32.mxu1 %vm13739_vm1, %v21311_v30  ;;  %v9260_v31 = vcombine.low %v9252_v63, %v9259_v12  ;;  %v9269_v25 = vrot.slane %v9261_v58, %v13786_v14  ;;  %v9276_v9 = vrot.slane %v9262_v2, %v13786_v14  ;;  %v22490_v12 = vld [vmem:[#allocation14_spill] sm:$0xff]  ;;  %v22491_v2 = vld [vmem:[#allocation53_spill] sm:$0xff] }
 0x2af   :  { %v9183_v10 = vsel %vm13859_vm9, %v9181_v4, %v9182_v35  ;;  %v5695_v29 = vcombine.low %v22486_v46, %v22485_v60  ;;  %v13737_v4 = vld [vmem:[%s20376_s1 + $0x10] sm:$0x7]  ;;  %v22499_v46 = vld [vmem:[#allocation17_spill] sm:$0xff] }
 0x2b0   :  { %v9278_v11 = vcombine.low %v9180_v39, %v9183_v10  ;;  %v9277_v35 = vcombine.low %v9269_v25, %v9276_v9  ;;  %v22492_v39 = vld [vmem:[#allocation48_spill] sm:$0xff]  ;;  %v22496_v25 = vld [vmem:[#allocation6_spill] sm:$0xff] }
 0x2b1   :  { %12649 = vmatmul.mubr.msk.f32.gmra.mrb[40].mxu0 %vm1907_vm6, %v9226_v5  ;;  %11988 = vmatmul.mubr.msk.f32.gmra.mrb[96].mxu1 %vm1907_vm6, %v5145_v36  ;;  %v5692_v5 = vrot.slane %v5685_v54, %v13786_v14  ;;  %v22487_v36 = vld [vmem:[#allocation5_spill] sm:$0xff]  ;;  %v5702_v54 = vrot.slane %v5695_v29, %v13786_v14  ;;  %v5705_v10 = vcombine.low %v22492_v39, %v22491_v2  ;;  %v22506_v39 = vld [vmem:[#allocation88_spill] sm:$0xff] }
 0x2b2   :  { %12651 = vmatprep.mubr.msk.f32.mxu0 %vm13739_vm1, %v21311_v30  ;;  %11992 = vmatprep.mubr.msk.f32.mxu1 %vm13739_vm1, %v21311_v30  ;;  %v9285_v0 = vrot.slane %v9278_v11, %v13786_v14  ;;  %v19188_v51 = vcombine.low %v22488_v34, %v22487_v36  ;;  %v22502_v36 = vld [vmem:[#allocation241_spill] sm:$0xff]  ;;  %v22503_v34 = vld [vmem:[#allocation376_spill] sm:$0xff] }
 0x2b3   :  { %v5693_v24 = vcombine.low %v22484_v17, %v5692_v5  ;;  %v5703_v58 = vcombine.low %v22490_v12, %v5702_v54  ;;  %v5712_v11 = vrot.slane %v5705_v10, %v13786_v14  ;;  %v22497_v17 = vld [vmem:[#allocation233_spill] sm:$0xff]  ;;  %v9289_v54 = vcombine.low %v22503_v34, %v22502_v36  ;;  %v22507_v10 = vld [vmem:[#allocation82_spill] sm:$0xff]  ;;  %v22515_v36 = vld [vmem:[#allocation104_spill] sm:$0xff] }
 0x2b5   :  { %12652 = vmatmul.mubr.msk.f32.gmra.mrb[42].mxu0 %vm1907_vm6, %v9243_v23  ;;  %11993 = vmatmul.mubr.msk.f32.vlgmr.msra.gmra.mrb[0].mxu1 %vm1907_vm6, %v5684_v42  ;;  %v22489_v23 = vld [vmem:[#allocation187_spill] sm:$0xff]  ;;  %v22494_v42 = vld [vmem:[#allocation182_spill] sm:$0xff]  ;;  %v5713_v29 = vcombine.low %v5712_v11, %v22499_v46 }
 0x2b6   :  { %12654 = vmatprep.mubr.msk.f32.mxu0 %vm13739_vm1, %v21311_v30  ;;  %11995 = vmatprep.mubr.msk.f32.mxu1 %vm13739_vm1, %v21311_v30  ;;  %v9286_v63 = vcombine.low %v9285_v0, %v22489_v23  ;;  %v9287_v5 = vcombine.low %v22494_v42, %v22493_v15  ;;  %v22504_v23 = vld [vmem:[#allocation24_spill] sm:$0xff]  ;;  %v5724_v15 = vcombine.low %v22507_v10, %v22506_v39  ;;  %v22508_v42 = vld [vmem:[#allocation383_spill] sm:$0xff] }
 0x2b7   :  { %12885 = vmatpush3.msk.msra.mxu1 %vm2006_vm0, %v13737_v4  ;;  %v22500_v4 = vld [vmem:[#allocation76_spill] sm:$0xff]  ;;  %v22519_v39 = vld [vmem:[#allocation31_spill] sm:$0xff] }
 0x2b9   :  { %12655 = vmatmul.mubr.msk.f32.gmra.mrb[44].mxu0 %vm1907_vm6, %v9260_v31  ;;  %11996 = vmatmul.mubr.msk.f32.gmra.mrb[2].mxu1 %vm1907_vm6, %v5693_v24  ;;  %v22495_v31 = vld [vmem:[#allocation16_spill] sm:$0xff] }
 0x2ba   :  { %12657 = vmatprep.mubr.msk.f32.mxu0 %vm13739_vm1, %v21311_v30  ;;  %11998 = vmatprep.mubr.msk.f32.mxu1 %vm13739_vm1, %v21311_v30  ;;  %v19212_v9 = vcombine.low %v22496_v25, %v22495_v31  ;;  %v22498_v24 = vld [vmem:[#allocation200_spill] sm:$0xff]  ;;  %v22510_v25 = vld [vmem:[#allocation25_spill] sm:$0xff] }
 0x2bb   :  { %v9288_v60 = vcombine.low %v22498_v24, %v22497_v17  ;;  %v5731_v17 = vrot.slane %v5724_v15, %v13786_v14  ;;  %v22511_v24 = vld [vmem:[#allocation46_spill] sm:$0xff] }
 0x2bd   :  { %12658 = vmatmul.mubr.msk.f32.gmra.mrb[46].mxu0 %vm1907_vm6, %v9277_v35  ;;  %11999 = vmatmul.mubr.msk.f32.gmra.mrb[4].mxu1 %vm1907_vm6, %v19188_v51  ;;  %v22501_v35 = vld [vmem:[#allocation71_spill] sm:$0xff] }
 0x2be   :  { %12660 = vmatprep.mubr.msk.f32.mxu0 %vm13739_vm1, %v21311_v30  ;;  %12001 = vmatprep.mubr.msk.f32.mxu1 %vm13739_vm1, %v21311_v30  ;;  %v5715_v0 = vcombine.low %v22501_v35, %v22500_v4  ;;  %v22513_v4 = vld [vmem:[#allocation29_spill] sm:$0xff] }
 0x2bf   :  { %v5732_v35 = vcombine.low %v22513_v4, %v5731_v17 }
 0x2c0   :  { %v5722_v2 = vrot.slane %v5715_v0, %v13786_v14  ;;  %v22514_v0 = vld [vmem:[#allocation108_spill] sm:$0xff] }
 0x2c1   :  { %12661 = vmatmul.mubr.msk.f32.gmra.mrb[48].mxu0 %vm1907_vm6, %v9286_v63  ;;  %12002 = vmatmul.mubr.msk.f32.gmra.mrb[6].mxu1 %vm1907_vm6, %v5703_v58  ;;  %v22505_v63 = vld [vmem:[#allocation20_spill] sm:$0xff]  ;;  %v5734_v34 = vcombine.low %v22515_v36, %v22514_v0  ;;  %v22527_v0 = vld [vmem:[#allocation95_spill] sm:$0xff] }
 0x2c2   :  { %12663 = vmatprep.mubr.msk.f32.mxu0 %vm13739_vm1, %v21311_v30  ;;  %12004 = vmatprep.mubr.msk.f32.mxu1 %vm13739_vm1, %v21311_v30  ;;  %v19237_v58 = vcombine.low %v22505_v63, %v22504_v23  ;;  %v5723_v11 = vcombine.low %v5722_v2, %v22510_v25  ;;  %v22517_v23 = vld [vmem:[#allocation34_spill] sm:$0xff]  ;;  %v22518_v2 = vld [vmem:[#allocation281_spill] sm:$0xff] }
 0x2c3   :  { %v19274_v10 = vcombine.low %v22519_v39, %v22518_v2  ;;  %v5741_v15 = vrot.slane %v5734_v34, %v13786_v14  ;;  %v22528_v34 = vld [vmem:[#allocation282_spill] sm:$0xff]  ;;  %v22531_v2 = vld [vmem:[#allocation119_spill] sm:$0xff]  ;;  %v22532_v39 = vld [vmem:[#allocation125_spill] sm:$0xff] }
 0x2c5   :  { %12664 = vmatmul.mubr.msk.f32.gmra.mrb[50].mxu0 %vm1907_vm6, %v9287_v5  ;;  %12005 = vmatmul.mubr.msk.f32.gmra.mrb[8].mxu1 %vm1907_vm6, %v19212_v9  ;;  %v22509_v5 = vld [vmem:[#allocation238_spill] sm:$0xff]  ;;  %22520 = vst [vmem:[#allocation175_spill] sm:$0xff] %v19274_v10 }
 0x2c6   :  { %12666 = vmatprep.mubr.msk.f32.mxu0 %vm13739_vm1, %v21311_v30  ;;  %12007 = vmatprep.mubr.msk.f32.mxu1 %vm13739_vm1, %v21311_v30  ;;  %v9290_v31 = vcombine.low %v22509_v5, %v22508_v42  ;;  %v22521_v42 = vld [vmem:[#allocation78_spill] sm:$0xff]  ;;  %v22522_v5 = vld [vmem:[#allocation47_spill] sm:$0xff] }
 0x2c9   :  { %12667 = vmatmul.mubr.msk.f32.gmra.mrb[52].mxu0 %vm1907_vm6, %v9288_v60  ;;  %12008 = vmatmul.mubr.msk.f32.gmra.mrb[10].mxu1 %vm1907_vm6, %v5713_v29  ;;  %v22512_v60 = vld [vmem:[#allocation365_spill] sm:$0xff] }
 0x2ca   :  { %12669 = vmatprep.mubr.msk.f32.mxu0 %vm13739_vm1, %v21311_v30  ;;  %12010 = vmatprep.mubr.msk.f32.mxu1 %vm13739_vm1, %v21311_v30  ;;  %v9291_v29 = vcombine.low %v22512_v60, %v22511_v24  ;;  %v22524_v24 = vld [vmem:[#allocation126_spill] sm:$0xff]  ;;  %v22525_v60 = vld [vmem:[#allocation121_spill] sm:$0xff] }
 0x2cd   :  { %12670 = vmatmul.mubr.msk.f32.gmra.mrb[54].mxu0 %vm1907_vm6, %v9289_v54  ;;  %12011 = vmatmul.mubr.msk.f32.gmra.mrb[12].mxu1 %vm1907_vm6, %v19237_v58  ;;  %v22516_v54 = vld [vmem:[#allocation55_spill] sm:$0xff] }
 0x2ce   :  { %12672 = vmatprep.mubr.msk.f32.mxu0 %vm13739_vm1, %v21311_v30  ;;  %12013 = vmatprep.mubr.msk.f32.mxu1 %vm13739_vm1, %v21311_v30  ;;  %v9292_v63 = vcombine.low %v22517_v23, %v22516_v54  ;;  %v22529_v54 = vld [vmem:[#allocation284_spill] sm:$0xff] }
 0x2cf   :  { %v19299_v23 = vcombine.low %v22529_v54, %v22528_v34 }
 0x2d1   :  { %12673 = vmatmul.mubr.msk.f32.gmra.mrb[56].mxu0 %vm1907_vm6, %v9290_v31  ;;  %12014 = vmatmul.mubr.msk.f32.gmra.mrb[14].mxu1 %vm1907_vm6, %v5723_v11  ;;  %v9293_v31 = vcombine.low %v22522_v5, %v22521_v42  ;;  %v22523_v11 = vld [vmem:[#allocation42_spill] sm:$0xff]  ;;  %22530 = vst [vmem:[#allocation174_spill] sm:$0xff] %v19299_v23  ;;  %v22533_v42 = vld [vmem:[#allocation43_spill] sm:$0xff] }
 0x2d2   :  { %12675 = vmatprep.mubr.msk.f32.mxu0 %vm13739_vm1, %v21311_v30  ;;  %12016 = vmatprep.mubr.msk.f32.mxu1 %vm13739_vm1, %v21311_v30  ;;  %v5742_v17 = vcombine.low %v22523_v11, %v5741_v15  ;;  %v9295_v15 = vcombine.low %v22532_v39, %v22531_v2  ;;  %v22542_v2 = vld [vmem:[#allocation154_spill] sm:$0xff] }
 0x2d5   :  { %12676 = vmatmul.mubr.msk.f32.gmra.mrb[58].mxu0 %vm1907_vm6, %v9291_v29  ;;  %12017 = vmatmul.mubr.msk.f32.gmra.mrb[16].mxu1 %vm1907_vm6, %v5732_v35  ;;  %v5744_v29 = vcombine.low %v22525_v60, %v22524_v24  ;;  %v22526_v35 = vld [vmem:[#allocation87_spill] sm:$0xff]  ;;  %v22536_v60 = vld [vmem:[#allocation148_spill] sm:$0xff] }
 0x2d6   :  { %12678 = vmatprep.mubr.msk.f32.mxu0 %vm13739_vm1, %v21311_v30  ;;  %12019 = vmatprep.mubr.msk.f32.mxu1 %vm13739_vm1, %v21311_v30  ;;  %v9294_v36 = vcombine.low %v22527_v0, %v22526_v35  ;;  %v22538_v0 = vld [vmem:[#allocation291_spill] sm:$0xff] }
 0x2d9   :  { %12679 = vmatmul.mubr.msk.f32.gmra.mrb[60].mxu0 %vm1907_vm6, %v9292_v63  ;;  %12020 = vmatmul.mubr.msk.f32.gmra.mrb[18].mxu1 %vm1907_vm6, %v19274_v10  ;;  %v5751_v63 = vrot.slane %v5744_v29, %v13786_v14  ;;  %v22537_v29 = vld [vmem:[#allocation330_spill] sm:$0xff]  ;;  %v22603_v10 = vld [vmem:[#allocation249_spill] sm:$0xff] }
 0x2da   :  { %12681 = vmatprep.mubr.msk.f32.mxu0 %vm13739_vm1, %v21311_v30  ;;  %12022 = vmatprep.mubr.msk.f32.mxu1 %vm13739_vm1, %v21311_v30  ;;  %v9296_v35 = vcombine.low %v22537_v29, %v22536_v60  ;;  %v22546_v29 = vld [vmem:[#allocation399_spill] sm:$0xff]  ;;  %v5812_v32 = vcombine.low %v22604_v61, %v22603_v10 }
 0x2db   :  { %v5752_v5 = vcombine.low %v5751_v63, %v22533_v42  ;;  %v22541_v63 = vld [vmem:[#allocation162_spill] sm:$0xff]  ;;  %v22597_v42 = vld [vmem:[#allocation91_spill] sm:$0xff] }
 0x2dc   :  { %v5763_v39 = vcombine.low %v22542_v2, %v22541_v63  ;;  %v22549_v2 = vld [vmem:[#allocation180_spill] sm:$0xff] }
 0x2dd   :  { %12682 = vmatmul.mubr.msk.f32.gmra.mrb[62].mxu0 %vm1907_vm6, %v9293_v31  ;;  %12023 = vmatmul.mubr.msk.f32.gmra.mrb[20].mxu1 %vm1907_vm6, %v5742_v17  ;;  %v22534_v31 = vld [vmem:[#allocation151_spill] sm:$0xff] }
 0x2de   :  { %12684 = vmatprep.mubr.msk.f32.mxu0 %vm13739_vm1, %v21311_v30  ;;  %12025 = vmatprep.mubr.msk.f32.mxu1 %vm13739_vm1, %v21311_v30  ;;  %v22535_v17 = vld [vmem:[#allocation143_spill] sm:$0xff] }
 0x2df   :  { %v5754_v24 = vcombine.low %v22535_v17, %v22534_v31  ;;  %v22544_v31 = vld [vmem:[#allocation137_spill] sm:$0xff] }
 0x2e1   :  { %12685 = vmatmul.mubr.msk.f32.gmra.mrb[64].mxu0 %vm1907_vm6, %v9294_v36  ;;  %12026 = vmatmul.mubr.msk.f32.gmra.mrb[22].mxu1 %vm1907_vm6, %v19299_v23  ;;  %v22539_v36 = vld [vmem:[#allocation60_spill] sm:$0xff]  ;;  %v5761_v54 = vrot.slane %v5754_v24, %v13786_v14  ;;  %v5770_v24 = vrot.slane %v5763_v39, %v13786_v14  ;;  %v22551_v39 = vld [vmem:[#allocation373_spill] sm:$0xff] }
 0x2e2   :  { %12687 = vmatprep.mubr.msk.f32.mxu0 %vm13739_vm1, %v21311_v30  ;;  %12028 = vmatprep.mubr.msk.f32.mxu1 %vm13739_vm1, %v21311_v30  ;;  %v19324_v34 = vcombine.low %v22539_v36, %v22538_v0  ;;  %v22548_v36 = vld [vmem:[#allocation59_spill] sm:$0xff] }
 0x2e3   :  { %v5771_v63 = vcombine.low %v22548_v36, %v5770_v24 }
 0x2e4   :  { %22540 = vst [vmem:[#allocation176_spill] sm:$0xff] %v19324_v34 }
 0x2e5   :  { %12688 = vmatmul.mubr.msk.f32.gmra.mrb[66].mxu0 %vm1907_vm6, %v9295_v15  ;;  %12029 = vmatmul.mubr.msk.f32.gmra.mrb[24].mxu1 %vm1907_vm6, %v5752_v5  ;;  %v22543_v15 = vld [vmem:[#allocation393_spill] sm:$0xff]  ;;  %v22545_v5 = vld [vmem:[#allocation58_spill] sm:$0xff] }
 0x2e6   :  { %12690 = vmatprep.mubr.msk.f32.mxu0 %vm13739_vm1, %v21311_v30  ;;  %12031 = vmatprep.mubr.msk.f32.mxu1 %vm13739_vm1, %v21311_v30  ;;  %v9297_v17 = vcombine.low %v22544_v31, %v22543_v15  ;;  %v5762_v60 = vcombine.low %v5761_v54, %v22545_v5  ;;  %v22550_v15 = vld [vmem:[#allocation177_spill] sm:$0xff]  ;;  %v22552_v31 = vld [vmem:[#allocation400_spill] sm:$0xff] }
 0x2e7   :  { %v5773_v54 = vcombine.low %v22550_v15, %v22549_v2  ;;  %v22557_v2 = vld [vmem:[#allocation170_spill] sm:$0xff] }
 0x2e9   :  { %12691 = vmatmul.mubr.msk.f32.gmra.mrb[68].mxu0 %vm1907_vm6, %v9296_v35  ;;  %12032 = vmatmul.mubr.msk.f32.gmra.mrb[26].mxu1 %vm1907_vm6, %v19324_v34  ;;  %v22547_v35 = vld [vmem:[#allocation394_spill] sm:$0xff]  ;;  %v5780_v24 = vrot.slane %v5773_v54, %v13786_v14  ;;  %v22561_v54 = vld [vmem:[#allocation63_spill] sm:$0xff] }
 0x2ea   :  { %12693 = vmatprep.mubr.msk.f32.mxu0 %vm13739_vm1, %v21311_v30  ;;  %12034 = vmatprep.mubr.msk.f32.mxu1 %vm13739_vm1, %v21311_v30  ;;  %v9298_v0 = vcombine.low %v22547_v35, %v22546_v29  ;;  %v22553_v29 = vld [vmem:[#allocation296_spill] sm:$0xff]  ;;  %v22596_v34 = vld [vmem:[#allocation203_spill] sm:$0xff] }
 0x2ed   :  { %12694 = vmatmul.mubr.msk.f32.gmra.mrb[70].mxu0 %vm1907_vm6, %v9297_v17  ;;  %12035 = vmatmul.mubr.msk.f32.gmra.mrb[28].mxu1 %vm1907_vm6, %v5762_v60  ;;  %v9299_v17 = vcombine.low %v22552_v31, %v22551_v39  ;;  %v22554_v60 = vld [vmem:[#allocation61_spill] sm:$0xff]  ;;  %v22558_v39 = vld [vmem:[#allocation199_spill] sm:$0xff] }
 0x2ee   :  { %12696 = vmatprep.mubr.msk.f32.mxu0 %vm13739_vm1, %v21311_v30  ;;  %12037 = vmatprep.mubr.msk.f32.mxu1 %vm13739_vm1, %v21311_v30  ;;  %v19361_v35 = vcombine.low %v22554_v60, %v22553_v29  ;;  %v22559_v31 = vld [vmem:[#allocation195_spill] sm:$0xff]  ;;  %v22560_v29 = vld [vmem:[#allocation293_spill] sm:$0xff] }
 0x2ef   :  { %v5781_v60 = vcombine.low %v22560_v29, %v5780_v24 }
 0x2f0   :  { %22555 = vst [vmem:[#allocation367_spill] sm:$0xff] %v19361_v35 }
 0x2f1   :  { %12697 = vmatmul.mubr.msk.f32.gmra.mrb[72].mxu0 %vm1907_vm6, %v9298_v0  ;;  %12038 = vmatmul.mubr.msk.f32.gmra.mrb[30].mxu1 %vm1907_vm6, %v5771_v63  ;;  %v22556_v0 = vld [vmem:[#allocation378_spill] sm:$0xff]  ;;  %v5783_v63 = vcombine.low %v22559_v31, %v22558_v39  ;;  %v22569_v39 = vld [vmem:[#allocation171_spill] sm:$0xff] }
 0x2f2   :  { %12699 = vmatprep.mubr.msk.f32.mxu0 %vm13739_vm1, %v21311_v30  ;;  %12040 = vmatprep.mubr.msk.f32.mxu1 %vm13739_vm1, %v21311_v30  ;;  %v9300_v15 = vcombine.low %v22557_v2, %v22556_v0  ;;  %v22565_v0 = vld [vmem:[#allocation73_spill] sm:$0xff]  ;;  %v22566_v2 = vld [vmem:[#allocation67_spill] sm:$0xff] }
 0x2f3   :  { %v22567_v43 = vcombine.low %v22565_v0, %v22566_v2  ;;  %v22570_v31 = vld [vmem:[#allocation183_spill] sm:$0xff]  ;;  %v5790_v29 = vrot.slane %v5783_v63, %v13786_v14 }
 0x2f4   :  { %v9301_v24 = vcombine.low %v22570_v31, %v22569_v39  ;;  %v22577_v63 = vld [vmem:[#allocation79_spill] sm:$0xff]  ;;  %v22578_v31 = vld [vmem:[#allocation225_spill] sm:$0xff] }
 0x2f5   :  { %12700 = vmatmul.mubr.msk.f32.gmra.mrb[74].mxu0 %vm1907_vm6, %v9299_v17  ;;  %12041 = vmatmul.mubr.msk.f32.gmra.mrb[32].mxu1 %vm1907_vm6, %v19361_v35  ;;  %v22562_v17 = vld [vmem:[#allocation56_spill] sm:$0xff]  ;;  %v19388_v55 = vrot.slane %v22567_v43, %v13786_v14  ;;  %v22574_v35 = vld [vmem:[#allocation85_spill] sm:$0xff]  ;;  %v22575_v43 = vld [vmem:[#allocation134_spill] sm:$0xff] }
 0x2f6   :  { %12702 = vmatprep.mubr.msk.f32.mxu0 %vm13739_vm1, %v21311_v30  ;;  %12043 = vmatprep.mubr.msk.f32.mxu1 %vm13739_vm1, %v21311_v30  ;;  %v22563_v13 = vcombine.low %v22561_v54, %v22562_v17  ;;  %v22572_v54 = vld [vmem:[#allocation70_spill] sm:$0xff]  ;;  %v6483_v0 = vrot.slane %v22574_v35, 7  ;;  %v22580_v35 = vld [vmem:[#allocation240_spill] sm:$0xff]  ;;  %v22584_v39 = vld [vmem:[#allocation147_spill] sm:$0xff] }
 0x2f7   :  { %22568 = vst [vmem:[#allocation191_spill] sm:$0xff] %v19388_v55  ;;  %v6489_v55 = vrot.slane %v22584_v39, 7 }
 0x2f8   :  { %v19382_v22 = vrot.slane %v22563_v13, %v13786_v14  ;;  %v22571_v13 = vld [vmem:[#allocation306_spill] sm:$0xff] }
 0x2f9   :  { %12703 = vmatmul.mubr.msk.f32.gmra.mrb[76].mxu0 %vm1907_vm6, %v9300_v15  ;;  %12044 = vmatmul.mubr.msk.f32.gmra.mrb[34].mxu1 %vm1907_vm6, %v5781_v60  ;;  %v19399_v17 = vcombine.low %v22572_v54, %v22571_v13  ;;  %v22576_v15 = vld [vmem:[#allocation381_spill] sm:$0xff]  ;;  %v5791_v60 = vcombine.low %v5790_v29, %v22577_v63  ;;  %v22579_v13 = vld [vmem:[#allocation219_spill] sm:$0xff] }
 0x2fa   :  { %22564 = vst [vmem:[#allocation360_spill] sm:$0xff] %v19382_v22  ;;  %12705 = vmatprep.mubr.msk.f32.mxu0 %vm13739_vm1, %v21311_v30  ;;  %12046 = vmatprep.mubr.msk.f32.mxu1 %vm13739_vm1, %v21311_v30  ;;  %v9302_v2 = vcombine.low %v22576_v15, %v22575_v43  ;;  %v5793_v54 = vcombine.low %v22579_v13, %v22578_v31  ;;  %v6485_v43 = vrot.slane %v6483_v0, 2  ;;  %v22583_v15 = vld [vmem:[#allocation150_spill] sm:$0xff]  ;;  %v22585_v29 = vld [vmem:[#allocation145_spill] sm:$0xff]  ;;  %v22586_v63 = vld [vmem:[#allocation159_spill] sm:$0xff] }
 0x2fb   :  { %22573 = vst [vmem:[#allocation178_spill] sm:$0xff] %v19399_v17  ;;  %v6486_v36 = vrot.slane %v22583_v15, 7  ;;  %v6492_v22 = vrot.slane %v22585_v29, 7  ;;  %v6495_v31 = vrot.slane %v22586_v63, 7  ;;  %v22587_v13 = vld [vmem:[#allocation390_spill] sm:$0xff]  ;;  %v19439_v63 = vsel %vm13859_vm9, %v10822_v18, %v6483_v0  ;;  %v22592_v18 = vld [vmem:[#allocation211_spill] sm:$0xff] }
 0x2fc   :  { %v5800_v16 = vrot.slane %v5793_v54, %v13786_v14  ;;  %v6498_v54 = vrot.slane %v16978_v6, 7  ;;  %v22593_v0 = vld [vmem:[#allocation198_spill] sm:$0xff]  ;;  %v22598_v6 = vld [vmem:[#allocation227_spill] sm:$0xff] }
 0x2fd   :  { %12706 = vmatmul.mubr.msk.f32.gmra.mrb[78].mxu0 %vm1907_vm6, %v9301_v24  ;;  %12047 = vmatmul.mubr.msk.f32.gmra.mrb[36].mxu1 %vm1907_vm6, %v19399_v17  ;;  %v5802_v24 = vcombine.low %v22581_v52, %v22580_v35  ;;  %v22588_v17 = vld [vmem:[#allocation190_spill] sm:$0xff]  ;;  %v22589_v52 = vld [vmem:[#allocation81_spill] sm:$0xff]  ;;  %v22590_v35 = vld [vmem:[#allocation72_spill] sm:$0xff]  ;;  %v9304_v28 = vcombine.low %v22593_v0, %v22592_v18 }
 0x2fe   :  { %12708 = vmatprep.mubr.msk.f32.mxu0 %vm13739_vm1, %v21311_v30  ;;  %12049 = vmatprep.mubr.msk.f32.mxu1 %vm13739_vm1, %v21311_v30  ;;  %v9303_v21 = vcombine.low %v22588_v17, %v22587_v13  ;;  %v19432_v15 = vcombine.low %v22590_v35, %v22589_v52  ;;  %v19443_v17 = vsel %vm13859_vm9, %v6485_v43, %v6486_v36  ;;  %v6491_v13 = vrot.slane %v6489_v55, 2  ;;  %v22594_v43 = vld [vmem:[#allocation92_spill] sm:$0xff] }
 0x2ff   :  { %v5809_v39 = vrot.slane %v5802_v24, %v13786_v14  ;;  %v6494_v52 = vrot.slane %v6492_v22, 2  ;;  %v6497_v35 = vrot.slane %v6495_v31, 2  ;;  %v9186_v24 = vrot.slane %v18600_v62, 7  ;;  %v22601_v0 = vld [vmem:[#allocation248_spill] sm:$0xff] }
 0x300   :  { %v9189_v5 = vrot.slane %v22594_v43, 7  ;;  %v5801_v23 = vcombine.low %v5800_v16, %v22597_v42  ;;  %v9307_v62 = vcombine.low %v19439_v63, %v19443_v17  ;;  %v22602_v43 = vld [vmem:[#allocation242_spill] sm:$0xff]  ;;  %v6500_v61 = vrot.slane %v6498_v54, 2 }
 0x301   :  { %12709 = vmatmul.mubr.msk.f32.gmra.mrb[80].mxu0 %vm1907_vm6, %v9302_v2  ;;  %12050 = vmatmul.mubr.msk.f32.gmra.mrb[38].mxu1 %vm1907_vm6, %v5791_v60  ;;  %v6488_v2 = vrot.slane %v6486_v36, 2  ;;  %v22591_v60 = vld [vmem:[#allocation166_spill] sm:$0xff]  ;;  %v22595_v36 = vld [vmem:[#allocation221_spill] sm:$0xff]  ;;  %v5811_v11 = vcombine.low %v22602_v43, %v22601_v0  ;;  %v9192_v43 = vrot.slane %v18628_v27, 7 }
 0x302   :  { %12711 = vmatprep.mubr.msk.f32.mxu0 %vm13739_vm1, %v21311_v30  ;;  %12052 = vmatprep.mubr.msk.f32.mxu1 %vm13739_vm1, %v21311_v30  ;;  %v6501_v29 = vrot.slane %v22591_v60, 7  ;;  %v9305_v48 = vcombine.low %v22596_v34, %v22595_v36  ;;  %v9306_v60 = vcombine.low %v22599_v41, %v22598_v6  ;;  %v19478_v6 = vsel %vm13859_vm9, %v6491_v13, %v6492_v22  ;;  %v22608_v36 = vld [vmem:[#allocation254_spill] sm:$0xff]  ;;  %v22609_v27 = vld [vmem:[#allocation265_spill] sm:$0xff] }
 0x303   :  { %v19472_v16 = vsel %vm13859_vm9, %v6488_v2, %v6489_v55  ;;  %v19482_v41 = vsel %vm13859_vm9, %v6494_v52, %v6495_v31  ;;  %v19486_v34 = vsel %vm13859_vm9, %v6497_v35, %v6498_v54  ;;  %v22606_v55 = vld [vmem:[#allocation307_spill] sm:$0xff]  ;;  %v9191_v2 = vrot.slane %v9189_v5, 2  ;;  %v22607_v54 = vld [vmem:[#allocation253_spill] sm:$0xff] }
 0x304   :  { %22605 = vst [vmem:[#allocation369_spill] sm:$0xff] %v19486_v34  ;;  %v10988_v10 = vrot.slane %v22606_v55, 9  ;;  %v19495_v22 = vcombine.high %v18631_v47, %v18631_v47  ;;  %v9195_v31 = vrot.slane %v18603_v44, 7  ;;  %v9198_v13 = vrot.slane %v18635_v8, 7 }
 0x305   :  { %12712 = vmatmul.mubr.msk.f32.gmra.mrb[82].mxu0 %vm1907_vm6, %v9303_v21  ;;  %12053 = vmatmul.mubr.msk.f32.gmra.mrb[40].mxu1 %vm1907_vm6, %v19432_v15  ;;  %v22600_v21 = vld [vmem:[#allocation99_spill] sm:$0xff]  ;;  %v9201_v52 = vrot.slane %v18631_v47, 7  ;;  %v5826_v35 = vrot.slane %v5812_v32, %v13786_v14  ;;  %v5828_v0 = vcombine.low %v22608_v36, %v22607_v54  ;;  %v5829_v55 = vcombine.low %v22338_v3, %v22609_v27 }
 0x306   :  { %12714 = vmatprep.mubr.msk.f32.mxu0 %vm13739_vm1, %v21311_v30  ;;  %v5810_v18 = vcombine.low %v22600_v21, %v5809_v39  ;;  %12055 = vmatprep.mubr.msk.f32.mxu1 %vm13739_vm1, %v21311_v30  ;;  %v9188_v39 = vrot.slane %v9186_v24, 2  ;;  %v9314_v44 = vrot.slane %v9307_v62, %v13786_v14  ;;  %v9316_v47 = vcombine.low %v19472_v16, %v19478_v6 }
 0x307   :  { %v19516_v32 = vsel %vm13859_vm9, %v6500_v61, %v6501_v29  ;;  %v9187_v27 = vsel %vm13859_vm9, %v10988_v10, %v9186_v24  ;;  %v9194_v62 = vrot.slane %v9192_v43, 2  ;;  %v9197_v36 = vrot.slane %v9195_v31, 2 }
 0x308   :  { %v9190_v3 = vsel %vm13859_vm9, %v9188_v39, %v9189_v5  ;;  %v9200_v8 = vrot.slane %v9198_v13, 2  ;;  %v9204_v29 = vrot.slane %v19495_v22, 7  ;;  %v19532_v24 = vrot.slane %v5828_v0, %v13786_v14  ;;  %v22610_v39 = vld [vmem:[#allocation2_spill] sm:$0xff] }
 0x309   :  { %12715 = vmatmul.mubr.msk.f32.gmra.mrb[84].mxu0 %vm1907_vm6, %v9304_v28  ;;  %12056 = vmatmul.mubr.msk.f32.gmra.mrb[42].mxu1 %vm1907_vm6, %v5801_v23  ;;  %v5819_v28 = vrot.slane %v5811_v11, %v13786_v14  ;;  %v9317_v23 = vcombine.low %v19482_v41, %v19486_v34  ;;  %v9193_v11 = vsel %vm13859_vm9, %v9191_v2, %v9192_v43  ;;  %v9203_v34 = vrot.slane %v9201_v52, 2 }
 0x30a   :  { %12717 = vmatprep.mubr.msk.f32.mxu0 %vm13739_vm1, %v21311_v30  ;;  %12058 = vmatprep.mubr.msk.f32.mxu1 %vm13739_vm1, %v21311_v30  ;;  %v5843_v5 = vrot.slane %v5829_v55, %v13786_v14  ;;  %v9324_v61 = vrot.slane %v9316_v47, %v13786_v14  ;;  %v9315_v2 = vcombine.low %v22610_v39, %v9314_v44 }
 0x30b   :  { %v9331_v10 = vrot.slane %v9317_v23, %v13786_v14  ;;  %v9334_v43 = vcombine.low %v9190_v3, %v9193_v11  ;;  %v9196_v55 = vsel %vm13859_vm9, %v9194_v62, %v9195_v31  ;;  %v9202_v47 = vsel %vm13859_vm9, %v9200_v8, %v9201_v52 }
 0x30c   :  { %v5844_v44 = vcombine.low %v19532_v24, %v5843_v5 }
 0x30d   :  { %12718 = vmatmul.mubr.msk.f32.gmra.mrb[86].mxu0 %vm1907_vm6, %v9305_v48  ;;  %12059 = vmatmul.mubr.msk.f32.gmra.mrb[44].mxu1 %vm1907_vm6, %v5810_v18  ;;  %v19529_v48 = vcombine.low %v5819_v28, %v5826_v35  ;;  %v9333_v18 = vcombine.low %v19516_v32, %v9187_v27  ;;  %v9199_v28 = vsel %vm13859_vm9, %v9197_v36, %v9198_v13  ;;  %v22611_v35 = vld [vmem:[#allocation273_spill] sm:$0xff]  ;;  %v22613_v36 = vld [vmem:[#allocation103_spill] sm:$0xff] }
 0x30e   :  { %12720 = vmatprep.mubr.msk.f32.mxu0 %vm13739_vm1, %v21311_v30  ;;  %12061 = vmatprep.mubr.msk.f32.mxu1 %vm13739_vm1, %v21311_v30  ;;  %v5846_v0 = vcombine.low %v15524_v19, %v22611_v35  ;;  %v9332_v23 = vcombine.low %v9324_v61, %v9331_v10  ;;  %v9348_v8 = vrot.slane %v9334_v43, %v13786_v14  ;;  %v22614_v61 = vld [vmem:[#allocation290_spill] sm:$0xff]  ;;  %v22622_v35 = vld [vmem:[#allocation21_spill] sm:$0xff] }
 0x30f   :  { %v9341_v31 = vrot.slane %v9333_v18, %v13786_v14  ;;  %v9350_v38 = vcombine.low %v9196_v55, %v9199_v28  ;;  %v5845_v19 = vcombine.low %v18665_v57, %v18677_v33  ;;  %v22612_v57 = vld [vmem:[#allocation280_spill] sm:$0xff]  ;;  %v22616_v18 = vld [vmem:[#allocation303_spill] sm:$0xff] }
 0x310   :  { %v5853_v13 = vrot.slane %v5846_v0, %v13786_v14  ;;  %v5856_v33 = vcombine.low %v22348_v45, %v22612_v57  ;;  %v5865_v45 = vcombine.low %v22360_v50, %v22614_v61  ;;  %v22615_v50 = vld [vmem:[#allocation11_spill] sm:$0xff]  ;;  %v5875_v43 = vcombine.low %v21919_v1, %v22616_v18  ;;  %v22617_v1 = vld [vmem:[#allocation12_spill] sm:$0xff] }
 0x311   :  { %12721 = vmatmul.mubr.msk.f32.gmra.mrb[88].mxu0 %vm1907_vm6, %v9306_v60  ;;  %v9205_v60 = vsel %vm13859_vm9, %v9203_v34, %v9204_v29  ;;  %12062 = vmatmul.mubr.msk.f32.gmra.mrb[46].mxu1 %vm1907_vm6, %v19529_v48  ;;  %v9349_v52 = vcombine.low %v9341_v31, %v9348_v8  ;;  %v9358_v27 = vrot.slane %v9350_v38, %v13786_v14  ;;  %v22619_v28 = vld [vmem:[#allocation304_spill] sm:$0xff]  ;;  %v22623_v31 = vld [vmem:[#allocation322_spill] sm:$0xff]  ;;  %v22630_v57 = vld [vmem:[#allocation175_spill] sm:$0xff] }
 0x312   :  { %12723 = vmatprep.mubr.msk.f32.mxu0 %vm13739_vm1, %v21311_v30  ;;  %12064 = vmatprep.mubr.msk.f32.mxu1 %vm13739_vm1, %v21311_v30  ;;  %v9351_v34 = vcombine.low %v9202_v47, %v9205_v60  ;;  %v5854_v11 = vcombine.low %v5853_v13, %v18696_v26  ;;  %v19587_v29 = vcombine.low %v22613_v36, %v18709_v7  ;;  %v22624_v8 = vld [vmem:[#allocation320_spill] sm:$0xff] }
 0x313   :  { %v5863_v5 = vrot.slane %v5856_v33, %v13786_v14  ;;  %v5872_v7 = vrot.slane %v5865_v45, %v13786_v14  ;;  %v9827_v39 = vcombine.low %v22490_v12, %v22615_v50  ;;  %v5882_v12 = vrot.slane %v5875_v43, %v13786_v14  ;;  %v22631_v33 = vld [vmem:[#allocation38_spill] sm:$0xff]  ;;  %v22634_v45 = vld [vmem:[#allocation345_spill] sm:$0xff] }
 0x314   :  { %v9365_v3 = vrot.slane %v9351_v34, %v13786_v14  ;;  %v9828_v55 = vcombine.low %v22617_v1, %v22499_v46  ;;  %v22621_v46 = vld [vmem:[#allocation105_spill] sm:$0xff]  ;;  %v9829_v0 = vcombine.low %v22622_v35, %v22510_v25  ;;  %v5895_v38 = vcombine.low %v22624_v8, %v22623_v31  ;;  %v22626_v25 = vld [vmem:[#allocation122_spill] sm:$0xff] }
 0x315   :  { %12724 = vmatmul.mubr.msk.f32.gmra.mrb[90].mxu0 %vm1907_vm6, %v9315_v2  ;;  %12065 = vmatmul.mubr.msk.f32.gmra.mrb[48].mxu1 %vm1907_vm6, %v5844_v44  ;;  %v5864_v10 = vcombine.low %v5863_v5, %v18743_v56  ;;  %v5873_v2 = vcombine.low %v18746_v40, %v5872_v7  ;;  %v22633_v5 = vld [vmem:[#allocation335_spill] sm:$0xff]  ;;  %v22636_v50 = vld [vmem:[#allocation130_spill] sm:$0xff]  ;;  %v22648_v8 = vld [vmem:[#allocation285_spill] sm:$0xff] }
 0x316   :  { %12726 = vmatprep.mubr.msk.f32.mxu0 %vm13739_vm1, %v21311_v30  ;;  %12067 = vmatprep.mubr.msk.f32.mxu1 %vm13739_vm1, %v21311_v30  ;;  %v9366_v62 = vcombine.low %v9358_v27, %v9365_v3  ;;  %v5902_v13 = vrot.slane %v5895_v38, %v13786_v14  ;;  %v22628_v27 = vld [vmem:[#allocation328_spill] sm:$0xff]  ;;  %v22638_v43 = vld [vmem:[#allocation174_spill] sm:$0xff] }
 0x317   :  { %v22640_v1 = vld [vmem:[#allocation50_spill] sm:$0xff] }
 0x318   :  { %v22647_v31 = vld [vmem:[#allocation58_spill] sm:$0xff] }
 0x319   :  { %12727 = vmatmul.mubr.msk.f32.gmra.mrb[92].mxu0 %vm1907_vm6, %v9332_v23  ;;  %12068 = vmatmul.mubr.msk.f32.gmra.mrb[50].mxu1 %vm1907_vm6, %v5845_v19  ;;  %v19671_v19 = vcombine.low %v22626_v25, %v18863_v49  ;;  %v9833_v38 = vcombine.low %v22648_v8, %v22647_v31  ;;  %v22650_v25 = vld [vmem:[#allocation368_spill] sm:$0xff]  ;;  %v22668_v31 = vld [vmem:[#allocation79_spill] sm:$0xff]  ;;  %v22669_v8 = vld [vmem:[#allocation298_spill] sm:$0xff] }
 0x31a   :  { %12729 = vmatprep.mubr.msk.f32.mxu0 %vm13739_vm1, %v21311_v30  ;;  %12070 = vmatprep.mubr.msk.f32.mxu1 %vm13739_vm1, %v21311_v30 }
 0x31d   :  { %12730 = vmatmul.mubr.msk.f32.gmra.mrb[94].mxu0 %vm1907_vm6, %v9349_v52  ;;  %12071 = vmatmul.mubr.msk.f32.gmra.mrb[52].mxu1 %vm1907_vm6, %v5854_v11  ;;  %v22627_v52 = vld [vmem:[#allocation326_spill] sm:$0xff] }
 0x31e   :  { %12732 = vmatprep.mubr.msk.f32.mxu0 %vm13739_vm1, %v21311_v30  ;;  %12073 = vmatprep.mubr.msk.f32.mxu1 %vm13739_vm1, %v21311_v30  ;;  %v5904_v3 = vcombine.low %v22628_v27, %v22627_v52  ;;  %v22652_v27 = vld [vmem:[#allocation68_spill] sm:$0xff] }
 0x320   :  { %v5911_v49 = vrot.slane %v5904_v3, %v13786_v14  ;;  %v22653_v3 = vld [vmem:[#allocation59_spill] sm:$0xff] }
 0x321   :  { %12733 = vmatmul.mubr.msk.f32.gmra.mrb[96].mxu0 %vm1907_vm6, %v9366_v62  ;;  %12074 = vmatmul.mubr.msk.f32.gmra.mrb[54].mxu1 %vm1907_vm6, %v19587_v29  ;;  %v22632_v62 = vld [vmem:[#allocation42_spill] sm:$0xff] }
 0x322   :  { %12737 = vmatprep.mubr.msk.f32.mxu0 %vm13739_vm1, %v21311_v30  ;;  %12076 = vmatprep.mubr.msk.f32.mxu1 %vm13739_vm1, %v21311_v30  ;;  %v9831_v36 = vcombine.low %v22632_v62, %v22631_v33  ;;  %v5912_v61 = vcombine.low %v22633_v5, %v5911_v49  ;;  %v22654_v49 = vld [vmem:[#allocation342_spill] sm:$0xff] }
 0x325   :  { %12738 = vmatmul.mubr.msk.f32.vlgmr.msra.gmra.mrb[0].mxu0 %vm1907_vm6, %v19188_v51  ;;  %12077 = vmatmul.mubr.msk.f32.gmra.mrb[56].mxu1 %vm1907_vm6, %v5864_v10  ;;  %v19621_v51 = vcombine.low %v18759_v53, %v18779_v20  ;;  %v5883_v53 = vcombine.low %v18782_v37, %v5882_v12  ;;  %v22618_v20 = vld [vmem:[#allocation309_spill] sm:$0xff]  ;;  %v22635_v10 = vld [vmem:[#allocation339_spill] sm:$0xff] }
 0x326   :  { %12740 = vmatprep.mubr.msk.f32.mxu0 %vm13739_vm1, %v21311_v30  ;;  %12079 = vmatprep.mubr.msk.f32.mxu1 %vm13739_vm1, %v21311_v30  ;;  %v5885_v47 = vcombine.low %v22619_v28, %v22618_v20  ;;  %v5914_v7 = vcombine.low %v22635_v10, %v22634_v45  ;;  %v22639_v12 = vld [vmem:[#allocation43_spill] sm:$0xff]  ;;  %v22642_v28 = vld [vmem:[#allocation349_spill] sm:$0xff]  ;;  %v22658_v10 = vld [vmem:[#allocation146_spill] sm:$0xff] }
 0x328   :  { %v5892_v44 = vrot.slane %v5885_v47, %v13786_v14  ;;  %v5921_v18 = vrot.slane %v5914_v7, %v13786_v14  ;;  %v22643_v47 = vld [vmem:[#allocation347_spill] sm:$0xff] }
 0x329   :  { %12741 = vmatmul.mubr.msk.f32.gmra.mrb[2].mxu0 %vm1907_vm6, %v9827_v39  ;;  %12080 = vmatmul.mubr.msk.f32.gmra.mrb[58].mxu1 %vm1907_vm6, %v5873_v2  ;;  %v22637_v39 = vld [vmem:[#allocation127_spill] sm:$0xff] }
 0x32a   :  { %12743 = vmatprep.mubr.msk.f32.mxu0 %vm13739_vm1, %v21311_v30  ;;  %12082 = vmatprep.mubr.msk.f32.mxu1 %vm13739_vm1, %v21311_v30  ;;  %v5893_v23 = vcombine.low %v5892_v44, %v18839_v59  ;;  %v19705_v2 = vcombine.low %v22637_v39, %v22636_v50  ;;  %v22645_v44 = vld [vmem:[#allocation340_spill] sm:$0xff]  ;;  %v22659_v39 = vld [vmem:[#allocation367_spill] sm:$0xff] }
 0x32d   :  { %12744 = vmatmul.mubr.msk.f32.gmra.mrb[4].mxu0 %vm1907_vm6, %v19212_v9  ;;  %12083 = vmatmul.mubr.msk.f32.gmra.mrb[60].mxu1 %vm1907_vm6, %v19621_v51  ;;  %v22620_v9 = vld [vmem:[#allocation332_spill] sm:$0xff] }
 0x32e   :  { %12746 = vmatprep.mubr.msk.f32.mxu0 %vm13739_vm1, %v21311_v30  ;;  %12085 = vmatprep.mubr.msk.f32.mxu1 %vm13739_vm1, %v21311_v30  ;;  %v19645_v60 = vcombine.low %v22621_v46, %v22620_v9  ;;  %v5924_v9 = vcombine.low %v22643_v47, %v22642_v28  ;;  %v22644_v46 = vld [vmem:[#allocation336_spill] sm:$0xff]  ;;  %v22664_v28 = vld [vmem:[#allocation382_spill] sm:$0xff] }
 0x32f   :  { %v19729_v35 = vcombine.low %v22645_v44, %v22644_v46  ;;  %v22666_v46 = vld [vmem:[#allocation353_spill] sm:$0xff] }
 0x331   :  { %12747 = vmatmul.mubr.msk.f32.gmra.mrb[6].mxu0 %vm1907_vm6, %v9828_v55  ;;  %12086 = vmatmul.mubr.msk.f32.gmra.mrb[62].mxu1 %vm1907_vm6, %v5883_v53  ;;  %v9832_v55 = vcombine.low %v22640_v1, %v22639_v12  ;;  %v22641_v53 = vld [vmem:[#allocation139_spill] sm:$0xff]  ;;  %v22662_v1 = vld [vmem:[#allocation158_spill] sm:$0xff] }
 0x332   :  { %12749 = vmatprep.mubr.msk.f32.mxu0 %vm13739_vm1, %v21311_v30  ;;  %12088 = vmatprep.mubr.msk.f32.mxu1 %vm13739_vm1, %v21311_v30  ;;  %v5922_v20 = vcombine.low %v22641_v53, %v5921_v18  ;;  %v22660_v18 = vld [vmem:[#allocation69_spill] sm:$0xff] }
 0x335   :  { %12750 = vmatmul.mubr.msk.f32.gmra.mrb[8].mxu0 %vm1907_vm6, %v19237_v58  ;;  %12089 = vmatmul.mubr.msk.f32.gmra.mrb[64].mxu1 %vm1907_vm6, %v19645_v60  ;;  %v22625_v58 = vld [vmem:[#allocation30_spill] sm:$0xff] }
 0x336   :  { %12752 = vmatprep.mubr.msk.f32.mxu0 %vm13739_vm1, %v21311_v30  ;;  %12091 = vmatprep.mubr.msk.f32.mxu1 %vm13739_vm1, %v21311_v30  ;;  %v9830_v34 = vcombine.low %v22513_v4, %v22625_v58  ;;  %v22629_v4 = vld [vmem:[#allocation132_spill] sm:$0xff]  ;;  %v22649_v58 = vld [vmem:[#allocation142_spill] sm:$0xff] }
 0x337   :  { %v5903_v11 = vcombine.low %v5902_v13, %v22629_v4  ;;  %v22651_v13 = vld [vmem:[#allocation363_spill] sm:$0xff] }
 0x338   :  { %v5934_v52 = vcombine.low %v22651_v13, %v22650_v25  ;;  %v22671_v13 = vld [vmem:[#allocation141_spill] sm:$0xff] }
 0x339   :  { %12753 = vmatmul.mubr.msk.f32.gmra.mrb[10].mxu0 %vm1907_vm6, %v9829_v0  ;;  %12092 = vmatmul.mubr.msk.f32.gmra.mrb[66].mxu1 %vm1907_vm6, %v5893_v23  ;;  %v5931_v0 = vrot.slane %v5924_v9, %v13786_v14  ;;  %v22646_v23 = vld [vmem:[#allocation176_spill] sm:$0xff]  ;;  %v22665_v9 = vld [vmem:[#allocation351_spill] sm:$0xff] }
 0x33a   :  { %12755 = vmatprep.mubr.msk.f32.mxu0 %vm13739_vm1, %v21311_v30  ;;  %12094 = vmatprep.mubr.msk.f32.mxu1 %vm13739_vm1, %v21311_v30  ;;  %v5941_v62 = vrot.slane %v5934_v52, %v13786_v14  ;;  %v19789_v44 = vcombine.low %v22666_v46, %v22665_v9  ;;  %v22672_v52 = vld [vmem:[#allocation186_spill] sm:$0xff] }
 0x33b   :  { %v22683_v46 = vld [vmem:[#allocation422_spill] sm:$0xff] }
 0x33c   :  { %v5942_v7 = vcombine.low %v5941_v62, %v22658_v10  ;;  %v22676_v62 = vld [vmem:[#allocation165_spill] sm:$0xff] }
 0x33d   :  { %12756 = vmatmul.mubr.msk.f32.gmra.mrb[12].mxu0 %vm1907_vm6, %v9830_v34  ;;  %12095 = vmatmul.mubr.msk.f32.gmra.mrb[68].mxu1 %vm1907_vm6, %v19671_v19  ;;  %v5932_v34 = vcombine.low %v5931_v0, %v22649_v58 }
 0x33e   :  { %12758 = vmatprep.mubr.msk.f32.mxu0 %vm13739_vm1, %v21311_v30  ;;  %12097 = vmatprep.mubr.msk.f32.mxu1 %vm13739_vm1, %v21311_v30 }
 0x341   :  { %12759 = vmatmul.mubr.msk.f32.gmra.mrb[14].mxu0 %vm1907_vm6, %v22630_v57  ;;  %12098 = vmatmul.mubr.msk.f32.gmra.mrb[70].mxu1 %vm1907_vm6, %v5903_v11  ;;  %v9834_v11 = vcombine.low %v22653_v3, %v22652_v27  ;;  %v22655_v57 = vld [vmem:[#allocation350_spill] sm:$0xff]  ;;  %v5963_v27 = vcombine.low %v22672_v52, %v22671_v13  ;;  %v22687_v13 = vld [vmem:[#allocation167_spill] sm:$0xff] }
 0x342   :  { %12761 = vmatprep.mubr.msk.f32.mxu0 %vm13739_vm1, %v21311_v30  ;;  %12100 = vmatprep.mubr.msk.f32.mxu1 %vm13739_vm1, %v21311_v30  ;;  %v19755_v33 = vcombine.low %v22655_v57, %v22654_v49  ;;  %v22673_v3 = vld [vmem:[#allocation150_spill] sm:$0xff]  ;;  %v22675_v57 = vld [vmem:[#allocation357_spill] sm:$0xff] }
 0x345   :  { %12762 = vmatmul.mubr.msk.f32.gmra.mrb[16].mxu0 %vm1907_vm6, %v9831_v36  ;;  %12101 = vmatmul.mubr.msk.f32.gmra.mrb[72].mxu1 %vm1907_vm6, %v5912_v61  ;;  %v22656_v36 = vld [vmem:[#allocation366_spill] sm:$0xff]  ;;  %v22657_v61 = vld [vmem:[#allocation372_spill] sm:$0xff] }
 0x346   :  { %12764 = vmatprep.mubr.msk.f32.mxu0 %vm13739_vm1, %v21311_v30  ;;  %12103 = vmatprep.mubr.msk.f32.mxu1 %vm13739_vm1, %v21311_v30  ;;  %v5943_v45 = vcombine.low %v22657_v61, %v22656_v36  ;;  %v19814_v36 = vcombine.low %v22676_v62, %v22675_v57  ;;  %v5971_v61 = vrot.slane %v5963_v27, %v13786_v14  ;;  %v22689_v27 = vld [vmem:[#allocation234_spill] sm:$0xff] }
 0x348   :  { %v5950_v50 = vrot.slane %v5943_v45, %v13786_v14 }
 0x349   :  { %12765 = vmatmul.mubr.msk.f32.gmra.mrb[18].mxu0 %vm1907_vm6, %v22638_v43  ;;  %12104 = vmatmul.mubr.msk.f32.gmra.mrb[74].mxu1 %vm1907_vm6, %v19705_v2  ;;  %v22661_v43 = vld [vmem:[#allocation293_spill] sm:$0xff] }
 0x34a   :  { %12767 = vmatprep.mubr.msk.f32.mxu0 %vm13739_vm1, %v21311_v30  ;;  %12106 = vmatprep.mubr.msk.f32.mxu1 %vm13739_vm1, %v21311_v30  ;;  %v9835_v12 = vcombine.low %v22661_v43, %v22660_v18  ;;  %v22679_v18 = vld [vmem:[#allocation155_spill] sm:$0xff] }
 0x34b   :  { %v22680_v43 = vld [vmem:[#allocation159_spill] sm:$0xff] }
 0x34d   :  { %12768 = vmatmul.mubr.msk.f32.gmra.mrb[20].mxu0 %vm1907_vm6, %v9832_v55  ;;  %12107 = vmatmul.mubr.msk.f32.gmra.mrb[76].mxu1 %vm1907_vm6, %v5922_v20  ;;  %v5951_v55 = vcombine.low %v22662_v1, %v5950_v50  ;;  %v22663_v20 = vld [vmem:[#allocation389_spill] sm:$0xff]  ;;  %v22678_v50 = vld [vmem:[#allocation147_spill] sm:$0xff] }
 0x34e   :  { %12770 = vmatprep.mubr.msk.f32.mxu0 %vm13739_vm1, %v21311_v30  ;;  %12109 = vmatprep.mubr.msk.f32.mxu1 %vm13739_vm1, %v21311_v30  ;;  %v5953_v47 = vcombine.low %v22664_v28, %v22663_v20 }
 0x350   :  { %v5960_v0 = vrot.slane %v5953_v47, %v13786_v14 }
 0x351   :  { %12771 = vmatmul.mubr.msk.f32.gmra.mrb[22].mxu0 %vm1907_vm6, %v22646_v23  ;;  %12110 = vmatmul.mubr.msk.f32.gmra.mrb[78].mxu1 %vm1907_vm6, %v19729_v35  ;;  %v22667_v23 = vld [vmem:[#allocation178_spill] sm:$0xff] }
 0x352   :  { %12773 = vmatprep.mubr.msk.f32.mxu0 %vm13739_vm1, %v21311_v30  ;;  %12112 = vmatprep.mubr.msk.f32.mxu1 %vm13739_vm1, %v21311_v30 }
 0x355   :  { %12774 = vmatmul.mubr.msk.f32.gmra.mrb[24].mxu0 %vm1907_vm6, %v9833_v38  ;;  %12113 = vmatmul.mubr.msk.f32.gmra.mrb[80].mxu1 %vm1907_vm6, %v5932_v34  ;;  %v9836_v38 = vcombine.low %v22669_v8, %v22668_v31  ;;  %v22670_v34 = vld [vmem:[#allocation164_spill] sm:$0xff]  ;;  %v22685_v8 = vld [vmem:[#allocation161_spill] sm:$0xff] }
 0x356   :  { %12776 = vmatprep.mubr.msk.f32.mxu0 %vm13739_vm1, %v21311_v30  ;;  %12115 = vmatprep.mubr.msk.f32.mxu1 %vm13739_vm1, %v21311_v30  ;;  %v5961_v25 = vcombine.low %v22670_v34, %v5960_v0  ;;  %v11039_v0 = vcombine.high %v22607_v54, %v22683_v46  ;;  %v22684_v31 = vld [vmem:[#allocation168_spill] sm:$0xff]  ;;  %v22688_v54 = vld [vmem:[#allocation7_spill] sm:$0xff] }
 0x357   :  { %v22698_v46 = vld [vmem:[#allocation192_spill] sm:$0xff] }
 0x359   :  { %12777 = vmatmul.mubr.msk.f32.gmra.mrb[26].mxu0 %vm1907_vm6, %v9834_v11  ;;  %12116 = vmatmul.mubr.msk.f32.gmra.mrb[82].mxu1 %vm1907_vm6, %v19755_v33  ;;  %v22674_v11 = vld [vmem:[#allocation85_spill] sm:$0xff] }
 0x35a   :  { %12779 = vmatprep.mubr.msk.f32.mxu0 %vm13739_vm1, %v21311_v30  ;;  %12118 = vmatprep.mubr.msk.f32.mxu1 %vm13739_vm1, %v21311_v30  ;;  %v5964_v49 = vcombine.low %v22674_v11, %v22673_v3  ;;  %v9848_v3 = vcombine.low %v22689_v27, %v22688_v54  ;;  %v22690_v11 = vld [vmem:[#allocation247_spill] sm:$0xff] }
 0x35c   :  { %v19819_v45 = vrot.slane %v5964_v49, %v13786_v14  ;;  %v22691_v49 = vld [vmem:[#allocation3_spill] sm:$0xff] }
 0x35d   :  { %12780 = vmatmul.mubr.msk.f32.gmra.mrb[28].mxu0 %vm1907_vm6, %v22659_v39  ;;  %12119 = vmatmul.mubr.msk.f32.gmra.mrb[84].mxu1 %vm1907_vm6, %v5942_v7  ;;  %v22677_v7 = vld [vmem:[#allocation145_spill] sm:$0xff]  ;;  %v9849_v57 = vcombine.low %v22691_v49, %v22690_v11 }
 0x35e   :  { %12782 = vmatprep.mubr.msk.f32.mxu0 %vm13739_vm1, %v21311_v30  ;;  %12121 = vmatprep.mubr.msk.f32.mxu1 %vm13739_vm1, %v21311_v30  ;;  %v5980_v39 = vcombine.low %v22678_v50, %v22677_v7  ;;  %v5979_v28 = vcombine.low %v5971_v61, %v19819_v45  ;;  %v22692_v7 = vld [vmem:[#allocation185_spill] sm:$0xff] }
 0x35f   :  { %v22693_v50 = vld [vmem:[#allocation169_spill] sm:$0xff] }
 0x360   :  { %v5988_v47 = vrot.slane %v5980_v39, %v13786_v14  ;;  %v6962_v39 = vcombine.low %v22693_v50, %v22692_v7  ;;  %v22707_v50 = vld [vmem:[#allocation220_spill] sm:$0xff] }
 0x361   :  { %12783 = vmatmul.mubr.msk.f32.gmra.mrb[30].mxu0 %vm1907_vm6, %v9835_v12  ;;  %12122 = vmatmul.mubr.msk.f32.gmra.mrb[86].mxu1 %vm1907_vm6, %v5951_v55  ;;  %v5981_v12 = vcombine.low %v22680_v43, %v22679_v18  ;;  %v22681_v55 = vld [vmem:[#allocation310_spill] sm:$0xff]  ;;  %v22694_v43 = vld [vmem:[#allocation189_spill] sm:$0xff] }
 0x362   :  { %12785 = vmatprep.mubr.msk.f32.mxu0 %vm13739_vm1, %v21311_v30  ;;  %12124 = vmatprep.mubr.msk.f32.mxu1 %vm13739_vm1, %v21311_v30  ;;  %v9837_v20 = vcombine.low %v22681_v55, %v22597_v42 }
 0x363   :  { %v5995_v9 = vrot.slane %v5981_v12, %v13786_v14  ;;  %v22695_v12 = vld [vmem:[#allocation181_spill] sm:$0xff] }
 0x364   :  { %v6963_v55 = vcombine.low %v22695_v12, %v22694_v43 }
 0x365   :  { %12786 = vmatmul.mubr.msk.f32.gmra.mrb[32].mxu0 %vm1907_vm6, %v22667_v23  ;;  %12125 = vmatmul.mubr.msk.f32.gmra.mrb[88].mxu1 %vm1907_vm6, %v19789_v44  ;;  %v19848_v23 = vcombine.low %v5988_v47, %v5995_v9  ;;  %v9863_v47 = vrot.slane %v9849_v57, %v13786_v14  ;;  %v22696_v9 = vld [vmem:[#allocation359_spill] sm:$0xff] }
 0x366   :  { %12788 = vmatprep.mubr.msk.f32.mxu0 %vm13739_vm1, %v21311_v30  ;;  %12127 = vmatprep.mubr.msk.f32.mxu1 %vm13739_vm1, %v21311_v30  ;;  %v6977_v54 = vrot.slane %v6963_v55, %v13786_v14 }
 0x369   :  { %12789 = vmatmul.mubr.msk.f32.gmra.mrb[34].mxu0 %vm1907_vm6, %v9836_v38  ;;  %12128 = vmatmul.mubr.msk.f32.gmra.mrb[90].mxu1 %vm1907_vm6, %v5961_v25  ;;  %v6945_v38 = vcombine.low %v22685_v8, %v22684_v31  ;;  %v22686_v25 = vld [vmem:[#allocation179_spill] sm:$0xff]  ;;  %v22700_v8 = vld [vmem:[#allocation209_spill] sm:$0xff] }
 0x36a   :  { %12791 = vmatprep.mubr.msk.f32.mxu0 %vm13739_vm1, %v21311_v30  ;;  %12130 = vmatprep.mubr.msk.f32.mxu1 %vm13739_vm1, %v21311_v30  ;;  %v6946_v52 = vcombine.low %v22687_v13, %v22686_v25  ;;  %v22702_v13 = vld [vmem:[#allocation360_spill] sm:$0xff] }
 0x36b   :  { %v6953_v62 = vrot.slane %v6945_v38, %v13786_v14  ;;  %v22701_v38 = vld [vmem:[#allocation201_spill] sm:$0xff] }
 0x36c   :  { %v6960_v61 = vrot.slane %v6946_v52, %v13786_v14  ;;  %v6980_v25 = vcombine.low %v22701_v38, %v22700_v8  ;;  %v22715_v38 = vld [vmem:[#allocation245_spill] sm:$0xff] }
 0x36d   :  { %12792 = vmatmul.mubr.msk.f32.gmra.mrb[36].mxu0 %vm1907_vm6, %v19432_v15  ;;  %12131 = vmatmul.mubr.msk.f32.gmra.mrb[92].mxu1 %vm1907_vm6, %v19814_v36  ;;  %v22682_v15 = vld [vmem:[#allocation311_spill] sm:$0xff] }
 0x36e   :  { %12794 = vmatprep.mubr.msk.f32.mxu0 %vm13739_vm1, %v21311_v30  ;;  %12133 = vmatprep.mubr.msk.f32.mxu1 %vm13739_vm1, %v21311_v30  ;;  %v9838_v42 = vcombine.low %v22600_v21, %v22682_v15  ;;  %v9846_v21 = vrot.slane %v11039_v0, %v13786_v14  ;;  %v22697_v15 = vld [vmem:[#allocation8_spill] sm:$0xff]  ;;  %v6994_v49 = vrot.slane %v6980_v25, %v13786_v14  ;;  %v22716_v25 = vld [vmem:[#allocation237_spill] sm:$0xff] }
 0x36f   :  { %v22699_v0 = vld [vmem:[#allocation188_spill] sm:$0xff] }
 0x370   :  { %v6979_v31 = vcombine.low %v22699_v0, %v22698_v46  ;;  %v22712_v46 = vld [vmem:[#allocation226_spill] sm:$0xff] }
 0x371   :  { %12795 = vmatmul.mubr.msk.f32.gmra.mrb[38].mxu0 %vm1907_vm6, %v9837_v20  ;;  %12134 = vmatmul.mubr.msk.f32.gmra.mrb[94].mxu1 %vm1907_vm6, %v5979_v28  ;;  %v9847_v20 = vcombine.low %v19532_v24, %v9846_v21  ;;  %v9856_v28 = vrot.slane %v9848_v3, %v13786_v14  ;;  %v6961_v24 = vcombine.low %v6953_v62, %v6960_v61  ;;  %v22705_v62 = vld [vmem:[#allocation214_spill] sm:$0xff] }
 0x372   :  { %12797 = vmatprep.mubr.msk.f32.mxu0 %vm13739_vm1, %v21311_v30  ;;  %12136 = vmatprep.mubr.msk.f32.mxu1 %vm13739_vm1, %v21311_v30  ;;  %v6970_v21 = vrot.slane %v6962_v39, %v13786_v14  ;;  %v6987_v11 = vrot.slane %v6979_v31, %v13786_v14  ;;  %v22706_v61 = vld [vmem:[#allocation206_spill] sm:$0xff]  ;;  %v22714_v31 = vld [vmem:[#allocation231_spill] sm:$0xff] }
 0x373   :  { %v9864_v27 = vcombine.low %v9856_v28, %v9863_v47  ;;  %v6996_v7 = vcombine.low %v22706_v61, %v22705_v62  ;;  %v22708_v39 = vld [vmem:[#allocation210_spill] sm:$0xff]  ;;  %v22709_v47 = vld [vmem:[#allocation356_spill] sm:$0xff] }
 0x374   :  { %v6978_v57 = vcombine.low %v6970_v21, %v6977_v54  ;;  %v6997_v43 = vcombine.low %v22708_v39, %v22707_v50  ;;  %v6995_v55 = vcombine.low %v6987_v11, %v6994_v49  ;;  %v22717_v21 = vld [vmem:[#allocation323_spill] sm:$0xff]  ;;  %v22718_v62 = vld [vmem:[#allocation274_spill] sm:$0xff]  ;;  %v22719_v61 = vld [vmem:[#allocation244_spill] sm:$0xff] }
 0x375   :  { %12798 = vmatmul.mubr.msk.f32.gmra.mrb[40].mxu0 %vm1907_vm6, %v9838_v42  ;;  %12137 = vmatmul.mubr.msk.f32.gmra.mrb[96].mxu1 %vm1907_vm6, %v19848_v23  ;;  %v9865_v42 = vcombine.low %v22697_v15, %v22696_v9  ;;  %v22710_v9 = vld [vmem:[#allocation215_spill] sm:$0xff]  ;;  %v9874_v54 = vcombine.low %v22717_v21, %v18743_v56  ;;  %v22721_v50 = vld [vmem:[#allocation269_spill] sm:$0xff] }
 0x376   :  { %12800 = vmatprep.mubr.msk.f32.mxu0 %vm13739_vm1, %v21311_v30  ;;  %12216 = vmatprep.mubr.msk.f32.mxu1 %vm13739_vm1, %v21311_v30  ;;  %v7011_v28 = vrot.slane %v6997_v43, %v13786_v14  ;;  %v7013_v15 = vcombine.low %v22710_v9, %v22709_v47  ;;  %v22722_v56 = vld [vmem:[#allocation317_spill] sm:$0xff]  ;;  %v22723_v9 = vld [vmem:[#allocation64_spill] sm:$0xff] }
 0x377   :  { %v9872_v3 = vrot.slane %v9865_v42, %v13786_v14  ;;  %v22711_v42 = vld [vmem:[#allocation222_spill] sm:$0xff]  ;;  %v9875_v43 = vcombine.low %v18746_v40, %v22722_v56  ;;  %v22735_v56 = vld [vmem:[#allocation28_spill] sm:$0xff] }
 0x378   :  { %v7014_v0 = vcombine.low %v22712_v46, %v22711_v42  ;;  %v22725_v46 = vld [vmem:[#allocation75_spill] sm:$0xff] }
 0x379   :  { %12801 = vmatmul.mubr.msk.f32.gmra.mrb[42].mxu0 %vm1907_vm6, %v19529_v48  ;;  %v22703_v48 = vld [vmem:[#allocation191_spill] sm:$0xff]  ;;  %v9873_v12 = vcombine.low %v9872_v3, %v18696_v26 }
 0x37a   :  { %12803 = vmatprep.mubr.msk.f32.mxu0 %vm13739_vm1, %v21311_v30  ;;  %v22704_v52 = vcombine.low %v22702_v13, %v22703_v48  ;;  %v22713_v26 = vld [vmem:[#allocation223_spill] sm:$0xff]  ;;  %v7031_v13 = vcombine.low %v22716_v25, %v22715_v38  ;;  %v22729_v25 = vld [vmem:[#allocation301_spill] sm:$0xff] }
 0x37b   :  { %v7030_v8 = vcombine.low %v22714_v31, %v22713_v26  ;;  %v22727_v31 = vld [vmem:[#allocation300_spill] sm:$0xff] }
 0x37c   :  { %12217 = vmatmul.mubr.msk.f32.vlgmr.msra.gmra.mrb[50].mxu1 %vm1907_vm6, %v22704_v52  ;;  %v7021_v52 = vrot.slane %v7013_v15, %v13786_v14  ;;  %v7045_v11 = vrot.slane %v7031_v13, %v13786_v14  ;;  %v22724_v15 = vld [vmem:[#allocation387_spill] sm:$0xff]  ;;  %v22730_v13 = vld [vmem:[#allocation302_spill] sm:$0xff] }
 0x37d   :  { %12219 = vmatprep.mubr.msk.f32.mxu1 %vm13739_vm1, %v21311_v30  ;;  %12804 = vmatmul.mubr.msk.f32.gmra.mrb[44].mxu0 %vm1907_vm6, %v9847_v20  ;;  %v7004_v20 = vrot.slane %v6996_v7, %v13786_v14  ;;  %v7038_v3 = vrot.slane %v7030_v8, %v13786_v14  ;;  %v7047_v7 = vcombine.low %v22719_v61, %v22718_v62  ;;  %v22728_v8 = vld [vmem:[#allocation66_spill] sm:$0xff] }
 0x37e   :  { %12806 = vmatprep.mubr.msk.f32.mxu0 %vm13739_vm1, %v21311_v30  ;;  %v7064_v42 = vcombine.low %v22724_v15, %v22723_v9  ;;  %v7081_v38 = vcombine.low %v22728_v8, %v22727_v31  ;;  %v22736_v9 = vld [vmem:[#allocation107_spill] sm:$0xff]  ;;  %v22737_v15 = vld [vmem:[#allocation84_spill] sm:$0xff] }
 0x37f   :  { %v7012_v48 = vcombine.low %v7004_v20, %v7011_v28  ;;  %v7055_v28 = vrot.slane %v7047_v7, %v13786_v14  ;;  %v22740_v31 = vld [vmem:[#allocation327_spill] sm:$0xff] }
 0x380   :  { %12220 = vmatmul.mubr.msk.f32.gmra.mrb[52].mxu1 %vm1907_vm6, %v6961_v24  ;;  %v7028_v24 = vrot.slane %v7014_v0, %v13786_v14  ;;  %v22726_v0 = vld [vmem:[#allocation57_spill] sm:$0xff]  ;;  %v7072_v21 = vrot.slane %v7064_v42, %v13786_v14  ;;  %v7115_v42 = vcombine.low %v22737_v15, %v22736_v9  ;;  %v9877_v8 = vcombine.low %v22740_v31, %v18839_v59  ;;  %v22753_v31 = vld [vmem:[#allocation396_spill] sm:$0xff] }
 0x381   :  { %12222 = vmatprep.mubr.msk.f32.mxu1 %vm13739_vm1, %v21311_v30  ;;  %12807 = vmatmul.mubr.msk.f32.gmra.mrb[46].mxu0 %vm1907_vm6, %v9864_v27  ;;  %v7065_v26 = vcombine.low %v22726_v0, %v22725_v46  ;;  %v22738_v46 = vld [vmem:[#allocation118_spill] sm:$0xff] }
 0x382   :  { %12809 = vmatprep.mubr.msk.f32.mxu0 %vm13739_vm1, %v21311_v30  ;;  %v22739_v0 = vld [vmem:[#allocation98_spill] sm:$0xff] }
 0x384   :  { %12223 = vmatmul.mubr.msk.f32.gmra.mrb[54].mxu1 %vm1907_vm6, %v6978_v57  ;;  %v7029_v57 = vcombine.low %v7021_v52, %v7028_v24 }
 0x385   :  { %12225 = vmatprep.mubr.msk.f32.mxu1 %vm13739_vm1, %v21311_v30  ;;  %12810 = vmatmul.mubr.msk.f32.gmra.mrb[48].mxu0 %vm1907_vm6, %v9873_v12 }
 0x386   :  { %12812 = vmatprep.mubr.msk.f32.mxu0 %vm13739_vm1, %v21311_v30 }
 0x388   :  { %12226 = vmatmul.mubr.msk.f32.gmra.mrb[56].mxu1 %vm1907_vm6, %v6995_v55  ;;  %v19939_v27 = vpop.f32.mrb[0].mxu1  ;;  %v7046_v55 = vcombine.low %v7038_v3, %v7045_v11  ;;  %v22731_v3 = vld [vmem:[#allocation116_spill] sm:$0xff] }
 0x389   :  { %12228 = vmatprep.mubr.msk.f32.mxu1 %vm13739_vm1, %v21311_v30  ;;  %12813 = vmatmul.mubr.msk.f32.gmra.mrb[50].mxu0 %vm1907_vm6, %v19587_v29  ;;  %v11994_v49 = vpop.f32.mrb[1].mxu1  ;;  %v22720_v29 = vld [vmem:[#allocation271_spill] sm:$0xff]  ;;  %v9876_v11 = vcombine.low %v18782_v37, %v22731_v3 }
 0x38a   :  { %12815 = vmatprep.mubr.msk.f32.mxu0 %vm13739_vm1, %v21311_v30  ;;  %v7048_v39 = vcombine.low %v22721_v50, %v22720_v29  ;;  %v22732_v29 = vld [vmem:[#allocation308_spill] sm:$0xff]  ;;  %v22733_v50 = vld [vmem:[#allocation305_spill] sm:$0xff] }
 0x38c   :  { %12229 = vmatmul.mubr.msk.f32.gmra.mrb[58].mxu1 %vm1907_vm6, %v7012_v48  ;;  %v19955_v12 = vpop.f32.mrb[2].mxu1  ;;  %v7062_v47 = vrot.slane %v7048_v39, %v13786_v14  ;;  %v7082_v48 = vcombine.low %v22730_v13, %v22729_v25  ;;  %v7098_v39 = vcombine.low %v22733_v50, %v22732_v29  ;;  %v22741_v25 = vld [vmem:[#allocation52_spill] sm:$0xff]  ;;  %v22742_v13 = vld [vmem:[#allocation111_spill] sm:$0xff] }
 0x38d   :  { %12231 = vmatprep.mubr.msk.f32.mxu1 %vm13739_vm1, %v21311_v30  ;;  %12816 = vmatmul.mubr.msk.f32.gmra.mrb[52].mxu0 %vm1907_vm6, %v9874_v54  ;;  %v11997_v20 = vpop.f32.mrb[3].mxu1  ;;  %v7079_v54 = vrot.slane %v7065_v26, %v13786_v14  ;;  %v7116_v26 = vcombine.low %v22739_v0, %v22738_v46  ;;  %v22745_v29 = vld [vmem:[#allocation156_spill] sm:$0xff]  ;;  %v22750_v46 = vld [vmem:[#allocation395_spill] sm:$0xff]  ;;  %v22751_v0 = vld [vmem:[#allocation93_spill] sm:$0xff] }
 0x38e   :  { %12818 = vmatprep.mubr.msk.f32.mxu0 %vm13739_vm1, %v21311_v30  ;;  %v7063_v24 = vcombine.low %v7055_v28, %v7062_v47  ;;  %v7096_v62 = vrot.slane %v7082_v48, %v13786_v14  ;;  %v7106_v28 = vrot.slane %v7098_v39, %v13786_v14  ;;  %v7132_v48 = vcombine.low %v22742_v13, %v22741_v25  ;;  %v22746_v50 = vld [vmem:[#allocation136_spill] sm:$0xff] }
 0x38f   :  { %v7080_v7 = vcombine.low %v7072_v21, %v7079_v54  ;;  %v7149_v39 = vcombine.low %v22746_v50, %v22745_v29 }
 0x390   :  { %12232 = vmatmul.mubr.msk.f32.gmra.mrb[60].mxu1 %vm1907_vm6, %v7029_v57  ;;  %v19969_v40 = vpop.f32.mrb[4].mxu1  ;;  %v7089_v57 = vrot.slane %v7081_v38, %v13786_v14 }
 0x391   :  { %12234 = vmatprep.mubr.msk.f32.mxu1 %vm13739_vm1, %v21311_v30  ;;  %12819 = vmatmul.mubr.msk.f32.gmra.mrb[54].mxu0 %vm1907_vm6, %v9875_v43  ;;  %v12000_v52 = vpop.f32.mrb[5].mxu1  ;;  %v7157_v15 = vrot.slane %v7149_v39, %v13786_v14  ;;  %v22759_v39 = vld [vmem:[#allocation403_spill] sm:$0xff] }
 0x392   :  { %12821 = vmatprep.mubr.msk.f32.mxu0 %vm13739_vm1, %v21311_v30  ;;  %v22743_v52 = vld [vmem:[#allocation334_spill] sm:$0xff] }
 0x394   :  { %12235 = vmatmul.mubr.msk.f32.gmra.mrb[62].mxu1 %vm1907_vm6, %v7046_v55  ;;  %v19986_v49 = vpop.f32.mrb[6].mxu1  ;;  %v7097_v55 = vcombine.low %v7089_v57, %v7096_v62  ;;  %v7140_v57 = vrot.slane %v7132_v48, %v13786_v14  ;;  %v22755_v48 = vld [vmem:[#allocation370_spill] sm:$0xff] }
 0x395   :  { %12237 = vmatprep.mubr.msk.f32.mxu1 %vm13739_vm1, %v21311_v30  ;;  %12822 = vmatmul.mubr.msk.f32.gmra.mrb[56].mxu0 %vm1907_vm6, %v19621_v51  ;;  %v12003_v61 = vpop.f32.mrb[7].mxu1  ;;  %v22734_v51 = vld [vmem:[#allocation33_spill] sm:$0xff] }
 0x396   :  { %12824 = vmatprep.mubr.msk.f32.mxu0 %vm13739_vm1, %v21311_v30  ;;  %v7099_v43 = vcombine.low %v22735_v56, %v22734_v51  ;;  %v22747_v51 = vld [vmem:[#allocation348_spill] sm:$0xff]  ;;  %v22748_v56 = vld [vmem:[#allocation149_spill] sm:$0xff] }
 0x398   :  { %12238 = vmatmul.mubr.msk.f32.gmra.mrb[64].mxu1 %vm1907_vm6, %v7063_v24  ;;  %v20000_v37 = vpop.f32.mrb[8].mxu1  ;;  %v7113_v47 = vrot.slane %v7099_v43, %v13786_v14  ;;  %v22744_v24 = vld [vmem:[#allocation331_spill] sm:$0xff]  ;;  %v7150_v43 = vcombine.low %v22748_v56, %v22747_v51  ;;  %v22760_v51 = vld [vmem:[#allocation402_spill] sm:$0xff] }
 0x399   :  { %12240 = vmatprep.mubr.msk.f32.mxu1 %vm13739_vm1, %v21311_v30  ;;  %12825 = vmatmul.mubr.msk.f32.gmra.mrb[58].mxu0 %vm1907_vm6, %v9876_v11  ;;  %v12006_v20 = vpop.f32.mrb[9].mxu1  ;;  %v7133_v21 = vcombine.low %v22744_v24, %v22743_v52  ;;  %v7130_v11 = vrot.slane %v7116_v26, %v13786_v14  ;;  %v7166_v26 = vcombine.low %v22751_v0, %v22750_v46  ;;  %v22756_v52 = vld [vmem:[#allocation398_spill] sm:$0xff] }
 0x39a   :  { %12827 = vmatprep.mubr.msk.f32.mxu0 %vm13739_vm1, %v21311_v30  ;;  %v7114_v3 = vcombine.low %v7106_v28, %v7113_v47  ;;  %v7183_v24 = vcombine.low %v22756_v52, %v22755_v48  ;;  %v7200_v56 = vcombine.low %v22760_v51, %v22759_v39  ;;  %v22768_v48 = vld [vmem:[#allocation375_spill] sm:$0xff]  ;;  %v22769_v52 = vld [vmem:[#allocation408_spill] sm:$0xff] }
 0x39b   :  { %v7147_v62 = vrot.slane %v7133_v21, %v13786_v14  ;;  %v22757_v21 = vld [vmem:[#allocation401_spill] sm:$0xff] }
 0x39c   :  { %12241 = vmatmul.mubr.msk.f32.gmra.mrb[66].mxu1 %vm1907_vm6, %v7080_v7  ;;  %v20017_v38 = vpop.f32.mrb[10].mxu1  ;;  %v7208_v0 = vrot.slane %v7200_v56, %v13786_v14 }
 0x39d   :  { %12243 = vmatprep.mubr.msk.f32.mxu1 %vm13739_vm1, %v21311_v30  ;;  %12828 = vmatmul.mubr.msk.f32.gmra.mrb[60].mxu0 %vm1907_vm6, %v19645_v60  ;;  %v12009_v54 = vpop.f32.mrb[11].mxu1  ;;  %v7123_v60 = vrot.slane %v7115_v42, %v13786_v14  ;;  %v7148_v47 = vcombine.low %v7140_v57, %v7147_v62  ;;  %v7164_v42 = vrot.slane %v7150_v43, %v13786_v14  ;;  %v22761_v43 = vld [vmem:[#allocation96_spill] sm:$0xff] }
 0x39e   :  { %12830 = vmatprep.mubr.msk.f32.mxu0 %vm13739_vm1, %v21311_v30  ;;  %v22758_v54 = vld [vmem:[#allocation371_spill] sm:$0xff]  ;;  %v7174_v57 = vrot.slane %v7166_v26, %v13786_v14 }
 0x39f   :  { %v7131_v7 = vcombine.low %v7123_v60, %v7130_v11  ;;  %v7165_v11 = vcombine.low %v7157_v15, %v7164_v42 }
 0x3a0   :  { %12244 = vmatmul.mubr.msk.f32.gmra.mrb[68].mxu1 %vm1907_vm6, %v7097_v55  ;;  %v20031_v59 = vpop.f32.mrb[12].mxu1  ;;  %v22749_v55 = vld [vmem:[#allocation120_spill] sm:$0xff] }
 0x3a1   :  { %12246 = vmatprep.mubr.msk.f32.mxu1 %vm13739_vm1, %v21311_v30  ;;  %12831 = vmatmul.mubr.msk.f32.gmra.mrb[62].mxu0 %vm1907_vm6, %v9877_v8  ;;  %v12012_v61 = vpop.f32.mrb[13].mxu1  ;;  %v9878_v20 = vcombine.low %v22749_v55, %v22629_v4  ;;  %v22754_v4 = vld [vmem:[#allocation333_spill] sm:$0xff] }
 0x3a2   :  { %12833 = vmatprep.mubr.msk.f32.mxu0 %vm13739_vm1, %v21311_v30  ;;  %v9879_v25 = vcombine.low %v22633_v5, %v22754_v4  ;;  %v7191_v61 = vrot.slane %v7183_v24, %v13786_v14  ;;  %v22762_v55 = vld [vmem:[#allocation405_spill] sm:$0xff]  ;;  %v22767_v4 = vld [vmem:[#allocation406_spill] sm:$0xff]  ;;  %v7234_v24 = vcombine.low %v22769_v52, %v22768_v48  ;;  %v22781_v48 = vld [vmem:[#allocation152_spill] sm:$0xff] }
 0x3a3   :  { %v9882_v52 = vcombine.low %v22781_v48, %v22658_v10  ;;  %v22786_v10 = vld [vmem:[#allocation153_spill] sm:$0xff]  ;;  %v22791_v48 = vld [vmem:[#allocation307_spill] sm:$0xff] }
 0x3a4   :  { %12247 = vmatmul.mubr.msk.f32.gmra.mrb[70].mxu1 %vm1907_vm6, %v7114_v3  ;;  %v20048_v28 = vpop.f32.mrb[14].mxu1  ;;  %v7184_v3 = vcombine.low %v22758_v54, %v22757_v21  ;;  %v22770_v21 = vld [vmem:[#allocation410_spill] sm:$0xff]  ;;  %v22771_v54 = vld [vmem:[#allocation409_spill] sm:$0xff] }
 0x3a5   :  { %12249 = vmatprep.mubr.msk.f32.mxu1 %vm13739_vm1, %v21311_v30  ;;  %12834 = vmatmul.mubr.msk.f32.gmra.mrb[64].mxu0 %vm1907_vm6, %v19671_v19  ;;  %v12015_v9 = vpop.f32.mrb[15].mxu1  ;;  %v22752_v19 = vld [vmem:[#allocation397_spill] sm:$0xff] }
 0x3a6   :  { %12836 = vmatprep.mubr.msk.f32.mxu0 %vm13739_vm1, %v21311_v30  ;;  %v7167_v8 = vcombine.low %v22753_v31, %v22752_v19  ;;  %v22764_v19 = vld [vmem:[#allocation157_spill] sm:$0xff]  ;;  %v22765_v31 = vld [vmem:[#allocation404_spill] sm:$0xff] }
 0x3a8   :  { %12250 = vmatmul.mubr.msk.f32.gmra.mrb[72].mxu1 %vm1907_vm6, %v7131_v7  ;;  %v20064_v13 = vpop.f32.mrb[16].mxu1  ;;  %v7181_v62 = vrot.slane %v7167_v8, %v13786_v14  ;;  %v7198_v7 = vrot.slane %v7184_v3, %v13786_v14  ;;  %v7217_v8 = vcombine.low %v22765_v31, %v22764_v19  ;;  %v7235_v3 = vcombine.low %v22771_v54, %v22770_v21  ;;  %v22777_v19 = vld [vmem:[#allocation194_spill] sm:$0xff]  ;;  %v22783_v54 = vld [vmem:[#allocation417_spill] sm:$0xff] }
 0x3a9   :  { %12252 = vmatprep.mubr.msk.f32.mxu1 %vm13739_vm1, %v21311_v30  ;;  %12837 = vmatmul.mubr.msk.f32.gmra.mrb[66].mxu0 %vm1907_vm6, %v9878_v20  ;;  %v12018_v60 = vpop.f32.mrb[17].mxu1  ;;  %v7201_v20 = vcombine.low %v22762_v55, %v22761_v43  ;;  %v22773_v43 = vld [vmem:[#allocation184_spill] sm:$0xff]  ;;  %v22774_v55 = vld [vmem:[#allocation411_spill] sm:$0xff]  ;;  %v22778_v31 = vld [vmem:[#allocation414_spill] sm:$0xff] }
 0x3aa   :  { %12839 = vmatprep.mubr.msk.f32.mxu0 %vm13739_vm1, %v21311_v30  ;;  %v7182_v50 = vcombine.low %v7174_v57, %v7181_v62  ;;  %v7199_v42 = vcombine.low %v7191_v61, %v7198_v7  ;;  %v7225_v57 = vrot.slane %v7217_v8, %v13786_v14  ;;  %v22772_v61 = vld [vmem:[#allocation140_spill] sm:$0xff]  ;;  %v7249_v39 = vrot.slane %v7235_v3, %v13786_v14  ;;  %v22782_v21 = vld [vmem:[#allocation418_spill] sm:$0xff] }
 0x3ab   :  { %v7215_v26 = vrot.slane %v7201_v20, %v13786_v14  ;;  %v9881_v7 = vcombine.low %v22772_v61, %v22649_v58  ;;  %v7251_v20 = vcombine.low %v22774_v55, %v22773_v43  ;;  %v7268_v8 = vcombine.low %v22778_v31, %v22777_v19 }
 0x3ac   :  { %12253 = vmatmul.mubr.msk.f32.gmra.mrb[74].mxu1 %vm1907_vm6, %v7148_v47  ;;  %v20078_v5 = vpop.f32.mrb[18].mxu1  ;;  %v22763_v47 = vld [vmem:[#allocation131_spill] sm:$0xff]  ;;  %v7285_v3 = vcombine.low %v22783_v54, %v22782_v21  ;;  %v22792_v21 = vld [vmem:[#allocation100_spill] sm:$0xff] }
 0x3ad   :  { %12255 = vmatprep.mubr.msk.f32.mxu1 %vm13739_vm1, %v21311_v30  ;;  %12840 = vmatmul.mubr.msk.f32.gmra.mrb[68].mxu0 %vm1907_vm6, %v9879_v25  ;;  %v12021_v29 = vpop.f32.mrb[19].mxu1  ;;  %v9880_v9 = vcombine.low %v22641_v53, %v22763_v47  ;;  %v22776_v47 = vld [vmem:[#allocation412_spill] sm:$0xff] }
 0x3ae   :  { %12842 = vmatprep.mubr.msk.f32.mxu0 %vm13739_vm1, %v21311_v30  ;;  %v22793_v54 = vld [vmem:[#allocation92_spill] sm:$0xff] }
 0x3b0   :  { %12256 = vmatmul.mubr.msk.f32.gmra.mrb[76].mxu1 %vm1907_vm6, %v7165_v11  ;;  %v20095_v15 = vpop.f32.mrb[20].mxu1  ;;  %v7216_v11 = vcombine.low %v7208_v0, %v7215_v26  ;;  %v7259_v0 = vrot.slane %v7251_v20, %v13786_v14  ;;  %v22787_v20 = vld [vmem:[#allocation421_spill] sm:$0xff] }
 0x3b1   :  { %12258 = vmatprep.mubr.msk.f32.mxu1 %vm13739_vm1, %v21311_v30  ;;  %12843 = vmatmul.mubr.msk.f32.gmra.mrb[70].mxu0 %vm1907_vm6, %v19705_v2  ;;  %v12024_v46 = vpop.f32.mrb[21].mxu1  ;;  %v22766_v2 = vld [vmem:[#allocation407_spill] sm:$0xff] }
 0x3b2   :  { %12845 = vmatprep.mubr.msk.f32.mxu0 %vm13739_vm1, %v21311_v30  ;;  %v7218_v25 = vcombine.low %v22767_v4, %v22766_v2  ;;  %v22779_v2 = vld [vmem:[#allocation416_spill] sm:$0xff]  ;;  %v22780_v4 = vld [vmem:[#allocation415_spill] sm:$0xff] }
 0x3b4   :  { %12259 = vmatmul.mubr.msk.f32.gmra.mrb[78].mxu1 %vm1907_vm6, %v7182_v50  ;;  %v20109_v53 = vpop.f32.mrb[22].mxu1  ;;  %v7232_v62 = vrot.slane %v7218_v25, %v13786_v14  ;;  %v7242_v50 = vrot.slane %v7234_v24, %v13786_v14  ;;  %v7269_v25 = vcombine.low %v22780_v4, %v22779_v2  ;;  %v22790_v4 = vld [vmem:[#allocation173_spill] sm:$0xff] }
 0x3b5   :  { %12261 = vmatprep.mubr.msk.f32.mxu1 %vm13739_vm1, %v21311_v30  ;;  %12846 = vmatmul.mubr.msk.f32.gmra.mrb[72].mxu0 %vm1907_vm6, %v9880_v9  ;;  %v12027_v60 = vpop.f32.mrb[23].mxu1 }
 0x3b6   :  { %12848 = vmatprep.mubr.msk.f32.mxu0 %vm13739_vm1, %v21311_v30  ;;  %v7233_v56 = vcombine.low %v7225_v57, %v7232_v62  ;;  %v22784_v60 = vld [vmem:[#allocation420_spill] sm:$0xff] }
 0x3b8   :  { %12262 = vmatmul.mubr.msk.f32.gmra.mrb[80].mxu1 %vm1907_vm6, %v7199_v42  ;;  %v20126_v29 = vpop.f32.mrb[24].mxu1  ;;  %v7250_v42 = vcombine.low %v7242_v50, %v7249_v39  ;;  %v9883_v50 = vcombine.low %v22662_v1, %v22786_v10 }
 0x3b9   :  { %12264 = vmatprep.mubr.msk.f32.mxu1 %vm13739_vm1, %v21311_v30  ;;  %12849 = vmatmul.mubr.msk.f32.gmra.mrb[74].mxu0 %vm1907_vm6, %v19729_v35  ;;  %v12030_v51 = vpop.f32.mrb[25].mxu1  ;;  %v22775_v35 = vld [vmem:[#allocation413_spill] sm:$0xff] }
 0x3ba   :  { %12851 = vmatprep.mubr.msk.f32.mxu0 %vm13739_vm1, %v21311_v30  ;;  %v7252_v9 = vcombine.low %v22776_v47, %v22775_v35  ;;  %v7293_v51 = vrot.slane %v7285_v3, %v13786_v14  ;;  %v7302_v35 = vcombine.low %v22787_v20, %v19439_v63  ;;  %v7303_v47 = vcombine.low %v19443_v17, %v19472_v16  ;;  %v22788_v16 = vld [vmem:[#allocation369_spill] sm:$0xff] }
 0x3bb   :  { %v7319_v17 = vcombine.low %v19478_v6, %v19482_v41  ;;  %v9887_v3 = vcombine.low %v22793_v54, %v22792_v21 }
 0x3bc   :  { %12265 = vmatmul.mubr.msk.f32.gmra.mrb[82].mxu1 %vm1907_vm6, %v7216_v11  ;;  %v20140_v58 = vpop.f32.mrb[26].mxu1  ;;  %v7266_v26 = vrot.slane %v7252_v9, %v13786_v14  ;;  %v22785_v11 = vld [vmem:[#allocation419_spill] sm:$0xff]  ;;  %v7317_v63 = vrot.slane %v7303_v47, %v13786_v14 }
 0x3bd   :  { %12267 = vmatprep.mubr.msk.f32.mxu1 %vm13739_vm1, %v21311_v30  ;;  %12852 = vmatmul.mubr.msk.f32.gmra.mrb[76].mxu0 %vm1907_vm6, %v9881_v7  ;;  %v12033_v46 = vpop.f32.mrb[27].mxu1  ;;  %v7286_v57 = vcombine.low %v22785_v11, %v22784_v60  ;;  %v7283_v7 = vrot.slane %v7269_v25, %v13786_v14  ;;  %v7327_v41 = vrot.slane %v7319_v17, %v13786_v14 }
 0x3be   :  { %12854 = vmatprep.mubr.msk.f32.mxu0 %vm13739_vm1, %v21311_v30  ;;  %v7267_v61 = vcombine.low %v7259_v0, %v7266_v26  ;;  %v7310_v46 = vrot.slane %v7302_v35, %v13786_v14  ;;  %v7320_v0 = vcombine.low %v22788_v16, %v19516_v32  ;;  %v22789_v26 = vld [vmem:[#allocation172_spill] sm:$0xff]  ;;  %v9885_v25 = vcombine.low %v22790_v4, %v19819_v45 }
 0x3bf   :  { %v9884_v19 = vcombine.low %v22670_v34, %v22789_v26  ;;  %v9901_v45 = vrot.slane %v9887_v3, %v13786_v14 }
 0x3c0   :  { %12268 = vmatmul.mubr.msk.f32.gmra.mrb[84].mxu1 %vm1907_vm6, %v7233_v56  ;;  %v20157_v24 = vpop.f32.mrb[28].mxu1  ;;  %v7300_v56 = vrot.slane %v7286_v57, %v13786_v14  ;;  %v7318_v6 = vcombine.low %v7310_v46, %v7317_v63  ;;  %v7334_v32 = vrot.slane %v7320_v0, %v13786_v14  ;;  %v22794_v57 = vld [vmem:[#allocation101_spill] sm:$0xff] }
 0x3c1   :  { %12270 = vmatprep.mubr.msk.f32.mxu1 %vm13739_vm1, %v21311_v30  ;;  %12855 = vmatmul.mubr.msk.f32.gmra.mrb[78].mxu0 %vm1907_vm6, %v19755_v33  ;;  %v12036_v62 = vpop.f32.mrb[29].mxu1  ;;  %v7276_v33 = vrot.slane %v7268_v8, %v13786_v14 }
 0x3c2   :  { %12857 = vmatprep.mubr.msk.f32.mxu0 %vm13739_vm1, %v21311_v30  ;;  %v7301_v9 = vcombine.low %v7293_v51, %v7300_v56  ;;  %v7335_v2 = vcombine.low %v7327_v41, %v7334_v32  ;;  %v22795_v62 = vld [vmem:[#allocation316_spill] sm:$0xff] }
 0x3c3   :  { %v7284_v55 = vcombine.low %v7276_v33, %v7283_v7 }
 0x3c4   :  { %12271 = vmatmul.mubr.msk.f32.gmra.mrb[86].mxu1 %vm1907_vm6, %v7250_v42  ;;  %v20173_v39 = vpop.f32.mrb[30].mxu1 }
 0x3c5   :  { %12273 = vmatprep.mubr.msk.f32.mxu1 %vm13739_vm1, %v21311_v30  ;;  %12858 = vmatmul.mubr.msk.f32.gmra.mrb[80].mxu0 %vm1907_vm6, %v9882_v52  ;;  %v12039_v43 = vpop.f32.mrb[31].mxu1  ;;  %v11040_v52 = vcombine.high %v22679_v18, %v22791_v48  ;;  %v9903_v18 = vcombine.low %v22795_v62, %v22794_v57 }
 0x3c6   :  { %12860 = vmatprep.mubr.msk.f32.mxu0 %vm13739_vm1, %v21311_v30 }
 0x3c7   :  { %v9911_v51 = vrot.slane %v9903_v18, %v13786_v14 }
 0x3c8   :  { %12274 = vmatmul.mubr.msk.f32.gmra.mrb[88].mxu1 %vm1907_vm6, %v7267_v61  ;;  %v20187_v1 = vpop.f32.mrb[32].mxu1  ;;  %v22796_v61 = vld [vmem:[#allocation102_spill] sm:$0xff] }
 0x3c9   :  { %12276 = vmatprep.mubr.msk.f32.mxu1 %vm13739_vm1, %v21311_v30  ;;  %12861 = vmatmul.mubr.msk.f32.gmra.mrb[82].mxu0 %vm1907_vm6, %v9883_v50  ;;  %v12042_v42 = vpop.f32.mrb[33].mxu1  ;;  %v9904_v33 = vcombine.low %v22796_v61, %v19495_v22 }
 0x3ca   :  { %12863 = vmatprep.mubr.msk.f32.mxu0 %vm13739_vm1, %v21311_v30  ;;  %v20264_v42 = vld [vmem:[%s20378_s2] ss:$0 sm:$0xff] }
 0x3cb   :  { %v9918_v56 = vrot.slane %v9904_v33, %v13786_v14  ;;  %v12886_v46 = vadd.f32 %v20264_v42, %v19939_v27  ;;  %v12888_v16 = vadd.f32 %v20264_v42, %v19955_v12  ;;  %v12892_v27 = vadd.f32 %v20264_v42, %v19986_v49 }
 0x3cc   :  { %12277 = vmatmul.mubr.msk.f32.gmra.mrb[90].mxu1 %vm1907_vm6, %v7284_v55  ;;  %v20204_v31 = vpop.f32.mrb[34].mxu1  ;;  %v12894_v12 = vadd.f32 %v20264_v42, %v20000_v37  ;;  %v12898_v49 = vadd.f32 %v20264_v42, %v20031_v59  ;;  %v12900_v37 = vadd.f32 %v20264_v42, %v20048_v28  ;;  %v12904_v59 = vadd.f32 %v20264_v42, %v20078_v5 }
 0x3cd   :  { %12279 = vmatprep.mubr.msk.f32.mxu1 %vm13739_vm1, %v21311_v30  ;;  %12864 = vmatmul.mubr.msk.f32.gmra.mrb[84].mxu0 %vm1907_vm6, %v19789_v44  ;;  %v12045_v8 = vpop.f32.mrb[35].mxu1  ;;  %v9919_v55 = vcombine.low %v9911_v51, %v9918_v56  ;;  %v12906_v28 = vadd.f32 %v20264_v42, %v20095_v15  ;;  %v12910_v5 = vadd.f32 %v20264_v42, %v20126_v29 }
 0x3ce   :  { %12866 = vmatprep.mubr.msk.f32.mxu0 %vm13739_vm1, %v21311_v30  ;;  %v12890_v8 = vadd.f32 %v20264_v42, %v19969_v40  ;;  %v12896_v40 = vadd.f32 %v20264_v42, %v20017_v38  ;;  %v12902_v38 = vadd.f32 %v20264_v42, %v20064_v13  ;;  %v12908_v13 = vadd.f32 %v20264_v42, %v20109_v53 }
 0x3cf   :  { %v12912_v15 = vadd.f32 %v20264_v42, %v20140_v58  ;;  %v12914_v53 = vadd.f32 %v20264_v42, %v20157_v24  ;;  %v12916_v29 = vadd.f32 %v20264_v42, %v20173_v39  ;;  %v12918_v58 = vadd.f32 %v20264_v42, %v20187_v1 }
 0x3d0   :  { %12280 = vmatmul.mubr.msk.f32.gmra.mrb[92].mxu1 %vm1907_vm6, %v7301_v9  ;;  %v20214_v44 = vpop.f32.mrb[36].mxu1  ;;  %v12920_v24 = vadd.f32 %v20264_v42, %v20204_v31 }
 0x3d1   :  { %12282 = vmatprep.mubr.msk.f32.mxu1 %vm13739_vm1, %v21311_v30  ;;  %12867 = vmatmul.mubr.msk.f32.gmra.mrb[86].mxu0 %vm1907_vm6, %v9884_v19  ;;  %v12048_v34 = vpop.f32.mrb[37].mxu1  ;;  %v12922_v39 = vadd.f32 %v20264_v42, %v20214_v44 }
 0x3d2   :  { %12869 = vmatprep.mubr.msk.f32.mxu0 %vm13739_vm1, %v21311_v30 }
 0x3d4   :  { %12283 = vmatmul.mubr.msk.f32.gmra.mrb[94].mxu1 %vm1907_vm6, %v7318_v6  ;;  %v20229_v60 = vpop.f32.mrb[38].mxu1 }
 0x3d5   :  { %12285 = vmatprep.mubr.msk.f32.mxu1 %vm13739_vm1, %v21311_v30  ;;  %12870 = vmatmul.mubr.msk.f32.gmra.mrb[88].mxu0 %vm1907_vm6, %v19814_v36  ;;  %v12051_v11 = vpop.f32.mrb[39].mxu1  ;;  %v9894_v36 = vrot.slane %v11040_v52, %v13786_v14  ;;  %v12924_v1 = vadd.f32 %v20264_v42, %v20229_v60 }
 0x3d6   :  { %12872 = vmatprep.mubr.msk.f32.mxu0 %vm13739_vm1, %v21311_v30 }
 0x3d7   :  { %v9902_v50 = vcombine.low %v9894_v36, %v9901_v45 }
 0x3d8   :  { %12286 = vmatmul.mubr.msk.f32.gmra.mrb[96].mxu1 %vm1907_vm6, %v7335_v2  ;;  %v20241_v7 = vpop.f32.mrb[40].mxu1 }
 0x3d9   :  { %12873 = vmatmul.mubr.msk.f32.gmra.mrb[90].mxu0 %vm1907_vm6, %v9885_v25  ;;  %v12054_v10 = vpop.f32.mrb[41].mxu1  ;;  %v12926_v31 = vadd.f32 %v20264_v42, %v20241_v7 }
 0x3da   :  { %12875 = vmatprep.mubr.msk.f32.mxu0 %vm13739_vm1, %v21311_v30 }
 0x3dc   :  { %v20249_v43 = vpop.f32.mrb[42].mxu1 }
 0x3dd   :  { %12876 = vmatmul.mubr.msk.f32.gmra.mrb[92].mxu0 %vm1907_vm6, %v19848_v23  ;;  %v12057_v22 = vpop.f32.mrb[43].mxu1  ;;  %v12928_v44 = vadd.f32 %v20264_v42, %v20249_v43 }
 0x3de   :  { %12878 = vmatprep.mubr.msk.f32.mxu0 %vm13739_vm1, %v21311_v30 }
 0x3e0   :  { %v20254_v20 = vpop.f32.mrb[44].mxu1 }
 0x3e1   :  { %12879 = vmatmul.mubr.msk.f32.gmra.mrb[94].mxu0 %vm1907_vm6, %v9902_v50  ;;  %v12060_v23 = vpop.f32.mrb[45].mxu1  ;;  %v12930_v60 = vadd.f32 %v20264_v42, %v20254_v20 }
 0x3e2   :  { %12881 = vmatprep.mubr.msk.f32.mxu0 %vm13739_vm1, %v21311_v30 }
 0x3e4   :  { %v20257_v35 = vpop.f32.mrb[46].mxu1 }
 0x3e5   :  { %12882 = vmatmul.mubr.msk.f32.gmra.mrb[96].mxu0 %vm1907_vm6, %v9919_v55  ;;  %v12063_v14 = vpop.f32.mrb[47].mxu1 }
 0x3e8   :  { %v20259_v47 = vpop.f32.mrb[48].mxu1 }
 0x3e9   :  { %v12066_v9 = vpop.f32.mrb[49].mxu1 }
 0x3f8   :  { %v10047_v30 = vpop.f32.mrb[0].mxu0 }
 0x3f9   :  { %v12739_v63 = vpop.f32.mrb[1].mxu0  ;;  %v12887_v17 = vadd.f32 %v12886_v46, %v10047_v30 }
 0x3fb   :  { %10340 = vxpose.xlu0.b32.start [1/16] (narrow) %v12887_v17, 8 }
 0x3fc   :  { %v10052_v0 = vpop.f32.mrb[2].mxu0 }
 0x3fd   :  { %v12889_v26 = vadd.f32 %v12888_v16, %v10052_v0  ;;  %v12742_v19 = vpop.f32.mrb[3].mxu0 }
 0x3ff   :  { %10341 = vxpose.xlu0.b32.cont [2/16] (narrow) %v12889_v26, 8 }
 0x400   :  { %v10057_v6 = vpop.f32.mrb[4].mxu0 }
 0x401   :  { %v12891_v41 = vadd.f32 %v12890_v8, %v10057_v6  ;;  %v12745_v32 = vpop.f32.mrb[5].mxu0 }
 0x403   :  { %10342 = vxpose.xlu0.b32.cont [3/16] (narrow) %v12891_v41, 8 }
 0x404   :  { %v10062_v34 = vpop.f32.mrb[6].mxu0 }
 0x405   :  { %v12893_v2 = vadd.f32 %v12892_v27, %v10062_v34  ;;  %v12748_v4 = vpop.f32.mrb[7].mxu0 }
 0x407   :  { %10343 = vxpose.xlu0.b32.cont [4/16] (narrow) %v12893_v2, 8 }
 0x408   :  { %v10067_v25 = vpop.f32.mrb[8].mxu0 }
 0x409   :  { %v12895_v48 = vadd.f32 %v12894_v12, %v10067_v25  ;;  %v12751_v52 = vpop.f32.mrb[9].mxu0 }
 0x40b   :  { %10344 = vxpose.xlu0.b32.cont [5/16] (narrow) %v12895_v48, 8 }
 0x40c   :  { %v10072_v21 = vpop.f32.mrb[10].mxu0 }
 0x40d   :  { %v12897_v54 = vadd.f32 %v12896_v40, %v10072_v21  ;;  %v12754_v3 = vpop.f32.mrb[11].mxu0 }
 0x40f   :  { %10345 = vxpose.xlu0.b32.cont [6/16] (narrow) %v12897_v54, 8 }
 0x410   :  { %v10077_v11 = vpop.f32.mrb[12].mxu0 }
 0x411   :  { %v12899_v36 = vadd.f32 %v12898_v49, %v10077_v11  ;;  %v12757_v45 = vpop.f32.mrb[13].mxu0 }
 0x413   :  { %10346 = vxpose.xlu0.b32.cont [7/16] (narrow) %v12899_v36, 8 }
 0x414   :  { %v10082_v57 = vpop.f32.mrb[14].mxu0 }
 0x415   :  { %v12901_v62 = vadd.f32 %v12900_v37, %v10082_v57  ;;  %v12760_v18 = vpop.f32.mrb[15].mxu0 }
 0x417   :  { %10347 = vxpose.xlu0.b32.cont [8/16] (narrow) %v12901_v62, 8 }
 0x418   :  { %v10087_v61 = vpop.f32.mrb[16].mxu0 }
 0x419   :  { %v12903_v33 = vadd.f32 %v12902_v38, %v10087_v61  ;;  %v12763_v10 = vpop.f32.mrb[17].mxu0 }
 0x41b   :  { %10348 = vxpose.xlu0.b32.cont [9/16] (narrow) %v12903_v33, 8 }
 0x41c   :  { %v10092_v50 = vpop.f32.mrb[18].mxu0 }
 0x41d   :  { %v12905_v51 = vadd.f32 %v12904_v59, %v10092_v50  ;;  %v12766_v56 = vpop.f32.mrb[19].mxu0  ;;  %v12932_v59 = vadd.f32 %v20264_v42, %v20257_v35 }
 0x41f   :  { %10349 = vxpose.xlu0.b32.cont [10/16] (narrow) %v12905_v51, 8 }
 0x420   :  { %v10097_v22 = vpop.f32.mrb[20].mxu0 }
 0x421   :  { %v12907_v55 = vadd.f32 %v12906_v28, %v10097_v22  ;;  %v12769_v23 = vpop.f32.mrb[21].mxu0  ;;  %v12934_v22 = vadd.f32 %v20264_v42, %v20259_v47 }
 0x423   :  { %10350 = vxpose.xlu0.b32.cont [11/16] (narrow) %v12907_v55, 8 }
 0x424   :  { %v10102_v14 = vpop.f32.mrb[22].mxu0 }
 0x425   :  { %v12909_v9 = vadd.f32 %v12908_v13, %v10102_v14  ;;  %v12772_v46 = vpop.f32.mrb[23].mxu0 }
 0x427   :  { %10351 = vxpose.xlu0.b32.cont [12/16] (narrow) %v12909_v9, 8 }
 0x428   :  { %v10107_v30 = vpop.f32.mrb[24].mxu0 }
 0x429   :  { %v12911_v63 = vadd.f32 %v12910_v5, %v10107_v30  ;;  %v12775_v17 = vpop.f32.mrb[25].mxu0 }
 0x42b   :  { %10352 = vxpose.xlu0.b32.cont [13/16] (narrow) %v12911_v63, 8 }
 0x42c   :  { %v10112_v16 = vpop.f32.mrb[26].mxu0 }
 0x42d   :  { %v12913_v0 = vadd.f32 %v12912_v15, %v10112_v16  ;;  %v12778_v26 = vpop.f32.mrb[27].mxu0 }
 0x42f   :  { %10353 = vxpose.xlu0.b32.cont [14/16] (narrow) %v12913_v0, 8 }
 0x430   :  { %v10117_v19 = vpop.f32.mrb[28].mxu0 }
 0x431   :  { %v12915_v8 = vadd.f32 %v12914_v53, %v10117_v19  ;;  %v12781_v6 = vpop.f32.mrb[29].mxu0 }
 0x433   :  { %10354 = vxpose.xlu0.b32.cont [15/16] (narrow) %v12915_v8, 8 }
 0x434   :  { %v10122_v41 = vpop.f32.mrb[30].mxu0 }
 0x435   :  { %v12917_v32 = vadd.f32 %v12916_v29, %v10122_v41  ;;  %v12784_v27 = vpop.f32.mrb[31].mxu0 }
 0x437   :  { %10355 = vxpose.xlu0.b32.end [16/16] (narrow) %v12917_v32, 8 }
 0x438   :  { %v10127_v34 = vpop.f32.mrb[32].mxu0 }
 0x439   :  { %v12787_v2 = vpop.f32.mrb[33].mxu0  ;;  %v12919_v4 = vadd.f32 %v12918_v58, %v10127_v34 }
 0x43b   :  { %10372 = vxpose.xlu1.b32.start [1/9] (short) (narrow) %v12919_v4, 8 }
 0x43c   :  { %v10132_v12 = vpop.f32.mrb[34].mxu0 }
 0x43d   :  { %v12921_v25 = vadd.f32 %v12920_v24, %v10132_v12  ;;  %v12790_v48 = vpop.f32.mrb[35].mxu0 }
 0x43f   :  { %10373 = vxpose.xlu1.b32.cont [2/9] (short) (narrow) %v12921_v25, 8 }
 0x440   :  { %v10137_v52 = vpop.f32.mrb[36].mxu0 }
 0x441   :  { %v12923_v40 = vadd.f32 %v12922_v39, %v10137_v52  ;;  %v12793_v21 = vpop.f32.mrb[37].mxu0 }
 0x443   :  { %10374 = vxpose.xlu1.b32.cont [3/9] (short) (narrow) %v12923_v40, 8 }
 0x444   :  { %v10142_v54 = vpop.f32.mrb[38].mxu0 }
 0x445   :  { %v12925_v3 = vadd.f32 %v12924_v1, %v10142_v54  ;;  %v12796_v49 = vpop.f32.mrb[39].mxu0 }
 0x447   :  { %10375 = vxpose.xlu1.b32.cont [4/9] (short) (narrow) %v12925_v3, 8 }
 0x448   :  { %v10147_v11 = vpop.f32.mrb[40].mxu0 }
 0x449   :  { %v12927_v36 = vadd.f32 %v12926_v31, %v10147_v11  ;;  %v12799_v45 = vpop.f32.mrb[41].mxu0 }
 0x44b   :  { %10376 = vxpose.xlu1.b32.cont [5/9] (short) (narrow) %v12927_v36, 8 }
 0x44c   :  { %v10152_v37 = vpop.f32.mrb[42].mxu0 }
 0x44d   :  { %v12929_v57 = vadd.f32 %v12928_v44, %v10152_v37  ;;  %v12802_v62 = vpop.f32.mrb[43].mxu0 }
 0x44f   :  { %v7628_v18 = vpop.f32.mrb[50].mxu1  ;;  %10377 = vxpose.xlu1.b32.cont [6/9] (short) (narrow) %v12929_v57, 8 }
 0x450   :  { %v12218_v38 = vpop.f32.mrb[51].mxu1  ;;  %v10157_v61 = vpop.f32.mrb[44].mxu0  ;;  %v12936_v9 = vadd.f32 %v20264_v42, %v7628_v18 }
 0x451   :  { %v12931_v33 = vadd.f32 %v12930_v60, %v10157_v61  ;;  %v12805_v7 = vpop.f32.mrb[45].mxu0 }
 0x453   :  { %v7633_v10 = vpop.f32.mrb[52].mxu1  ;;  %10378 = vxpose.xlu1.b32.cont [7/9] (short) (narrow) %v12931_v33, 8 }
 0x454   :  { %v12221_v50 = vpop.f32.mrb[53].mxu1  ;;  %v10162_v43 = vpop.f32.mrb[46].mxu0  ;;  %v12938_v17 = vadd.f32 %v20264_v42, %v7633_v10 }
 0x455   :  { %v12933_v51 = vadd.f32 %v12932_v59, %v10162_v43  ;;  %v12808_v56 = vpop.f32.mrb[47].mxu0 }
 0x457   :  { %v7638_v28 = vpop.f32.mrb[54].mxu1  ;;  %10379 = vxpose.xlu1.b32.cont [8/9] (short) (narrow) %v12933_v51, 8 }
 0x458   :  { %v12224_v20 = vpop.f32.mrb[55].mxu1  ;;  %v10167_v55 = vpop.f32.mrb[48].mxu0  ;;  %v12940_v6 = vadd.f32 %v20264_v42, %v7638_v28 }
 0x459   :  { %v12935_v23 = vadd.f32 %v12934_v22, %v10167_v55  ;;  %v12811_v13 = vpop.f32.mrb[49].mxu0 }
 0x45b   :  { %v7643_v14 = vpop.f32.mrb[56].mxu1  ;;  %10380 = vxpose.xlu1.b32.end [9/9] (short) (narrow) %v12935_v23, 8  ;;  %v10433_v15 = vrot.slane %v12935_v23, 4 }
 0x45c   :  { %v12227_v46 = vpop.f32.mrb[57].mxu1  ;;  %v10172_v35 = vpop.f32.mrb[50].mxu0  ;;  %v12942_v4 = vadd.f32 %v20264_v42, %v7643_v14 }
 0x45d   :  { %v12937_v5 = vadd.f32 %v12936_v9, %v10172_v35  ;;  %v12814_v30 = vpop.f32.mrb[51].mxu0 }
 0x45f   :  { %v7648_v63 = vpop.f32.mrb[58].mxu1  ;;  %v10434_v16 = vrot.slane %v12937_v5, 4 }
 0x460   :  { %v12230_v47 = vpop.f32.mrb[59].mxu1  ;;  %v10177_v0 = vpop.f32.mrb[52].mxu0  ;;  %v12944_v21 = vadd.f32 %v20264_v42, %v7648_v63 }
 0x461   :  { %v12939_v26 = vadd.f32 %v12938_v17, %v10177_v0  ;;  %v12817_v53 = vpop.f32.mrb[53].mxu0  ;;  %v10435_v19 = vsel %vm10432_vm10, %v10433_v15, %v10434_v16 }
 0x462   :  { %10507 = vxpose.xlu1.b32.start [1/16] (narrow) %v10435_v19, 8 }
 0x463   :  { %v7653_v8 = vpop.f32.mrb[60].mxu1  ;;  %v10436_v29 = vrot.slane %v12939_v26, 4 }
 0x464   :  { %v12233_v41 = vpop.f32.mrb[61].mxu1  ;;  %v10182_v32 = vpop.f32.mrb[54].mxu0  ;;  %v12946_v45 = vadd.f32 %v20264_v42, %v7653_v8 }
 0x465   :  { %v12941_v27 = vadd.f32 %v12940_v6, %v10182_v32  ;;  %v12820_v58 = vpop.f32.mrb[55].mxu0  ;;  %v10437_v34 = vsel %vm10432_vm10, %v10434_v16, %v10436_v29 }
 0x466   :  { %10508 = vxpose.xlu1.b32.cont [2/16] (narrow) %v10437_v34, 8 }
 0x467   :  { %v7658_v2 = vpop.f32.mrb[62].mxu1  ;;  %v10438_v24 = vrot.slane %v12941_v27, 4 }
 0x468   :  { %v12236_v12 = vpop.f32.mrb[63].mxu1  ;;  %v10187_v25 = vpop.f32.mrb[56].mxu0  ;;  %v12948_v61 = vadd.f32 %v20264_v42, %v7658_v2 }
 0x469   :  { %v12943_v48 = vadd.f32 %v12942_v4, %v10187_v25  ;;  %v12823_v39 = vpop.f32.mrb[57].mxu0  ;;  %v10439_v52 = vsel %vm10432_vm10, %v10436_v29, %v10438_v24 }
 0x46a   :  { %10509 = vxpose.xlu1.b32.cont [3/16] (narrow) %v10439_v52, 8 }
 0x46b   :  { %v7663_v40 = vpop.f32.mrb[64].mxu1  ;;  %v10440_v1 = vrot.slane %v12943_v48, 4 }
 0x46c   :  { %v12239_v54 = vpop.f32.mrb[65].mxu1  ;;  %v10192_v3 = vpop.f32.mrb[58].mxu0  ;;  %v12950_v56 = vadd.f32 %v20264_v42, %v7663_v40 }
 0x46d   :  { %v12945_v49 = vadd.f32 %v12944_v21, %v10192_v3  ;;  %v12826_v31 = vpop.f32.mrb[59].mxu0  ;;  %v10441_v11 = vsel %vm10432_vm10, %v10438_v24, %v10440_v1 }
 0x46e   :  { %10510 = vxpose.xlu1.b32.cont [4/16] (narrow) %v10441_v11, 8 }
 0x46f   :  { %v7668_v36 = vpop.f32.mrb[66].mxu1  ;;  %v10442_v44 = vrot.slane %v12945_v49, 4 }
 0x470   :  { %v12242_v37 = vpop.f32.mrb[67].mxu1  ;;  %v10197_v57 = vpop.f32.mrb[60].mxu0  ;;  %v12952_v9 = vadd.f32 %v20264_v42, %v7668_v36 }
 0x471   :  { %v12947_v62 = vadd.f32 %v12946_v45, %v10197_v57  ;;  %v12829_v18 = vpop.f32.mrb[61].mxu0  ;;  %v10443_v60 = vsel %vm10432_vm10, %v10440_v1, %v10442_v44 }
 0x472   :  { %10511 = vxpose.xlu1.b32.cont [5/16] (narrow) %v10443_v60, 8 }
 0x473   :  { %v7673_v38 = vpop.f32.mrb[68].mxu1  ;;  %v10444_v33 = vrot.slane %v12947_v62, 4 }
 0x474   :  { %v12245_v7 = vpop.f32.mrb[69].mxu1  ;;  %v10202_v10 = vpop.f32.mrb[62].mxu0  ;;  %v12954_v47 = vadd.f32 %v20264_v42, %v7673_v38 }
 0x475   :  { %v12949_v59 = vadd.f32 %v12948_v61, %v10202_v10  ;;  %v12832_v50 = vpop.f32.mrb[63].mxu0  ;;  %v10445_v43 = vsel %vm10432_vm10, %v10442_v44, %v10444_v33 }
 0x476   :  { %10512 = vxpose.xlu1.b32.cont [6/16] (narrow) %v10445_v43, 8 }
 0x477   :  { %v7678_v51 = vpop.f32.mrb[70].mxu1  ;;  %v10446_v28 = vrot.slane %v12949_v59, 4 }
 0x478   :  { %v12248_v22 = vpop.f32.mrb[71].mxu1  ;;  %v10207_v20 = vpop.f32.mrb[64].mxu0  ;;  %v12956_v41 = vadd.f32 %v20264_v42, %v7678_v51 }
 0x479   :  { %v12951_v55 = vadd.f32 %v12950_v56, %v10207_v20  ;;  %v12835_v23 = vpop.f32.mrb[65].mxu0  ;;  %v10447_v13 = vsel %vm10432_vm10, %v10444_v33, %v10446_v28 }
 0x47a   :  { %10513 = vxpose.xlu1.b32.cont [7/16] (narrow) %v10447_v13, 8 }
 0x47b   :  { %v7683_v14 = vpop.f32.mrb[72].mxu1  ;;  %v10448_v46 = vrot.slane %v12951_v55, 4  ;;  %v10356_v5 = vpop.trf.xlu0 }
 0x47c   :  { %v12251_v35 = vpop.f32.mrb[73].mxu1  ;;  %v10212_v30 = vpop.f32.mrb[66].mxu0  ;;  %10404 = vst [vmem:[%s20379_s3] sm:$0x3f] %v10356_v5  ;;  %v12958_v12 = vadd.f32 %v20264_v42, %v7683_v14 }
 0x47d   :  { %v12953_v63 = vadd.f32 %v12952_v9, %v10212_v30  ;;  %v12838_v17 = vpop.f32.mrb[67].mxu0  ;;  %v10449_v15 = vsel %vm10432_vm10, %v10446_v28, %v10448_v46 }
 0x47e   :  { %10514 = vxpose.xlu1.b32.cont [8/16] (narrow) %v10449_v15, 8 }
 0x47f   :  { %v7688_v16 = vpop.f32.mrb[74].mxu1  ;;  %v10450_v0 = vrot.slane %v12953_v63, 4 }
 0x480   :  { %v12254_v26 = vpop.f32.mrb[75].mxu1  ;;  %v10217_v53 = vpop.f32.mrb[68].mxu0  ;;  %v12960_v54 = vadd.f32 %v20264_v42, %v7688_v16 }
 0x481   :  { %v12955_v19 = vadd.f32 %v12954_v47, %v10217_v53  ;;  %v12841_v8 = vpop.f32.mrb[69].mxu0  ;;  %v10451_v6 = vsel %vm10432_vm10, %v10448_v46, %v10450_v0 }
 0x482   :  { %10515 = vxpose.xlu1.b32.cont [9/16] (narrow) %v10451_v6, 8 }
 0x483   :  { %v7693_v29 = vpop.f32.mrb[76].mxu1  ;;  %v10452_v32 = vrot.slane %v12955_v19, 4 }
 0x484   :  { %v12257_v27 = vpop.f32.mrb[77].mxu1  ;;  %v10222_v58 = vpop.f32.mrb[70].mxu0  ;;  %v12962_v37 = vadd.f32 %v20264_v42, %v7693_v29 }
 0x485   :  { %v12957_v34 = vadd.f32 %v12956_v41, %v10222_v58  ;;  %v12844_v2 = vpop.f32.mrb[71].mxu0  ;;  %v10453_v4 = vsel %vm10432_vm10, %v10450_v0, %v10452_v32 }
 0x486   :  { %10516 = vxpose.xlu1.b32.cont [10/16] (narrow) %v10453_v4, 8 }
 0x487   :  { %v7698_v24 = vpop.f32.mrb[78].mxu1  ;;  %v10454_v25 = vrot.slane %v12957_v34, 4 }
 0x488   :  { %v12260_v48 = vpop.f32.mrb[79].mxu1  ;;  %v10227_v39 = vpop.f32.mrb[72].mxu0  ;;  %v12964_v7 = vadd.f32 %v20264_v42, %v7698_v24 }
 0x489   :  { %v12959_v52 = vadd.f32 %v12958_v12, %v10227_v39  ;;  %v12847_v40 = vpop.f32.mrb[73].mxu0  ;;  %v10455_v21 = vsel %vm10432_vm10, %v10452_v32, %v10454_v25 }
 0x48a   :  { %10517 = vxpose.xlu1.b32.cont [11/16] (narrow) %v10455_v21, 8 }
 0x48b   :  { %v7703_v1 = vpop.f32.mrb[80].mxu1  ;;  %v10456_v3 = vrot.slane %v12959_v52, 4 }
 0x48c   :  { %v12263_v49 = vpop.f32.mrb[81].mxu1  ;;  %v10232_v31 = vpop.f32.mrb[74].mxu0  ;;  %v12966_v22 = vadd.f32 %v20264_v42, %v7703_v1 }
 0x48d   :  { %v12961_v11 = vadd.f32 %v12960_v54, %v10232_v31  ;;  %v12850_v36 = vpop.f32.mrb[75].mxu0  ;;  %v10457_v45 = vsel %vm10432_vm10, %v10454_v25, %v10456_v3 }
 0x48e   :  { %10518 = vxpose.xlu1.b32.cont [12/16] (narrow) %v10457_v45, 8 }
 0x48f   :  { %v7708_v44 = vpop.f32.mrb[82].mxu1  ;;  %v10458_v57 = vrot.slane %v12961_v11, 4 }
 0x490   :  { %v12266_v62 = vpop.f32.mrb[83].mxu1  ;;  %v10237_v18 = vpop.f32.mrb[76].mxu0  ;;  %v12968_v35 = vadd.f32 %v20264_v42, %v7708_v44 }
 0x491   :  { %v12963_v60 = vadd.f32 %v12962_v37, %v10237_v18  ;;  %v12853_v38 = vpop.f32.mrb[77].mxu0  ;;  %v10459_v61 = vsel %vm10432_vm10, %v10456_v3, %v10458_v57 }
 0x492   :  { %10519 = vxpose.xlu1.b32.cont [13/16] (narrow) %v10459_v61, 8 }
 0x493   :  { %v7713_v33 = vpop.f32.mrb[84].mxu1  ;;  %v10460_v10 = vrot.slane %v12963_v60, 4 }
 0x494   :  { %v12269_v59 = vpop.f32.mrb[85].mxu1  ;;  %v10242_v50 = vpop.f32.mrb[78].mxu0  ;;  %v12970_v0 = vadd.f32 %v20264_v42, %v7713_v33 }
 0x495   :  { %v12965_v43 = vadd.f32 %v12964_v7, %v10242_v50  ;;  %v12856_v51 = vpop.f32.mrb[79].mxu0  ;;  %v10461_v56 = vsel %vm10432_vm10, %v10458_v57, %v10460_v10 }
 0x496   :  { %10520 = vxpose.xlu1.b32.cont [14/16] (narrow) %v10461_v56, 8 }
 0x497   :  { %v7718_v28 = vpop.f32.mrb[86].mxu1  ;;  %v10462_v20 = vrot.slane %v12965_v43, 4 }
 0x498   :  { %v12272_v55 = vpop.f32.mrb[87].mxu1  ;;  %v10247_v23 = vpop.f32.mrb[80].mxu0  ;;  %v12972_v32 = vadd.f32 %v20264_v42, %v7718_v28 }
 0x499   :  { %v12967_v13 = vadd.f32 %v12966_v22, %v10247_v23  ;;  %v12859_v14 = vpop.f32.mrb[81].mxu0  ;;  %v10463_v9 = vsel %vm10432_vm10, %v10460_v10, %v10462_v20 }
 0x49a   :  { %10521 = vxpose.xlu1.b32.cont [15/16] (narrow) %v10463_v9, 8 }
 0x49b   :  { %v7723_v46 = vpop.f32.mrb[88].mxu1  ;;  %v10464_v5 = vrot.slane %v12967_v13, 4 }
 0x49c   :  { %v12275_v30 = vpop.f32.mrb[89].mxu1  ;;  %v10252_v63 = vpop.f32.mrb[82].mxu0  ;;  %v12974_v25 = vadd.f32 %v20264_v42, %v7723_v46 }
 0x49d   :  { %v12969_v17 = vadd.f32 %v12968_v35, %v10252_v63  ;;  %v12862_v15 = vpop.f32.mrb[83].mxu0  ;;  %v10465_v16 = vsel %vm10432_vm10, %v10462_v20, %v10464_v5 }
 0x49e   :  { %10522 = vxpose.xlu1.b32.end [16/16] (narrow) %v10465_v16, 8 }
 0x49f   :  { %v7728_v47 = vpop.f32.mrb[90].mxu1  ;;  %v10466_v26 = vrot.slane %v12969_v17, 4 }
 0x4a0   :  { %v12278_v53 = vpop.f32.mrb[91].mxu1  ;;  %v10257_v19 = vpop.f32.mrb[84].mxu0  ;;  %v12976_v3 = vadd.f32 %v20264_v42, %v7728_v47 }
 0x4a1   :  { %v12971_v8 = vadd.f32 %v12970_v0, %v10257_v19  ;;  %v12865_v6 = vpop.f32.mrb[85].mxu0  ;;  %v10467_v29 = vsel %vm10432_vm10, %v10464_v5, %v10466_v26 }
 0x4a2   :  { %10539 = vxpose.xlu0.b32.start [1/9] (short) (narrow) %v10467_v29, 8 }
 0x4a3   :  { %v7733_v41 = vpop.f32.mrb[92].mxu1  ;;  %v10468_v27 = vrot.slane %v12971_v8, 4 }
 0x4a4   :  { %v12281_v58 = vpop.f32.mrb[93].mxu1  ;;  %v10262_v34 = vpop.f32.mrb[86].mxu0  ;;  %v12978_v37 = vadd.f32 %v20264_v42, %v7733_v41 }
 0x4a5   :  { %v12973_v2 = vadd.f32 %v12972_v32, %v10262_v34  ;;  %v12868_v4 = vpop.f32.mrb[87].mxu0  ;;  %v10469_v24 = vsel %vm10432_vm10, %v10466_v26, %v10468_v27 }
 0x4a6   :  { %10540 = vxpose.xlu0.b32.cont [2/9] (short) (narrow) %v10469_v24, 8 }
 0x4a7   :  { %v7738_v12 = vpop.f32.mrb[94].mxu1  ;;  %v10470_v48 = vrot.slane %v12973_v2, 4 }
 0x4a8   :  { %v12284_v39 = vpop.f32.mrb[95].mxu1  ;;  %v10267_v52 = vpop.f32.mrb[88].mxu0  ;;  %v12980_v61 = vadd.f32 %v20264_v42, %v7738_v12 }
 0x4a9   :  { %v12975_v40 = vadd.f32 %v12974_v25, %v10267_v52  ;;  %v12871_v21 = vpop.f32.mrb[89].mxu0  ;;  %v10471_v1 = vsel %vm10432_vm10, %v10468_v27, %v10470_v48 }
 0x4aa   :  { %10541 = vxpose.xlu0.b32.cont [3/9] (short) (narrow) %v10471_v1, 8 }
 0x4ab   :  { %v7743_v54 = vpop.f32.mrb[96].mxu1  ;;  %v10472_v49 = vrot.slane %v12975_v40, 4 }
 0x4ac   :  { %v12287_v31 = vpop.f32.mrb[97].mxu1  ;;  %v10272_v11 = vpop.f32.mrb[90].mxu0  ;;  %v12982_v43 = vadd.f32 %v20264_v42, %v7743_v54 }
 0x4ad   :  { %v12977_v36 = vadd.f32 %v12976_v3, %v10272_v11  ;;  %v12874_v45 = vpop.f32.mrb[91].mxu0  ;;  %v10473_v44 = vsel %vm10432_vm10, %v10470_v48, %v10472_v49 }
 0x4ae   :  { %10542 = vxpose.xlu0.b32.cont [4/9] (short) (narrow) %v10473_v44, 8 }
 0x4af   :  { %v10474_v57 = vrot.slane %v12977_v36, 4 }
 0x4b0   :  { %v10277_v62 = vpop.f32.mrb[92].mxu0 }
 0x4b1   :  { %v12979_v18 = vadd.f32 %v12978_v37, %v10277_v62  ;;  %v12877_v60 = vpop.f32.mrb[93].mxu0  ;;  %v10475_v38 = vsel %vm10432_vm10, %v10472_v49, %v10474_v57 }
 0x4b2   :  { %10543 = vxpose.xlu0.b32.cont [5/9] (short) (narrow) %v10475_v38, 8 }
 0x4b3   :  { %v10476_v33 = vrot.slane %v12979_v18, 4 }
 0x4b4   :  { %v10282_v7 = vpop.f32.mrb[94].mxu0 }
 0x4b5   :  { %v12981_v10 = vadd.f32 %v12980_v61, %v10282_v7  ;;  %v12880_v59 = vpop.f32.mrb[95].mxu0  ;;  %v10477_v50 = vsel %vm10432_vm10, %v10474_v57, %v10476_v33 }
 0x4b6   :  { %10544 = vxpose.xlu0.b32.cont [6/9] (short) (narrow) %v10477_v50, 8 }
 0x4b7   :  { %v10478_v51 = vrot.slane %v12981_v10, 4 }
 0x4b8   :  { %v10287_v56 = vpop.f32.mrb[96].mxu0 }
 0x4b9   :  { %v12983_v28 = vadd.f32 %v12982_v43, %v10287_v56  ;;  %v12883_v22 = vpop.f32.mrb[97].mxu0  ;;  %v10479_v20 = vsel %vm10432_vm10, %v10476_v33, %v10478_v51 }
 0x4ba   :  { %10545 = vxpose.xlu0.b32.cont [7/9] (short) (narrow) %v10479_v20, 8 }
 0x4bb   :  { %v10480_v55 = vrot.slane %v12983_v28, 4  ;;  %v10388_v23 = vpop.trf.xlu1 }
 0x4bc   :  { %10406 = vst.msk [vmem:[%s20379_s3 + $0x8] sm:$0x3f] %vm10405_vm11, %v10388_v23 }
 0x4bd   :  { %v10481_v13 = vsel %vm10432_vm10, %v10478_v51, %v10480_v55 }
 0x4be   :  { %10546 = vxpose.xlu0.b32.cont [8/9] (short) (narrow) %v10481_v13, 8 }
 0x4c2   :  { %10547 = vxpose.xlu0.b32.end [9/9] (short) (narrow) %v10480_v55, 8 }
 0x4e2   :  { %v10523_v14 = vpop.trf.xlu1 }
 0x4e3   :  { %11091 = vst [vmem:[%s20379_s3 + $0x10] sm:$0x3f] %v10523_v14 }
 0x522   :  { %v10555_v42 = vpop.trf.xlu0 }
 0x523   :  { %11092 = vst.msk [vmem:[%s20379_s3 + $0x18] sm:$0x3f] %vm10405_vm11, %v10555_v42 }

</bundles_post_ra>
